<compile_context>
chip_gen: v7x
topology: tpu7x:2x2x1
jax: 0.10.0
libtpu: 0.0.40
codegen_flags: <defaults>
</compile_context>

<pallas_src>
import jax
import jax.numpy as jnp
import numpy as np
from jax.experimental import pallas as pl
from jax.experimental.pallas import tpu as pltpu

BN_EPS = 1e-5


def _head_block_kernel(xp_ref, w1_ref, b1_ref, gamma_ref, beta_ref,
                       w2_ref, b2_ref, o_ref, hp_ref):
    # xp_ref   : (N, H+2, W+2, Cin)  zero-padded input, NHWC
    # w1_ref   : (9*Cin, Ch)         conv1 weights, rows ordered (dy, dx, cin)
    # b1_ref   : (1, Ch)
    # gamma_ref, beta_ref : (1, Ch)  BatchNorm affine parameters
    # w2_ref   : (9, Ch)             conv2 weights, rows ordered (dy, dx)
    # b2_ref   : (1, 1)  [SMEM]      conv2 bias (scalar)
    # o_ref    : (N*H, W)            output, W on the lane axis
    # hp_ref   : (N, H+2, W+2, Ch)   VMEM scratch: zero-padded hidden act.
    N, Hp, Wp, Cin = xp_ref.shape
    H, W = Hp - 2, Wp - 2
    Ch = w1_ref.shape[1]
    R = N * H * W

    # ---- Conv1: 9 windowed loads -> one (R, 9*Cin) x (9*Cin, Ch) matmul ----
    taps = []
    for dy in range(3):
        for dx in range(3):
            win = xp_ref[:, dy:dy + H, dx:dx + W, :]       # (N, H, W, Cin)
            taps.append(win.reshape(R, Cin))               # leading-dim merge
    patches = jnp.concatenate(taps, axis=-1)               # (R, 9*Cin)
    y = jnp.dot(patches, w1_ref[...],
                preferred_element_type=jnp.float32) + b1_ref[...]   # (R, Ch)

    # ---- BatchNorm2d (training-mode biased batch stats), fused one pass ----
    inv_n = 1.0 / float(R)
    mean = jnp.sum(y, axis=0, keepdims=True) * inv_n
    ex2 = jnp.sum(y * y, axis=0, keepdims=True) * inv_n
    var = ex2 - mean * mean
    h = (y - mean) * jax.lax.rsqrt(var + BN_EPS)
    h = h * gamma_ref[...] + beta_ref[...]

    # ---- ReLU ----
    h = jnp.maximum(h, 0.0)

    # ---- Pad hidden activation: zero only the 4 border strips, write the
    #      interior exactly once (no full zero-fill + overwrite). ----
    hp_ref[:, 0:1, :, :] = jnp.zeros((N, 1, Wp, Ch), jnp.float32)
    hp_ref[:, Hp - 1:Hp, :, :] = jnp.zeros((N, 1, Wp, Ch), jnp.float32)
    hp_ref[:, 1:Hp - 1, 0:1, :] = jnp.zeros((N, H, 1, Ch), jnp.float32)
    hp_ref[:, 1:Hp - 1, Wp - 1:Wp, :] = jnp.zeros((N, H, 1, Ch), jnp.float32)
    hp_ref[:, 1:Hp - 1, 1:Wp - 1, :] = h.reshape(N, H, W, Ch)

    # ---- Conv2 (Ch -> 1) on the VPU: 9 broadcast FMAs, then a single
    #      cross-lane (channel) reduction. No MXU push with output width 1,
    #      no (rows, 1) accumulator. ----
    w2 = w2_ref[...]                                        # (9, Ch)
    acc = jnp.zeros((N, H, W, Ch), jnp.float32)
    for dy in range(3):
        for dx in range(3):
            tap = hp_ref[:, dy:dy + H, dx:dx + W, :]        # (N, H, W, Ch)
            acc = acc + tap * w2[dy * 3 + dx].reshape(1, 1, 1, Ch)
    out = jnp.sum(acc, axis=-1) + b2_ref[0, 0]              # (N, H, W)

    # Lane-major store: last dim is W (dense for W >= 128).
    o_ref[...] = out.reshape(N * H, W).astype(o_ref.dtype)


def head_block_2d(x_nchw, params):
    """Forward pass of HeadBlock2d. x_nchw: (N, Cin, H, W) -> (N, 1, H, W)."""
    w1, b1, gamma, beta, w2, b2 = (params["w1"], params["b1"], params["gamma"],
                                   params["beta"], params["w2"], params["b2"])
    N, Cin, H, W = x_nchw.shape
    Ch = w1.shape[-1]

    # NCHW -> NHWC plus zero-pad of H/W by 1: both fuse into a single tiny
    # XLA op; the pad lets every conv1 boundary tap be a plain windowed load.
    x = jnp.transpose(x_nchw, (0, 2, 3, 1)).astype(jnp.float32)
    xp = jnp.pad(x, ((0, 0), (1, 1), (1, 1), (0, 0)))

    w1m = w1.reshape(9 * Cin, Ch).astype(jnp.float32)       # rows = (dy,dx,cin)
    w2m = w2.reshape(9, Ch).astype(jnp.float32)             # rows = (dy,dx)
    b1m = b1.reshape(1, Ch).astype(jnp.float32)
    gm = gamma.reshape(1, Ch).astype(jnp.float32)
    bm = beta.reshape(1, Ch).astype(jnp.float32)
    b2m = b2.reshape(1, 1).astype(jnp.float32)

    # Explicit VMEM budget: resident buffers (I/O + scratch) with headroom for
    # in-kernel temporaries (im2col patches, activations, accumulator).
    resident_bytes = 4 * (xp.size + w1m.size + w2m.size + 3 * Ch + 1
                          + N * H * W + N * (H + 2) * (W + 2) * Ch)
    vmem_limit = int(min(max(resident_bytes * 6, 4 << 20), 100 << 20))

    out2d = pl.pallas_call(
        _head_block_kernel,
        out_shape=jax.ShapeDtypeStruct((N * H, W), jnp.float32),
        in_specs=[pl.BlockSpec(memory_space=pltpu.MemorySpace.VMEM)] * 6
                 + [pl.BlockSpec(memory_space=pltpu.MemorySpace.SMEM)],
        out_specs=pl.BlockSpec(memory_space=pltpu.MemorySpace.VMEM),
        scratch_shapes=[pltpu.VMEM((N, H + 2, W + 2, Ch), jnp.float32)],
        compiler_params=pltpu.CompilerParams(vmem_limit_bytes=vmem_limit),
    )(xp, w1m, b1m, gm, bm, w2m, b2m)

    # (N*H, W) -> (N, 1, H, W)   (pure reshape; flat order is (n, h, w))
    return out2d.reshape(N, 1, H, W)


def head_block_2d_ref(x_nchw, params):
    """Pure-JAX reference (lax conv) mirroring the PyTorch forward."""
    w1, b1, gamma, beta, w2, b2 = (params["w1"], params["b1"], params["gamma"],
                                   params["beta"], params["w2"], params["b2"])
    x = jnp.transpose(x_nchw, (0, 2, 3, 1)).astype(jnp.float32)
    dn = ("NHWC", "HWIO", "NHWC")
    y = jax.lax.conv_general_dilated(x, w1, (1, 1), "SAME",
                                     dimension_numbers=dn) + b1
    mean = y.mean(axis=(0, 1, 2))
    var = ((y - mean) ** 2).mean(axis=(0, 1, 2))
    y = (y - mean) / jnp.sqrt(var + BN_EPS) * gamma + beta
    y = jnp.maximum(y, 0.0)
    z = jax.lax.conv_general_dilated(y, w2, (1, 1), "SAME",
                                     dimension_numbers=dn) + b2
    return jnp.transpose(z, (0, 3, 1, 2))


def init_params(key, in_size, hidden_size):
    k1, k2, k3, k4 = jax.random.split(key, 4)
    # Conv weights kept directly in HWIO; biases as in nn.Conv2d; BN gamma=1, beta=0.
    w1 = jax.random.normal(k1, (3, 3, in_size, hidden_size), jnp.float32) * 0.1
    b1 = jax.random.normal(k2, (hidden_size,), jnp.float32) * 0.1
    w2 = jax.random.normal(k3, (3, 3, hidden_size, 1), jnp.float32) * 0.1
    b2 = jax.random.normal(k4, (1,), jnp.float32) * 0.1
    gamma = jnp.ones((hidden_size,), jnp.float32)
    beta = jnp.zeros((hidden_size,), jnp.float32)
    return {"w1": w1, "b1": b1, "gamma": gamma, "beta": beta,
            "w2": w2, "b2": b2}


if __name__ == "__main__":
    N, Cin, H, W = 2, 4, 16, 16
    hidden = 32

    key = jax.random.PRNGKey(0)
    kx, kp = jax.random.split(key)
    x = jax.random.normal(kx, (N, Cin, H, W), jnp.float32)
    params = init_params(kp, Cin, hidden)

    out = jax.block_until_ready(head_block_2d(x, params))
    ref = jax.block_until_ready(head_block_2d_ref(x, params))

    assert out.shape == (N, 1, H, W), out.shape
    np.testing.assert_allclose(np.asarray(out), np.asarray(ref),
                               rtol=1e-3, atol=1e-3)
    print("KERNEL_OK")
</pallas_src>

<mosaic_0001>
module attributes {stable_mosaic.version = 11 : i64} {
  func.func @_head_block_kernel(%arg0: memref<2x18x18x4xf32, #tpu.memory_space<vmem>>, %arg1: memref<36x32xf32, #tpu.memory_space<vmem>>, %arg2: memref<1x32xf32, #tpu.memory_space<vmem>>, %arg3: memref<1x32xf32, #tpu.memory_space<vmem>>, %arg4: memref<1x32xf32, #tpu.memory_space<vmem>>, %arg5: memref<9x32xf32, #tpu.memory_space<vmem>>, %arg6: memref<1x1xf32, #tpu.memory_space<smem>>, %arg7: memref<32x16xf32, #tpu.memory_space<vmem>>, %arg8: memref<2x18x18x32xf32, #tpu.memory_space<vmem>>) attributes {dimension_semantics = [], scalar_prefetch = 0 : i64, scratch_operands = 1 : i64, tpu.core_type = #tpu.core_type<tc>} {
    %c0 = arith.constant 0 : index
    %c0_0 = arith.constant 0 : index
    %c0_1 = arith.constant 0 : index
    %c0_2 = arith.constant 0 : index
    %0 = vector.load %arg0[%c0, %c0_0, %c0_1, %c0_2] : memref<2x18x18x4xf32, #tpu.memory_space<vmem>>, vector<2x16x16x4xf32>
    %1 = vector.shape_cast %0 : vector<2x16x16x4xf32> to vector<512x4xf32>
    %c0_3 = arith.constant 0 : index
    %c0_4 = arith.constant 0 : index
    %c1 = arith.constant 1 : index
    %c0_5 = arith.constant 0 : index
    %2 = vector.load %arg0[%c0_3, %c0_4, %c1, %c0_5] : memref<2x18x18x4xf32, #tpu.memory_space<vmem>>, vector<2x16x16x4xf32>
    %3 = vector.shape_cast %2 : vector<2x16x16x4xf32> to vector<512x4xf32>
    %c0_6 = arith.constant 0 : index
    %c0_7 = arith.constant 0 : index
    %c2 = arith.constant 2 : index
    %c0_8 = arith.constant 0 : index
    %4 = vector.load %arg0[%c0_6, %c0_7, %c2, %c0_8] : memref<2x18x18x4xf32, #tpu.memory_space<vmem>>, vector<2x16x16x4xf32>
    %5 = vector.shape_cast %4 : vector<2x16x16x4xf32> to vector<512x4xf32>
    %c0_9 = arith.constant 0 : index
    %c1_10 = arith.constant 1 : index
    %c0_11 = arith.constant 0 : index
    %c0_12 = arith.constant 0 : index
    %6 = vector.load %arg0[%c0_9, %c1_10, %c0_11, %c0_12] : memref<2x18x18x4xf32, #tpu.memory_space<vmem>>, vector<2x16x16x4xf32>
    %7 = vector.shape_cast %6 : vector<2x16x16x4xf32> to vector<512x4xf32>
    %c0_13 = arith.constant 0 : index
    %c1_14 = arith.constant 1 : index
    %c1_15 = arith.constant 1 : index
    %c0_16 = arith.constant 0 : index
    %8 = vector.load %arg0[%c0_13, %c1_14, %c1_15, %c0_16] : memref<2x18x18x4xf32, #tpu.memory_space<vmem>>, vector<2x16x16x4xf32>
    %9 = vector.shape_cast %8 : vector<2x16x16x4xf32> to vector<512x4xf32>
    %c0_17 = arith.constant 0 : index
    %c1_18 = arith.constant 1 : index
    %c2_19 = arith.constant 2 : index
    %c0_20 = arith.constant 0 : index
    %10 = vector.load %arg0[%c0_17, %c1_18, %c2_19, %c0_20] : memref<2x18x18x4xf32, #tpu.memory_space<vmem>>, vector<2x16x16x4xf32>
    %11 = vector.shape_cast %10 : vector<2x16x16x4xf32> to vector<512x4xf32>
    %c0_21 = arith.constant 0 : index
    %c2_22 = arith.constant 2 : index
    %c0_23 = arith.constant 0 : index
    %c0_24 = arith.constant 0 : index
    %12 = vector.load %arg0[%c0_21, %c2_22, %c0_23, %c0_24] : memref<2x18x18x4xf32, #tpu.memory_space<vmem>>, vector<2x16x16x4xf32>
    %13 = vector.shape_cast %12 : vector<2x16x16x4xf32> to vector<512x4xf32>
    %c0_25 = arith.constant 0 : index
    %c2_26 = arith.constant 2 : index
    %c1_27 = arith.constant 1 : index
    %c0_28 = arith.constant 0 : index
    %14 = vector.load %arg0[%c0_25, %c2_26, %c1_27, %c0_28] : memref<2x18x18x4xf32, #tpu.memory_space<vmem>>, vector<2x16x16x4xf32>
    %15 = vector.shape_cast %14 : vector<2x16x16x4xf32> to vector<512x4xf32>
    %c0_29 = arith.constant 0 : index
    %c2_30 = arith.constant 2 : index
    %c2_31 = arith.constant 2 : index
    %c0_32 = arith.constant 0 : index
    %16 = vector.load %arg0[%c0_29, %c2_30, %c2_31, %c0_32] : memref<2x18x18x4xf32, #tpu.memory_space<vmem>>, vector<2x16x16x4xf32>
    %17 = vector.shape_cast %16 : vector<2x16x16x4xf32> to vector<512x4xf32>
    %18 = tpu.concatenate %1, %3, %5, %7, %9, %11, %13, %15, %17 in 1 : vector<512x4xf32>, vector<512x4xf32>, vector<512x4xf32>, vector<512x4xf32>, vector<512x4xf32>, vector<512x4xf32>, vector<512x4xf32>, vector<512x4xf32>, vector<512x4xf32> -> vector<512x36xf32>
    %c0_33 = arith.constant 0 : index
    %c0_34 = arith.constant 0 : index
    %19 = vector.load %arg1[%c0_33, %c0_34] : memref<36x32xf32, #tpu.memory_space<vmem>>, vector<36x32xf32>
    %cst = arith.constant dense<0.000000e+00> : vector<512x32xf32>
    %20 = tpu.matmul %18, %19, %cst {dimension_numbers = #tpu.dot_dimension_numbers<[1], [0], [0], [1], [0, 0, 1, 1], [], []>} : vector<512x36xf32>, vector<36x32xf32>, vector<512x32xf32> -> vector<512x32xf32>
    %c0_35 = arith.constant 0 : index
    %c0_36 = arith.constant 0 : index
    %21 = vector.load %arg2[%c0_35, %c0_36] : memref<1x32xf32, #tpu.memory_space<vmem>>, vector<1x32xf32>
    %22 = vector.broadcast %21 : vector<1x32xf32> to vector<512x32xf32>
    %23 = arith.addf %20, %22 : vector<512x32xf32>
    %cst_37 = arith.constant dense<0.000000e+00> : vector<32xf32>
    %24 = vector.multi_reduction <add>, %23, %cst_37 [0] : vector<512x32xf32> to vector<32xf32>
    %25 = vector.shape_cast %24 : vector<32xf32> to vector<1x32xf32>
    %cst_38 = arith.constant 0.001953125 : f32
    %26 = vector.broadcast %cst_38 : f32 to vector<1x32xf32>
    %27 = arith.mulf %25, %26 : vector<1x32xf32>
    %28 = arith.mulf %23, %23 : vector<512x32xf32>
    %cst_39 = arith.constant dense<0.000000e+00> : vector<32xf32>
    %29 = vector.multi_reduction <add>, %28, %cst_39 [0] : vector<512x32xf32> to vector<32xf32>
    %30 = vector.shape_cast %29 : vector<32xf32> to vector<1x32xf32>
    %cst_40 = arith.constant 0.001953125 : f32
    %31 = vector.broadcast %cst_40 : f32 to vector<1x32xf32>
    %32 = arith.mulf %30, %31 : vector<1x32xf32>
    %33 = arith.mulf %27, %27 : vector<1x32xf32>
    %34 = arith.subf %32, %33 : vector<1x32xf32>
    %35 = vector.broadcast %27 : vector<1x32xf32> to vector<512x32xf32>
    %36 = arith.subf %23, %35 : vector<512x32xf32>
    %cst_41 = arith.constant 9.99999974E-6 : f32
    %37 = vector.broadcast %cst_41 : f32 to vector<1x32xf32>
    %38 = arith.addf %34, %37 : vector<1x32xf32>
    %39 = math.rsqrt %38 : vector<1x32xf32>
    %40 = vector.broadcast %39 : vector<1x32xf32> to vector<512x32xf32>
    %41 = arith.mulf %36, %40 : vector<512x32xf32>
    %c0_42 = arith.constant 0 : index
    %c0_43 = arith.constant 0 : index
    %42 = vector.load %arg3[%c0_42, %c0_43] : memref<1x32xf32, #tpu.memory_space<vmem>>, vector<1x32xf32>
    %43 = vector.broadcast %42 : vector<1x32xf32> to vector<512x32xf32>
    %44 = arith.mulf %41, %43 : vector<512x32xf32>
    %c0_44 = arith.constant 0 : index
    %c0_45 = arith.constant 0 : index
    %45 = vector.load %arg4[%c0_44, %c0_45] : memref<1x32xf32, #tpu.memory_space<vmem>>, vector<1x32xf32>
    %46 = vector.broadcast %45 : vector<1x32xf32> to vector<512x32xf32>
    %47 = arith.addf %44, %46 : vector<512x32xf32>
    %cst_46 = arith.constant 0.000000e+00 : f32
    %48 = vector.broadcast %cst_46 : f32 to vector<512x32xf32>
    %49 = arith.maximumf %47, %48 : vector<512x32xf32>
    %cst_47 = arith.constant 0.000000e+00 : f32
    %50 = vector.broadcast %cst_47 : f32 to vector<2x1x18x32xf32>
    %c0_48 = arith.constant 0 : index
    %c0_49 = arith.constant 0 : index
    %c0_50 = arith.constant 0 : index
    %c0_51 = arith.constant 0 : index
    %51 = vector.load %arg8[%c0_48, %c0_49, %c0_50, %c0_51] : memref<2x18x18x32xf32, #tpu.memory_space<vmem>>, vector<2x1x18x32xf32>
    tpu.vector_store %arg8[%c0_48, %c0_49, %c0_50, %c0_51], %50 {strides = array<i32>} : memref<2x18x18x32xf32, #tpu.memory_space<vmem>>, vector<2x1x18x32xf32>,
    %cst_52 = arith.constant 0.000000e+00 : f32
    %52 = vector.broadcast %cst_52 : f32 to vector<2x1x18x32xf32>
    %c0_53 = arith.constant 0 : index
    %c17 = arith.constant 17 : index
    %c0_54 = arith.constant 0 : index
    %c0_55 = arith.constant 0 : index
    %53 = vector.load %arg8[%c0_53, %c17, %c0_54, %c0_55] : memref<2x18x18x32xf32, #tpu.memory_space<vmem>>, vector<2x1x18x32xf32>
    tpu.vector_store %arg8[%c0_53, %c17, %c0_54, %c0_55], %52 {strides = array<i32>} : memref<2x18x18x32xf32, #tpu.memory_space<vmem>>, vector<2x1x18x32xf32>,
    %cst_56 = arith.constant 0.000000e+00 : f32
    %54 = vector.broadcast %cst_56 : f32 to vector<2x16x1x32xf32>
    %c0_57 = arith.constant 0 : index
    %c1_58 = arith.constant 1 : index
    %c0_59 = arith.constant 0 : index
    %c0_60 = arith.constant 0 : index
    %55 = vector.load %arg8[%c0_57, %c1_58, %c0_59, %c0_60] : memref<2x18x18x32xf32, #tpu.memory_space<vmem>>, vector<2x16x1x32xf32>
    tpu.vector_store %arg8[%c0_57, %c1_58, %c0_59, %c0_60], %54 {strides = array<i32>} : memref<2x18x18x32xf32, #tpu.memory_space<vmem>>, vector<2x16x1x32xf32>,
    %cst_61 = arith.constant 0.000000e+00 : f32
    %56 = vector.broadcast %cst_61 : f32 to vector<2x16x1x32xf32>
    %c0_62 = arith.constant 0 : index
    %c1_63 = arith.constant 1 : index
    %c17_64 = arith.constant 17 : index
    %c0_65 = arith.constant 0 : index
    %57 = vector.load %arg8[%c0_62, %c1_63, %c17_64, %c0_65] : memref<2x18x18x32xf32, #tpu.memory_space<vmem>>, vector<2x16x1x32xf32>
    tpu.vector_store %arg8[%c0_62, %c1_63, %c17_64, %c0_65], %56 {strides = array<i32>} : memref<2x18x18x32xf32, #tpu.memory_space<vmem>>, vector<2x16x1x32xf32>,
    %58 = vector.shape_cast %49 : vector<512x32xf32> to vector<2x16x16x32xf32>
    %c0_66 = arith.constant 0 : index
    %c1_67 = arith.constant 1 : index
    %c1_68 = arith.constant 1 : index
    %c0_69 = arith.constant 0 : index
    %59 = vector.load %arg8[%c0_66, %c1_67, %c1_68, %c0_69] : memref<2x18x18x32xf32, #tpu.memory_space<vmem>>, vector<2x16x16x32xf32>
    tpu.vector_store %arg8[%c0_66, %c1_67, %c1_68, %c0_69], %58 {strides = array<i32>} : memref<2x18x18x32xf32, #tpu.memory_space<vmem>>, vector<2x16x16x32xf32>,
    %c0_70 = arith.constant 0 : index
    %c0_71 = arith.constant 0 : index
    %60 = vector.load %arg5[%c0_70, %c0_71] : memref<9x32xf32, #tpu.memory_space<vmem>>, vector<9x32xf32>
    %cst_72 = arith.constant 0.000000e+00 : f32
    %61 = vector.broadcast %cst_72 : f32 to vector<2x16x16x32xf32>
    %c0_73 = arith.constant 0 : index
    %c0_74 = arith.constant 0 : index
    %c0_75 = arith.constant 0 : index
    %c0_76 = arith.constant 0 : index
    %62 = vector.load %arg8[%c0_73, %c0_74, %c0_75, %c0_76] : memref<2x18x18x32xf32, #tpu.memory_space<vmem>>, vector<2x16x16x32xf32>
    %63 = vector.extract_strided_slice %60 {offsets = [0, 0], sizes = [1, 32], strides = [1, 1]} : vector<9x32xf32> to vector<1x32xf32>
    %64 = vector.shape_cast %63 : vector<1x32xf32> to vector<32xf32>
    %65 = vector.shape_cast %64 : vector<32xf32> to vector<1x1x1x32xf32>
    %66 = vector.broadcast %65 : vector<1x1x1x32xf32> to vector<2x16x16x32xf32>
    %67 = arith.mulf %62, %66 : vector<2x16x16x32xf32>
    %68 = arith.addf %61, %67 : vector<2x16x16x32xf32>
    %c0_77 = arith.constant 0 : index
    %c0_78 = arith.constant 0 : index
    %c1_79 = arith.constant 1 : index
    %c0_80 = arith.constant 0 : index
    %69 = vector.load %arg8[%c0_77, %c0_78, %c1_79, %c0_80] : memref<2x18x18x32xf32, #tpu.memory_space<vmem>>, vector<2x16x16x32xf32>
    %70 = vector.extract_strided_slice %60 {offsets = [1, 0], sizes = [1, 32], strides = [1, 1]} : vector<9x32xf32> to vector<1x32xf32>
    %71 = vector.shape_cast %70 : vector<1x32xf32> to vector<32xf32>
    %72 = vector.shape_cast %71 : vector<32xf32> to vector<1x1x1x32xf32>
    %73 = vector.broadcast %72 : vector<1x1x1x32xf32> to vector<2x16x16x32xf32>
    %74 = arith.mulf %69, %73 : vector<2x16x16x32xf32>
    %75 = arith.addf %68, %74 : vector<2x16x16x32xf32>
    %c0_81 = arith.constant 0 : index
    %c0_82 = arith.constant 0 : index
    %c2_83 = arith.constant 2 : index
    %c0_84 = arith.constant 0 : index
    %76 = vector.load %arg8[%c0_81, %c0_82, %c2_83, %c0_84] : memref<2x18x18x32xf32, #tpu.memory_space<vmem>>, vector<2x16x16x32xf32>
    %77 = vector.extract_strided_slice %60 {offsets = [2, 0], sizes = [1, 32], strides = [1, 1]} : vector<9x32xf32> to vector<1x32xf32>
    %78 = vector.shape_cast %77 : vector<1x32xf32> to vector<32xf32>
    %79 = vector.shape_cast %78 : vector<32xf32> to vector<1x1x1x32xf32>
    %80 = vector.broadcast %79 : vector<1x1x1x32xf32> to vector<2x16x16x32xf32>
    %81 = arith.mulf %76, %80 : vector<2x16x16x32xf32>
    %82 = arith.addf %75, %81 : vector<2x16x16x32xf32>
    %c0_85 = arith.constant 0 : index
    %c1_86 = arith.constant 1 : index
    %c0_87 = arith.constant 0 : index
    %c0_88 = arith.constant 0 : index
    %83 = vector.load %arg8[%c0_85, %c1_86, %c0_87, %c0_88] : memref<2x18x18x32xf32, #tpu.memory_space<vmem>>, vector<2x16x16x32xf32>
    %84 = vector.extract_strided_slice %60 {offsets = [3, 0], sizes = [1, 32], strides = [1, 1]} : vector<9x32xf32> to vector<1x32xf32>
    %85 = vector.shape_cast %84 : vector<1x32xf32> to vector<32xf32>
    %86 = vector.shape_cast %85 : vector<32xf32> to vector<1x1x1x32xf32>
    %87 = vector.broadcast %86 : vector<1x1x1x32xf32> to vector<2x16x16x32xf32>
    %88 = arith.mulf %83, %87 : vector<2x16x16x32xf32>
    %89 = arith.addf %82, %88 : vector<2x16x16x32xf32>
    %c0_89 = arith.constant 0 : index
    %c1_90 = arith.constant 1 : index
    %c1_91 = arith.constant 1 : index
    %c0_92 = arith.constant 0 : index
    %90 = vector.load %arg8[%c0_89, %c1_90, %c1_91, %c0_92] : memref<2x18x18x32xf32, #tpu.memory_space<vmem>>, vector<2x16x16x32xf32>
    %91 = vector.extract_strided_slice %60 {offsets = [4, 0], sizes = [1, 32], strides = [1, 1]} : vector<9x32xf32> to vector<1x32xf32>
    %92 = vector.shape_cast %91 : vector<1x32xf32> to vector<32xf32>
    %93 = vector.shape_cast %92 : vector<32xf32> to vector<1x1x1x32xf32>
    %94 = vector.broadcast %93 : vector<1x1x1x32xf32> to vector<2x16x16x32xf32>
    %95 = arith.mulf %90, %94 : vector<2x16x16x32xf32>
    %96 = arith.addf %89, %95 : vector<2x16x16x32xf32>
    %c0_93 = arith.constant 0 : index
    %c1_94 = arith.constant 1 : index
    %c2_95 = arith.constant 2 : index
    %c0_96 = arith.constant 0 : index
    %97 = vector.load %arg8[%c0_93, %c1_94, %c2_95, %c0_96] : memref<2x18x18x32xf32, #tpu.memory_space<vmem>>, vector<2x16x16x32xf32>
    %98 = vector.extract_strided_slice %60 {offsets = [5, 0], sizes = [1, 32], strides = [1, 1]} : vector<9x32xf32> to vector<1x32xf32>
    %99 = vector.shape_cast %98 : vector<1x32xf32> to vector<32xf32>
    %100 = vector.shape_cast %99 : vector<32xf32> to vector<1x1x1x32xf32>
    %101 = vector.broadcast %100 : vector<1x1x1x32xf32> to vector<2x16x16x32xf32>
    %102 = arith.mulf %97, %101 : vector<2x16x16x32xf32>
    %103 = arith.addf %96, %102 : vector<2x16x16x32xf32>
    %c0_97 = arith.constant 0 : index
    %c2_98 = arith.constant 2 : index
    %c0_99 = arith.constant 0 : index
    %c0_100 = arith.constant 0 : index
    %104 = vector.load %arg8[%c0_97, %c2_98, %c0_99, %c0_100] : memref<2x18x18x32xf32, #tpu.memory_space<vmem>>, vector<2x16x16x32xf32>
    %105 = vector.extract_strided_slice %60 {offsets = [6, 0], sizes = [1, 32], strides = [1, 1]} : vector<9x32xf32> to vector<1x32xf32>
    %106 = vector.shape_cast %105 : vector<1x32xf32> to vector<32xf32>
    %107 = vector.shape_cast %106 : vector<32xf32> to vector<1x1x1x32xf32>
    %108 = vector.broadcast %107 : vector<1x1x1x32xf32> to vector<2x16x16x32xf32>
    %109 = arith.mulf %104, %108 : vector<2x16x16x32xf32>
    %110 = arith.addf %103, %109 : vector<2x16x16x32xf32>
    %c0_101 = arith.constant 0 : index
    %c2_102 = arith.constant 2 : index
    %c1_103 = arith.constant 1 : index
    %c0_104 = arith.constant 0 : index
    %111 = vector.load %arg8[%c0_101, %c2_102, %c1_103, %c0_104] : memref<2x18x18x32xf32, #tpu.memory_space<vmem>>, vector<2x16x16x32xf32>
    %112 = vector.extract_strided_slice %60 {offsets = [7, 0], sizes = [1, 32], strides = [1, 1]} : vector<9x32xf32> to vector<1x32xf32>
    %113 = vector.shape_cast %112 : vector<1x32xf32> to vector<32xf32>
    %114 = vector.shape_cast %113 : vector<32xf32> to vector<1x1x1x32xf32>
    %115 = vector.broadcast %114 : vector<1x1x1x32xf32> to vector<2x16x16x32xf32>
    %116 = arith.mulf %111, %115 : vector<2x16x16x32xf32>
    %117 = arith.addf %110, %116 : vector<2x16x16x32xf32>
    %c0_105 = arith.constant 0 : index
    %c2_106 = arith.constant 2 : index
    %c2_107 = arith.constant 2 : index
    %c0_108 = arith.constant 0 : index
    %118 = vector.load %arg8[%c0_105, %c2_106, %c2_107, %c0_108] : memref<2x18x18x32xf32, #tpu.memory_space<vmem>>, vector<2x16x16x32xf32>
    %119 = vector.extract_strided_slice %60 {offsets = [8, 0], sizes = [1, 32], strides = [1, 1]} : vector<9x32xf32> to vector<1x32xf32>
    %120 = vector.shape_cast %119 : vector<1x32xf32> to vector<32xf32>
    %121 = vector.shape_cast %120 : vector<32xf32> to vector<1x1x1x32xf32>
    %122 = vector.broadcast %121 : vector<1x1x1x32xf32> to vector<2x16x16x32xf32>
    %123 = arith.mulf %118, %122 : vector<2x16x16x32xf32>
    %124 = arith.addf %117, %123 : vector<2x16x16x32xf32>
    %cst_109 = arith.constant dense<0.000000e+00> : vector<2x16x16xf32>
    %125 = vector.multi_reduction <add>, %124, %cst_109 [3] : vector<2x16x16x32xf32> to vector<2x16x16xf32>
    %c0_110 = arith.constant 0 : index
    %c0_111 = arith.constant 0 : index
    %126 = memref.load %arg6[%c0_110, %c0_111] : memref<1x1xf32, #tpu.memory_space<smem>>
    %127 = vector.broadcast %126 : f32 to vector<2x16x16xf32>
    %128 = arith.addf %125, %127 : vector<2x16x16xf32>
    %129 = vector.shape_cast %128 : vector<2x16x16xf32> to vector<32x16xf32>
    %c0_112 = arith.constant 0 : index
    %c0_113 = arith.constant 0 : index
    %130 = vector.load %arg7[%c0_112, %c0_113] : memref<32x16xf32, #tpu.memory_space<vmem>>, vector<32x16xf32>
    tpu.vector_store %arg7[%c0_112, %c0_113], %129 {strides = array<i32>} : memref<32x16xf32, #tpu.memory_space<vmem>>, vector<32x16xf32>,
    return
  }
}

</mosaic_0001>

<bundles_post_ra>
// kernel: tpu_custom_call.1
= control target key start
LH: loop header
LB: loop body
LE: loop exit
PB: predicated region body
PF: predicated region fallthrough
CT: control target
= control target key end

     0   :  { %s7725_s28 = smov 4   ;;  %s7726_s24 = smov 8   ;;  %vm3378_vm0 = vcmask 1043456   ;;  %vm2653_vm1 = vcmask 31744   ;;  %vm2718_vm2 = vcmask 64512   ;;  %vm2783_vm3 = vcmask 97280   ;;  %s15348_s0 = inlined_call_operand.vmem [shape: f32[2,18,18,4], index: 0, kind: input, shape index: {}]   ;;  %s15349_s1 = inlined_call_operand.vmem [shape: f32[36,32], index: 1, kind: input, shape index: {}]   ;;  %s15350_s2 = inlined_call_operand.vmem [shape: f32[1,32], index: 2, kind: input, shape index: {}]   ;;  %s15351_s5 = inlined_call_operand.vmem [shape: f32[9,32], index: 5, kind: input, shape index: {}]   ;;  %s15352_s3 = inlined_call_operand.vmem [shape: f32[1,32], index: 3, kind: input, shape index: {}]   ;;  %s15353_s4 = inlined_call_operand.vmem [shape: f32[1,32], index: 4, kind: input, shape index: {}]   ;;  %s15354_s6 = inlined_call_operand.<no memory space> [shape: f32[1,1], index: 6, kind: input, shape index: {}]   ;;  %s15355_s7 = inlined_call_operand.vmem [shape: f32[32,16], index: 7, kind: output, shape index: {}]  }
   0x1   :  { %v93_v0 = vld [vmem:[%s15348_s0 + $0x19] sm:$0xff]  ;;  %v91_v1 = vld [vmem:[%s15348_s0 + $0x1] sm:$0xff]  ;;  %v92_v3 = vld [vmem:[%s15348_s0 + $0x9] sm:$0xff]  ;;  %s7727_s20 = smov 12   ;;  %s7728_s16 = smov 16   ;;  %vm2848_vm4 = vcmask 130048  }
   0x2   :  { %673 = vrot.lane.b32.xlu1 %v93_v0, %s7725_s28  ;;  %669 = vrot.lane.b32.xlu0 %v91_v1, %s7725_s28  ;;  %v94_v2 = vld [vmem:[%s15348_s0 + $0x21] sm:$0xff]  ;;  %v96_v4 = vld [vmem:[%s15348_s0 + $0x39] sm:$0xff]  ;;  %s7729_s12 = smov 20   ;;  %s7730_s8 = smov 24   ;;  %vm2913_vm5 = vcmask 162816   ;;  %vm2978_vm6 = vcmask 195584  }
   0x3   :  { %v95_v5 = vld [vmem:[%s15348_s0 + $0x31] sm:$0xff]  ;;  %v97_v7 = vld [vmem:[%s15348_s0 + $0x49] sm:$0xff]  ;;  %v99_v9 = vld [vmem:[%s15348_s0 + $0x61] sm:$0xff]  ;;  %s7732_s11 = smov 32   ;;  %vm3043_vm7 = vcmask 228352   ;;  %vm3108_vm8 = vcmask 261120  }
   0x4   :  { %v98_v6 = vld [vmem:[%s15348_s0 + $0x51] sm:$0xff]  ;;  %v100_v8 = vld [vmem:[%s15348_s0 + $0x69] sm:$0xff]  ;;  %v102_v10 = vld [vmem:[%s15348_s0 + $0x81] sm:$0xff]  ;;  %vm3185_vm9 = vcmask 293888   ;;  %vm4439_vm10 = vcmask 254976   ;;  %vm4452_vm11 = vcmask 253952  }
   0x5   :  { %v101_v11 = vld [vmem:[%s15348_s0 + $0x79] sm:$0xff]  ;;  %v103_v13 = vld [vmem:[%s15348_s0 + $0x91] sm:$0xff]  ;;  %v105_v15 = vld [vmem:[%s15348_s0 + $0xa9] sm:$0xff]  ;;  %vm6681_vm12 = vcmask 130112   ;;  %vm6962_vm13 = vcmask 1041409   ;;  %vm6964_vm14 = vcmask 1042434  }
   0x6   :  { %675 = vrot.lane.b32.xlu1 %v94_v2, %s7725_s28  ;;  %671 = vrot.lane.b32.xlu0 %v92_v3, %s7725_s28  ;;  %v104_v12 = vld [vmem:[%s15348_s0 + $0x99] sm:$0xff]  ;;  %v106_v14 = vld [vmem:[%s15348_s0 + $0xb1] sm:$0xff]  ;;  %vm6966_vm15 = vcmask 1043459  }
   0x7   :  { %v108_v16 = vld [vmem:[%s15348_s0 + $0xc9] sm:$0xff]  ;;  %v107_v17 = vld [vmem:[%s15348_s0 + $0xc1] sm:$0xff]  ;;  %v109_v19 = vld [vmem:[%s15348_s0 + $0xd9] sm:$0xff] }
   0x8   :  { %v110_v18 = vld [vmem:[%s15348_s0 + $0xe1] sm:$0xff]  ;;  %v112_v20 = vld [vmem:[%s15348_s0 + $0xf9] sm:$0xff]  ;;  %v111_v21 = vld [vmem:[%s15348_s0 + $0xf1] sm:$0xff] }
   0x9   :  { %v114_v22 = vld [vmem:[%s15348_s0 + $0x111] sm:$0xff]  ;;  %v113_v23 = vld [vmem:[%s15348_s0 + $0x109] sm:$0xff]  ;;  %v115_v25 = vld [vmem:[%s15348_s0 + $0x121] sm:$0xff] }
   0xa   :  { %679 = vrot.lane.b32.xlu1 %v96_v4, %s7725_s28  ;;  %677 = vrot.lane.b32.xlu0 %v95_v5, %s7725_s28  ;;  %v116_v24 = vld [vmem:[%s15348_s0 + $0x129] sm:$0xff]  ;;  %v118_v26 = vld [vmem:[%s15348_s0 + $0x141] sm:$0xff] }
   0xb   :  { %v117_v27 = vld [vmem:[%s15348_s0 + $0x139] sm:$0xff]  ;;  %v119_v29 = vld [vmem:[%s15348_s0 + $0x151] sm:$0xff]  ;;  %v121_v31 = vld [vmem:[%s15348_s0 + $0x169] sm:$0xff] }
   0xc   :  { %v120_v28 = vld [vmem:[%s15348_s0 + $0x159] sm:$0xff]  ;;  %v122_v30 = vld [vmem:[%s15348_s0 + $0x171] sm:$0xff]  ;;  %v125_v35 = vld [vmem:[%s15348_s0 + $0x1c9] sm:$0xff] }
   0xd   :  { %v124_v32 = vld [vmem:[%s15348_s0 + $0x1b9] sm:$0xff]  ;;  %v123_v33 = vld [vmem:[%s15348_s0 + $0x1b1] sm:$0xff]  ;;  %v128_v36 = vld [vmem:[%s15348_s0 + $0x1e9] sm:$0xff] }
   0xe   :  { %683 = vrot.lane.b32.xlu1 %v98_v6, %s7725_s28  ;;  %681 = vrot.lane.b32.xlu0 %v97_v7, %s7725_s28  ;;  %v126_v34 = vld [vmem:[%s15348_s0 + $0x1d1] sm:$0xff]  ;;  %v127_v37 = vld [vmem:[%s15348_s0 + $0x1e1] sm:$0xff] }
   0xf   :  { %v130_v38 = vld [vmem:[%s15348_s0 + $0x201] sm:$0xff]  ;;  %v129_v39 = vld [vmem:[%s15348_s0 + $0x1f9] sm:$0xff]  ;;  %v131_v41 = vld [vmem:[%s15348_s0 + $0x211] sm:$0xff] }
  0x10   :  { %v132_v40 = vld [vmem:[%s15348_s0 + $0x219] sm:$0xff]  ;;  %v134_v42 = vld [vmem:[%s15348_s0 + $0x231] sm:$0xff]  ;;  %v133_v43 = vld [vmem:[%s15348_s0 + $0x229] sm:$0xff] }
  0x11   :  { %v136_v44 = vld [vmem:[%s15348_s0 + $0x249] sm:$0xff]  ;;  %v135_v45 = vld [vmem:[%s15348_s0 + $0x241] sm:$0xff]  ;;  %v137_v47 = vld [vmem:[%s15348_s0 + $0x259] sm:$0xff] }
  0x12   :  { %687 = vrot.lane.b32.xlu1 %v100_v8, %s7725_s28  ;;  %685 = vrot.lane.b32.xlu0 %v99_v9, %s7725_s28  ;;  %v138_v46 = vld [vmem:[%s15348_s0 + $0x261] sm:$0xff]  ;;  %v140_v48 = vld [vmem:[%s15348_s0 + $0x279] sm:$0xff] }
  0x13   :  { %v139_v49 = vld [vmem:[%s15348_s0 + $0x271] sm:$0xff]  ;;  %v141_v51 = vld [vmem:[%s15348_s0 + $0x289] sm:$0xff]  ;;  %v143_v53 = vld [vmem:[%s15348_s0 + $0x2a1] sm:$0xff] }
  0x14   :  { %v142_v50 = vld [vmem:[%s15348_s0 + $0x291] sm:$0xff]  ;;  %v144_v52 = vld [vmem:[%s15348_s0 + $0x2a9] sm:$0xff]  ;;  %v146_v54 = vld [vmem:[%s15348_s0 + $0x2c1] sm:$0xff] }
  0x15   :  { %v145_v55 = vld [vmem:[%s15348_s0 + $0x2b9] sm:$0xff]  ;;  %v147_v57 = vld [vmem:[%s15348_s0 + $0x2d1] sm:$0xff]  ;;  %v149_v59 = vld [vmem:[%s15348_s0 + $0x2e9] sm:$0xff] }
  0x16   :  { %691 = vrot.lane.b32.xlu1 %v102_v10, %s7725_s28  ;;  %689 = vrot.lane.b32.xlu0 %v101_v11, %s7725_s28  ;;  %v148_v56 = vld [vmem:[%s15348_s0 + $0x2d9] sm:$0xff]  ;;  %v150_v58 = vld [vmem:[%s15348_s0 + $0x2f1] sm:$0xff] }
  0x17   :  { %v152_v62 = vld [vmem:[%s15348_s0 + $0x309] sm:$0xff]  ;;  %v151_v63 = vld [vmem:[%s15348_s0 + $0x301] sm:$0xff]  ;;  %v153_v3 = vld [vmem:[%s15348_s0 + $0x319] sm:$0xff] }
  0x18   :  { %v154_v2 = vld [vmem:[%s15348_s0 + $0x321] sm:$0xff]  ;;  %v156_v6 = vld [vmem:[%s15348_s0 + $0xa] sm:$0xff] }
  0x19   :  { %v155_v7 = vld [vmem:[%s15348_s0 + $0x2] sm:$0xff]  ;;  %v157_v11 = vld [vmem:[%s15348_s0 + $0x1a] sm:$0xff] }
  0x1a   :  { %695 = vrot.lane.b32.xlu1 %v104_v12, %s7725_s28  ;;  %693 = vrot.lane.b32.xlu0 %v103_v13, %s7725_s28  ;;  %v158_v10 = vld [vmem:[%s15348_s0 + $0x22] sm:$0xff] }
  0x1e   :  { %699 = vrot.lane.b32.xlu1 %v106_v14, %s7725_s28  ;;  %697 = vrot.lane.b32.xlu0 %v105_v15, %s7725_s28  ;;  %v160_v14 = vld [vmem:[%s15348_s0 + $0x3a] sm:$0xff]  ;;  %v159_v15 = vld [vmem:[%s15348_s0 + $0x32] sm:$0xff] }
  0x22   :  { %703 = vrot.lane.b32.xlu1 %v108_v16, %s7725_s28  ;;  %701 = vrot.lane.b32.xlu0 %v107_v17, %s7725_s28 }
  0x26   :  { %707 = vrot.lane.b32.xlu1 %v110_v18, %s7725_s28  ;;  %705 = vrot.lane.b32.xlu0 %v109_v19, %s7725_s28  ;;  %v162_v18 = vld [vmem:[%s15348_s0 + $0x52] sm:$0xff]  ;;  %v161_v19 = vld [vmem:[%s15348_s0 + $0x4a] sm:$0xff] }
  0x2a   :  { %711 = vrot.lane.b32.xlu1 %v112_v20, %s7725_s28  ;;  %709 = vrot.lane.b32.xlu0 %v111_v21, %s7725_s28 }
  0x2e   :  { %715 = vrot.lane.b32.xlu1 %v114_v22, %s7725_s28  ;;  %713 = vrot.lane.b32.xlu0 %v113_v23, %s7725_s28  ;;  %v164_v22 = vld [vmem:[%s15348_s0 + $0x6a] sm:$0xff]  ;;  %v163_v23 = vld [vmem:[%s15348_s0 + $0x62] sm:$0xff] }
  0x32   :  { %719 = vrot.lane.b32.xlu1 %v116_v24, %s7725_s28  ;;  %717 = vrot.lane.b32.xlu0 %v115_v25, %s7725_s28 }
  0x36   :  { %723 = vrot.lane.b32.xlu1 %v118_v26, %s7725_s28  ;;  %721 = vrot.lane.b32.xlu0 %v117_v27, %s7725_s28  ;;  %v166_v26 = vld [vmem:[%s15348_s0 + $0x82] sm:$0xff]  ;;  %v165_v27 = vld [vmem:[%s15348_s0 + $0x7a] sm:$0xff] }
  0x3a   :  { %727 = vrot.lane.b32.xlu1 %v120_v28, %s7725_s28  ;;  %725 = vrot.lane.b32.xlu0 %v119_v29, %s7725_s28 }
  0x3e   :  { %731 = vrot.lane.b32.xlu1 %v122_v30, %s7725_s28  ;;  %729 = vrot.lane.b32.xlu0 %v121_v31, %s7725_s28  ;;  %v168_v30 = vld [vmem:[%s15348_s0 + $0x9a] sm:$0xff]  ;;  %v167_v31 = vld [vmem:[%s15348_s0 + $0x92] sm:$0xff] }
  0x42   :  { %735 = vrot.lane.b32.xlu1 %v124_v32, %s7725_s28  ;;  %733 = vrot.lane.b32.xlu0 %v123_v33, %s7725_s28 }
  0x46   :  { %739 = vrot.lane.b32.xlu1 %v126_v34, %s7725_s28  ;;  %737 = vrot.lane.b32.xlu0 %v125_v35, %s7725_s28  ;;  %v170_v34 = vld [vmem:[%s15348_s0 + $0xb2] sm:$0xff]  ;;  %v169_v35 = vld [vmem:[%s15348_s0 + $0xaa] sm:$0xff] }
  0x4a   :  { %743 = vrot.lane.b32.xlu1 %v128_v36, %s7725_s28  ;;  %741 = vrot.lane.b32.xlu0 %v127_v37, %s7725_s28 }
  0x4e   :  { %747 = vrot.lane.b32.xlu1 %v130_v38, %s7725_s28  ;;  %745 = vrot.lane.b32.xlu0 %v129_v39, %s7725_s28  ;;  %v172_v38 = vld [vmem:[%s15348_s0 + $0xca] sm:$0xff]  ;;  %v171_v39 = vld [vmem:[%s15348_s0 + $0xc2] sm:$0xff] }
  0x52   :  { %751 = vrot.lane.b32.xlu1 %v132_v40, %s7725_s28  ;;  %749 = vrot.lane.b32.xlu0 %v131_v41, %s7725_s28 }
  0x56   :  { %755 = vrot.lane.b32.xlu1 %v134_v42, %s7725_s28  ;;  %753 = vrot.lane.b32.xlu0 %v133_v43, %s7725_s28  ;;  %v174_v42 = vld [vmem:[%s15348_s0 + $0xe2] sm:$0xff]  ;;  %v173_v43 = vld [vmem:[%s15348_s0 + $0xda] sm:$0xff] }
  0x5a   :  { %759 = vrot.lane.b32.xlu1 %v136_v44, %s7725_s28  ;;  %757 = vrot.lane.b32.xlu0 %v135_v45, %s7725_s28 }
  0x5e   :  { %763 = vrot.lane.b32.xlu1 %v138_v46, %s7725_s28  ;;  %761 = vrot.lane.b32.xlu0 %v137_v47, %s7725_s28  ;;  %v176_v46 = vld [vmem:[%s15348_s0 + $0xfa] sm:$0xff]  ;;  %v175_v47 = vld [vmem:[%s15348_s0 + $0xf2] sm:$0xff] }
  0x62   :  { %767 = vrot.lane.b32.xlu1 %v140_v48, %s7725_s28  ;;  %765 = vrot.lane.b32.xlu0 %v139_v49, %s7725_s28 }
  0x66   :  { %771 = vrot.lane.b32.xlu1 %v142_v50, %s7725_s28  ;;  %769 = vrot.lane.b32.xlu0 %v141_v51, %s7725_s28  ;;  %v178_v50 = vld [vmem:[%s15348_s0 + $0x112] sm:$0xff]  ;;  %v177_v51 = vld [vmem:[%s15348_s0 + $0x10a] sm:$0xff] }
  0x6a   :  { %775 = vrot.lane.b32.xlu1 %v144_v52, %s7725_s28  ;;  %773 = vrot.lane.b32.xlu0 %v143_v53, %s7725_s28 }
  0x6e   :  { %779 = vrot.lane.b32.xlu1 %v146_v54, %s7725_s28  ;;  %777 = vrot.lane.b32.xlu0 %v145_v55, %s7725_s28  ;;  %v180_v54 = vld [vmem:[%s15348_s0 + $0x12a] sm:$0xff]  ;;  %v179_v55 = vld [vmem:[%s15348_s0 + $0x122] sm:$0xff] }
  0x72   :  { %783 = vrot.lane.b32.xlu1 %v148_v56, %s7725_s28  ;;  %781 = vrot.lane.b32.xlu0 %v147_v57, %s7725_s28 }
  0x74   :  { %v8012_v60 = vpop.permute.xlu1 %673  ;;  %v8014_v61 = vpop.permute.xlu0 %669 }
  0x76   :  { %787 = vrot.lane.b32.xlu1 %v150_v58, %s7725_s28  ;;  %785 = vrot.lane.b32.xlu0 %v149_v59, %s7725_s28  ;;  %v182_v58 = vld [vmem:[%s15348_s0 + $0x142] sm:$0xff]  ;;  %v181_v59 = vld [vmem:[%s15348_s0 + $0x13a] sm:$0xff] }
  0x78   :  { %v8024_v0 = vpop.permute.xlu1 %675  ;;  %v8026_v1 = vpop.permute.xlu0 %671 }
  0x7a   :  { %791 = vrot.lane.b32.xlu1 %v152_v62, %s7725_s28  ;;  %789 = vrot.lane.b32.xlu0 %v151_v63, %s7725_s28 }
  0x7c   :  { %v8036_v4 = vpop.permute.xlu1 %679  ;;  %v8038_v5 = vpop.permute.xlu0 %677 }
  0x7e   :  { %795 = vrot.lane.b32.xlu1 %v154_v2, %s7725_s28  ;;  %793 = vrot.lane.b32.xlu0 %v153_v3, %s7725_s28  ;;  %v184_v2 = vld [vmem:[%s15348_s0 + $0x15a] sm:$0xff]  ;;  %v183_v3 = vld [vmem:[%s15348_s0 + $0x152] sm:$0xff] }
  0x80   :  { %v8048_v8 = vpop.permute.xlu1 %683  ;;  %v8050_v9 = vpop.permute.xlu0 %681 }
  0x81   :  { %15483 = vst [vmem:[#allocation4_spill] sm:$0xff] %v8048_v8  ;;  %15484 = vst [vmem:[#allocation5_spill] sm:$0xff] %v8050_v9  ;;  %v9454_v8 = vld [vmem:[%s15348_s0 + $0x152] sm:$0xff] }
  0x82   :  { %927 = vrot.lane.b32.xlu1 %v156_v6, %s7726_s24  ;;  %925 = vrot.lane.b32.xlu0 %v155_v7, %s7726_s24  ;;  %15686 = vst [vmem:[#allocation207_spill] sm:$0xff] %v9454_v8 }
  0x84   :  { %v8060_v12 = vpop.permute.xlu1 %687  ;;  %v8062_v13 = vpop.permute.xlu0 %685 }
  0x85   :  { %15485 = vst [vmem:[#allocation6_spill] sm:$0xff] %v8060_v12  ;;  %15486 = vst [vmem:[#allocation7_spill] sm:$0xff] %v8062_v13  ;;  %v9382_v12 = vld [vmem:[%s15348_s0 + $0xf2] sm:$0xff]  ;;  %v9418_v13 = vld [vmem:[%s15348_s0 + $0x122] sm:$0xff] }
  0x86   :  { %931 = vrot.lane.b32.xlu1 %v158_v10, %s7726_s24  ;;  %929 = vrot.lane.b32.xlu0 %v157_v11, %s7726_s24  ;;  %v186_v10 = vld [vmem:[%s15348_s0 + $0x172] sm:$0xff]  ;;  %v185_v11 = vld [vmem:[%s15348_s0 + $0x16a] sm:$0xff] }
  0x88   :  { %v8072_v16 = vpop.permute.xlu1 %691  ;;  %v8074_v17 = vpop.permute.xlu0 %689 }
  0x89   :  { %15487 = vst [vmem:[#allocation8_spill] sm:$0xff] %v8072_v16  ;;  %15488 = vst [vmem:[#allocation9_spill] sm:$0xff] %v8074_v17  ;;  %v9310_v16 = vld [vmem:[%s15348_s0 + $0x92] sm:$0xff]  ;;  %v9346_v17 = vld [vmem:[%s15348_s0 + $0xc2] sm:$0xff] }
  0x8a   :  { %935 = vrot.lane.b32.xlu1 %v160_v14, %s7726_s24  ;;  %933 = vrot.lane.b32.xlu0 %v159_v15, %s7726_s24 }
  0x8c   :  { %v8084_v20 = vpop.permute.xlu1 %695  ;;  %v8086_v21 = vpop.permute.xlu0 %693 }
  0x8d   :  { %15489 = vst [vmem:[#allocation10_spill] sm:$0xff] %v8084_v20  ;;  %15490 = vst [vmem:[#allocation11_spill] sm:$0xff] %v8086_v21  ;;  %v9269_v20 = vld [vmem:[%s15348_s0 + $0x6a] sm:$0xff] }
  0x8e   :  { %939 = vrot.lane.b32.xlu1 %v162_v18, %s7726_s24  ;;  %937 = vrot.lane.b32.xlu0 %v161_v19, %s7726_s24  ;;  %v188_v18 = vld [vmem:[%s15348_s0 + $0x1ba] sm:$0xff]  ;;  %v187_v19 = vld [vmem:[%s15348_s0 + $0x1b2] sm:$0xff] }
  0x90   :  { %v8096_v24 = vpop.permute.xlu1 %699  ;;  %v8098_v25 = vpop.permute.xlu0 %697 }
  0x91   :  { %15491 = vst [vmem:[#allocation12_spill] sm:$0xff] %v8096_v24  ;;  %15492 = vst [vmem:[#allocation13_spill] sm:$0xff] %v8098_v25 }
  0x92   :  { %943 = vrot.lane.b32.xlu1 %v164_v22, %s7726_s24  ;;  %941 = vrot.lane.b32.xlu0 %v163_v23, %s7726_s24 }
  0x94   :  { %v8108_v28 = vpop.permute.xlu1 %703  ;;  %v8110_v29 = vpop.permute.xlu0 %701 }
  0x95   :  { %15493 = vst [vmem:[#allocation14_spill] sm:$0xff] %v8108_v28  ;;  %15494 = vst [vmem:[#allocation15_spill] sm:$0xff] %v8110_v29  ;;  %v7085_v28 = vld [vmem:[%s15348_s0 + $0xa9] sm:$0xff] }
  0x96   :  { %947 = vrot.lane.b32.xlu1 %v166_v26, %s7726_s24  ;;  %945 = vrot.lane.b32.xlu0 %v165_v27, %s7726_s24  ;;  %v190_v26 = vld [vmem:[%s15348_s0 + $0x1d2] sm:$0xff]  ;;  %v189_v27 = vld [vmem:[%s15348_s0 + $0x1ca] sm:$0xff] }
  0x98   :  { %v8120_v32 = vpop.permute.xlu1 %707  ;;  %v8122_v33 = vpop.permute.xlu0 %705 }
  0x99   :  { %15495 = vst [vmem:[#allocation16_spill] sm:$0xff] %v8120_v32  ;;  %15496 = vst [vmem:[#allocation17_spill] sm:$0xff] %v8122_v33  ;;  %v7083_v32 = vld [vmem:[%s15348_s0 + $0x91] sm:$0xff] }
  0x9a   :  { %951 = vrot.lane.b32.xlu1 %v168_v30, %s7726_s24  ;;  %949 = vrot.lane.b32.xlu0 %v167_v31, %s7726_s24 }
  0x9c   :  { %v8132_v36 = vpop.permute.xlu1 %711  ;;  %v8134_v37 = vpop.permute.xlu0 %709 }
  0x9d   :  { %15497 = vst [vmem:[#allocation18_spill] sm:$0xff] %v8132_v36  ;;  %15498 = vst [vmem:[#allocation19_spill] sm:$0xff] %v8134_v37  ;;  %v8884_v36 = vld [vmem:[%s15348_s0 + $0x79] sm:$0xff] }
  0x9e   :  { %955 = vrot.lane.b32.xlu1 %v170_v34, %s7726_s24  ;;  %953 = vrot.lane.b32.xlu0 %v169_v35, %s7726_s24  ;;  %v192_v34 = vld [vmem:[%s15348_s0 + $0x1ea] sm:$0xff]  ;;  %v191_v35 = vld [vmem:[%s15348_s0 + $0x1e2] sm:$0xff] }
  0xa0   :  { %v8144_v40 = vpop.permute.xlu1 %715  ;;  %v8146_v41 = vpop.permute.xlu0 %713 }
  0xa1   :  { %15499 = vst [vmem:[#allocation20_spill] sm:$0xff] %v8144_v40  ;;  %15500 = vst [vmem:[#allocation21_spill] sm:$0xff] %v8146_v41  ;;  %v8866_v40 = vld [vmem:[%s15348_s0 + $0x61] sm:$0xff] }
  0xa2   :  { %959 = vrot.lane.b32.xlu1 %v172_v38, %s7726_s24  ;;  %957 = vrot.lane.b32.xlu0 %v171_v39, %s7726_s24 }
  0xa4   :  { %v8156_v44 = vpop.permute.xlu1 %719  ;;  %v8158_v45 = vpop.permute.xlu0 %717 }
  0xa5   :  { %15501 = vst [vmem:[#allocation22_spill] sm:$0xff] %v8156_v44  ;;  %15502 = vst [vmem:[#allocation23_spill] sm:$0xff] %v8158_v45 }
  0xa6   :  { %963 = vrot.lane.b32.xlu1 %v174_v42, %s7726_s24  ;;  %961 = vrot.lane.b32.xlu0 %v173_v43, %s7726_s24  ;;  %v194_v42 = vld [vmem:[%s15348_s0 + $0x202] sm:$0xff]  ;;  %v193_v43 = vld [vmem:[%s15348_s0 + $0x1fa] sm:$0xff] }
  0xa8   :  { %v8168_v48 = vpop.permute.xlu1 %723  ;;  %v8170_v49 = vpop.permute.xlu0 %721 }
  0xa9   :  { %15503 = vst [vmem:[#allocation24_spill] sm:$0xff] %v8168_v48  ;;  %15504 = vst [vmem:[#allocation25_spill] sm:$0xff] %v8170_v49 }
  0xaa   :  { %967 = vrot.lane.b32.xlu1 %v176_v46, %s7726_s24  ;;  %965 = vrot.lane.b32.xlu0 %v175_v47, %s7726_s24 }
  0xac   :  { %v8180_v52 = vpop.permute.xlu1 %727  ;;  %v8182_v53 = vpop.permute.xlu0 %725 }
  0xad   :  { %15505 = vst [vmem:[#allocation26_spill] sm:$0xff] %v8180_v52  ;;  %15506 = vst [vmem:[#allocation27_spill] sm:$0xff] %v8182_v53  ;;  %v61_v53 = vld [vmem:[%s15348_s0 + $0x1c8] sm:$0xff] }
  0xae   :  { %971 = vrot.lane.b32.xlu1 %v178_v50, %s7726_s24  ;;  %969 = vrot.lane.b32.xlu0 %v177_v51, %s7726_s24  ;;  %v196_v50 = vld [vmem:[%s15348_s0 + $0x21a] sm:$0xff]  ;;  %v195_v51 = vld [vmem:[%s15348_s0 + $0x212] sm:$0xff] }
  0xb0   :  { %v8192_v56 = vpop.permute.xlu1 %731  ;;  %v8194_v57 = vpop.permute.xlu0 %729 }
  0xb1   :  { %15507 = vst [vmem:[#allocation28_spill] sm:$0xff] %v8192_v56  ;;  %15508 = vst [vmem:[#allocation29_spill] sm:$0xff] %v8194_v57  ;;  %v51_v57 = vld [vmem:[%s15348_s0 + $0x120] sm:$0xff] }
  0xb2   :  { %975 = vrot.lane.b32.xlu1 %v180_v54, %s7726_s24  ;;  %973 = vrot.lane.b32.xlu0 %v179_v55, %s7726_s24 }
  0xb4   :  { %v8204_v62 = vpop.permute.xlu1 %735  ;;  %v8206_v63 = vpop.permute.xlu0 %733 }
  0xb5   :  { %15509 = vst [vmem:[#allocation30_spill] sm:$0xff] %v8204_v62  ;;  %15510 = vst [vmem:[#allocation31_spill] sm:$0xff] %v8206_v63  ;;  %v49_v63 = vld [vmem:[%s15348_s0 + $0x108] sm:$0xff] }
  0xb6   :  { %979 = vrot.lane.b32.xlu1 %v182_v58, %s7726_s24  ;;  %977 = vrot.lane.b32.xlu0 %v181_v59, %s7726_s24  ;;  %v198_v58 = vld [vmem:[%s15348_s0 + $0x232] sm:$0xff]  ;;  %v197_v59 = vld [vmem:[%s15348_s0 + $0x22a] sm:$0xff] }
  0xb8   :  { %v8216_v6 = vpop.permute.xlu1 %739  ;;  %v8218_v7 = vpop.permute.xlu0 %737 }
  0xb9   :  { %15511 = vst [vmem:[#allocation32_spill] sm:$0xff] %v8216_v6  ;;  %15512 = vst [vmem:[#allocation33_spill] sm:$0xff] %v8218_v7  ;;  %v47_v7 = vld [vmem:[%s15348_s0 + $0xf0] sm:$0xff] }
  0xba   :  { %983 = vrot.lane.b32.xlu1 %v184_v2, %s7726_s24  ;;  %981 = vrot.lane.b32.xlu0 %v183_v3, %s7726_s24 }
  0xbc   :  { %v8228_v14 = vpop.permute.xlu1 %743  ;;  %v8230_v15 = vpop.permute.xlu0 %741 }
  0xbd   :  { %15513 = vst [vmem:[#allocation34_spill] sm:$0xff] %v8228_v14  ;;  %15514 = vst [vmem:[#allocation35_spill] sm:$0xff] %v8230_v15  ;;  %v45_v15 = vld [vmem:[%s15348_s0 + $0xd8] sm:$0xff] }
  0xbe   :  { %987 = vrot.lane.b32.xlu1 %v186_v10, %s7726_s24  ;;  %985 = vrot.lane.b32.xlu0 %v185_v11, %s7726_s24  ;;  %v200_v10 = vld [vmem:[%s15348_s0 + $0x24a] sm:$0xff]  ;;  %v199_v11 = vld [vmem:[%s15348_s0 + $0x242] sm:$0xff] }
  0xc0   :  { %v8240_v22 = vpop.permute.xlu1 %747  ;;  %v8242_v23 = vpop.permute.xlu0 %745 }
  0xc1   :  { %15515 = vst [vmem:[#allocation36_spill] sm:$0xff] %v8240_v22  ;;  %15516 = vst [vmem:[#allocation37_spill] sm:$0xff] %v8242_v23  ;;  %v43_v23 = vld [vmem:[%s15348_s0 + $0xc0] sm:$0xff] }
  0xc2   :  { %991 = vrot.lane.b32.xlu1 %v188_v18, %s7726_s24  ;;  %989 = vrot.lane.b32.xlu0 %v187_v19, %s7726_s24 }
  0xc4   :  { %v8252_v30 = vpop.permute.xlu1 %751  ;;  %v8254_v31 = vpop.permute.xlu0 %749 }
  0xc5   :  { %15517 = vst [vmem:[#allocation38_spill] sm:$0xff] %v8252_v30  ;;  %15518 = vst [vmem:[#allocation39_spill] sm:$0xff] %v8254_v31  ;;  %v41_v31 = vld [vmem:[%s15348_s0 + $0xa8] sm:$0xff] }
  0xc6   :  { %995 = vrot.lane.b32.xlu1 %v190_v26, %s7726_s24  ;;  %993 = vrot.lane.b32.xlu0 %v189_v27, %s7726_s24  ;;  %v202_v26 = vld [vmem:[%s15348_s0 + $0x262] sm:$0xff]  ;;  %v201_v27 = vld [vmem:[%s15348_s0 + $0x25a] sm:$0xff] }
  0xc8   :  { %v8264_v38 = vpop.permute.xlu1 %755  ;;  %v8266_v39 = vpop.permute.xlu0 %753 }
  0xc9   :  { %15519 = vst [vmem:[#allocation40_spill] sm:$0xff] %v8264_v38  ;;  %15520 = vst [vmem:[#allocation41_spill] sm:$0xff] %v8266_v39  ;;  %v39_v39 = vld [vmem:[%s15348_s0 + $0x90] sm:$0xff] }
  0xca   :  { %999 = vrot.lane.b32.xlu1 %v192_v34, %s7726_s24  ;;  %997 = vrot.lane.b32.xlu0 %v191_v35, %s7726_s24 }
  0xcc   :  { %v8276_v46 = vpop.permute.xlu1 %759  ;;  %v8278_v47 = vpop.permute.xlu0 %757 }
  0xcd   :  { %15521 = vst [vmem:[#allocation42_spill] sm:$0xff] %v8276_v46  ;;  %15522 = vst [vmem:[#allocation43_spill] sm:$0xff] %v8278_v47  ;;  %v37_v47 = vld [vmem:[%s15348_s0 + $0x78] sm:$0xff] }
  0xce   :  { %1003 = vrot.lane.b32.xlu1 %v194_v42, %s7726_s24  ;;  %1001 = vrot.lane.b32.xlu0 %v193_v43, %s7726_s24  ;;  %v204_v42 = vld [vmem:[%s15348_s0 + $0x27a] sm:$0xff]  ;;  %v203_v43 = vld [vmem:[%s15348_s0 + $0x272] sm:$0xff] }
  0xd0   :  { %v8288_v54 = vpop.permute.xlu1 %763  ;;  %v8290_v55 = vpop.permute.xlu0 %761 }
  0xd1   :  { %15523 = vst [vmem:[#allocation44_spill] sm:$0xff] %v8288_v54  ;;  %15524 = vst [vmem:[#allocation45_spill] sm:$0xff] %v8290_v55  ;;  %v35_v55 = vld [vmem:[%s15348_s0 + $0x60] sm:$0xff] }
  0xd2   :  { %1007 = vrot.lane.b32.xlu1 %v196_v50, %s7726_s24  ;;  %1005 = vrot.lane.b32.xlu0 %v195_v51, %s7726_s24 }
  0xd4   :  { %v8300_v2 = vpop.permute.xlu1 %767  ;;  %v8302_v3 = vpop.permute.xlu0 %765 }
  0xd5   :  { %15525 = vst [vmem:[#allocation46_spill] sm:$0xff] %v8300_v2  ;;  %15526 = vst [vmem:[#allocation47_spill] sm:$0xff] %v8302_v3  ;;  %v33_v3 = vld [vmem:[%s15348_s0 + $0x48] sm:$0xff] }
  0xd6   :  { %1011 = vrot.lane.b32.xlu1 %v198_v58, %s7726_s24  ;;  %1009 = vrot.lane.b32.xlu0 %v197_v59, %s7726_s24  ;;  %v206_v58 = vld [vmem:[%s15348_s0 + $0x292] sm:$0xff]  ;;  %v205_v59 = vld [vmem:[%s15348_s0 + $0x28a] sm:$0xff] }
  0xd8   :  { %v8312_v18 = vpop.permute.xlu1 %771  ;;  %v8314_v19 = vpop.permute.xlu0 %769 }
  0xd9   :  { %15527 = vst [vmem:[#allocation48_spill] sm:$0xff] %v8312_v18  ;;  %15528 = vst [vmem:[#allocation49_spill] sm:$0xff] %v8314_v19  ;;  %v32_v18 = vld [vmem:[%s15348_s0 + $0x38] sm:$0xff]  ;;  %v31_v19 = vld [vmem:[%s15348_s0 + $0x30] sm:$0xff] }
  0xda   :  { %1015 = vrot.lane.b32.xlu1 %v200_v10, %s7726_s24  ;;  %1013 = vrot.lane.b32.xlu0 %v199_v11, %s7726_s24 }
  0xdc   :  { %v8324_v34 = vpop.permute.xlu1 %775  ;;  %v8326_v35 = vpop.permute.xlu0 %773 }
  0xdd   :  { %15529 = vst [vmem:[#allocation50_spill] sm:$0xff] %v8324_v34  ;;  %15530 = vst [vmem:[#allocation51_spill] sm:$0xff] %v8326_v35  ;;  %v30_v35 = vld [vmem:[%s15348_s0 + $0x20] sm:$0xff] }
  0xde   :  { %1019 = vrot.lane.b32.xlu1 %v202_v26, %s7726_s24  ;;  %1017 = vrot.lane.b32.xlu0 %v201_v27, %s7726_s24  ;;  %v208_v26 = vld [vmem:[%s15348_s0 + $0x2aa] sm:$0xff]  ;;  %v207_v27 = vld [vmem:[%s15348_s0 + $0x2a2] sm:$0xff] }
  0xe0   :  { %v8336_v50 = vpop.permute.xlu1 %779  ;;  %v8338_v51 = vpop.permute.xlu0 %777 }
  0xe1   :  { %15531 = vst [vmem:[#allocation52_spill] sm:$0xff] %v8336_v50  ;;  %15532 = vst [vmem:[#allocation53_spill] sm:$0xff] %v8338_v51 }
  0xe2   :  { %1023 = vrot.lane.b32.xlu1 %v204_v42, %s7726_s24  ;;  %1021 = vrot.lane.b32.xlu0 %v203_v43, %s7726_s24 }
  0xe4   :  { %v8348_v10 = vpop.permute.xlu1 %783  ;;  %v8350_v11 = vpop.permute.xlu0 %781 }
  0xe5   :  { %15533 = vst [vmem:[#allocation54_spill] sm:$0xff] %v8348_v10  ;;  %15534 = vst [vmem:[#allocation55_spill] sm:$0xff] %v8350_v11 }
  0xe6   :  { %1027 = vrot.lane.b32.xlu1 %v206_v58, %s7726_s24  ;;  %1025 = vrot.lane.b32.xlu0 %v205_v59, %s7726_s24  ;;  %v210_v58 = vld [vmem:[%s15348_s0 + $0x2c2] sm:$0xff]  ;;  %v209_v59 = vld [vmem:[%s15348_s0 + $0x2ba] sm:$0xff] }
  0xe8   :  { %v8360_v42 = vpop.permute.xlu1 %787  ;;  %v8362_v43 = vpop.permute.xlu0 %785 }
  0xe9   :  { %15535 = vst [vmem:[#allocation56_spill] sm:$0xff] %v8360_v42  ;;  %15536 = vst [vmem:[#allocation57_spill] sm:$0xff] %v8362_v43 }
  0xea   :  { %1031 = vrot.lane.b32.xlu1 %v208_v26, %s7726_s24  ;;  %1029 = vrot.lane.b32.xlu0 %v207_v27, %s7726_s24  ;;  %v212_v26 = vld [vmem:[%s15348_s0 + $0x2da] sm:$0xff]  ;;  %v211_v27 = vld [vmem:[%s15348_s0 + $0x2d2] sm:$0xff] }
  0xec   :  { %v8372_v10 = vpop.permute.xlu1 %791  ;;  %v8374_v11 = vpop.permute.xlu0 %789 }
  0xed   :  { %15537 = vst [vmem:[#allocation58_spill] sm:$0xff] %v8372_v10  ;;  %15538 = vst [vmem:[#allocation59_spill] sm:$0xff] %v8374_v11 }
  0xee   :  { %1035 = vrot.lane.b32.xlu1 %v210_v58, %s7726_s24  ;;  %1033 = vrot.lane.b32.xlu0 %v209_v59, %s7726_s24  ;;  %v214_v58 = vld [vmem:[%s15348_s0 + $0x2f2] sm:$0xff]  ;;  %v213_v59 = vld [vmem:[%s15348_s0 + $0x2ea] sm:$0xff] }
  0xf0   :  { %v8384_v42 = vpop.permute.xlu1 %795  ;;  %v8386_v43 = vpop.permute.xlu0 %793 }
  0xf1   :  { %15539 = vst [vmem:[#allocation60_spill] sm:$0xff] %v8384_v42  ;;  %15540 = vst [vmem:[#allocation61_spill] sm:$0xff] %v8386_v43 }
  0xf2   :  { %1039 = vrot.lane.b32.xlu1 %v212_v26, %s7726_s24  ;;  %1037 = vrot.lane.b32.xlu0 %v211_v27, %s7726_s24  ;;  %v216_v26 = vld [vmem:[%s15348_s0 + $0x30a] sm:$0xff]  ;;  %v215_v27 = vld [vmem:[%s15348_s0 + $0x302] sm:$0xff] }
  0xf4   :  { %v8396_v10 = vpop.permute.xlu1 %927  ;;  %v8398_v11 = vpop.permute.xlu0 %925 }
  0xf6   :  { %1043 = vrot.lane.b32.xlu1 %v214_v58, %s7726_s24  ;;  %1041 = vrot.lane.b32.xlu0 %v213_v59, %s7726_s24  ;;  %v218_v58 = vld [vmem:[%s15348_s0 + $0x322] sm:$0xff]  ;;  %v217_v59 = vld [vmem:[%s15348_s0 + $0x31a] sm:$0xff] }
  0xf8   :  { %v8408_v43 = vpop.permute.xlu1 %931  ;;  %v8410_v42 = vpop.permute.xlu0 %929 }
  0xfa   :  { %1047 = vrot.lane.b32.xlu1 %v216_v26, %s7726_s24  ;;  %1045 = vrot.lane.b32.xlu0 %v215_v27, %s7726_s24  ;;  %v29_v27 = vld [vmem:[%s15348_s0 + $0x18] sm:$0xff] }
  0xfc   :  { %v8420_v50 = vpop.permute.xlu1 %935  ;;  %v8422_v51 = vpop.permute.xlu0 %933 }
  0xfe   :  { %1051 = vrot.lane.b32.xlu1 %v218_v58, %s7726_s24  ;;  %1049 = vrot.lane.b32.xlu0 %v217_v59, %s7726_s24 }
 0x100   :  { %v8426_v34 = vpop.permute.xlu1 %939  ;;  %v8428_v26 = vpop.permute.xlu0 %937 }
 0x101   :  { %15541 = vst [vmem:[#allocation62_spill] sm:$0xff] %v8426_v34  ;;  %15542 = vst [vmem:[#allocation63_spill] sm:$0xff] %v8428_v26 }
 0x102   :  { %1183 = vrot.lane.b32.xlu1 %v30_v35, %s7727_s20  ;;  %1181 = vrot.lane.b32.xlu0 %v29_v27, %s7727_s20  ;;  %v34_v27 = vld [vmem:[%s15348_s0 + $0x50] sm:$0xff] }
 0x104   :  { %v8438_v58 = vpop.permute.xlu1 %943  ;;  %v8440_v59 = vpop.permute.xlu0 %941 }
 0x105   :  { %15543 = vst [vmem:[#allocation64_spill] sm:$0xff] %v8438_v58  ;;  %15544 = vst [vmem:[#allocation65_spill] sm:$0xff] %v8440_v59 }
 0x106   :  { %1187 = vrot.lane.b32.xlu1 %v32_v18, %s7727_s20  ;;  %1185 = vrot.lane.b32.xlu0 %v31_v19, %s7727_s20  ;;  %v36_v19 = vld [vmem:[%s15348_s0 + $0x68] sm:$0xff] }
 0x108   :  { %v8450_v2 = vpop.permute.xlu1 %947  ;;  %v8452_v35 = vpop.permute.xlu0 %945 }
 0x109   :  { %15545 = vst [vmem:[#allocation66_spill] sm:$0xff] %v8450_v2  ;;  %15546 = vst [vmem:[#allocation67_spill] sm:$0xff] %v8452_v35 }
 0x10a   :  { %1191 = vrot.lane.b32.xlu1 %v34_v27, %s7727_s20  ;;  %1189 = vrot.lane.b32.xlu0 %v33_v3, %s7727_s20  ;;  %v38_v3 = vld [vmem:[%s15348_s0 + $0x80] sm:$0xff] }
 0x10c   :  { %v8462_v54 = vpop.permute.xlu1 %951  ;;  %v8464_v18 = vpop.permute.xlu0 %949 }
 0x10d   :  { %15547 = vst [vmem:[#allocation68_spill] sm:$0xff] %v8462_v54  ;;  %15548 = vst [vmem:[#allocation69_spill] sm:$0xff] %v8464_v18 }
 0x10e   :  { %1195 = vrot.lane.b32.xlu1 %v36_v19, %s7727_s20  ;;  %1193 = vrot.lane.b32.xlu0 %v35_v55, %s7727_s20  ;;  %v40_v55 = vld [vmem:[%s15348_s0 + $0x98] sm:$0xff] }
 0x110   :  { %v8474_v46 = vpop.permute.xlu1 %955  ;;  %v8476_v27 = vpop.permute.xlu0 %953 }
 0x111   :  { %15549 = vst [vmem:[#allocation70_spill] sm:$0xff] %v8474_v46  ;;  %15550 = vst [vmem:[#allocation71_spill] sm:$0xff] %v8476_v27 }
 0x112   :  { %1199 = vrot.lane.b32.xlu1 %v38_v3, %s7727_s20  ;;  %1197 = vrot.lane.b32.xlu0 %v37_v47, %s7727_s20  ;;  %v42_v47 = vld [vmem:[%s15348_s0 + $0xb0] sm:$0xff] }
 0x114   :  { %v8486_v38 = vpop.permute.xlu1 %959  ;;  %v8488_v19 = vpop.permute.xlu0 %957 }
 0x115   :  { %15551 = vst [vmem:[#allocation72_spill] sm:$0xff] %v8486_v38  ;;  %15552 = vst [vmem:[#allocation73_spill] sm:$0xff] %v8488_v19  ;;  %v7086_v38 = vld [vmem:[%s15348_s0 + $0xb1] sm:$0xff] }
 0x116   :  { %1203 = vrot.lane.b32.xlu1 %v40_v55, %s7727_s20  ;;  %1201 = vrot.lane.b32.xlu0 %v39_v39, %s7727_s20  ;;  %v44_v39 = vld [vmem:[%s15348_s0 + $0xc8] sm:$0xff] }
 0x118   :  { %v8498_v30 = vpop.permute.xlu1 %963  ;;  %v8500_v3 = vpop.permute.xlu0 %961 }
 0x119   :  { %15553 = vst [vmem:[#allocation74_spill] sm:$0xff] %v8498_v30  ;;  %15554 = vst [vmem:[#allocation75_spill] sm:$0xff] %v8500_v3  ;;  %v7084_v30 = vld [vmem:[%s15348_s0 + $0x99] sm:$0xff] }
 0x11a   :  { %1207 = vrot.lane.b32.xlu1 %v42_v47, %s7727_s20  ;;  %1205 = vrot.lane.b32.xlu0 %v41_v31, %s7727_s20  ;;  %v46_v31 = vld [vmem:[%s15348_s0 + $0xe0] sm:$0xff] }
 0x11c   :  { %v8510_v22 = vpop.permute.xlu1 %967  ;;  %v8512_v55 = vpop.permute.xlu0 %965 }
 0x11d   :  { %15555 = vst [vmem:[#allocation76_spill] sm:$0xff] %v8510_v22  ;;  %15556 = vst [vmem:[#allocation77_spill] sm:$0xff] %v8512_v55  ;;  %v8879_v22 = vld [vmem:[%s15348_s0 + $0x81] sm:$0xff] }
 0x11e   :  { %1211 = vrot.lane.b32.xlu1 %v44_v39, %s7727_s20  ;;  %1209 = vrot.lane.b32.xlu0 %v43_v23, %s7727_s20  ;;  %v48_v23 = vld [vmem:[%s15348_s0 + $0xf8] sm:$0xff] }
 0x120   :  { %v8522_v14 = vpop.permute.xlu1 %971  ;;  %v8524_v47 = vpop.permute.xlu0 %969 }
 0x121   :  { %15557 = vst [vmem:[#allocation78_spill] sm:$0xff] %v8522_v14  ;;  %15558 = vst [vmem:[#allocation79_spill] sm:$0xff] %v8524_v47  ;;  %v8861_v14 = vld [vmem:[%s15348_s0 + $0x69] sm:$0xff] }
 0x122   :  { %1215 = vrot.lane.b32.xlu1 %v46_v31, %s7727_s20  ;;  %1213 = vrot.lane.b32.xlu0 %v45_v15, %s7727_s20  ;;  %v50_v15 = vld [vmem:[%s15348_s0 + $0x110] sm:$0xff] }
 0x124   :  { %v8534_v6 = vpop.permute.xlu1 %975  ;;  %v8536_v39 = vpop.permute.xlu0 %973 }
 0x125   :  { %15559 = vst [vmem:[#allocation80_spill] sm:$0xff] %v8534_v6  ;;  %15560 = vst [vmem:[#allocation81_spill] sm:$0xff] %v8536_v39 }
 0x126   :  { %1219 = vrot.lane.b32.xlu1 %v48_v23, %s7727_s20  ;;  %1217 = vrot.lane.b32.xlu0 %v47_v7, %s7727_s20  ;;  %v52_v7 = vld [vmem:[%s15348_s0 + $0x128] sm:$0xff] }
 0x128   :  { %v8546_v62 = vpop.permute.xlu1 %979  ;;  %v8548_v31 = vpop.permute.xlu0 %977 }
 0x129   :  { %15561 = vst [vmem:[#allocation82_spill] sm:$0xff] %v8546_v62  ;;  %15562 = vst [vmem:[#allocation83_spill] sm:$0xff] %v8548_v31 }
 0x12a   :  { %1223 = vrot.lane.b32.xlu1 %v50_v15, %s7727_s20  ;;  %1221 = vrot.lane.b32.xlu0 %v49_v63, %s7727_s20  ;;  %v54_v63 = vld [vmem:[%s15348_s0 + $0x140] sm:$0xff] }
 0x12c   :  { %v8558_v56 = vpop.permute.xlu1 %983  ;;  %v8560_v23 = vpop.permute.xlu0 %981 }
 0x12d   :  { %15563 = vst [vmem:[#allocation84_spill] sm:$0xff] %v8558_v56  ;;  %15564 = vst [vmem:[#allocation85_spill] sm:$0xff] %v8560_v23  ;;  %v53_v56 = vld [vmem:[%s15348_s0 + $0x138] sm:$0xff] }
 0x12e   :  { %1227 = vrot.lane.b32.xlu1 %v52_v7, %s7727_s20  ;;  %1225 = vrot.lane.b32.xlu0 %v51_v57, %s7727_s20  ;;  %v56_v57 = vld [vmem:[%s15348_s0 + $0x158] sm:$0xff] }
 0x130   :  { %v8570_v52 = vpop.permute.xlu1 %987  ;;  %v8572_v15 = vpop.permute.xlu0 %985 }
 0x131   :  { %15565 = vst [vmem:[#allocation86_spill] sm:$0xff] %v8570_v52  ;;  %15566 = vst [vmem:[#allocation87_spill] sm:$0xff] %v8572_v15  ;;  %v55_v52 = vld [vmem:[%s15348_s0 + $0x150] sm:$0xff] }
 0x132   :  { %1231 = vrot.lane.b32.xlu1 %v54_v63, %s7727_s20  ;;  %1229 = vrot.lane.b32.xlu0 %v53_v56, %s7727_s20  ;;  %v58_v56 = vld [vmem:[%s15348_s0 + $0x170] sm:$0xff] }
 0x134   :  { %v8582_v23 = vpop.permute.xlu1 %991  ;;  %v8584_v7 = vpop.permute.xlu0 %989 }
 0x135   :  { %15567 = vst [vmem:[#allocation88_spill] sm:$0xff] %v8582_v23  ;;  %15568 = vst [vmem:[#allocation89_spill] sm:$0xff] %v8584_v7  ;;  %v57_v23 = vld [vmem:[%s15348_s0 + $0x168] sm:$0xff] }
 0x136   :  { %1235 = vrot.lane.b32.xlu1 %v56_v57, %s7727_s20  ;;  %1233 = vrot.lane.b32.xlu0 %v55_v52, %s7727_s20  ;;  %v7040_v52 = vld [vmem:[%s15348_s0 + $0x188] sm:$0xff]  ;;  %v7039_v57 = vld [vmem:[%s15348_s0 + $0x180] sm:$0xff] }
 0x138   :  { %v8594_v15 = vpop.permute.xlu1 %995  ;;  %v8596_v63 = vpop.permute.xlu0 %993 }
 0x139   :  { %15569 = vst [vmem:[#allocation90_spill] sm:$0xff] %v8594_v15  ;;  %15570 = vst [vmem:[#allocation91_spill] sm:$0xff] %v8596_v63 }
 0x13a   :  { %1239 = vrot.lane.b32.xlu1 %v58_v56, %s7727_s20  ;;  %1237 = vrot.lane.b32.xlu0 %v57_v23, %s7727_s20  ;;  %v62_v23 = vld [vmem:[%s15348_s0 + $0x1d0] sm:$0xff] }
 0x13c   :  { %v8612_v15 = vpop.permute.xlu1 %999  ;;  %v8614_v63 = vpop.permute.xlu0 %997 }
 0x13d   :  { %15571 = vst [vmem:[#allocation92_spill] sm:$0xff] %v8612_v15  ;;  %15572 = vst [vmem:[#allocation93_spill] sm:$0xff] %v8614_v63  ;;  %v89_v63 = vld [vmem:[%s15348_s0 + $0x318] sm:$0xff] }
 0x13e   :  { %1243 = vrot.lane.b32.xlu1 %v7040_v52, %s7727_s20  ;;  %1241 = vrot.lane.b32.xlu0 %v7039_v57, %s7727_s20  ;;  %v64_v57 = vld [vmem:[%s15348_s0 + $0x1e8] sm:$0xff] }
 0x140   :  { %v8618_v7 = vpop.permute.xlu1 %1003  ;;  %v8620_v56 = vpop.permute.xlu0 %1001 }
 0x141   :  { %15573 = vst [vmem:[#allocation94_spill] sm:$0xff] %v8618_v7  ;;  %15574 = vst [vmem:[#allocation95_spill] sm:$0xff] %v8620_v56  ;;  %v63_v7 = vld [vmem:[%s15348_s0 + $0x1e0] sm:$0xff] }
 0x142   :  { %1247 = vrot.lane.b32.xlu1 %v62_v23, %s7727_s20  ;;  %1245 = vrot.lane.b32.xlu0 %v61_v53, %s7727_s20  ;;  %v66_v53 = vld [vmem:[%s15348_s0 + $0x200] sm:$0xff] }
 0x144   :  { %v8630_v15 = vpop.permute.xlu1 %1007  ;;  %v8632_v52 = vpop.permute.xlu0 %1005 }
 0x145   :  { %15575 = vst [vmem:[#allocation96_spill] sm:$0xff] %v8630_v15  ;;  %15576 = vst [vmem:[#allocation97_spill] sm:$0xff] %v8632_v52  ;;  %v65_v15 = vld [vmem:[%s15348_s0 + $0x1f8] sm:$0xff] }
 0x146   :  { %1251 = vrot.lane.b32.xlu1 %v64_v57, %s7727_s20  ;;  %1249 = vrot.lane.b32.xlu0 %v63_v7, %s7727_s20  ;;  %v68_v7 = vld [vmem:[%s15348_s0 + $0x218] sm:$0xff] }
 0x148   :  { %v8642_v56 = vpop.permute.xlu1 %1011  ;;  %v8644_v23 = vpop.permute.xlu0 %1009 }
 0x149   :  { %15577 = vst [vmem:[#allocation98_spill] sm:$0xff] %v8642_v56  ;;  %15578 = vst [vmem:[#allocation99_spill] sm:$0xff] %v8644_v23  ;;  %v67_v56 = vld [vmem:[%s15348_s0 + $0x210] sm:$0xff] }
 0x14a   :  { %1255 = vrot.lane.b32.xlu1 %v66_v53, %s7727_s20  ;;  %1253 = vrot.lane.b32.xlu0 %v65_v15, %s7727_s20  ;;  %v70_v15 = vld [vmem:[%s15348_s0 + $0x230] sm:$0xff] }
 0x14c   :  { %v8654_v52 = vpop.permute.xlu1 %1015  ;;  %v8656_v57 = vpop.permute.xlu0 %1013 }
 0x14d   :  { %15579 = vst [vmem:[#allocation100_spill] sm:$0xff] %v8654_v52  ;;  %15580 = vst [vmem:[#allocation101_spill] sm:$0xff] %v8656_v57  ;;  %v69_v52 = vld [vmem:[%s15348_s0 + $0x228] sm:$0xff] }
 0x14e   :  { %1259 = vrot.lane.b32.xlu1 %v68_v7, %s7727_s20  ;;  %1257 = vrot.lane.b32.xlu0 %v67_v56, %s7727_s20  ;;  %v72_v56 = vld [vmem:[%s15348_s0 + $0x248] sm:$0xff] }
 0x150   :  { %v8666_v23 = vpop.permute.xlu1 %1019  ;;  %v8668_v53 = vpop.permute.xlu0 %1017 }
 0x151   :  { %15581 = vst [vmem:[#allocation102_spill] sm:$0xff] %v8666_v23  ;;  %15582 = vst [vmem:[#allocation103_spill] sm:$0xff] %v8668_v53  ;;  %v71_v23 = vld [vmem:[%s15348_s0 + $0x240] sm:$0xff] }
 0x152   :  { %1263 = vrot.lane.b32.xlu1 %v70_v15, %s7727_s20  ;;  %1261 = vrot.lane.b32.xlu0 %v69_v52, %s7727_s20  ;;  %v74_v52 = vld [vmem:[%s15348_s0 + $0x260] sm:$0xff] }
 0x154   :  { %v8678_v57 = vpop.permute.xlu1 %1023  ;;  %v8680_v7 = vpop.permute.xlu0 %1021 }
 0x155   :  { %15583 = vst [vmem:[#allocation104_spill] sm:$0xff] %v8678_v57  ;;  %15584 = vst [vmem:[#allocation105_spill] sm:$0xff] %v8680_v7  ;;  %v73_v57 = vld [vmem:[%s15348_s0 + $0x258] sm:$0xff] }
 0x156   :  { %1267 = vrot.lane.b32.xlu1 %v72_v56, %s7727_s20  ;;  %1265 = vrot.lane.b32.xlu0 %v71_v23, %s7727_s20  ;;  %v76_v23 = vld [vmem:[%s15348_s0 + $0x278] sm:$0xff] }
 0x158   :  { %v8690_v53 = vpop.permute.xlu1 %1027  ;;  %v8692_v15 = vpop.permute.xlu0 %1025 }
 0x159   :  { %15585 = vst [vmem:[#allocation106_spill] sm:$0xff] %v8690_v53  ;;  %15586 = vst [vmem:[#allocation107_spill] sm:$0xff] %v8692_v15  ;;  %v75_v53 = vld [vmem:[%s15348_s0 + $0x270] sm:$0xff] }
 0x15a   :  { %1271 = vrot.lane.b32.xlu1 %v74_v52, %s7727_s20  ;;  %1269 = vrot.lane.b32.xlu0 %v73_v57, %s7727_s20  ;;  %v78_v57 = vld [vmem:[%s15348_s0 + $0x290] sm:$0xff] }
 0x15c   :  { %v8702_v7 = vpop.permute.xlu1 %1031  ;;  %v8704_v56 = vpop.permute.xlu0 %1029 }
 0x15d   :  { %15587 = vst [vmem:[#allocation108_spill] sm:$0xff] %v8702_v7  ;;  %15588 = vst [vmem:[#allocation109_spill] sm:$0xff] %v8704_v56  ;;  %v77_v7 = vld [vmem:[%s15348_s0 + $0x288] sm:$0xff] }
 0x15e   :  { %1275 = vrot.lane.b32.xlu1 %v76_v23, %s7727_s20  ;;  %1273 = vrot.lane.b32.xlu0 %v75_v53, %s7727_s20  ;;  %v80_v53 = vld [vmem:[%s15348_s0 + $0x2a8] sm:$0xff] }
 0x160   :  { %v8714_v15 = vpop.permute.xlu1 %1035  ;;  %v8716_v52 = vpop.permute.xlu0 %1033 }
 0x161   :  { %15589 = vst [vmem:[#allocation110_spill] sm:$0xff] %v8714_v15  ;;  %15590 = vst [vmem:[#allocation111_spill] sm:$0xff] %v8716_v52  ;;  %v79_v15 = vld [vmem:[%s15348_s0 + $0x2a0] sm:$0xff] }
 0x162   :  { %1279 = vrot.lane.b32.xlu1 %v78_v57, %s7727_s20  ;;  %1277 = vrot.lane.b32.xlu0 %v77_v7, %s7727_s20  ;;  %v82_v7 = vld [vmem:[%s15348_s0 + $0x2c0] sm:$0xff] }
 0x164   :  { %v8726_v56 = vpop.permute.xlu1 %1039  ;;  %v8728_v23 = vpop.permute.xlu0 %1037 }
 0x165   :  { %15591 = vst [vmem:[#allocation112_spill] sm:$0xff] %v8726_v56  ;;  %15592 = vst [vmem:[#allocation113_spill] sm:$0xff] %v8728_v23  ;;  %v81_v56 = vld [vmem:[%s15348_s0 + $0x2b8] sm:$0xff] }
 0x166   :  { %1283 = vrot.lane.b32.xlu1 %v80_v53, %s7727_s20  ;;  %1281 = vrot.lane.b32.xlu0 %v79_v15, %s7727_s20  ;;  %v84_v15 = vld [vmem:[%s15348_s0 + $0x2d8] sm:$0xff] }
 0x168   :  { %v8738_v52 = vpop.permute.xlu1 %1043  ;;  %v8740_v57 = vpop.permute.xlu0 %1041 }
 0x169   :  { %15593 = vst [vmem:[#allocation114_spill] sm:$0xff] %v8738_v52  ;;  %15594 = vst [vmem:[#allocation115_spill] sm:$0xff] %v8740_v57  ;;  %v83_v52 = vld [vmem:[%s15348_s0 + $0x2d0] sm:$0xff] }
 0x16a   :  { %1287 = vrot.lane.b32.xlu1 %v82_v7, %s7727_s20  ;;  %1285 = vrot.lane.b32.xlu0 %v81_v56, %s7727_s20  ;;  %v86_v56 = vld [vmem:[%s15348_s0 + $0x2f0] sm:$0xff] }
 0x16c   :  { %v8750_v23 = vpop.permute.xlu1 %1047  ;;  %v8752_v53 = vpop.permute.xlu0 %1045 }
 0x16d   :  { %15595 = vst [vmem:[#allocation116_spill] sm:$0xff] %v8750_v23  ;;  %15596 = vst [vmem:[#allocation117_spill] sm:$0xff] %v8752_v53  ;;  %v85_v23 = vld [vmem:[%s15348_s0 + $0x2e8] sm:$0xff] }
 0x16e   :  { %1291 = vrot.lane.b32.xlu1 %v84_v15, %s7727_s20  ;;  %1289 = vrot.lane.b32.xlu0 %v83_v52, %s7727_s20  ;;  %v88_v52 = vld [vmem:[%s15348_s0 + $0x308] sm:$0xff] }
 0x170   :  { %v8762_v57 = vpop.permute.xlu1 %1051  ;;  %v8764_v7 = vpop.permute.xlu0 %1049 }
 0x171   :  { %15597 = vst [vmem:[#allocation118_spill] sm:$0xff] %v8762_v57  ;;  %15598 = vst [vmem:[#allocation119_spill] sm:$0xff] %v8764_v7  ;;  %v87_v7 = vld [vmem:[%s15348_s0 + $0x300] sm:$0xff] }
 0x172   :  { %1295 = vrot.lane.b32.xlu1 %v86_v56, %s7727_s20  ;;  %1293 = vrot.lane.b32.xlu0 %v85_v23, %s7727_s20  ;;  %v90_v23 = vld [vmem:[%s15348_s0 + $0x320] sm:$0xff] }
 0x174   :  { %v8774_v53 = vpop.permute.xlu1 %1183  ;;  %v8776_v15 = vpop.permute.xlu0 %1181 }
 0x176   :  { %1299 = vrot.lane.b32.xlu1 %v88_v52, %s7727_s20  ;;  %1297 = vrot.lane.b32.xlu0 %v87_v7, %s7727_s20  ;;  %v7072_v7 = vld [vmem:[%s15348_s0 + $0x338] sm:$0xff]  ;;  %v7071_v52 = vld [vmem:[%s15348_s0 + $0x330] sm:$0xff] }
 0x178   :  { %v8786_v57 = vpop.permute.xlu1 %1187  ;;  %v8788_v56 = vpop.permute.xlu0 %1185 }
 0x17a   :  { %1303 = vrot.lane.b32.xlu1 %v90_v23, %s7727_s20  ;;  %1301 = vrot.lane.b32.xlu0 %v89_v63, %s7727_s20  ;;  %v7074_v63 = vld [vmem:[%s15348_s0 + $0x21] sm:$0xff]  ;;  %v7073_v23 = vld [vmem:[%s15348_s0 + $0x19] sm:$0xff] }
 0x17c   :  { %v8804_v62 = vpop.permute.xlu1 %1191  ;;  %v8806_v48 = vpop.permute.xlu0 %1189 }
 0x17d   :  { %15599 = vst [vmem:[#allocation120_spill] sm:$0xff] %v8804_v62 }
 0x17e   :  { %1307 = vrot.lane.b32.xlu1 %v7072_v7, %s7727_s20  ;;  %1305 = vrot.lane.b32.xlu0 %v7071_v52, %s7727_s20  ;;  %v8825_v7 = vld [vmem:[%s15348_s0 + $0x39] sm:$0xff]  ;;  %v8830_v52 = vld [vmem:[%s15348_s0 + $0x31] sm:$0xff] }
 0x180   :  { %v8816_v31 = vpop.permute.xlu1 %1195  ;;  %v8818_v49 = vpop.permute.xlu0 %1193 }
 0x181   :  { %15600 = vst [vmem:[#allocation121_spill] sm:$0xff] %v8816_v31  ;;  %15601 = vst [vmem:[#allocation122_spill] sm:$0xff] %v8818_v49  ;;  %v9436_v31 = vld [vmem:[%s15348_s0 + $0x13a] sm:$0xff]  ;;  %v9472_v49 = vld [vmem:[%s15348_s0 + $0x16a] sm:$0xff] }
 0x182   :  { %1439 = vrot.lane.b32.xlu1 %v7074_v63, %s7728_s16  ;;  %1437 = vrot.lane.b32.xlu0 %v7073_v23, %s7728_s16  ;;  %v8843_v63 = vld [vmem:[%s15348_s0 + $0x51] sm:$0xff]  ;;  %v8848_v23 = vld [vmem:[%s15348_s0 + $0x49] sm:$0xff]  ;;  %15690 = vst [vmem:[#allocation211_spill] sm:$0xff] %v9472_v49 }
 0x184   :  { %v8832_v6 = vpop.permute.xlu1 %1199  ;;  %v8834_v44 = vpop.permute.xlu0 %1197 }
 0x185   :  { %15602 = vst [vmem:[#allocation123_spill] sm:$0xff] %v8832_v6  ;;  %15603 = vst [vmem:[#allocation124_spill] sm:$0xff] %v8834_v44  ;;  %v9364_v6 = vld [vmem:[%s15348_s0 + $0xda] sm:$0xff]  ;;  %v9400_v44 = vld [vmem:[%s15348_s0 + $0x10a] sm:$0xff] }
 0x186   :  { %1443 = vrot.lane.b32.xlu1 %v8825_v7, %s7728_s16  ;;  %1441 = vrot.lane.b32.xlu0 %v8830_v52, %s7728_s16 }
 0x188   :  { %v8850_v39 = vpop.permute.xlu1 %1203  ;;  %v8852_v45 = vpop.permute.xlu0 %1201 }
 0x189   :  { %15604 = vst [vmem:[#allocation125_spill] sm:$0xff] %v8850_v39  ;;  %15605 = vst [vmem:[#allocation126_spill] sm:$0xff] %v8852_v45  ;;  %v9292_v39 = vld [vmem:[%s15348_s0 + $0x7a] sm:$0xff]  ;;  %v9328_v45 = vld [vmem:[%s15348_s0 + $0xaa] sm:$0xff] }
 0x18a   :  { %1447 = vrot.lane.b32.xlu1 %v8843_v63, %s7728_s16  ;;  %1445 = vrot.lane.b32.xlu0 %v8848_v23, %s7728_s16 }
 0x18c   :  { %v8868_v47 = vpop.permute.xlu1 %1207  ;;  %v8870_v41 = vpop.permute.xlu0 %1205 }
 0x18d   :  { %15606 = vst [vmem:[#allocation127_spill] sm:$0xff] %v8868_v47  ;;  %15607 = vst [vmem:[#allocation128_spill] sm:$0xff] %v8870_v41  ;;  %v9274_v41 = vld [vmem:[%s15348_s0 + $0x62] sm:$0xff] }
 0x18e   :  { %1451 = vrot.lane.b32.xlu1 %v8861_v14, %s7728_s16  ;;  %1449 = vrot.lane.b32.xlu0 %v8866_v40, %s7728_s16 }
 0x190   :  { %v8886_v55 = vpop.permute.xlu1 %1211  ;;  %v8888_v37 = vpop.permute.xlu0 %1209 }
 0x191   :  { %15608 = vst [vmem:[#allocation129_spill] sm:$0xff] %v8886_v55  ;;  %15609 = vst [vmem:[#allocation130_spill] sm:$0xff] %v8888_v37 }
 0x192   :  { %1455 = vrot.lane.b32.xlu1 %v8879_v22, %s7728_s16  ;;  %1453 = vrot.lane.b32.xlu0 %v8884_v36, %s7728_s16 }
 0x194   :  { %v8900_v3 = vpop.permute.xlu1 %1215  ;;  %v8902_v33 = vpop.permute.xlu0 %1213 }
 0x195   :  { %15610 = vst [vmem:[#allocation131_spill] sm:$0xff] %v8900_v3  ;;  %15611 = vst [vmem:[#allocation132_spill] sm:$0xff] %v8902_v33 }
 0x196   :  { %1459 = vrot.lane.b32.xlu1 %v7084_v30, %s7728_s16  ;;  %1457 = vrot.lane.b32.xlu0 %v7083_v32, %s7728_s16  ;;  %v7088_v32 = vld [vmem:[%s15348_s0 + $0xc9] sm:$0xff]  ;;  %v7087_v30 = vld [vmem:[%s15348_s0 + $0xc1] sm:$0xff] }
 0x198   :  { %v8912_v19 = vpop.permute.xlu1 %1219  ;;  %v8914_v29 = vpop.permute.xlu0 %1217 }
 0x199   :  { %15612 = vst [vmem:[#allocation133_spill] sm:$0xff] %v8912_v19  ;;  %15613 = vst [vmem:[#allocation134_spill] sm:$0xff] %v8914_v29 }
 0x19a   :  { %1463 = vrot.lane.b32.xlu1 %v7086_v38, %s7728_s16  ;;  %1461 = vrot.lane.b32.xlu0 %v7085_v28, %s7728_s16  ;;  %v7090_v28 = vld [vmem:[%s15348_s0 + $0xe1] sm:$0xff]  ;;  %v7089_v38 = vld [vmem:[%s15348_s0 + $0xd9] sm:$0xff] }
 0x19c   :  { %v8924_v3 = vpop.permute.xlu1 %1223  ;;  %v8926_v33 = vpop.permute.xlu0 %1221 }
 0x19d   :  { %15614 = vst [vmem:[#allocation135_spill] sm:$0xff] %v8924_v3  ;;  %15615 = vst [vmem:[#allocation136_spill] sm:$0xff] %v8926_v33 }
 0x19e   :  { %1467 = vrot.lane.b32.xlu1 %v7088_v32, %s7728_s16  ;;  %1465 = vrot.lane.b32.xlu0 %v7087_v30, %s7728_s16  ;;  %v7092_v32 = vld [vmem:[%s15348_s0 + $0xf9] sm:$0xff]  ;;  %v7091_v30 = vld [vmem:[%s15348_s0 + $0xf1] sm:$0xff] }
 0x1a0   :  { %v8936_v19 = vpop.permute.xlu1 %1227  ;;  %v8938_v29 = vpop.permute.xlu0 %1225 }
 0x1a1   :  { %15616 = vst [vmem:[#allocation137_spill] sm:$0xff] %v8936_v19  ;;  %15617 = vst [vmem:[#allocation138_spill] sm:$0xff] %v8938_v29 }
 0x1a2   :  { %1471 = vrot.lane.b32.xlu1 %v7090_v28, %s7728_s16  ;;  %1469 = vrot.lane.b32.xlu0 %v7089_v38, %s7728_s16  ;;  %v7094_v28 = vld [vmem:[%s15348_s0 + $0x111] sm:$0xff]  ;;  %v7093_v38 = vld [vmem:[%s15348_s0 + $0x109] sm:$0xff] }
 0x1a4   :  { %v8948_v3 = vpop.permute.xlu1 %1231  ;;  %v8950_v33 = vpop.permute.xlu0 %1229 }
 0x1a5   :  { %15618 = vst [vmem:[#allocation139_spill] sm:$0xff] %v8948_v3  ;;  %15619 = vst [vmem:[#allocation140_spill] sm:$0xff] %v8950_v33 }
 0x1a6   :  { %1475 = vrot.lane.b32.xlu1 %v7092_v32, %s7728_s16  ;;  %1473 = vrot.lane.b32.xlu0 %v7091_v30, %s7728_s16  ;;  %v7096_v32 = vld [vmem:[%s15348_s0 + $0x129] sm:$0xff]  ;;  %v7095_v30 = vld [vmem:[%s15348_s0 + $0x121] sm:$0xff] }
 0x1a8   :  { %v8960_v19 = vpop.permute.xlu1 %1235  ;;  %v8962_v29 = vpop.permute.xlu0 %1233 }
 0x1a9   :  { %15620 = vst [vmem:[#allocation141_spill] sm:$0xff] %v8960_v19  ;;  %15621 = vst [vmem:[#allocation142_spill] sm:$0xff] %v8962_v29 }
 0x1aa   :  { %1479 = vrot.lane.b32.xlu1 %v7094_v28, %s7728_s16  ;;  %1477 = vrot.lane.b32.xlu0 %v7093_v38, %s7728_s16  ;;  %v7098_v28 = vld [vmem:[%s15348_s0 + $0x141] sm:$0xff]  ;;  %v7097_v38 = vld [vmem:[%s15348_s0 + $0x139] sm:$0xff] }
 0x1ac   :  { %v8972_v3 = vpop.permute.xlu1 %1239  ;;  %v8974_v33 = vpop.permute.xlu0 %1237 }
 0x1ad   :  { %15622 = vst [vmem:[#allocation143_spill] sm:$0xff] %v8972_v3  ;;  %15623 = vst [vmem:[#allocation144_spill] sm:$0xff] %v8974_v33 }
 0x1ae   :  { %1483 = vrot.lane.b32.xlu1 %v7096_v32, %s7728_s16  ;;  %1481 = vrot.lane.b32.xlu0 %v7095_v30, %s7728_s16  ;;  %v7100_v32 = vld [vmem:[%s15348_s0 + $0x159] sm:$0xff]  ;;  %v7099_v30 = vld [vmem:[%s15348_s0 + $0x151] sm:$0xff] }
 0x1b0   :  { %v8984_v19 = vpop.permute.xlu1 %1243  ;;  %v8986_v29 = vpop.permute.xlu0 %1241 }
 0x1b1   :  { %15624 = vst [vmem:[#allocation145_spill] sm:$0xff] %v8984_v19  ;;  %15625 = vst [vmem:[#allocation146_spill] sm:$0xff] %v8986_v29 }
 0x1b2   :  { %1487 = vrot.lane.b32.xlu1 %v7098_v28, %s7728_s16  ;;  %1485 = vrot.lane.b32.xlu0 %v7097_v38, %s7728_s16  ;;  %v7102_v28 = vld [vmem:[%s15348_s0 + $0x171] sm:$0xff]  ;;  %v7101_v38 = vld [vmem:[%s15348_s0 + $0x169] sm:$0xff] }
 0x1b4   :  { %v8996_v3 = vpop.permute.xlu1 %1247  ;;  %v8998_v33 = vpop.permute.xlu0 %1245 }
 0x1b5   :  { %15626 = vst [vmem:[#allocation147_spill] sm:$0xff] %v8996_v3  ;;  %15627 = vst [vmem:[#allocation148_spill] sm:$0xff] %v8998_v33 }
 0x1b6   :  { %1491 = vrot.lane.b32.xlu1 %v7100_v32, %s7728_s16  ;;  %1489 = vrot.lane.b32.xlu0 %v7099_v30, %s7728_s16  ;;  %v7104_v32 = vld [vmem:[%s15348_s0 + $0x189] sm:$0xff]  ;;  %v7103_v30 = vld [vmem:[%s15348_s0 + $0x181] sm:$0xff] }
 0x1b8   :  { %v9008_v19 = vpop.permute.xlu1 %1251  ;;  %v9010_v29 = vpop.permute.xlu0 %1249 }
 0x1b9   :  { %15628 = vst [vmem:[#allocation149_spill] sm:$0xff] %v9008_v19  ;;  %15629 = vst [vmem:[#allocation150_spill] sm:$0xff] %v9010_v29 }
 0x1ba   :  { %1495 = vrot.lane.b32.xlu1 %v7102_v28, %s7728_s16  ;;  %1493 = vrot.lane.b32.xlu0 %v7101_v38, %s7728_s16  ;;  %v7106_v28 = vld [vmem:[%s15348_s0 + $0x1d1] sm:$0xff]  ;;  %v7105_v38 = vld [vmem:[%s15348_s0 + $0x1c9] sm:$0xff] }
 0x1bc   :  { %v9020_v3 = vpop.permute.xlu1 %1255  ;;  %v9022_v33 = vpop.permute.xlu0 %1253 }
 0x1bd   :  { %15630 = vst [vmem:[#allocation151_spill] sm:$0xff] %v9020_v3  ;;  %15631 = vst [vmem:[#allocation152_spill] sm:$0xff] %v9022_v33 }
 0x1be   :  { %1499 = vrot.lane.b32.xlu1 %v7104_v32, %s7728_s16  ;;  %1497 = vrot.lane.b32.xlu0 %v7103_v30, %s7728_s16  ;;  %v7108_v32 = vld [vmem:[%s15348_s0 + $0x1e9] sm:$0xff]  ;;  %v7107_v30 = vld [vmem:[%s15348_s0 + $0x1e1] sm:$0xff] }
 0x1c0   :  { %v9032_v19 = vpop.permute.xlu1 %1259  ;;  %v9034_v29 = vpop.permute.xlu0 %1257 }
 0x1c1   :  { %15632 = vst [vmem:[#allocation153_spill] sm:$0xff] %v9032_v19  ;;  %15633 = vst [vmem:[#allocation154_spill] sm:$0xff] %v9034_v29 }
 0x1c2   :  { %1503 = vrot.lane.b32.xlu1 %v7106_v28, %s7728_s16  ;;  %1501 = vrot.lane.b32.xlu0 %v7105_v38, %s7728_s16  ;;  %v7110_v28 = vld [vmem:[%s15348_s0 + $0x201] sm:$0xff]  ;;  %v7109_v38 = vld [vmem:[%s15348_s0 + $0x1f9] sm:$0xff] }
 0x1c4   :  { %v9044_v3 = vpop.permute.xlu1 %1263  ;;  %v9046_v33 = vpop.permute.xlu0 %1261 }
 0x1c5   :  { %15634 = vst [vmem:[#allocation155_spill] sm:$0xff] %v9044_v3  ;;  %15635 = vst [vmem:[#allocation156_spill] sm:$0xff] %v9046_v33 }
 0x1c6   :  { %1507 = vrot.lane.b32.xlu1 %v7108_v32, %s7728_s16  ;;  %1505 = vrot.lane.b32.xlu0 %v7107_v30, %s7728_s16  ;;  %v7112_v32 = vld [vmem:[%s15348_s0 + $0x219] sm:$0xff]  ;;  %v7111_v30 = vld [vmem:[%s15348_s0 + $0x211] sm:$0xff] }
 0x1c8   :  { %v9056_v19 = vpop.permute.xlu1 %1267  ;;  %v9058_v29 = vpop.permute.xlu0 %1265 }
 0x1c9   :  { %15636 = vst [vmem:[#allocation157_spill] sm:$0xff] %v9056_v19  ;;  %15637 = vst [vmem:[#allocation158_spill] sm:$0xff] %v9058_v29 }
 0x1ca   :  { %1511 = vrot.lane.b32.xlu1 %v7110_v28, %s7728_s16  ;;  %1509 = vrot.lane.b32.xlu0 %v7109_v38, %s7728_s16  ;;  %v7114_v28 = vld [vmem:[%s15348_s0 + $0x231] sm:$0xff]  ;;  %v7113_v38 = vld [vmem:[%s15348_s0 + $0x229] sm:$0xff] }
 0x1cc   :  { %v9068_v3 = vpop.permute.xlu1 %1271  ;;  %v9070_v33 = vpop.permute.xlu0 %1269 }
 0x1cd   :  { %15638 = vst [vmem:[#allocation159_spill] sm:$0xff] %v9068_v3  ;;  %15639 = vst [vmem:[#allocation160_spill] sm:$0xff] %v9070_v33 }
 0x1ce   :  { %1515 = vrot.lane.b32.xlu1 %v7112_v32, %s7728_s16  ;;  %1513 = vrot.lane.b32.xlu0 %v7111_v30, %s7728_s16  ;;  %v7116_v32 = vld [vmem:[%s15348_s0 + $0x249] sm:$0xff]  ;;  %v7115_v30 = vld [vmem:[%s15348_s0 + $0x241] sm:$0xff] }
 0x1d0   :  { %v9080_v19 = vpop.permute.xlu1 %1275  ;;  %v9082_v29 = vpop.permute.xlu0 %1273 }
 0x1d1   :  { %15640 = vst [vmem:[#allocation161_spill] sm:$0xff] %v9080_v19  ;;  %15641 = vst [vmem:[#allocation162_spill] sm:$0xff] %v9082_v29 }
 0x1d2   :  { %1519 = vrot.lane.b32.xlu1 %v7114_v28, %s7728_s16  ;;  %1517 = vrot.lane.b32.xlu0 %v7113_v38, %s7728_s16  ;;  %v7118_v28 = vld [vmem:[%s15348_s0 + $0x261] sm:$0xff]  ;;  %v7117_v38 = vld [vmem:[%s15348_s0 + $0x259] sm:$0xff] }
 0x1d4   :  { %v9092_v3 = vpop.permute.xlu1 %1279  ;;  %v9094_v33 = vpop.permute.xlu0 %1277 }
 0x1d5   :  { %15642 = vst [vmem:[#allocation163_spill] sm:$0xff] %v9092_v3  ;;  %15643 = vst [vmem:[#allocation164_spill] sm:$0xff] %v9094_v33 }
 0x1d6   :  { %1523 = vrot.lane.b32.xlu1 %v7116_v32, %s7728_s16  ;;  %1521 = vrot.lane.b32.xlu0 %v7115_v30, %s7728_s16  ;;  %v7120_v32 = vld [vmem:[%s15348_s0 + $0x279] sm:$0xff]  ;;  %v7119_v30 = vld [vmem:[%s15348_s0 + $0x271] sm:$0xff] }
 0x1d8   :  { %v9104_v19 = vpop.permute.xlu1 %1283  ;;  %v9106_v29 = vpop.permute.xlu0 %1281 }
 0x1d9   :  { %15644 = vst [vmem:[#allocation165_spill] sm:$0xff] %v9104_v19  ;;  %15645 = vst [vmem:[#allocation166_spill] sm:$0xff] %v9106_v29 }
 0x1da   :  { %1527 = vrot.lane.b32.xlu1 %v7118_v28, %s7728_s16  ;;  %1525 = vrot.lane.b32.xlu0 %v7117_v38, %s7728_s16  ;;  %v7122_v28 = vld [vmem:[%s15348_s0 + $0x291] sm:$0xff]  ;;  %v7121_v38 = vld [vmem:[%s15348_s0 + $0x289] sm:$0xff] }
 0x1dc   :  { %v9116_v3 = vpop.permute.xlu1 %1287  ;;  %v9118_v33 = vpop.permute.xlu0 %1285 }
 0x1dd   :  { %15646 = vst [vmem:[#allocation167_spill] sm:$0xff] %v9116_v3  ;;  %15647 = vst [vmem:[#allocation168_spill] sm:$0xff] %v9118_v33 }
 0x1de   :  { %1531 = vrot.lane.b32.xlu1 %v7120_v32, %s7728_s16  ;;  %1529 = vrot.lane.b32.xlu0 %v7119_v30, %s7728_s16  ;;  %v7124_v32 = vld [vmem:[%s15348_s0 + $0x2a9] sm:$0xff]  ;;  %v7123_v30 = vld [vmem:[%s15348_s0 + $0x2a1] sm:$0xff] }
 0x1e0   :  { %v9128_v19 = vpop.permute.xlu1 %1291  ;;  %v9130_v29 = vpop.permute.xlu0 %1289 }
 0x1e1   :  { %15648 = vst [vmem:[#allocation169_spill] sm:$0xff] %v9128_v19  ;;  %15649 = vst [vmem:[#allocation170_spill] sm:$0xff] %v9130_v29 }
 0x1e2   :  { %1535 = vrot.lane.b32.xlu1 %v7122_v28, %s7728_s16  ;;  %1533 = vrot.lane.b32.xlu0 %v7121_v38, %s7728_s16  ;;  %v7126_v28 = vld [vmem:[%s15348_s0 + $0x2c1] sm:$0xff]  ;;  %v7125_v38 = vld [vmem:[%s15348_s0 + $0x2b9] sm:$0xff] }
 0x1e4   :  { %v9140_v3 = vpop.permute.xlu1 %1295  ;;  %v9142_v33 = vpop.permute.xlu0 %1293 }
 0x1e5   :  { %15650 = vst [vmem:[#allocation171_spill] sm:$0xff] %v9140_v3  ;;  %15651 = vst [vmem:[#allocation172_spill] sm:$0xff] %v9142_v33 }
 0x1e6   :  { %1539 = vrot.lane.b32.xlu1 %v7124_v32, %s7728_s16  ;;  %1537 = vrot.lane.b32.xlu0 %v7123_v30, %s7728_s16  ;;  %v7128_v32 = vld [vmem:[%s15348_s0 + $0x2d9] sm:$0xff]  ;;  %v7127_v30 = vld [vmem:[%s15348_s0 + $0x2d1] sm:$0xff] }
 0x1e8   :  { %v9152_v19 = vpop.permute.xlu1 %1299  ;;  %v9154_v29 = vpop.permute.xlu0 %1297 }
 0x1e9   :  { %15652 = vst [vmem:[#allocation173_spill] sm:$0xff] %v9152_v19  ;;  %15653 = vst [vmem:[#allocation174_spill] sm:$0xff] %v9154_v29 }
 0x1ea   :  { %1543 = vrot.lane.b32.xlu1 %v7126_v28, %s7728_s16  ;;  %1541 = vrot.lane.b32.xlu0 %v7125_v38, %s7728_s16  ;;  %v7130_v28 = vld [vmem:[%s15348_s0 + $0x2f1] sm:$0xff]  ;;  %v7129_v38 = vld [vmem:[%s15348_s0 + $0x2e9] sm:$0xff] }
 0x1ec   :  { %v9164_v3 = vpop.permute.xlu1 %1303  ;;  %v9166_v33 = vpop.permute.xlu0 %1301 }
 0x1ed   :  { %15654 = vst [vmem:[#allocation175_spill] sm:$0xff] %v9164_v3  ;;  %15655 = vst [vmem:[#allocation176_spill] sm:$0xff] %v9166_v33 }
 0x1ee   :  { %1547 = vrot.lane.b32.xlu1 %v7128_v32, %s7728_s16  ;;  %1545 = vrot.lane.b32.xlu0 %v7127_v30, %s7728_s16  ;;  %v7132_v32 = vld [vmem:[%s15348_s0 + $0x309] sm:$0xff]  ;;  %v7131_v30 = vld [vmem:[%s15348_s0 + $0x301] sm:$0xff] }
 0x1f0   :  { %v9176_v19 = vpop.permute.xlu1 %1307  ;;  %v9178_v29 = vpop.permute.xlu0 %1305 }
 0x1f1   :  { %15656 = vst [vmem:[#allocation177_spill] sm:$0xff] %v9176_v19  ;;  %15657 = vst [vmem:[#allocation178_spill] sm:$0xff] %v9178_v29 }
 0x1f2   :  { %1551 = vrot.lane.b32.xlu1 %v7130_v28, %s7728_s16  ;;  %1549 = vrot.lane.b32.xlu0 %v7129_v38, %s7728_s16  ;;  %v7134_v28 = vld [vmem:[%s15348_s0 + $0x321] sm:$0xff]  ;;  %v7133_v38 = vld [vmem:[%s15348_s0 + $0x319] sm:$0xff] }
 0x1f4   :  { %v9188_v3 = vpop.permute.xlu1 %1439  ;;  %v9190_v33 = vpop.permute.xlu0 %1437 }
 0x1f6   :  { %1555 = vrot.lane.b32.xlu1 %v7132_v32, %s7728_s16  ;;  %1553 = vrot.lane.b32.xlu0 %v7131_v30, %s7728_s16  ;;  %v7136_v32 = vld [vmem:[%s15348_s0 + $0x339] sm:$0xff]  ;;  %v7135_v30 = vld [vmem:[%s15348_s0 + $0x331] sm:$0xff] }
 0x1f8   :  { %v9200_v29 = vpop.permute.xlu1 %1443  ;;  %v9202_v19 = vpop.permute.xlu0 %1441 }
 0x1fa   :  { %1559 = vrot.lane.b32.xlu1 %v7134_v28, %s7728_s16  ;;  %1557 = vrot.lane.b32.xlu0 %v7133_v38, %s7728_s16  ;;  %v7138_v28 = vld [vmem:[%s15348_s0 + $0x22] sm:$0xff]  ;;  %v7137_v38 = vld [vmem:[%s15348_s0 + $0x1a] sm:$0xff] }
 0x1fc   :  { %v9212_v55 = vpop.permute.xlu1 %1447  ;;  %v9214_v46 = vpop.permute.xlu0 %1445 }
 0x1fd   :  { %15658 = vst [vmem:[#allocation179_spill] sm:$0xff] %v9212_v55 }
 0x1fe   :  { %1563 = vrot.lane.b32.xlu1 %v7136_v32, %s7728_s16  ;;  %1561 = vrot.lane.b32.xlu0 %v7135_v30, %s7728_s16  ;;  %v9233_v32 = vld [vmem:[%s15348_s0 + $0x3a] sm:$0xff]  ;;  %v9238_v30 = vld [vmem:[%s15348_s0 + $0x32] sm:$0xff] }
 0x200   :  { %v9224_v24 = vpop.permute.xlu1 %1451  ;;  %v9226_v37 = vpop.permute.xlu0 %1449 }
 0x201   :  { %15659 = vst [vmem:[#allocation180_spill] sm:$0xff] %v9224_v24  ;;  %15660 = vst [vmem:[#allocation181_spill] sm:$0xff] %v9226_v37 }
 0x202   :  { %1695 = vrot.lane.b32.xlu1 %v7138_v28, %s7729_s12  ;;  %1693 = vrot.lane.b32.xlu0 %v7137_v38, %s7729_s12  ;;  %v9251_v28 = vld [vmem:[%s15348_s0 + $0x52] sm:$0xff]  ;;  %v9256_v38 = vld [vmem:[%s15348_s0 + $0x4a] sm:$0xff] }
 0x204   :  { %v9240_v27 = vpop.permute.xlu1 %1455  ;;  %v9242_v25 = vpop.permute.xlu0 %1453 }
 0x205   :  { %15661 = vst [vmem:[#allocation182_spill] sm:$0xff] %v9240_v27  ;;  %15662 = vst [vmem:[#allocation183_spill] sm:$0xff] %v9242_v25 }
 0x206   :  { %1699 = vrot.lane.b32.xlu1 %v9233_v32, %s7729_s12  ;;  %1697 = vrot.lane.b32.xlu0 %v9238_v30, %s7729_s12 }
 0x208   :  { %v9258_v47 = vpop.permute.xlu1 %1459  ;;  %v9260_v54 = vpop.permute.xlu0 %1457 }
 0x209   :  { %15663 = vst [vmem:[#allocation184_spill] sm:$0xff] %v9258_v47  ;;  %15664 = vst [vmem:[#allocation185_spill] sm:$0xff] %v9260_v54  ;;  %v9287_v47 = vld [vmem:[%s15348_s0 + $0x82] sm:$0xff] }
 0x20a   :  { %1703 = vrot.lane.b32.xlu1 %v9251_v28, %s7729_s12  ;;  %1701 = vrot.lane.b32.xlu0 %v9256_v38, %s7729_s12 }
 0x20c   :  { %v9276_v18 = vpop.permute.xlu1 %1463  ;;  %v9278_v21 = vpop.permute.xlu0 %1461 }
 0x20d   :  { %15665 = vst [vmem:[#allocation186_spill] sm:$0xff] %v9276_v18  ;;  %15666 = vst [vmem:[#allocation187_spill] sm:$0xff] %v9278_v21  ;;  %v9305_v21 = vld [vmem:[%s15348_s0 + $0x9a] sm:$0xff] }
 0x20e   :  { %1707 = vrot.lane.b32.xlu1 %v9269_v20, %s7729_s12  ;;  %1705 = vrot.lane.b32.xlu0 %v9274_v41, %s7729_s12 }
 0x210   :  { %v9294_v2 = vpop.permute.xlu1 %1467  ;;  %v9296_v18 = vpop.permute.xlu0 %1465 }
 0x211   :  { %15667 = vst [vmem:[#allocation188_spill] sm:$0xff] %v9294_v2  ;;  %15668 = vst [vmem:[#allocation189_spill] sm:$0xff] %v9296_v18  ;;  %v9323_v18 = vld [vmem:[%s15348_s0 + $0xb2] sm:$0xff] }
 0x212   :  { %1711 = vrot.lane.b32.xlu1 %v9287_v47, %s7729_s12  ;;  %1709 = vrot.lane.b32.xlu0 %v9292_v39, %s7729_s12 }
 0x214   :  { %v9312_v54 = vpop.permute.xlu1 %1471  ;;  %v9314_v2 = vpop.permute.xlu0 %1469 }
 0x215   :  { %15669 = vst [vmem:[#allocation190_spill] sm:$0xff] %v9312_v54  ;;  %15670 = vst [vmem:[#allocation191_spill] sm:$0xff] %v9314_v2  ;;  %v9341_v2 = vld [vmem:[%s15348_s0 + $0xca] sm:$0xff] }
 0x216   :  { %1715 = vrot.lane.b32.xlu1 %v9305_v21, %s7729_s12  ;;  %1713 = vrot.lane.b32.xlu0 %v9310_v16, %s7729_s12 }
 0x218   :  { %v9330_v35 = vpop.permute.xlu1 %1475  ;;  %v9332_v54 = vpop.permute.xlu0 %1473 }
 0x219   :  { %15671 = vst [vmem:[#allocation192_spill] sm:$0xff] %v9330_v35  ;;  %15672 = vst [vmem:[#allocation193_spill] sm:$0xff] %v9332_v54  ;;  %v9359_v54 = vld [vmem:[%s15348_s0 + $0xe2] sm:$0xff] }
 0x21a   :  { %1719 = vrot.lane.b32.xlu1 %v9323_v18, %s7729_s12  ;;  %1717 = vrot.lane.b32.xlu0 %v9328_v45, %s7729_s12 }
 0x21c   :  { %v9348_v27 = vpop.permute.xlu1 %1479  ;;  %v9350_v35 = vpop.permute.xlu0 %1477 }
 0x21d   :  { %15673 = vst [vmem:[#allocation194_spill] sm:$0xff] %v9348_v27  ;;  %15674 = vst [vmem:[#allocation195_spill] sm:$0xff] %v9350_v35  ;;  %v9377_v35 = vld [vmem:[%s15348_s0 + $0xfa] sm:$0xff] }
 0x21e   :  { %1723 = vrot.lane.b32.xlu1 %v9341_v2, %s7729_s12  ;;  %1721 = vrot.lane.b32.xlu0 %v9346_v17, %s7729_s12 }
 0x220   :  { %v9366_v58 = vpop.permute.xlu1 %1483  ;;  %v9368_v27 = vpop.permute.xlu0 %1481 }
 0x221   :  { %15675 = vst [vmem:[#allocation196_spill] sm:$0xff] %v9366_v58  ;;  %15676 = vst [vmem:[#allocation197_spill] sm:$0xff] %v9368_v27  ;;  %v9395_v27 = vld [vmem:[%s15348_s0 + $0x112] sm:$0xff] }
 0x222   :  { %1727 = vrot.lane.b32.xlu1 %v9359_v54, %s7729_s12  ;;  %1725 = vrot.lane.b32.xlu0 %v9364_v6, %s7729_s12 }
 0x224   :  { %v9384_v25 = vpop.permute.xlu1 %1487  ;;  %v9386_v58 = vpop.permute.xlu0 %1485 }
 0x225   :  { %15677 = vst [vmem:[#allocation198_spill] sm:$0xff] %v9384_v25  ;;  %15678 = vst [vmem:[#allocation199_spill] sm:$0xff] %v9386_v58  ;;  %v9413_v58 = vld [vmem:[%s15348_s0 + $0x12a] sm:$0xff] }
 0x226   :  { %1731 = vrot.lane.b32.xlu1 %v9377_v35, %s7729_s12  ;;  %1729 = vrot.lane.b32.xlu0 %v9382_v12, %s7729_s12 }
 0x228   :  { %v9402_v59 = vpop.permute.xlu1 %1491  ;;  %v9404_v25 = vpop.permute.xlu0 %1489 }
 0x229   :  { %15679 = vst [vmem:[#allocation200_spill] sm:$0xff] %v9402_v59  ;;  %15680 = vst [vmem:[#allocation201_spill] sm:$0xff] %v9404_v25  ;;  %v9431_v25 = vld [vmem:[%s15348_s0 + $0x142] sm:$0xff] }
 0x22a   :  { %1735 = vrot.lane.b32.xlu1 %v9395_v27, %s7729_s12  ;;  %1733 = vrot.lane.b32.xlu0 %v9400_v44, %s7729_s12 }
 0x22c   :  { %v9420_v24 = vpop.permute.xlu1 %1495  ;;  %v9422_v59 = vpop.permute.xlu0 %1493 }
 0x22d   :  { %15681 = vst [vmem:[#allocation202_spill] sm:$0xff] %v9420_v24  ;;  %15682 = vst [vmem:[#allocation203_spill] sm:$0xff] %v9422_v59  ;;  %v9449_v59 = vld [vmem:[%s15348_s0 + $0x15a] sm:$0xff] }
 0x22e   :  { %1739 = vrot.lane.b32.xlu1 %v9413_v58, %s7729_s12  ;;  %1737 = vrot.lane.b32.xlu0 %v9418_v13, %s7729_s12  ;;  %15685 = vst [vmem:[#allocation206_spill] sm:$0xff] %v9449_v59 }
 0x230   :  { %v9438_v34 = vpop.permute.xlu1 %1499  ;;  %v9440_v24 = vpop.permute.xlu0 %1497 }
 0x231   :  { %15683 = vst [vmem:[#allocation204_spill] sm:$0xff] %v9438_v34  ;;  %15684 = vst [vmem:[#allocation205_spill] sm:$0xff] %v9440_v24  ;;  %v9467_v24 = vld [vmem:[%s15348_s0 + $0x172] sm:$0xff] }
 0x232   :  { %1743 = vrot.lane.b32.xlu1 %v9431_v25, %s7729_s12  ;;  %1741 = vrot.lane.b32.xlu0 %v9436_v31, %s7729_s12  ;;  %15689 = vst [vmem:[#allocation210_spill] sm:$0xff] %v9467_v24 }
 0x234   :  { %v9456_v37 = vpop.permute.xlu1 %1503  ;;  %v9458_v34 = vpop.permute.xlu0 %1501 }
 0x235   :  { %15687 = vst [vmem:[#allocation208_spill] sm:$0xff] %v9456_v37  ;;  %15688 = vst [vmem:[#allocation209_spill] sm:$0xff] %v9458_v34  ;;  %v9485_v34 = vld [vmem:[%s15348_s0 + $0x18a] sm:$0xff] }
 0x236   :  { %1747 = vrot.lane.b32.xlu1 %v9449_v59, %s7729_s12  ;;  %1745 = vrot.lane.b32.xlu0 %v9454_v8, %s7729_s12  ;;  %15693 = vst [vmem:[#allocation214_spill] sm:$0xff] %v9485_v34  ;;  %v9490_v59 = vld [vmem:[%s15348_s0 + $0x182] sm:$0xff] }
 0x237   :  { %15694 = vst [vmem:[#allocation215_spill] sm:$0xff] %v9490_v59 }
 0x238   :  { %v9474_v26 = vpop.permute.xlu1 %1507  ;;  %v9476_v37 = vpop.permute.xlu0 %1505 }
 0x239   :  { %15691 = vst [vmem:[#allocation212_spill] sm:$0xff] %v9474_v26  ;;  %15692 = vst [vmem:[#allocation213_spill] sm:$0xff] %v9476_v37  ;;  %v7170_v37 = vld [vmem:[%s15348_s0 + $0x1d2] sm:$0xff] }
 0x23a   :  { %1751 = vrot.lane.b32.xlu1 %v9467_v24, %s7729_s12  ;;  %1749 = vrot.lane.b32.xlu0 %v9472_v49, %s7729_s12  ;;  %v7169_v24 = vld [vmem:[%s15348_s0 + $0x1ca] sm:$0xff] }
 0x23c   :  { %v9492_v8 = vpop.permute.xlu1 %1511  ;;  %v9494_v26 = vpop.permute.xlu0 %1509 }
 0x23d   :  { %15695 = vst [vmem:[#allocation216_spill] sm:$0xff] %v9492_v8  ;;  %15696 = vst [vmem:[#allocation217_spill] sm:$0xff] %v9494_v26  ;;  %v9515_v8 = vld [vmem:[%s15348_s0 + $0x1ea] sm:$0xff]  ;;  %v9520_v26 = vld [vmem:[%s15348_s0 + $0x1e2] sm:$0xff] }
 0x23e   :  { %1755 = vrot.lane.b32.xlu1 %v9485_v34, %s7729_s12  ;;  %1753 = vrot.lane.b32.xlu0 %v9490_v59, %s7729_s12  ;;  %15699 = vst [vmem:[#allocation220_spill] sm:$0xff] %v9515_v8  ;;  %15700 = vst [vmem:[#allocation221_spill] sm:$0xff] %v9520_v26 }
 0x240   :  { %v9506_v49 = vpop.permute.xlu1 %1515  ;;  %v9508_v9 = vpop.permute.xlu0 %1513 }
 0x241   :  { %15697 = vst [vmem:[#allocation218_spill] sm:$0xff] %v9506_v49  ;;  %15698 = vst [vmem:[#allocation219_spill] sm:$0xff] %v9508_v9  ;;  %v7175_v9 = vld [vmem:[%s15348_s0 + $0x212] sm:$0xff] }
 0x242   :  { %1759 = vrot.lane.b32.xlu1 %v7170_v37, %s7729_s12  ;;  %1757 = vrot.lane.b32.xlu0 %v7169_v24, %s7729_s12  ;;  %v7174_v24 = vld [vmem:[%s15348_s0 + $0x202] sm:$0xff]  ;;  %v9536_v37 = vld [vmem:[%s15348_s0 + $0x1fa] sm:$0xff] }
 0x243   :  { %15703 = vst [vmem:[#allocation224_spill] sm:$0xff] %v9536_v37 }
 0x244   :  { %v9522_v34 = vpop.permute.xlu1 %1519  ;;  %v9524_v59 = vpop.permute.xlu0 %1517 }
 0x245   :  { %15701 = vst [vmem:[#allocation222_spill] sm:$0xff] %v9522_v34  ;;  %15702 = vst [vmem:[#allocation223_spill] sm:$0xff] %v9524_v59  ;;  %v7176_v59 = vld [vmem:[%s15348_s0 + $0x21a] sm:$0xff] }
 0x246   :  { %1763 = vrot.lane.b32.xlu1 %v9515_v8, %s7729_s12  ;;  %1761 = vrot.lane.b32.xlu0 %v9520_v26, %s7729_s12 }
 0x248   :  { %v9538_v49 = vpop.permute.xlu1 %1523  ;;  %v9540_v34 = vpop.permute.xlu0 %1521 }
 0x249   :  { %15704 = vst [vmem:[#allocation225_spill] sm:$0xff] %v9538_v49  ;;  %15705 = vst [vmem:[#allocation226_spill] sm:$0xff] %v9540_v34  ;;  %v7177_v49 = vld [vmem:[%s15348_s0 + $0x22a] sm:$0xff] }
 0x24a   :  { %1767 = vrot.lane.b32.xlu1 %v7174_v24, %s7729_s12  ;;  %1765 = vrot.lane.b32.xlu0 %v9536_v37, %s7729_s12  ;;  %v7178_v24 = vld [vmem:[%s15348_s0 + $0x232] sm:$0xff] }
 0x24c   :  { %v9551_v8 = vpop.permute.xlu1 %1527  ;;  %v9553_v26 = vpop.permute.xlu0 %1525 }
 0x24d   :  { %15706 = vst [vmem:[#allocation227_spill] sm:$0xff] %v9551_v8  ;;  %15707 = vst [vmem:[#allocation228_spill] sm:$0xff] %v9553_v26 }
 0x24e   :  { %1771 = vrot.lane.b32.xlu1 %v7176_v59, %s7729_s12  ;;  %1769 = vrot.lane.b32.xlu0 %v7175_v9, %s7729_s12  ;;  %v7180_v9 = vld [vmem:[%s15348_s0 + $0x24a] sm:$0xff]  ;;  %v7179_v59 = vld [vmem:[%s15348_s0 + $0x242] sm:$0xff] }
 0x250   :  { %v9563_v34 = vpop.permute.xlu1 %1531  ;;  %v9565_v37 = vpop.permute.xlu0 %1529 }
 0x251   :  { %15708 = vst [vmem:[#allocation229_spill] sm:$0xff] %v9563_v34  ;;  %15709 = vst [vmem:[#allocation230_spill] sm:$0xff] %v9565_v37  ;;  %v3173_v34 = vld [vmem:[%s15349_s1] sm:$0xff] }
 0x252   :  { %1775 = vrot.lane.b32.xlu1 %v7178_v24, %s7729_s12  ;;  %1773 = vrot.lane.b32.xlu0 %v7177_v49, %s7729_s12  ;;  %v3174_v49 = vld [vmem:[%s15349_s1 + $0x8] sm:$0xff] }
 0x253   :  { %v7637_v24 = vpack.c.bf16 %v3174_v49, %v3173_v34  ;;  %v7182_v37 = vld [vmem:[%s15348_s0 + $0x262] sm:$0xff]  ;;  %v3176_v34 = vld [vmem:[%s15349_s1 + $0x18] sm:$0xff] }
 0x254   :  { %v9575_v8 = vpop.permute.xlu1 %1535  ;;  %v9577_v26 = vpop.permute.xlu0 %1533  ;;  %v7184_v49 = vld [vmem:[%s15348_s0 + $0x27a] sm:$0xff] }
 0x255   :  { %15710 = vst [vmem:[#allocation231_spill] sm:$0xff] %v9575_v8  ;;  %15711 = vst [vmem:[#allocation232_spill] sm:$0xff] %v9577_v26  ;;  %v7181_v8 = vld [vmem:[%s15348_s0 + $0x25a] sm:$0xff]  ;;  %7638 = vmatprep.subr.bf16.mxu0 %v7637_v24  ;;  %7645 = vmatprep.subr.bf16.mxu1 %v7637_v24 }
 0x256   :  { %1779 = vrot.lane.b32.xlu1 %v7180_v9, %s7729_s12  ;;  %1777 = vrot.lane.b32.xlu0 %v7179_v59, %s7729_s12  ;;  %v3175_v9 = vld [vmem:[%s15349_s1 + $0x10] sm:$0xff] }
 0x257   :  { %7640 = vmatpush3.bf16.msra.mxu0 %v7637_v24  ;;  %7648 = vmatpush3.bf16.msra.mxu1 %v7637_v24  ;;  %v7641_v59 = vpack.c.bf16 %v3176_v34, %v3175_v9  ;;  %v3177_v24 = vld [vmem:[%s15349_s1 + $0x20] sm:$0xf]  ;;  %s7731_s1 = smov 28  }
 0x258   :  { %v9593_v26 = vpop.permute.xlu1 %1539  ;;  %v9595_v55 = vpop.permute.xlu0 %1537 }
 0x259   :  { %15712 = vst [vmem:[#allocation233_spill] sm:$0xff] %v9593_v26  ;;  %15713 = vst [vmem:[#allocation234_spill] sm:$0xff] %v9595_v55  ;;  %v7183_v26 = vld [vmem:[%s15348_s0 + $0x272] sm:$0xff]  ;;  %7642 = vmatprep.subr.bf16.mxu0 %v7641_v59  ;;  %7646 = vmatprep.subr.bf16.mxu1 %v7641_v59 }
 0x25a   :  { %1783 = vrot.lane.b32.xlu1 %v7182_v37, %s7729_s12  ;;  %1781 = vrot.lane.b32.xlu0 %v7181_v8, %s7729_s12  ;;  %v7201_v8 = vld [vmem:[%s15348_s0 + $0x30] sm:$0xff] }
 0x25b   :  { %7644 = vmatpush3.bf16.msra.mxu0 %v7641_v59  ;;  %7649 = vmatpush3.bf16.msra.mxu1 %v7641_v59  ;;  %v7185_v37 = vld [vmem:[%s15348_s0 + $0x28a] sm:$0xff] }
 0x25c   :  { %v9611_v55 = vpop.permute.xlu1 %1543  ;;  %v9613_v62 = vpop.permute.xlu0 %1541  ;;  %7539 = vmatprep.subr.msk.mxu0 %vm3378_vm0, %v3177_v24  ;;  %7647 = vmatprep.subr.msk.mxu1 %vm3378_vm0, %v3177_v24 }
 0x25d   :  { %15714 = vst [vmem:[#allocation235_spill] sm:$0xff] %v9611_v55  ;;  %15715 = vst [vmem:[#allocation236_spill] sm:$0xff] %v9613_v62  ;;  %v7275_v55 = vld [vmem:[%s15348_s0 + $0xa9] sm:$0xff] }
 0x25e   :  { %1787 = vrot.lane.b32.xlu1 %v7184_v49, %s7729_s12  ;;  %1785 = vrot.lane.b32.xlu0 %v7183_v26, %s7729_s12  ;;  %v7202_v26 = vld [vmem:[%s15348_s0 + $0x38] sm:$0xff] }
 0x25f   :  { %7540 = vmatpush3.msk.msra.mxu0 %vm3378_vm0, %v3177_v24  ;;  %7650 = vmatpush3.msk.msra.mxu1 %vm3378_vm0, %v3177_v24  ;;  %vm6968_vm0 = vcmask 1044484  }
 0x260   :  { %v9626_v9 = vpop.permute.xlu1 %1547  ;;  %v9628_v34 = vpop.permute.xlu0 %1545 }
 0x261   :  { %15716 = vst [vmem:[#allocation237_spill] sm:$0xff] %v9626_v9  ;;  %15717 = vst [vmem:[#allocation238_spill] sm:$0xff] %v9628_v34  ;;  %v7211_v34 = vld [vmem:[%s15348_s0 + $0xa8] sm:$0xff] }
 0x262   :  { %1949 = vrot.lane.b32.xlu1 %v7201_v8, %s7730_s8  ;;  %1789 = vrot.lane.b32.xlu0 %v7185_v37, %s7729_s12  ;;  %v7203_v8 = vld [vmem:[%s15348_s0 + $0x48] sm:$0xff] }
 0x264   :  { %v9635_v59 = vpop.permute.xlu1 %1551  ;;  %v9637_v49 = vpop.permute.xlu0 %1549 }
 0x265   :  { %15718 = vst [vmem:[#allocation239_spill] sm:$0xff] %v9635_v59  ;;  %15719 = vst [vmem:[#allocation240_spill] sm:$0xff] %v9637_v49 }
 0x266   :  { %2205 = vrot.lane.b32.xlu1 %v8830_v52, %s7731_s1  ;;  %1951 = vrot.lane.b32.xlu0 %v7202_v26, %s7730_s8 }
 0x268   :  { %v9642_v24 = vpop.permute.xlu1 %1555  ;;  %v9644_v9 = vpop.permute.xlu0 %1553 }
 0x269   :  { %15720 = vst [vmem:[#allocation241_spill] sm:$0xff] %v9642_v24  ;;  %15721 = vst [vmem:[#allocation242_spill] sm:$0xff] %v9644_v9 }
 0x26a   :  { %2461 = vrot.lane.b32.xlu1 %v9238_v30, %s7732_s11  ;;  %2207 = vrot.lane.b32.xlu0 %v8825_v7, %s7731_s1  ;;  %v7204_v30 = vld [vmem:[%s15348_s0 + $0x50] sm:$0xff] }
 0x26c   :  { %v9653_v37 = vpop.permute.xlu1 %1559  ;;  %v9655_v52 = vpop.permute.xlu0 %1557 }
 0x26d   :  { %15722 = vst [vmem:[#allocation243_spill] sm:$0xff] %v9653_v37  ;;  %15723 = vst [vmem:[#allocation244_spill] sm:$0xff] %v9655_v52 }
 0x26e   :  { %1953 = vrot.lane.b32.xlu1 %v7203_v8, %s7730_s8  ;;  %2463 = vrot.lane.b32.xlu0 %v9233_v32, %s7732_s11  ;;  %v7205_v32 = vld [vmem:[%s15348_s0 + $0x60] sm:$0xff] }
 0x270   :  { %v9663_v26 = vpop.permute.xlu1 %1563  ;;  %v9665_v7 = vpop.permute.xlu0 %1561 }
 0x271   :  { %15724 = vst [vmem:[#allocation245_spill] sm:$0xff] %v9663_v26  ;;  %15725 = vst [vmem:[#allocation246_spill] sm:$0xff] %v9665_v7 }
 0x272   :  { %2209 = vrot.lane.b32.xlu1 %v8848_v23, %s7731_s1  ;;  %1955 = vrot.lane.b32.xlu0 %v7204_v30, %s7730_s8  ;;  %v7206_v23 = vld [vmem:[%s15348_s0 + $0x68] sm:$0xff] }
 0x274   :  { %v9670_v37 = vpop.permute.xlu1 %1695  ;;  %v9672_v52 = vpop.permute.xlu0 %1693 }
 0x276   :  { %2465 = vrot.lane.b32.xlu1 %v9256_v38, %s7732_s11  ;;  %2211 = vrot.lane.b32.xlu0 %v8843_v63, %s7731_s1 }
 0x278   :  { %v9681_v8 = vpop.permute.xlu1 %1699  ;;  %v9683_v7 = vpop.permute.xlu0 %1697 }
 0x27a   :  { %1957 = vrot.lane.b32.xlu1 %v7205_v32, %s7730_s8  ;;  %2467 = vrot.lane.b32.xlu0 %v9251_v28, %s7732_s11  ;;  %v7207_v28 = vld [vmem:[%s15348_s0 + $0x78] sm:$0xff] }
 0x27c   :  { %v9691_v38 = vpop.permute.xlu1 %1703  ;;  %v9693_v63 = vpop.permute.xlu0 %1701 }
 0x27e   :  { %2213 = vrot.lane.b32.xlu1 %v8866_v40, %s7731_s1  ;;  %1959 = vrot.lane.b32.xlu0 %v7206_v23, %s7730_s8  ;;  %v7208_v40 = vld [vmem:[%s15348_s0 + $0x80] sm:$0xff] }
 0x280   :  { %v9698_v30 = vpop.permute.xlu1 %1707  ;;  %v9700_v26 = vpop.permute.xlu0 %1705 }
 0x282   :  { %2469 = vrot.lane.b32.xlu1 %v9274_v41, %s7732_s11  ;;  %2215 = vrot.lane.b32.xlu0 %v8861_v14, %s7731_s1 }
 0x284   :  { %v9709_v32 = vpop.permute.xlu1 %1711  ;;  %v9711_v24 = vpop.permute.xlu0 %1709 }
 0x286   :  { %1961 = vrot.lane.b32.xlu1 %v7207_v28, %s7730_s8  ;;  %2471 = vrot.lane.b32.xlu0 %v9269_v20, %s7732_s11  ;;  %v7209_v20 = vld [vmem:[%s15348_s0 + $0x90] sm:$0xff] }
 0x288   :  { %v9719_v41 = vpop.permute.xlu1 %1715  ;;  %v9721_v14 = vpop.permute.xlu0 %1713 }
 0x28a   :  { %2217 = vrot.lane.b32.xlu1 %v8884_v36, %s7731_s1  ;;  %1963 = vrot.lane.b32.xlu0 %v7208_v40, %s7730_s8  ;;  %v7273_v36 = vld [vmem:[%s15348_s0 + $0x91] sm:$0xff] }
 0x28c   :  { %v9726_v23 = vpop.permute.xlu1 %1719  ;;  %v9728_v9 = vpop.permute.xlu0 %1717 }
 0x28e   :  { %2473 = vrot.lane.b32.xlu1 %v9292_v39, %s7732_s11  ;;  %2219 = vrot.lane.b32.xlu0 %v8879_v22, %s7731_s1  ;;  %v7210_v22 = vld [vmem:[%s15348_s0 + $0x98] sm:$0xff] }
 0x290   :  { %v9737_v28 = vpop.permute.xlu1 %1723  ;;  %v9739_v59 = vpop.permute.xlu0 %1721 }
 0x292   :  { %1965 = vrot.lane.b32.xlu1 %v7209_v20, %s7730_s8  ;;  %2475 = vrot.lane.b32.xlu0 %v9287_v47, %s7732_s11  ;;  %v7274_v47 = vld [vmem:[%s15348_s0 + $0x99] sm:$0xff] }
 0x294   :  { %v9750_v39 = vpop.permute.xlu1 %1727  ;;  %v9752_v40 = vpop.permute.xlu0 %1725 }
 0x296   :  { %2221 = vrot.lane.b32.xlu1 %v7273_v36, %s7731_s1  ;;  %1967 = vrot.lane.b32.xlu0 %v7210_v22, %s7730_s8 }
 0x298   :  { %v9759_v20 = vpop.permute.xlu1 %1731  ;;  %v9761_v49 = vpop.permute.xlu0 %1729 }
 0x29a   :  { %2477 = vrot.lane.b32.xlu1 %v9310_v16, %s7732_s11  ;;  %2223 = vrot.lane.b32.xlu0 %v7274_v47, %s7731_s1  ;;  %v7212_v16 = vld [vmem:[%s15348_s0 + $0xb0] sm:$0xff] }
 0x29c   :  { %v9769_v36 = vpop.permute.xlu1 %1735  ;;  %v9771_v22 = vpop.permute.xlu0 %1733 }
 0x29d   :  { %15726 = vst [vmem:[#allocation247_spill] sm:$0xff] %v9769_v36 }
 0x29e   :  { %1969 = vrot.lane.b32.xlu1 %v7211_v34, %s7730_s8  ;;  %2479 = vrot.lane.b32.xlu0 %v9305_v21, %s7732_s11  ;;  %v7276_v21 = vld [vmem:[%s15348_s0 + $0xb1] sm:$0xff] }
 0x2a0   :  { %v9782_v47 = vpop.permute.xlu1 %1739  ;;  %v9784_v62 = vpop.permute.xlu0 %1737 }
 0x2a1   :  { %15727 = vst [vmem:[#allocation248_spill] sm:$0xff] %v9782_v47  ;;  %v7213_v47 = vld [vmem:[%s15348_s0 + $0xc0] sm:$0xff] }
 0x2a2   :  { %2225 = vrot.lane.b32.xlu1 %v7275_v55, %s7731_s1  ;;  %1971 = vrot.lane.b32.xlu0 %v7212_v16, %s7730_s8 }
 0x2a4   :  { %v9791_v34 = vpop.permute.xlu1 %1743  ;;  %v9793_v36 = vpop.permute.xlu0 %1741 }
 0x2a5   :  { %15728 = vst [vmem:[#allocation249_spill] sm:$0xff] %v9791_v34  ;;  %15729 = vst [vmem:[#allocation250_spill] sm:$0xff] %v9793_v36  ;;  %v7277_v34 = vld [vmem:[%s15348_s0 + $0xc1] sm:$0xff] }
 0x2a6   :  { %2481 = vrot.lane.b32.xlu1 %v9328_v45, %s7732_s11  ;;  %2227 = vrot.lane.b32.xlu0 %v7276_v21, %s7731_s1  ;;  %v7214_v45 = vld [vmem:[%s15348_s0 + $0xc8] sm:$0xff] }
 0x2a8   :  { %v9801_v55 = vpop.permute.xlu1 %1747  ;;  %v9803_v16 = vpop.permute.xlu0 %1745 }
 0x2a9   :  { %15730 = vst [vmem:[#allocation251_spill] sm:$0xff] %v9801_v55 }
 0x2aa   :  { %1973 = vrot.lane.b32.xlu1 %v7213_v47, %s7730_s8  ;;  %2483 = vrot.lane.b32.xlu0 %v9323_v18, %s7732_s11  ;;  %v7278_v18 = vld [vmem:[%s15348_s0 + $0xc9] sm:$0xff] }
 0x2ac   :  { %v9814_v21 = vpop.permute.xlu1 %1751  ;;  %v9816_v36 = vpop.permute.xlu0 %1749 }
 0x2ad   :  { %15731 = vst [vmem:[#allocation252_spill] sm:$0xff] %v9814_v21  ;;  %v7215_v21 = vld [vmem:[%s15348_s0 + $0xd8] sm:$0xff] }
 0x2ae   :  { %2229 = vrot.lane.b32.xlu1 %v7277_v34, %s7731_s1  ;;  %1975 = vrot.lane.b32.xlu0 %v7214_v45, %s7730_s8 }
 0x2b0   :  { %v9823_v47 = vpop.permute.xlu1 %1755  ;;  %v9825_v55 = vpop.permute.xlu0 %1753 }
 0x2b1   :  { %15732 = vst [vmem:[#allocation253_spill] sm:$0xff] %v9823_v47  ;;  %15733 = vst [vmem:[#allocation254_spill] sm:$0xff] %v9825_v55  ;;  %v7279_v47 = vld [vmem:[%s15348_s0 + $0xd9] sm:$0xff] }
 0x2b2   :  { %2485 = vrot.lane.b32.xlu1 %v9346_v17, %s7732_s11  ;;  %2231 = vrot.lane.b32.xlu0 %v7278_v18, %s7731_s1  ;;  %v7216_v17 = vld [vmem:[%s15348_s0 + $0xe0] sm:$0xff] }
 0x2b4   :  { %v9833_v34 = vpop.permute.xlu1 %1759  ;;  %v9835_v45 = vpop.permute.xlu0 %1757 }
 0x2b5   :  { %15734 = vst [vmem:[#allocation255_spill] sm:$0xff] %v9833_v34 }
 0x2b6   :  { %1977 = vrot.lane.b32.xlu1 %v7215_v21, %s7730_s8  ;;  %2487 = vrot.lane.b32.xlu0 %v9341_v2, %s7732_s11  ;;  %v7280_v2 = vld [vmem:[%s15348_s0 + $0xe1] sm:$0xff] }
 0x2b8   :  { %v9846_v18 = vpop.permute.xlu1 %1763  ;;  %v9848_v55 = vpop.permute.xlu0 %1761 }
 0x2b9   :  { %15735 = vst [vmem:[#allocation256_spill] sm:$0xff] %v9846_v18  ;;  %v7217_v18 = vld [vmem:[%s15348_s0 + $0xf0] sm:$0xff] }
 0x2ba   :  { %2233 = vrot.lane.b32.xlu1 %v7279_v47, %s7731_s1  ;;  %1979 = vrot.lane.b32.xlu0 %v7216_v17, %s7730_s8 }
 0x2bc   :  { %v9855_v21 = vpop.permute.xlu1 %1767  ;;  %v9857_v34 = vpop.permute.xlu0 %1765 }
 0x2bd   :  { %15736 = vst [vmem:[#allocation257_spill] sm:$0xff] %v9855_v21  ;;  %15737 = vst [vmem:[#allocation258_spill] sm:$0xff] %v9857_v34  ;;  %v7281_v21 = vld [vmem:[%s15348_s0 + $0xf1] sm:$0xff] }
 0x2be   :  { %2489 = vrot.lane.b32.xlu1 %v9364_v6, %s7732_s11  ;;  %2235 = vrot.lane.b32.xlu0 %v7280_v2, %s7731_s1  ;;  %v7218_v6 = vld [vmem:[%s15348_s0 + $0xf8] sm:$0xff] }
 0x2c0   :  { %v9865_v47 = vpop.permute.xlu1 %1771  ;;  %v9867_v17 = vpop.permute.xlu0 %1769 }
 0x2c1   :  { %15738 = vst [vmem:[#allocation259_spill] sm:$0xff] %v9865_v47 }
 0x2c2   :  { %1981 = vrot.lane.b32.xlu1 %v7217_v18, %s7730_s8  ;;  %2491 = vrot.lane.b32.xlu0 %v9359_v54, %s7732_s11  ;;  %v7282_v54 = vld [vmem:[%s15348_s0 + $0xf9] sm:$0xff] }
 0x2c4   :  { %v9878_v2 = vpop.permute.xlu1 %1775  ;;  %v9880_v34 = vpop.permute.xlu0 %1773 }
 0x2c5   :  { %15739 = vst [vmem:[#allocation260_spill] sm:$0xff] %v9878_v2  ;;  %v7219_v2 = vld [vmem:[%s15348_s0 + $0x108] sm:$0xff] }
 0x2c6   :  { %2237 = vrot.lane.b32.xlu1 %v7281_v21, %s7731_s1  ;;  %1983 = vrot.lane.b32.xlu0 %v7218_v6, %s7730_s8 }
 0x2c8   :  { %v9887_v18 = vpop.permute.xlu1 %1779  ;;  %v9889_v47 = vpop.permute.xlu0 %1777 }
 0x2c9   :  { %15740 = vst [vmem:[#allocation261_spill] sm:$0xff] %v9887_v18  ;;  %15741 = vst [vmem:[#allocation262_spill] sm:$0xff] %v9889_v47  ;;  %v7283_v18 = vld [vmem:[%s15348_s0 + $0x109] sm:$0xff] }
 0x2ca   :  { %2493 = vrot.lane.b32.xlu1 %v9382_v12, %s7732_s11  ;;  %2239 = vrot.lane.b32.xlu0 %v7282_v54, %s7731_s1  ;;  %v7220_v12 = vld [vmem:[%s15348_s0 + $0x110] sm:$0xff] }
 0x2cc   :  { %v9897_v21 = vpop.permute.xlu1 %1783  ;;  %v9899_v6 = vpop.permute.xlu0 %1781 }
 0x2cd   :  { %15742 = vst [vmem:[#allocation263_spill] sm:$0xff] %v9897_v21  ;;  %15743 = vst [vmem:[#allocation264_spill] sm:$0xff] %v9899_v6 }
 0x2ce   :  { %1985 = vrot.lane.b32.xlu1 %v7219_v2, %s7730_s8  ;;  %2495 = vrot.lane.b32.xlu0 %v9377_v35, %s7732_s11  ;;  %v27_v35 = vld [vmem:[%s15348_s0] sm:$0xff]  ;;  %v7284_v2 = vld [vmem:[%s15348_s0 + $0x111] sm:$0xff] }
 0x2d0   :  { %v9910_v54 = vpop.permute.xlu1 %1787  ;;  %v9912_v47 = vpop.permute.xlu0 %1785 }
 0x2d1   :  { %15744 = vst [vmem:[#allocation265_spill] sm:$0xff] %v9910_v54  ;;  %15745 = vst [vmem:[#allocation266_spill] sm:$0xff] %v9912_v47  ;;  %v2654_v54 = vsel %vm2653_vm1, %v27_v35, %v8014_v61 }
 0x2d2   :  { %2241 = vrot.lane.b32.xlu1 %v7283_v18, %s7731_s1  ;;  %1987 = vrot.lane.b32.xlu0 %v7220_v12, %s7730_s8  ;;  %v28_v18 = vld [vmem:[%s15348_s0 + $0x8] sm:$0xff]  ;;  %v2719_v12 = vsel %vm2718_vm2, %v2654_v54, %v8398_v11 }
 0x2d3   :  { %v2784_v61 = vsel %vm2783_vm3, %v2719_v12, %v8776_v15  ;;  %v2655_v47 = vsel %vm2653_vm1, %v28_v18, %v8026_v1  ;;  %v7222_v1 = vld [vmem:[%s15348_s0 + $0x128] sm:$0xff] }
 0x2d4   :  { %v1950_v21 = vpop.permute.xlu1 %1949  ;;  %v9922_v6 = vpop.permute.xlu0 %1789  ;;  %v2720_v15 = vsel %vm2718_vm2, %v2655_v47, %v8396_v10 }
 0x2d5   :  { %15746 = vst [vmem:[#allocation267_spill] sm:$0xff] %v9922_v6  ;;  %v7221_v6 = vld [vmem:[%s15348_s0 + $0x120] sm:$0xff] }
 0x2d6   :  { %2497 = vrot.lane.b32.xlu1 %v9400_v44, %s7732_s11  ;;  %2243 = vrot.lane.b32.xlu0 %v7284_v2, %s7731_s1  ;;  %v2849_v2 = vsel %vm2848_vm4, %v2784_v61, %v9190_v33  ;;  %v7285_v33 = vld [vmem:[%s15348_s0 + $0x121] sm:$0xff] }
 0x2d7   :  { %v2914_v11 = vsel %vm2913_vm5, %v2849_v2, %v9672_v52  ;;  %v2785_v52 = vsel %vm2783_vm3, %v2720_v15, %v8774_v53  ;;  %v7286_v53 = vld [vmem:[%s15348_s0 + $0x129] sm:$0xff]  ;;  %v7223_v15 = vld [vmem:[%s15348_s0 + $0x138] sm:$0xff] }
 0x2d8   :  { %v2206_v35 = vpop.permute.xlu1 %2205  ;;  %v1952_v44 = vpop.permute.xlu0 %1951  ;;  %v2979_v54 = vsel %vm2978_vm6, %v2914_v11, %v1950_v21  ;;  %v2850_v10 = vsel %vm2848_vm4, %v2785_v52, %v9188_v3 }
 0x2d9   :  { %v2915_v21 = vsel %vm2913_vm5, %v2850_v10, %v9670_v37  ;;  %v7662_v37 = vld [vmem:[%s15348_s0 + $0x18] sm:$0xff] }
 0x2da   :  { %1989 = vrot.lane.b32.xlu1 %v7221_v6, %s7730_s8  ;;  %2499 = vrot.lane.b32.xlu0 %v9395_v27, %s7732_s11  ;;  %v3044_v6 = vsel %vm3043_vm7, %v2979_v54, %v2206_v35  ;;  %v2980_v12 = vsel %vm2978_vm6, %v2915_v21, %v1952_v44  ;;  %v2656_v11 = vsel %vm2653_vm1, %v7662_v37, %v8012_v60 }
 0x2db   :  { %v2721_v44 = vsel %vm2718_vm2, %v2656_v11, %v8410_v42 }
 0x2dc   :  { %v2462_v27 = vpop.permute.xlu1 %2461  ;;  %v2208_v18 = vpop.permute.xlu0 %2207  ;;  %v2786_v54 = vsel %vm2783_vm3, %v2721_v44, %v8788_v56 }
 0x2dd   :  { %v3109_v47 = vsel %vm3108_vm8, %v3044_v6, %v2462_v27  ;;  %v3045_v61 = vsel %vm3043_vm7, %v2980_v12, %v2208_v18  ;;  %v2851_v60 = vsel %vm2848_vm4, %v2786_v54, %v9202_v19  ;;  %v7287_v6 = vld [vmem:[%s15348_s0 + $0x139] sm:$0xff]  ;;  %v7289_v54 = vld [vmem:[%s15348_s0 + $0x151] sm:$0xff] }
 0x2de   :  { %2245 = vrot.lane.b32.xlu1 %v7285_v33, %s7731_s1  ;;  %1991 = vrot.lane.b32.xlu0 %v7222_v1, %s7730_s8  ;;  %v2916_v52 = vsel %vm2913_vm5, %v2851_v60, %v9683_v7 }
 0x2df   :  { %7541 = vmatprep.mubr.msk.f32.mxu0 %vm3185_vm9, %v3109_v47 }
 0x2e0   :  { %v1954_v3 = vpop.permute.xlu1 %1953  ;;  %v2464_v35 = vpop.permute.xlu0 %2463 }
 0x2e1   :  { %v3110_v2 = vsel %vm3108_vm8, %v3045_v61, %v2464_v35  ;;  %v2981_v19 = vsel %vm2978_vm6, %v2916_v52, %v1954_v3 }
 0x2e2   :  { %2501 = vrot.lane.b32.xlu1 %v9418_v13, %s7732_s11  ;;  %2247 = vrot.lane.b32.xlu0 %v7286_v53, %s7731_s1  ;;  %v7663_v13 = vld [vmem:[%s15348_s0 + $0x20] sm:$0xff] }
 0x2e3   :  { %7542 = vmatmul.mubr.msk.f32.vlgmr.msra.gmra.mrb[0].mxu0 %vm3185_vm9, %v3110_v2  ;;  %v2657_v42 = vsel %vm2653_vm1, %v7663_v13, %v8024_v0  ;;  %v7224_v0 = vld [vmem:[%s15348_s0 + $0x140] sm:$0xff]  ;;  %v7225_v2 = vld [vmem:[%s15348_s0 + $0x150] sm:$0xff]  ;;  %v15748_v13 = vld [vmem:[#allocation179_spill] sm:$0xff] }
 0x2e4   :  { %v2210_v33 = vpop.permute.xlu1 %2209  ;;  %v1956_v1 = vpop.permute.xlu0 %1955  ;;  %v2722_v56 = vsel %vm2718_vm2, %v2657_v42, %v8408_v43 }
 0x2e5   :  { %v2787_v7 = vsel %vm2783_vm3, %v2722_v56, %v8786_v57  ;;  %v3046_v27 = vsel %vm3043_vm7, %v2981_v19, %v2210_v33  ;;  %v7288_v57 = vld [vmem:[%s15348_s0 + $0x141] sm:$0xff]  ;;  %v7290_v19 = vld [vmem:[%s15348_s0 + $0x159] sm:$0xff] }
 0x2e6   :  { %1993 = vrot.lane.b32.xlu1 %v7223_v15, %s7730_s8  ;;  %2503 = vrot.lane.b32.xlu0 %v9413_v58, %s7732_s11  ;;  %v2852_v43 = vsel %vm2848_vm4, %v2787_v7, %v9200_v29  ;;  %v15747_v33 = vld [vmem:[#allocation120_spill] sm:$0xff] }
 0x2e7   :  { %v2917_v47 = vsel %vm2913_vm5, %v2852_v43, %v9681_v8  ;;  %v7664_v8 = vld [vmem:[%s15348_s0 + $0x30] sm:$0xff]  ;;  %v15750_v43 = vld [vmem:[#allocation207_spill] sm:$0xff] }
 0x2e8   :  { %v2466_v18 = vpop.permute.xlu1 %2465  ;;  %v2212_v58 = vpop.permute.xlu0 %2211  ;;  %v2982_v21 = vsel %vm2978_vm6, %v2917_v47, %v1956_v1  ;;  %v2658_v3 = vsel %vm2653_vm1, %v7664_v8, %v8038_v5 }
 0x2e9   :  { %v3111_v10 = vsel %vm3108_vm8, %v3046_v27, %v2466_v18  ;;  %v3047_v12 = vsel %vm3043_vm7, %v2982_v21, %v2212_v58  ;;  %v2723_v35 = vsel %vm2718_vm2, %v2658_v3, %v8422_v51  ;;  %v15749_v18 = vld [vmem:[#allocation5_spill] sm:$0xff]  ;;  %v7667_v3 = vld [vmem:[%s15348_s0 + $0x50] sm:$0xff] }
 0x2ea   :  { %2249 = vrot.lane.b32.xlu1 %v7287_v6, %s7731_s1  ;;  %1995 = vrot.lane.b32.xlu0 %v7224_v0, %s7730_s8  ;;  %v2788_v37 = vsel %vm2783_vm3, %v2723_v35, %v8806_v48  ;;  %v7227_v21 = vld [vmem:[%s15348_s0 + $0x168] sm:$0xff]  ;;  %v15754_v35 = vld [vmem:[#allocation4_spill] sm:$0xff] }
 0x2eb   :  { %7544 = vmatprep.mubr.msk.f32.mxu0 %vm3185_vm9, %v3111_v10  ;;  %v2853_v5 = vsel %vm2848_vm4, %v2788_v37, %v9214_v46  ;;  %v15751_v10 = vld [vmem:[#allocation63_spill] sm:$0xff] }
 0x2ec   :  { %v1958_v29 = vpop.permute.xlu1 %1957  ;;  %v2468_v53 = vpop.permute.xlu0 %2467  ;;  %v2918_v15 = vsel %vm2913_vm5, %v2853_v5, %v9693_v63 }
 0x2ed   :  { %v3112_v61 = vsel %vm3108_vm8, %v3047_v12, %v2468_v53  ;;  %v2983_v46 = vsel %vm2978_vm6, %v2918_v15, %v1958_v29  ;;  %v7228_v15 = vld [vmem:[%s15348_s0 + $0x170] sm:$0xff] }
 0x2ee   :  { %2505 = vrot.lane.b32.xlu1 %v9436_v31, %s7732_s11  ;;  %2251 = vrot.lane.b32.xlu0 %v7288_v57, %s7731_s1  ;;  %v7665_v31 = vld [vmem:[%s15348_s0 + $0x38] sm:$0xff]  ;;  %v15752_v57 = vld [vmem:[#allocation122_spill] sm:$0xff] }
 0x2ef   :  { %7545 = vmatmul.mubr.msk.f32.gmra.mrb[2].mxu0 %vm3185_vm9, %v3112_v61  ;;  %v2659_v51 = vsel %vm2653_vm1, %v7665_v31, %v8036_v4  ;;  %v7226_v4 = vld [vmem:[%s15348_s0 + $0x158] sm:$0xff]  ;;  %v15753_v61 = vld [vmem:[#allocation181_spill] sm:$0xff] }
 0x2f0   :  { %v2214_v11 = vpop.permute.xlu1 %2213  ;;  %v1960_v44 = vpop.permute.xlu0 %1959  ;;  %v2724_v48 = vsel %vm2718_vm2, %v2659_v51, %v8420_v50  ;;  %v7291_v51 = vld [vmem:[%s15348_s0 + $0x169] sm:$0xff] }
 0x2f1   :  { %v2789_v63 = vsel %vm2783_vm3, %v2724_v48, %v15747_v33  ;;  %v3048_v1 = vsel %vm3043_vm7, %v2983_v46, %v2214_v11  ;;  %v15755_v11 = vld [vmem:[#allocation206_spill] sm:$0xff]  ;;  %v15757_v48 = vld [vmem:[#allocation121_spill] sm:$0xff]  ;;  %v15758_v33 = vld [vmem:[#allocation180_spill] sm:$0xff] }
 0x2f2   :  { %1997 = vrot.lane.b32.xlu1 %v7225_v2, %s7730_s8  ;;  %2507 = vrot.lane.b32.xlu0 %v9431_v25, %s7732_s11  ;;  %v2854_v50 = vsel %vm2848_vm4, %v2789_v63, %v15748_v13  ;;  %v2661_v2 = vsel %vm2653_vm1, %v7667_v3, %v15754_v35  ;;  %v7292_v13 = vld [vmem:[%s15348_s0 + $0x171] sm:$0xff] }
 0x2f3   :  { %v2919_v52 = vsel %vm2913_vm5, %v2854_v50, %v9691_v38  ;;  %v7666_v38 = vld [vmem:[%s15348_s0 + $0x48] sm:$0xff] }
 0x2f4   :  { %v2470_v60 = vpop.permute.xlu1 %2469  ;;  %v2216_v25 = vpop.permute.xlu0 %2215  ;;  %v2984_v56 = vsel %vm2978_vm6, %v2919_v52, %v1960_v44  ;;  %v2660_v58 = vsel %vm2653_vm1, %v7666_v38, %v15749_v18  ;;  %v15756_v44 = vld [vmem:[#allocation62_spill] sm:$0xff]  ;;  %v7229_v38 = vld [vmem:[%s15348_s0 + $0x180] sm:$0xff] }
 0x2f5   :  { %v3113_v42 = vsel %vm3108_vm8, %v3048_v1, %v2470_v60  ;;  %v3049_v6 = vsel %vm3043_vm7, %v2984_v56, %v2216_v25  ;;  %v2725_v47 = vsel %vm2718_vm2, %v2660_v58, %v15751_v10  ;;  %v2726_v5 = vsel %vm2718_vm2, %v2661_v2, %v15756_v44  ;;  %v15762_v18 = vld [vmem:[#allocation124_spill] sm:$0xff] }
 0x2f6   :  { %2253 = vrot.lane.b32.xlu1 %v7289_v54, %s7731_s1  ;;  %1999 = vrot.lane.b32.xlu0 %v7226_v4, %s7730_s8  ;;  %v2790_v12 = vsel %vm2783_vm3, %v2725_v47, %v15752_v57  ;;  %v15763_v47 = vld [vmem:[#allocation183_spill] sm:$0xff]  ;;  %v7669_v57 = vld [vmem:[%s15348_s0 + $0x68] sm:$0xff] }
 0x2f7   :  { %7547 = vmatprep.mubr.msk.f32.mxu0 %vm3185_vm9, %v3113_v42  ;;  %v2855_v8 = vsel %vm2848_vm4, %v2790_v12, %v15753_v61  ;;  %v15764_v12 = vld [vmem:[#allocation6_spill] sm:$0xff]  ;;  %v7293_v2 = vld [vmem:[%s15348_s0 + $0x181] sm:$0xff] }
 0x2f8   :  { %v1962_v0 = vpop.permute.xlu1 %1961  ;;  %v2472_v7 = vpop.permute.xlu0 %2471  ;;  %v2920_v37 = vsel %vm2913_vm5, %v2855_v8, %v9700_v26  ;;  %v2791_v26 = vsel %vm2783_vm3, %v2726_v5, %v15757_v48  ;;  %v15765_v61 = vld [vmem:[#allocation210_spill] sm:$0xff]  ;;  %v15766_v8 = vld [vmem:[#allocation64_spill] sm:$0xff] }
 0x2f9   :  { %v3114_v27 = vsel %vm3108_vm8, %v3049_v6, %v2472_v7  ;;  %v2985_v31 = vsel %vm2978_vm6, %v2920_v37, %v1962_v0  ;;  %v2856_v63 = vsel %vm2848_vm4, %v2791_v26, %v15758_v33  ;;  %v15760_v0 = vld [vmem:[#allocation211_spill] sm:$0xff]  ;;  %v15761_v7 = vld [vmem:[#allocation65_spill] sm:$0xff] }
 0x2fa   :  { %2509 = vrot.lane.b32.xlu1 %v15750_v43, %s7732_s11  ;;  %2255 = vrot.lane.b32.xlu0 %v7290_v19, %s7731_s1  ;;  %v2921_v60 = vsel %vm2913_vm5, %v2856_v63, %v9698_v30  ;;  %v7668_v30 = vld [vmem:[%s15348_s0 + $0x60] sm:$0xff]  ;;  %v15759_v19 = vld [vmem:[#allocation7_spill] sm:$0xff]  ;;  %v7230_v37 = vld [vmem:[%s15348_s0 + $0x188] sm:$0xff] }
 0x2fb   :  { %7548 = vmatmul.mubr.msk.f32.gmra.mrb[4].mxu0 %vm3185_vm9, %v3114_v27  ;;  %v2662_v6 = vsel %vm2653_vm1, %v7668_v30, %v15759_v19 }
 0x2fc   :  { %v2218_v29 = vpop.permute.xlu1 %2217  ;;  %v1964_v53 = vpop.permute.xlu0 %1963  ;;  %v2727_v27 = vsel %vm2718_vm2, %v2662_v6, %v15761_v7 }
 0x2fd   :  { %v3050_v46 = vsel %vm3043_vm7, %v2985_v31, %v2218_v29  ;;  %v2986_v25 = vsel %vm2978_vm6, %v2921_v60, %v1964_v53  ;;  %v2792_v58 = vsel %vm2783_vm3, %v2727_v27, %v15762_v18  ;;  %v2663_v29 = vsel %vm2653_vm1, %v7669_v57, %v15764_v12  ;;  %v15769_v60 = vld [vmem:[#allocation9_spill] sm:$0xff]  ;;  %v7671_v27 = vld [vmem:[%s15348_s0 + $0x80] sm:$0xff] }
 0x2fe   :  { %2001 = vrot.lane.b32.xlu1 %v7227_v21, %s7730_s8  ;;  %2511 = vrot.lane.b32.xlu0 %v15755_v11, %s7732_s11  ;;  %v2857_v21 = vsel %vm2848_vm4, %v2792_v58, %v15763_v47  ;;  %v2728_v3 = vsel %vm2718_vm2, %v2663_v29, %v15766_v8  ;;  %v15767_v11 = vld [vmem:[#allocation123_spill] sm:$0xff]  ;;  %v7232_v12 = vld [vmem:[%s15348_s0 + $0x1a0] sm:$0xff]  ;;  %v15777_v29 = vld [vmem:[#allocation125_spill] sm:$0xff] }
 0x2ff   :  { %v2922_v53 = vsel %vm2913_vm5, %v2857_v21, %v9711_v24  ;;  %v2793_v24 = vsel %vm2783_vm3, %v2728_v3, %v15767_v11  ;;  %v7295_v57 = vld [vmem:[%s15348_s0 + $0x199] sm:$0xff] }
 0x300   :  { %v2474_v54 = vpop.permute.xlu1 %2473  ;;  %v2220_v4 = vpop.permute.xlu0 %2219  ;;  %v15778_v3 = vld [vmem:[#allocation184_spill] sm:$0xff] }
 0x301   :  { %v3115_v1 = vsel %vm3108_vm8, %v3050_v46, %v2474_v54  ;;  %v3051_v50 = vsel %vm3043_vm7, %v2986_v25, %v2220_v4  ;;  %v7294_v54 = vld [vmem:[%s15348_s0 + $0x189] sm:$0xff] }
 0x302   :  { %2257 = vrot.lane.b32.xlu1 %v7291_v51, %s7731_s1  ;;  %2003 = vrot.lane.b32.xlu0 %v7228_v15, %s7730_s8  ;;  %v15768_v51 = vld [vmem:[#allocation182_spill] sm:$0xff] }
 0x303   :  { %7550 = vmatprep.mubr.msk.f32.mxu0 %vm3185_vm9, %v3115_v1  ;;  %v2858_v15 = vsel %vm2848_vm4, %v2793_v24, %v15768_v51  ;;  %v7359_v24 = vld [vmem:[%s15348_s0 + $0x19a] sm:$0xff] }
 0x304   :  { %v1966_v42 = vpop.permute.xlu1 %1965  ;;  %v2476_v52 = vpop.permute.xlu0 %2475  ;;  %v2923_v26 = vsel %vm2913_vm5, %v2858_v15, %v9709_v32  ;;  %v7670_v32 = vld [vmem:[%s15348_s0 + $0x78] sm:$0xff]  ;;  %v7672_v15 = vld [vmem:[%s15348_s0 + $0x90] sm:$0xff] }
 0x305   :  { %v3116_v56 = vsel %vm3108_vm8, %v3051_v50, %v2476_v52  ;;  %v2987_v35 = vsel %vm2978_vm6, %v2922_v53, %v1966_v42  ;;  %v2664_v25 = vsel %vm2653_vm1, %v7670_v32, %v15769_v60  ;;  %v15771_v50 = vld [vmem:[#allocation67_spill] sm:$0xff] }
 0x306   :  { %2513 = vrot.lane.b32.xlu1 %v15760_v0, %s7732_s11  ;;  %2259 = vrot.lane.b32.xlu0 %v7292_v13, %s7731_s1  ;;  %v15770_v13 = vld [vmem:[#allocation215_spill] sm:$0xff]  ;;  %v2729_v42 = vsel %vm2718_vm2, %v2664_v25, %v15771_v50  ;;  %v15773_v0 = vld [vmem:[#allocation185_spill] sm:$0xff] }
 0x307   :  { %7551 = vmatmul.mubr.msk.f32.gmra.mrb[6].mxu0 %vm3185_vm9, %v3116_v56  ;;  %v7231_v52 = vld [vmem:[%s15348_s0 + $0x198] sm:$0xff]  ;;  %v15772_v56 = vld [vmem:[#allocation126_spill] sm:$0xff] }
 0x308   :  { %v2222_v43 = vpop.permute.xlu1 %2221  ;;  %v1968_v10 = vpop.permute.xlu0 %1967  ;;  %v2794_v30 = vsel %vm2783_vm3, %v2729_v42, %v15772_v56  ;;  %v15782_v25 = vld [vmem:[#allocation187_spill] sm:$0xff]  ;;  %v15783_v42 = vld [vmem:[#allocation10_spill] sm:$0xff] }
 0x309   :  { %v3052_v44 = vsel %vm3043_vm7, %v2987_v35, %v2222_v43  ;;  %v2988_v46 = vsel %vm2978_vm6, %v2923_v26, %v1968_v10  ;;  %v2859_v7 = vsel %vm2848_vm4, %v2794_v30, %v15773_v0  ;;  %v15775_v43 = vld [vmem:[#allocation214_spill] sm:$0xff]  ;;  %v7673_v50 = vld [vmem:[%s15348_s0 + $0x98] sm:$0xff]  ;;  %v15784_v30 = vld [vmem:[#allocation68_spill] sm:$0xff] }
 0x30a   :  { %2005 = vrot.lane.b32.xlu1 %v7229_v38, %s7730_s8  ;;  %2515 = vrot.lane.b32.xlu0 %v15765_v61, %s7732_s11  ;;  %v15774_v38 = vld [vmem:[#allocation8_spill] sm:$0xff]  ;;  %v2924_v58 = vsel %vm2913_vm5, %v2859_v7, %v9721_v14  ;;  %v15776_v10 = vld [vmem:[#allocation66_spill] sm:$0xff]  ;;  %v7234_v7 = vld [vmem:[%s15348_s0 + $0x1e8] sm:$0xff] }
 0x30b   :  { %v2665_v18 = vsel %vm2653_vm1, %v7671_v27, %v15774_v38  ;;  %v7297_v0 = vld [vmem:[%s15348_s0 + $0x1e1] sm:$0xff]  ;;  %v15785_v27 = vld [vmem:[#allocation127_spill] sm:$0xff] }
 0x30c   :  { %v2478_v5 = vpop.permute.xlu1 %2477  ;;  %v2224_v31 = vpop.permute.xlu0 %2223  ;;  %v2730_v47 = vsel %vm2718_vm2, %v2665_v18, %v15776_v10 }
 0x30d   :  { %v3117_v48 = vsel %vm3108_vm8, %v3052_v44, %v2478_v5  ;;  %v3053_v4 = vsel %vm3043_vm7, %v2988_v46, %v2224_v31  ;;  %v2795_v14 = vsel %vm2783_vm3, %v2730_v47, %v15777_v29  ;;  %v7296_v44 = vld [vmem:[%s15348_s0 + $0x1a1] sm:$0xff] }
 0x30e   :  { %2261 = vrot.lane.b32.xlu1 %v7293_v2, %s7731_s1  ;;  %2007 = vrot.lane.b32.xlu0 %v7230_v37, %s7730_s8  ;;  %v2860_v35 = vsel %vm2848_vm4, %v2795_v14, %v15778_v3  ;;  %v15780_v46 = vld [vmem:[#allocation69_spill] sm:$0xff] }
 0x30f   :  { %7553 = vmatprep.mubr.msk.f32.mxu0 %vm3185_vm9, %v3117_v48  ;;  %v2925_v37 = vsel %vm2913_vm5, %v2860_v35, %v9719_v41  ;;  %v15779_v48 = vld [vmem:[#allocation11_spill] sm:$0xff]  ;;  %v15788_v35 = vld [vmem:[#allocation221_spill] sm:$0xff] }
 0x310   :  { %v1970_v33 = vpop.permute.xlu1 %1969  ;;  %v2480_v63 = vpop.permute.xlu0 %2479  ;;  %v2666_v26 = vsel %vm2653_vm1, %v7672_v15, %v15779_v48  ;;  %v7675_v15 = vld [vmem:[%s15348_s0 + $0xb0] sm:$0xff]  ;;  %v15792_v48 = vld [vmem:[#allocation12_spill] sm:$0xff] }
 0x311   :  { %v3118_v1 = vsel %vm3108_vm8, %v3053_v4, %v2480_v63  ;;  %v2989_v21 = vsel %vm2978_vm6, %v2924_v58, %v1970_v33  ;;  %v7233_v4 = vld [vmem:[%s15348_s0 + $0x1e0] sm:$0xff] }
 0x312   :  { %2517 = vrot.lane.b32.xlu1 %v15770_v13, %s7732_s11  ;;  %2263 = vrot.lane.b32.xlu0 %v7294_v54, %s7731_s1  ;;  %v2731_v54 = vsel %vm2718_vm2, %v2666_v26, %v15780_v46  ;;  %v7360_v33 = vld [vmem:[%s15348_s0 + $0x1a2] sm:$0xff]  ;;  %v2669_v26 = vsel %vm2653_vm1, %v7675_v15, %v15792_v48  ;;  %v15805_v15 = vld [vmem:[#allocation190_spill] sm:$0xff] }
 0x313   :  { %7554 = vmatmul.mubr.msk.f32.gmra.mrb[8].mxu0 %vm3185_vm9, %v3118_v1  ;;  %v15781_v63 = vld [vmem:[#allocation128_spill] sm:$0xff] }
 0x314   :  { %v2226_v19 = vpop.permute.xlu1 %2225  ;;  %v1972_v6 = vpop.permute.xlu0 %1971  ;;  %v2796_v1 = vsel %vm2783_vm3, %v2731_v54, %v15781_v63  ;;  %v15793_v54 = vld [vmem:[#allocation220_spill] sm:$0xff] }
 0x315   :  { %v3054_v53 = vsel %vm3043_vm7, %v2989_v21, %v2226_v19  ;;  %v2990_v11 = vsel %vm2978_vm6, %v2925_v37, %v1972_v6  ;;  %v2861_v13 = vsel %vm2848_vm4, %v2796_v1, %v15782_v25  ;;  %v7299_v1 = vld [vmem:[%s15348_s0 + $0x1f9] sm:$0xff] }
 0x316   :  { %2009 = vrot.lane.b32.xlu1 %v7231_v52, %s7730_s8  ;;  %2519 = vrot.lane.b32.xlu0 %v15775_v43, %s7732_s11  ;;  %v2667_v52 = vsel %vm2653_vm1, %v7673_v50, %v15783_v42  ;;  %v2926_v56 = vsel %vm2913_vm5, %v2861_v13, %v9728_v9  ;;  %v15786_v43 = vld [vmem:[#allocation186_spill] sm:$0xff]  ;;  %v15796_v42 = vld [vmem:[#allocation188_spill] sm:$0xff] }
 0x317   :  { %v2732_v19 = vsel %vm2718_vm2, %v2667_v52, %v15784_v30 }
 0x318   :  { %v2482_v61 = vpop.permute.xlu1 %2481  ;;  %v2228_v8 = vpop.permute.xlu0 %2227  ;;  %v2797_v9 = vsel %vm2783_vm3, %v2732_v19, %v15785_v27 }
 0x319   :  { %v3119_v2 = vsel %vm3108_vm8, %v3054_v53, %v2482_v61  ;;  %v3055_v5 = vsel %vm3043_vm7, %v2990_v11, %v2228_v8  ;;  %v2862_v10 = vsel %vm2848_vm4, %v2797_v9, %v15786_v43  ;;  %v15787_v8 = vld [vmem:[#allocation13_spill] sm:$0xff]  ;;  %v7235_v11 = vld [vmem:[%s15348_s0 + $0x1f8] sm:$0xff] }
 0x31a   :  { %2265 = vrot.lane.b32.xlu1 %v7295_v57, %s7731_s1  ;;  %2011 = vrot.lane.b32.xlu0 %v7232_v12, %s7730_s8  ;;  %v2927_v21 = vsel %vm2913_vm5, %v2862_v10, %v9726_v23  ;;  %v7298_v12 = vld [vmem:[%s15348_s0 + $0x1e9] sm:$0xff] }
 0x31b   :  { %7556 = vmatprep.mubr.msk.f32.mxu0 %vm3185_vm9, %v3119_v2  ;;  %v7674_v23 = vld [vmem:[%s15348_s0 + $0xa8] sm:$0xff]  ;;  %v15789_v2 = vld [vmem:[#allocation71_spill] sm:$0xff] }
 0x31c   :  { %v1974_v31 = vpop.permute.xlu1 %1973  ;;  %v2484_v41 = vpop.permute.xlu0 %2483  ;;  %v2668_v3 = vsel %vm2653_vm1, %v7674_v23, %v15787_v8  ;;  %v15799_v43 = vld [vmem:[#allocation73_spill] sm:$0xff]  ;;  %v15802_v8 = vld [vmem:[#allocation14_spill] sm:$0xff] }
 0x31d   :  { %v3120_v51 = vsel %vm3108_vm8, %v3055_v5, %v2484_v41  ;;  %v2991_v6 = vsel %vm2978_vm6, %v2926_v56, %v1974_v31  ;;  %v2733_v37 = vsel %vm2718_vm2, %v2668_v3, %v15789_v2  ;;  %v15791_v41 = vld [vmem:[#allocation189_spill] sm:$0xff]  ;;  %v15803_v2 = vld [vmem:[#allocation72_spill] sm:$0xff] }
 0x31e   :  { %2521 = vrot.lane.b32.xlu1 %v7359_v24, %s7732_s11  ;;  %2267 = vrot.lane.b32.xlu0 %v7296_v44, %s7731_s1  ;;  %v15790_v24 = vld [vmem:[#allocation130_spill] sm:$0xff]  ;;  %v7677_v23 = vld [vmem:[%s15348_s0 + $0xc8] sm:$0xff] }
 0x31f   :  { %7557 = vmatmul.mubr.msk.f32.gmra.mrb[10].mxu0 %vm3185_vm9, %v3120_v51  ;;  %v2798_v44 = vsel %vm2783_vm3, %v2733_v37, %v15790_v24  ;;  %v2671_v3 = vsel %vm2653_vm1, %v7677_v23, %v15802_v8  ;;  %v7301_v24 = vld [vmem:[%s15348_s0 + $0x211] sm:$0xff] }
 0x320   :  { %v2230_v32 = vpop.permute.xlu1 %2229  ;;  %v1976_v60 = vpop.permute.xlu0 %1975  ;;  %v2863_v51 = vsel %vm2848_vm4, %v2798_v44, %v15791_v41  ;;  %v2736_v37 = vsel %vm2718_vm2, %v2671_v3, %v15803_v2  ;;  %v7238_v44 = vld [vmem:[%s15348_s0 + $0x218] sm:$0xff]  ;;  %v7367_v3 = vld [vmem:[%s15348_s0 + $0x22a] sm:$0xff] }
 0x321   :  { %v3056_v38 = vsel %vm3043_vm7, %v2991_v6, %v2230_v32  ;;  %v2992_v57 = vsel %vm2978_vm6, %v2927_v21, %v1976_v60  ;;  %v2928_v46 = vsel %vm2913_vm5, %v2863_v51, %v9739_v59  ;;  %v7236_v32 = vld [vmem:[%s15348_s0 + $0x200] sm:$0xff]  ;;  %v15795_v60 = vld [vmem:[#allocation129_spill] sm:$0xff] }
 0x322   :  { %2013 = vrot.lane.b32.xlu1 %v7233_v4, %s7730_s8  ;;  %2523 = vrot.lane.b32.xlu0 %v7360_v33, %s7732_s11  ;;  %v15794_v4 = vld [vmem:[#allocation70_spill] sm:$0xff]  ;;  %v7300_v6 = vld [vmem:[%s15348_s0 + $0x201] sm:$0xff] }
 0x323   :  { %v2734_v33 = vsel %vm2718_vm2, %v2669_v26, %v15794_v4  ;;  %v7364_v21 = vld [vmem:[%s15348_s0 + $0x202] sm:$0xff]  ;;  %v7365_v4 = vld [vmem:[%s15348_s0 + $0x212] sm:$0xff] }
 0x324   :  { %v2486_v18 = vpop.permute.xlu1 %2485  ;;  %v2232_v58 = vpop.permute.xlu0 %2231  ;;  %v2799_v59 = vsel %vm2783_vm3, %v2734_v33, %v15795_v60  ;;  %v7302_v33 = vld [vmem:[%s15348_s0 + $0x219] sm:$0xff] }
 0x325   :  { %v3121_v47 = vsel %vm3108_vm8, %v3056_v38, %v2486_v18  ;;  %v3057_v29 = vsel %vm3043_vm7, %v2992_v57, %v2232_v58  ;;  %v2864_v52 = vsel %vm2848_vm4, %v2799_v59, %v15796_v42  ;;  %v15797_v38 = vld [vmem:[#allocation15_spill] sm:$0xff]  ;;  %v15798_v58 = vld [vmem:[#allocation224_spill] sm:$0xff]  ;;  %v15806_v59 = vld [vmem:[#allocation17_spill] sm:$0xff] }
 0x326   :  { %2269 = vrot.lane.b32.xlu1 %v7297_v0, %s7731_s1  ;;  %2015 = vrot.lane.b32.xlu0 %v7234_v7, %s7730_s8  ;;  %v2929_v30 = vsel %vm2913_vm5, %v2864_v52, %v9737_v28  ;;  %v7676_v28 = vld [vmem:[%s15348_s0 + $0xc0] sm:$0xff]  ;;  %v7678_v60 = vld [vmem:[%s15348_s0 + $0xd8] sm:$0xff] }
 0x327   :  { %7559 = vmatprep.mubr.msk.f32.mxu0 %vm3185_vm9, %v3121_v47  ;;  %v2670_v18 = vsel %vm2653_vm1, %v7676_v28, %v15797_v38  ;;  %v7237_v47 = vld [vmem:[%s15348_s0 + $0x210] sm:$0xff]  ;;  %v15800_v57 = vld [vmem:[#allocation132_spill] sm:$0xff]  ;;  %v7239_v42 = vld [vmem:[%s15348_s0 + $0x228] sm:$0xff] }
 0x328   :  { %v1978_v14 = vpop.permute.xlu1 %1977  ;;  %v2488_v53 = vpop.permute.xlu0 %2487  ;;  %v2735_v10 = vsel %vm2718_vm2, %v2670_v18, %v15799_v43  ;;  %v7366_v52 = vld [vmem:[%s15348_s0 + $0x21a] sm:$0xff]  ;;  %v15811_v18 = vld [vmem:[#allocation74_spill] sm:$0xff] }
 0x329   :  { %v3122_v61 = vsel %vm3108_vm8, %v3057_v29, %v2488_v53  ;;  %v2993_v63 = vsel %vm2978_vm6, %v2928_v46, %v1978_v14  ;;  %v15801_v53 = vld [vmem:[#allocation191_spill] sm:$0xff] }
 0x32a   :  { %2525 = vrot.lane.b32.xlu1 %v15788_v35, %s7732_s11  ;;  %2271 = vrot.lane.b32.xlu0 %v7298_v12, %s7731_s1  ;;  %v2800_v12 = vsel %vm2783_vm3, %v2735_v10, %v15800_v57  ;;  %v7303_v10 = vld [vmem:[%s15348_s0 + $0x229] sm:$0xff] }
 0x32b   :  { %7560 = vmatmul.mubr.msk.f32.gmra.mrb[12].mxu0 %vm3185_vm9, %v3122_v61  ;;  %v2865_v61 = vsel %vm2848_vm4, %v2800_v12, %v15801_v53 }
 0x32c   :  { %v2234_v5 = vpop.permute.xlu1 %2233  ;;  %v1980_v31 = vpop.permute.xlu0 %1979  ;;  %v2930_v35 = vsel %vm2913_vm5, %v2865_v61, %v9752_v40 }
 0x32d   :  { %v3058_v25 = vsel %vm3043_vm7, %v2993_v63, %v2234_v5  ;;  %v2994_v19 = vsel %vm2978_vm6, %v2929_v30, %v1980_v31  ;;  %v15804_v5 = vld [vmem:[#allocation131_spill] sm:$0xff] }
 0x32e   :  { %2017 = vrot.lane.b32.xlu1 %v7235_v11, %s7730_s8  ;;  %2527 = vrot.lane.b32.xlu0 %v15793_v54, %s7732_s11  ;;  %v2801_v40 = vsel %vm2783_vm3, %v2736_v37, %v15804_v5 }
 0x32f   :  { %v2866_v48 = vsel %vm2848_vm4, %v2801_v40, %v15805_v15  ;;  %v15815_v40 = vld [vmem:[#allocation77_spill] sm:$0xff]  ;;  %v15816_v15 = vld [vmem:[#allocation136_spill] sm:$0xff] }
 0x330   :  { %v2490_v13 = vpop.permute.xlu1 %2489  ;;  %v2236_v50 = vpop.permute.xlu0 %2235  ;;  %v2931_v46 = vsel %vm2913_vm5, %v2866_v48, %v9750_v39 }
 0x331   :  { %v3123_v56 = vsel %vm3108_vm8, %v3058_v25, %v2490_v13  ;;  %v3059_v0 = vsel %vm3043_vm7, %v2994_v19, %v2236_v50  ;;  %v2672_v25 = vsel %vm2653_vm1, %v7678_v60, %v15806_v59  ;;  %v15807_v13 = vld [vmem:[#allocation75_spill] sm:$0xff] }
 0x332   :  { %2273 = vrot.lane.b32.xlu1 %v7299_v1, %s7731_s1  ;;  %2019 = vrot.lane.b32.xlu0 %v7236_v32, %s7730_s8  ;;  %v2737_v50 = vsel %vm2718_vm2, %v2672_v25, %v15807_v13  ;;  %v7305_v25 = vld [vmem:[%s15348_s0 + $0x241] sm:$0xff] }
 0x333   :  { %7562 = vmatprep.mubr.msk.f32.mxu0 %vm3185_vm9, %v3123_v56  ;;  %v15808_v56 = vld [vmem:[#allocation134_spill] sm:$0xff]  ;;  %v7242_v13 = vld [vmem:[%s15348_s0 + $0x248] sm:$0xff] }
 0x334   :  { %v1982_v7 = vpop.permute.xlu1 %1981  ;;  %v2492_v27 = vpop.permute.xlu0 %2491  ;;  %v2802_v30 = vsel %vm2783_vm3, %v2737_v50, %v15808_v56  ;;  %v15820_v50 = vld [vmem:[#allocation135_spill] sm:$0xff] }
 0x335   :  { %v3124_v9 = vsel %vm3108_vm8, %v3059_v0, %v2492_v27  ;;  %v2995_v11 = vsel %vm2978_vm6, %v2930_v35, %v1982_v7  ;;  %v15809_v0 = vld [vmem:[#allocation193_spill] sm:$0xff]  ;;  %v7679_v27 = vld [vmem:[%s15348_s0 + $0xe0] sm:$0xff]  ;;  %v7304_v35 = vld [vmem:[%s15348_s0 + $0x231] sm:$0xff] }
 0x336   :  { %2529 = vrot.lane.b32.xlu1 %v15798_v58, %s7732_s11  ;;  %2275 = vrot.lane.b32.xlu0 %v7300_v6, %s7731_s1  ;;  %v2867_v7 = vsel %vm2848_vm4, %v2802_v30, %v15809_v0  ;;  %v15821_v30 = vld [vmem:[#allocation194_spill] sm:$0xff]  ;;  %v15822_v0 = vld [vmem:[#allocation247_spill] sm:$0xff] }
 0x337   :  { %7563 = vmatmul.mubr.msk.f32.gmra.mrb[14].mxu0 %vm3185_vm9, %v3124_v9  ;;  %v15810_v9 = vld [vmem:[#allocation16_spill] sm:$0xff]  ;;  %v2932_v38 = vsel %vm2913_vm5, %v2867_v7, %v9761_v49 }
 0x338   :  { %v2238_v29 = vpop.permute.xlu1 %2237  ;;  %v1984_v14 = vpop.permute.xlu0 %1983  ;;  %v2673_v28 = vsel %vm2653_vm1, %v7679_v27, %v15810_v9  ;;  %v7369_v9 = vld [vmem:[%s15348_s0 + $0x242] sm:$0xff] }
 0x339   :  { %v3060_v31 = vsel %vm3043_vm7, %v2995_v11, %v2238_v29  ;;  %v2996_v54 = vsel %vm2978_vm6, %v2931_v46, %v1984_v14  ;;  %v2738_v58 = vsel %vm2718_vm2, %v2673_v28, %v15811_v18  ;;  %v15813_v14 = vld [vmem:[#allocation192_spill] sm:$0xff]  ;;  %v7306_v28 = vld [vmem:[%s15348_s0 + $0x249] sm:$0xff] }
 0x33a   :  { %2021 = vrot.lane.b32.xlu1 %v7237_v47, %s7730_s8  ;;  %2531 = vrot.lane.b32.xlu0 %v7364_v21, %s7732_s11  ;;  %v7240_v47 = vld [vmem:[%s15348_s0 + $0x230] sm:$0xff]  ;;  %v15812_v21 = vld [vmem:[#allocation133_spill] sm:$0xff] }
 0x33b   :  { %v2803_v49 = vsel %vm2783_vm3, %v2738_v58, %v15812_v21 }
 0x33c   :  { %v2494_v41 = vpop.permute.xlu1 %2493  ;;  %v2240_v51 = vpop.permute.xlu0 %2239  ;;  %v2868_v53 = vsel %vm2848_vm4, %v2803_v49, %v15813_v14  ;;  %v15824_v49 = vld [vmem:[#allocation79_spill] sm:$0xff]  ;;  %v15825_v14 = vld [vmem:[#allocation138_spill] sm:$0xff] }
 0x33d   :  { %v3125_v26 = vsel %vm3108_vm8, %v3060_v31, %v2494_v41  ;;  %v3061_v63 = vsel %vm3043_vm7, %v2996_v54, %v2240_v51  ;;  %v2933_v23 = vsel %vm2913_vm5, %v2868_v53, %v9759_v20  ;;  %v7241_v41 = vld [vmem:[%s15348_s0 + $0x240] sm:$0xff]  ;;  %v7368_v51 = vld [vmem:[%s15348_s0 + $0x232] sm:$0xff] }
 0x33e   :  { %2277 = vrot.lane.b32.xlu1 %v7301_v24, %s7731_s1  ;;  %2023 = vrot.lane.b32.xlu0 %v7238_v44, %s7730_s8  ;;  %v7680_v24 = vld [vmem:[%s15348_s0 + $0xf0] sm:$0xff]  ;;  %v15814_v44 = vld [vmem:[#allocation19_spill] sm:$0xff] }
 0x33f   :  { %7565 = vmatprep.mubr.msk.f32.mxu0 %vm3185_vm9, %v3125_v26  ;;  %v2674_v5 = vsel %vm2653_vm1, %v7680_v24, %v15814_v44  ;;  %v15817_v54 = vld [vmem:[#allocation195_spill] sm:$0xff] }
 0x340   :  { %v1986_v1 = vpop.permute.xlu1 %1985  ;;  %v2496_v39 = vpop.permute.xlu0 %2495  ;;  %v2739_v31 = vsel %vm2718_vm2, %v2674_v5, %v15815_v40  ;;  %v7307_v5 = vld [vmem:[%s15348_s0 + $0x259] sm:$0xff] }
 0x341   :  { %v3126_v32 = vsel %vm3108_vm8, %v3061_v63, %v2496_v39  ;;  %v2997_v43 = vsel %vm2978_vm6, %v2932_v38, %v1986_v1  ;;  %v2804_v48 = vsel %vm2783_vm3, %v2739_v31, %v15816_v15  ;;  %v15818_v63 = vld [vmem:[#allocation18_spill] sm:$0xff]  ;;  %v7244_v40 = vld [vmem:[%s15348_s0 + $0x260] sm:$0xff]  ;;  %v15829_v31 = vld [vmem:[#allocation137_spill] sm:$0xff] }
 0x342   :  { %2533 = vrot.lane.b32.xlu1 %v7365_v4, %s7732_s11  ;;  %2279 = vrot.lane.b32.xlu0 %v7302_v33, %s7731_s1  ;;  %v2869_v4 = vsel %vm2848_vm4, %v2804_v48, %v15817_v54  ;;  %v7681_v33 = vld [vmem:[%s15348_s0 + $0xf8] sm:$0xff]  ;;  %v15830_v48 = vld [vmem:[#allocation196_spill] sm:$0xff] }
 0x343   :  { %7566 = vmatmul.mubr.msk.f32.gmra.mrb[16].mxu0 %vm3185_vm9, %v3126_v32  ;;  %v2675_v1 = vsel %vm2653_vm1, %v7681_v33, %v15818_v63  ;;  %v2934_v39 = vsel %vm2913_vm5, %v2869_v4, %v9771_v22  ;;  %v15819_v32 = vld [vmem:[#allocation76_spill] sm:$0xff] }
 0x344   :  { %v2242_v19 = vpop.permute.xlu1 %2241  ;;  %v1988_v6 = vpop.permute.xlu0 %1987  ;;  %v2740_v60 = vsel %vm2718_vm2, %v2675_v1, %v15819_v32  ;;  %v15831_v54 = vld [vmem:[#allocation248_spill] sm:$0xff] }
 0x345   :  { %v3062_v57 = vsel %vm3043_vm7, %v2997_v43, %v2242_v19  ;;  %v2998_v8 = vsel %vm2978_vm6, %v2933_v23, %v1988_v6  ;;  %v2805_v22 = vsel %vm2783_vm3, %v2740_v60, %v15820_v50  ;;  %v7371_v63 = vld [vmem:[%s15348_s0 + $0x25a] sm:$0xff] }
 0x346   :  { %2025 = vrot.lane.b32.xlu1 %v7239_v42, %s7730_s8  ;;  %2535 = vrot.lane.b32.xlu0 %v7366_v52, %s7732_s11  ;;  %v2870_v19 = vsel %vm2848_vm4, %v2805_v22, %v15821_v30  ;;  %v7308_v1 = vld [vmem:[%s15348_s0 + $0x261] sm:$0xff] }
 0x347   :  { %v2935_v7 = vsel %vm2913_vm5, %v2870_v19, %v15822_v0  ;;  %v15833_v22 = vld [vmem:[#allocation81_spill] sm:$0xff]  ;;  %v15834_v30 = vld [vmem:[#allocation140_spill] sm:$0xff] }
 0x348   :  { %v2498_v12 = vpop.permute.xlu1 %2497  ;;  %v2244_v29 = vpop.permute.xlu0 %2243 }
 0x349   :  { %v3127_v61 = vsel %vm3108_vm8, %v3062_v57, %v2498_v12  ;;  %v3063_v2 = vsel %vm3043_vm7, %v2998_v8, %v2244_v29  ;;  %v7243_v12 = vld [vmem:[%s15348_s0 + $0x258] sm:$0xff]  ;;  %v7370_v29 = vld [vmem:[%s15348_s0 + $0x24a] sm:$0xff] }
 0x34a   :  { %2281 = vrot.lane.b32.xlu1 %v7303_v10, %s7731_s1  ;;  %2027 = vrot.lane.b32.xlu0 %v7240_v47, %s7730_s8  ;;  %v7682_v10 = vld [vmem:[%s15348_s0 + $0x108] sm:$0xff] }
 0x34b   :  { %7568 = vmatprep.mubr.msk.f32.mxu0 %vm3185_vm9, %v3127_v61  ;;  %v15823_v47 = vld [vmem:[#allocation21_spill] sm:$0xff] }
 0x34c   :  { %v1990_v37 = vpop.permute.xlu1 %1989  ;;  %v2500_v20 = vpop.permute.xlu0 %2499  ;;  %v2676_v21 = vsel %vm2653_vm1, %v7682_v10, %v15823_v47  ;;  %v15826_v8 = vld [vmem:[#allocation197_spill] sm:$0xff] }
 0x34d   :  { %v3128_v11 = vsel %vm3108_vm8, %v3063_v2, %v2500_v20  ;;  %v2999_v59 = vsel %vm2978_vm6, %v2934_v39, %v1990_v37  ;;  %v2741_v57 = vsel %vm2718_vm2, %v2676_v21, %v15824_v49  ;;  %v15827_v2 = vld [vmem:[#allocation20_spill] sm:$0xff]  ;;  %v7309_v21 = vld [vmem:[%s15348_s0 + $0x271] sm:$0xff] }
 0x34e   :  { %2537 = vrot.lane.b32.xlu1 %v7367_v3, %s7732_s11  ;;  %2283 = vrot.lane.b32.xlu0 %v7304_v35, %s7731_s1  ;;  %v2806_v53 = vsel %vm2783_vm3, %v2741_v57, %v15825_v14  ;;  %v7683_v35 = vld [vmem:[%s15348_s0 + $0x110] sm:$0xff]  ;;  %v7246_v49 = vld [vmem:[%s15348_s0 + $0x278] sm:$0xff] }
 0x34f   :  { %7569 = vmatmul.mubr.msk.f32.gmra.mrb[18].mxu0 %vm3185_vm9, %v3128_v11  ;;  %v2871_v3 = vsel %vm2848_vm4, %v2806_v53, %v15826_v8  ;;  %v2677_v37 = vsel %vm2653_vm1, %v7683_v35, %v15827_v2  ;;  %v15828_v11 = vld [vmem:[#allocation78_spill] sm:$0xff]  ;;  %v15839_v57 = vld [vmem:[#allocation139_spill] sm:$0xff] }
 0x350   :  { %v2246_v26 = vpop.permute.xlu1 %2245  ;;  %v1992_v46 = vpop.permute.xlu0 %1991  ;;  %v2936_v20 = vsel %vm2913_vm5, %v2871_v3, %v9784_v62  ;;  %v2742_v24 = vsel %vm2718_vm2, %v2677_v37, %v15828_v11  ;;  %v15841_v3 = vld [vmem:[#allocation249_spill] sm:$0xff]  ;;  %v7373_v37 = vld [vmem:[%s15348_s0 + $0x272] sm:$0xff] }
 0x351   :  { %v3064_v42 = vsel %vm3043_vm7, %v2999_v59, %v2246_v26  ;;  %v3000_v27 = vsel %vm2978_vm6, %v2935_v7, %v1992_v46  ;;  %v2807_v62 = vsel %vm2783_vm3, %v2742_v24, %v15829_v31  ;;  %v15835_v7 = vld [vmem:[#allocation199_spill] sm:$0xff]  ;;  %v15842_v31 = vld [vmem:[#allocation25_spill] sm:$0xff] }
 0x352   :  { %2029 = vrot.lane.b32.xlu1 %v7241_v41, %s7730_s8  ;;  %2539 = vrot.lane.b32.xlu0 %v7368_v51, %s7732_s11  ;;  %v2872_v26 = vsel %vm2848_vm4, %v2807_v62, %v15830_v48  ;;  %v7374_v48 = vld [vmem:[%s15348_s0 + $0x27a] sm:$0xff] }
 0x353   :  { %v2937_v4 = vsel %vm2913_vm5, %v2872_v26, %v15831_v54  ;;  %v15844_v26 = vld [vmem:[#allocation142_spill] sm:$0xff] }
 0x354   :  { %v2502_v52 = vpop.permute.xlu1 %2501  ;;  %v2248_v56 = vpop.permute.xlu0 %2247 }
 0x355   :  { %v3129_v6 = vsel %vm3108_vm8, %v3064_v42, %v2502_v52  ;;  %v3065_v38 = vsel %vm3043_vm7, %v3000_v27, %v2248_v56  ;;  %v7245_v52 = vld [vmem:[%s15348_s0 + $0x270] sm:$0xff]  ;;  %v7372_v56 = vld [vmem:[%s15348_s0 + $0x262] sm:$0xff] }
 0x356   :  { %2285 = vrot.lane.b32.xlu1 %v7305_v25, %s7731_s1  ;;  %2031 = vrot.lane.b32.xlu0 %v7242_v13, %s7730_s8  ;;  %v7684_v25 = vld [vmem:[%s15348_s0 + $0x120] sm:$0xff]  ;;  %v15832_v13 = vld [vmem:[#allocation23_spill] sm:$0xff] }
 0x357   :  { %7571 = vmatprep.mubr.msk.f32.mxu0 %vm3185_vm9, %v3129_v6  ;;  %v2678_v50 = vsel %vm2653_vm1, %v7684_v25, %v15832_v13 }
 0x358   :  { %v1994_v18 = vpop.permute.xlu1 %1993  ;;  %v2504_v58 = vpop.permute.xlu0 %2503  ;;  %v2743_v42 = vsel %vm2718_vm2, %v2678_v50, %v15833_v22  ;;  %v7311_v50 = vld [vmem:[%s15348_s0 + $0x289] sm:$0xff] }
 0x359   :  { %v3130_v43 = vsel %vm3108_vm8, %v3065_v38, %v2504_v58  ;;  %v3001_v44 = vsel %vm2978_vm6, %v2936_v20, %v1994_v18  ;;  %v2808_v19 = vsel %vm2783_vm3, %v2743_v42, %v15834_v30  ;;  %v15837_v18 = vld [vmem:[#allocation250_spill] sm:$0xff]  ;;  %v7310_v20 = vld [vmem:[%s15348_s0 + $0x279] sm:$0xff]  ;;  %v15848_v42 = vld [vmem:[#allocation141_spill] sm:$0xff] }
 0x35a   :  { %2541 = vrot.lane.b32.xlu1 %v7369_v9, %s7732_s11  ;;  %2287 = vrot.lane.b32.xlu0 %v7306_v28, %s7731_s1  ;;  %v2873_v27 = vsel %vm2848_vm4, %v2808_v19, %v15835_v7  ;;  %v7685_v9 = vld [vmem:[%s15348_s0 + $0x128] sm:$0xff]  ;;  %v15836_v28 = vld [vmem:[#allocation22_spill] sm:$0xff]  ;;  %v15849_v19 = vld [vmem:[#allocation200_spill] sm:$0xff] }
 0x35b   :  { %7572 = vmatmul.mubr.msk.f32.gmra.mrb[20].mxu0 %vm3185_vm9, %v3130_v43  ;;  %v2679_v38 = vsel %vm2653_vm1, %v7685_v9, %v15836_v28  ;;  %v2938_v58 = vsel %vm2913_vm5, %v2873_v27, %v15837_v18  ;;  %v15838_v43 = vld [vmem:[#allocation80_spill] sm:$0xff]  ;;  %v7248_v22 = vld [vmem:[%s15348_s0 + $0x290] sm:$0xff]  ;;  %v15850_v7 = vld [vmem:[#allocation251_spill] sm:$0xff] }
 0x35c   :  { %v2250_v61 = vpop.permute.xlu1 %2249  ;;  %v1996_v23 = vpop.permute.xlu0 %1995  ;;  %v2744_v10 = vsel %vm2718_vm2, %v2679_v38, %v15838_v43  ;;  %v7375_v28 = vld [vmem:[%s15348_s0 + $0x28a] sm:$0xff] }
 0x35d   :  { %v3066_v41 = vsel %vm3043_vm7, %v3001_v44, %v2250_v61  ;;  %v3002_v33 = vsel %vm2978_vm6, %v2937_v4, %v1996_v23  ;;  %v15840_v61 = vld [vmem:[#allocation198_spill] sm:$0xff] }
 0x35e   :  { %2033 = vrot.lane.b32.xlu1 %v7243_v12, %s7730_s8  ;;  %2543 = vrot.lane.b32.xlu0 %v7370_v29, %s7732_s11  ;;  %v2809_v12 = vsel %vm2783_vm3, %v2744_v10, %v15839_v57  ;;  %v7312_v38 = vld [vmem:[%s15348_s0 + $0x291] sm:$0xff]  ;;  %v15852_v57 = vld [vmem:[#allocation85_spill] sm:$0xff] }
 0x35f   :  { %v2874_v23 = vsel %vm2848_vm4, %v2809_v12, %v15840_v61 }
 0x360   :  { %v2506_v51 = vpop.permute.xlu1 %2505  ;;  %v2252_v15 = vpop.permute.xlu0 %2251  ;;  %v2939_v35 = vsel %vm2913_vm5, %v2874_v23, %v15841_v3 }
 0x361   :  { %v3131_v46 = vsel %vm3108_vm8, %v3066_v41, %v2506_v51  ;;  %v3067_v39 = vsel %vm3043_vm7, %v3002_v33, %v2252_v15  ;;  %v15843_v41 = vld [vmem:[#allocation83_spill] sm:$0xff]  ;;  %v7247_v15 = vld [vmem:[%s15348_s0 + $0x288] sm:$0xff] }
 0x362   :  { %2289 = vrot.lane.b32.xlu1 %v7307_v5, %s7731_s1  ;;  %2035 = vrot.lane.b32.xlu0 %v7244_v40, %s7730_s8  ;;  %v7686_v40 = vld [vmem:[%s15348_s0 + $0x138] sm:$0xff]  ;;  %v15845_v33 = vld [vmem:[#allocation201_spill] sm:$0xff] }
 0x363   :  { %7574 = vmatprep.mubr.msk.f32.mxu0 %vm3185_vm9, %v3131_v46  ;;  %v2680_v62 = vsel %vm2653_vm1, %v7686_v40, %v15842_v31  ;;  %v7249_v40 = vld [vmem:[%s15348_s0 + $0x2a0] sm:$0xff]  ;;  %v15857_v31 = vld [vmem:[#allocation143_spill] sm:$0xff] }
 0x364   :  { %v1998_v32 = vpop.permute.xlu1 %1997  ;;  %v2508_v60 = vpop.permute.xlu0 %2507  ;;  %v2745_v51 = vsel %vm2718_vm2, %v2680_v62, %v15843_v41 }
 0x365   :  { %v3132_v59 = vsel %vm3108_vm8, %v3067_v39, %v2508_v60  ;;  %v3003_v47 = vsel %vm2978_vm6, %v2938_v58, %v1998_v32  ;;  %v2810_v46 = vsel %vm2783_vm3, %v2745_v51, %v15844_v26  ;;  %v15846_v39 = vld [vmem:[#allocation24_spill] sm:$0xff] }
 0x366   :  { %2545 = vrot.lane.b32.xlu1 %v7371_v63, %s7732_s11  ;;  %2291 = vrot.lane.b32.xlu0 %v7308_v1, %s7731_s1  ;;  %v2875_v63 = vsel %vm2848_vm4, %v2810_v46, %v15845_v33  ;;  %v7687_v1 = vld [vmem:[%s15348_s0 + $0x140] sm:$0xff]  ;;  %v7314_v33 = vld [vmem:[%s15348_s0 + $0x2a9] sm:$0xff] }
 0x367   :  { %7575 = vmatmul.mubr.msk.f32.gmra.mrb[22].mxu0 %vm3185_vm9, %v3132_v59  ;;  %v2681_v32 = vsel %vm2653_vm1, %v7687_v1, %v15846_v39  ;;  %v2940_v60 = vsel %vm2913_vm5, %v2875_v63, %v9803_v16  ;;  %v15847_v59 = vld [vmem:[#allocation82_spill] sm:$0xff]  ;;  %v15859_v46 = vld [vmem:[#allocation252_spill] sm:$0xff] }
 0x368   :  { %v2254_v6 = vpop.permute.xlu1 %2253  ;;  %v2000_v0 = vpop.permute.xlu0 %1999  ;;  %v2746_v25 = vsel %vm2718_vm2, %v2681_v32, %v15847_v59  ;;  %v7313_v63 = vld [vmem:[%s15348_s0 + $0x2a1] sm:$0xff] }
 0x369   :  { %v3068_v29 = vsel %vm3043_vm7, %v3003_v47, %v2254_v6  ;;  %v3004_v2 = vsel %vm2978_vm6, %v2939_v35, %v2000_v0  ;;  %v2811_v16 = vsel %vm2783_vm3, %v2746_v25, %v15848_v42  ;;  %v7688_v47 = vld [vmem:[%s15348_s0 + $0x150] sm:$0xff]  ;;  %v7689_v35 = vld [vmem:[%s15348_s0 + $0x158] sm:$0xff]  ;;  %v7690_v59 = vld [vmem:[%s15348_s0 + $0x168] sm:$0xff] }
 0x36a   :  { %2037 = vrot.lane.b32.xlu1 %v7245_v52, %s7730_s8  ;;  %2547 = vrot.lane.b32.xlu0 %v7372_v56, %s7732_s11  ;;  %v2876_v6 = vsel %vm2848_vm4, %v2811_v16, %v15849_v19  ;;  %v15860_v25 = vld [vmem:[#allocation29_spill] sm:$0xff]  ;;  %v15862_v16 = vld [vmem:[#allocation146_spill] sm:$0xff] }
 0x36b   :  { %v2941_v27 = vsel %vm2913_vm5, %v2876_v6, %v15850_v7  ;;  %v7187_v42 = vld [vmem:[%s15348_s0 + $0x2a2] sm:$0xff] }
 0x36c   :  { %v2510_v14 = vpop.permute.xlu1 %2509  ;;  %v2256_v53 = vpop.permute.xlu0 %2255  ;;  %v15863_v19 = vld [vmem:[#allocation205_spill] sm:$0xff]  ;;  %v15864_v7 = vld [vmem:[#allocation28_spill] sm:$0xff] }
 0x36d   :  { %v3133_v8 = vsel %vm3108_vm8, %v3068_v29, %v2510_v14  ;;  %v3069_v11 = vsel %vm3043_vm7, %v3004_v2, %v2256_v53  ;;  %v7186_v29 = vld [vmem:[%s15348_s0 + $0x292] sm:$0xff]  ;;  %v15853_v14 = vld [vmem:[#allocation144_spill] sm:$0xff] }
 0x36e   :  { %2293 = vrot.lane.b32.xlu1 %v7309_v21, %s7731_s1  ;;  %2039 = vrot.lane.b32.xlu0 %v7246_v49, %s7730_s8  ;;  %v15851_v21 = vld [vmem:[#allocation27_spill] sm:$0xff]  ;;  %v15855_v2 = vld [vmem:[#allocation26_spill] sm:$0xff] }
 0x36f   :  { %7577 = vmatprep.mubr.msk.f32.mxu0 %vm3185_vm9, %v3133_v8  ;;  %v2682_v49 = vsel %vm2653_vm1, %v7688_v47, %v15851_v21  ;;  %v15854_v8 = vld [vmem:[#allocation203_spill] sm:$0xff] }
 0x370   :  { %v2002_v24 = vpop.permute.xlu1 %2001  ;;  %v2512_v44 = vpop.permute.xlu0 %2511  ;;  %v2747_v12 = vsel %vm2718_vm2, %v2682_v49, %v15852_v57 }
 0x371   :  { %v3134_v5 = vsel %vm3108_vm8, %v3069_v11, %v2512_v44  ;;  %v3005_v13 = vsel %vm2978_vm6, %v2940_v60, %v2002_v24  ;;  %v2812_v53 = vsel %vm2783_vm3, %v2747_v12, %v15853_v14  ;;  %v15856_v11 = vld [vmem:[#allocation84_spill] sm:$0xff] }
 0x372   :  { %2549 = vrot.lane.b32.xlu1 %v7373_v37, %s7732_s11  ;;  %2295 = vrot.lane.b32.xlu0 %v7310_v20, %s7731_s1  ;;  %v2877_v3 = vsel %vm2848_vm4, %v2812_v53, %v15854_v8  ;;  %v2683_v37 = vsel %vm2653_vm1, %v7689_v35, %v15855_v2  ;;  %v15868_v12 = vld [vmem:[#allocation204_spill] sm:$0xff]  ;;  %v15869_v53 = vld [vmem:[#allocation253_spill] sm:$0xff]  ;;  %v7251_v35 = vld [vmem:[%s15348_s0 + $0x2b8] sm:$0xff] }
 0x373   :  { %7578 = vmatmul.mubr.msk.f32.gmra.mrb[24].mxu0 %vm3185_vm9, %v3134_v5  ;;  %v2942_v20 = vsel %vm2913_vm5, %v2877_v3, %v9816_v36  ;;  %v2748_v24 = vsel %vm2718_vm2, %v2683_v37, %v15856_v11  ;;  %v7250_v5 = vld [vmem:[%s15348_s0 + $0x2a8] sm:$0xff]  ;;  %v7252_v3 = vld [vmem:[%s15348_s0 + $0x2c0] sm:$0xff] }
 0x374   :  { %v2258_v54 = vpop.permute.xlu1 %2257  ;;  %v2004_v4 = vpop.permute.xlu0 %2003  ;;  %v2813_v36 = vsel %vm2783_vm3, %v2748_v24, %v15857_v31  ;;  %v15870_v24 = vld [vmem:[#allocation31_spill] sm:$0xff] }
 0x375   :  { %v3070_v52 = vsel %vm3043_vm7, %v3005_v13, %v2258_v54  ;;  %v3006_v9 = vsel %vm2978_vm6, %v2941_v27, %v2004_v4  ;;  %v2684_v13 = vsel %vm2653_vm1, %v7690_v59, %v15860_v25 }
 0x376   :  { %2041 = vrot.lane.b32.xlu1 %v7247_v15, %s7730_s8  ;;  %2551 = vrot.lane.b32.xlu0 %v7374_v48, %s7732_s11  ;;  %v15858_v15 = vld [vmem:[#allocation202_spill] sm:$0xff] }
 0x377   :  { %v2878_v48 = vsel %vm2848_vm4, %v2813_v36, %v15858_v15  ;;  %v7316_v36 = vld [vmem:[%s15348_s0 + $0x2c1] sm:$0xff] }
 0x378   :  { %v2514_v56 = vpop.permute.xlu1 %2513  ;;  %v2260_v30 = vpop.permute.xlu0 %2259  ;;  %v2943_v54 = vsel %vm2913_vm5, %v2878_v48, %v15859_v46 }
 0x379   :  { %v3135_v0 = vsel %vm3108_vm8, %v3070_v52, %v2514_v56  ;;  %v3071_v18 = vsel %vm3043_vm7, %v3006_v9, %v2260_v30  ;;  %v15865_v9 = vld [vmem:[#allocation254_spill] sm:$0xff] }
 0x37a   :  { %2297 = vrot.lane.b32.xlu1 %v7311_v50, %s7731_s1  ;;  %2043 = vrot.lane.b32.xlu0 %v7248_v22, %s7730_s8  ;;  %v15861_v50 = vld [vmem:[#allocation87_spill] sm:$0xff] }
 0x37b   :  { %7580 = vmatprep.mubr.msk.f32.mxu0 %vm3185_vm9, %v3135_v0  ;;  %v2749_v22 = vsel %vm2718_vm2, %v2684_v13, %v15861_v50  ;;  %v7691_v0 = vld [vmem:[%s15348_s0 + $0x170] sm:$0xff]  ;;  %v15877_v50 = vld [vmem:[#allocation208_spill] sm:$0xff] }
 0x37c   :  { %v2006_v58 = vpop.permute.xlu1 %2005  ;;  %v2516_v43 = vpop.permute.xlu0 %2515  ;;  %v2814_v52 = vsel %vm2783_vm3, %v2749_v22, %v15862_v16  ;;  %v2685_v27 = vsel %vm2653_vm1, %v7691_v0, %v15864_v7  ;;  %v15878_v16 = vld [vmem:[#allocation255_spill] sm:$0xff] }
 0x37d   :  { %v3136_v10 = vsel %vm3108_vm8, %v3071_v18, %v2516_v43  ;;  %v3007_v44 = vsel %vm2978_vm6, %v2942_v20, %v2006_v58  ;;  %v2879_v6 = vsel %vm2848_vm4, %v2814_v52, %v15863_v19  ;;  %v7188_v43 = vld [vmem:[%s15348_s0 + $0x2aa] sm:$0xff] }
 0x37e   :  { %2553 = vrot.lane.b32.xlu1 %v7375_v28, %s7732_s11  ;;  %2299 = vrot.lane.b32.xlu0 %v7312_v38, %s7731_s1  ;;  %v2944_v28 = vsel %vm2913_vm5, %v2879_v6, %v15865_v9  ;;  %v15866_v38 = vld [vmem:[#allocation86_spill] sm:$0xff]  ;;  %v15879_v9 = vld [vmem:[#allocation33_spill] sm:$0xff] }
 0x37f   :  { %7581 = vmatmul.mubr.msk.f32.gmra.mrb[26].mxu0 %vm3185_vm9, %v3136_v10  ;;  %v2750_v18 = vsel %vm2718_vm2, %v2685_v27, %v15866_v38  ;;  %v15867_v10 = vld [vmem:[#allocation145_spill] sm:$0xff]  ;;  %v15880_v38 = vld [vmem:[#allocation91_spill] sm:$0xff] }
 0x380   :  { %v2262_v61 = vpop.permute.xlu1 %2261  ;;  %v2008_v23 = vpop.permute.xlu0 %2007  ;;  %v2815_v47 = vsel %vm2783_vm3, %v2750_v18, %v15867_v10  ;;  %v7692_v27 = vld [vmem:[%s15348_s0 + $0x1c8] sm:$0xff]  ;;  %v15881_v10 = vld [vmem:[#allocation150_spill] sm:$0xff] }
 0x381   :  { %v3072_v62 = vsel %vm3043_vm7, %v3007_v44, %v2262_v61  ;;  %v3008_v4 = vsel %vm2978_vm6, %v2943_v54, %v2008_v23  ;;  %v59_v23 = vld [vmem:[%s15348_s0 + $0x1b0] sm:$0xff] }
 0x382   :  { %1791 = vrot.lane.b32.xlu1 %v7186_v29, %s7729_s12  ;;  %2555 = vrot.lane.b32.xlu0 %v7186_v29, %s7732_s11  ;;  %v2880_v29 = vsel %vm2848_vm4, %v2815_v47, %v15868_v12  ;;  %v2686_v44 = vsel %vm2653_vm1, %v59_v23, %v15870_v24  ;;  %v15874_v54 = vld [vmem:[#allocation30_spill] sm:$0xff] }
 0x383   :  { %v2945_v61 = vsel %vm2913_vm5, %v2880_v29, %v15869_v53  ;;  %v7693_v29 = vld [vmem:[%s15348_s0 + $0x1d0] sm:$0xff] }
 0x384   :  { %v2518_v41 = vpop.permute.xlu1 %2517  ;;  %v2264_v51 = vpop.permute.xlu0 %2263  ;;  %v15884_v23 = vld [vmem:[#allocation90_spill] sm:$0xff] }
 0x385   :  { %v3137_v26 = vsel %vm3108_vm8, %v3072_v62, %v2518_v41  ;;  %v3073_v1 = vsel %vm3043_vm7, %v3008_v4, %v2264_v51  ;;  %v7315_v62 = vld [vmem:[%s15348_s0 + $0x2b9] sm:$0xff] }
 0x386   :  { %2047 = vrot.lane.b32.xlu1 %v7250_v5, %s7730_s8  ;;  %2045 = vrot.lane.b32.xlu0 %v7249_v40, %s7730_s8  ;;  %v60_v5 = vld [vmem:[%s15348_s0 + $0x1b8] sm:$0xff]  ;;  %v15871_v40 = vld [vmem:[#allocation89_spill] sm:$0xff]  ;;  %v15872_v41 = vld [vmem:[#allocation148_spill] sm:$0xff] }
 0x387   :  { %7583 = vmatprep.mubr.msk.f32.mxu0 %vm3185_vm9, %v3137_v26  ;;  %v2751_v31 = vsel %vm2718_vm2, %v2686_v44, %v15871_v40  ;;  %v15873_v26 = vld [vmem:[#allocation209_spill] sm:$0xff]  ;;  %v2687_v4 = vsel %vm2653_vm1, %v60_v5, %v15874_v54  ;;  %v15886_v44 = vld [vmem:[#allocation212_spill] sm:$0xff]  ;;  %v15888_v54 = vld [vmem:[#allocation35_spill] sm:$0xff] }
 0x388   :  { %v2010_v39 = vpop.permute.xlu1 %2009  ;;  %v2520_v32 = vpop.permute.xlu0 %2519  ;;  %v2816_v51 = vsel %vm2783_vm3, %v2751_v31, %v15872_v41  ;;  %v15887_v31 = vld [vmem:[#allocation256_spill] sm:$0xff]  ;;  %v7191_v41 = vld [vmem:[%s15348_s0 + $0x2d2] sm:$0xff] }
 0x389   :  { %v3138_v60 = vsel %vm3108_vm8, %v3073_v1, %v2520_v32  ;;  %v3009_v58 = vsel %vm2978_vm6, %v2944_v28, %v2010_v39  ;;  %v2881_v46 = vsel %vm2848_vm4, %v2816_v51, %v15873_v26  ;;  %v7189_v32 = vld [vmem:[%s15348_s0 + $0x2ba] sm:$0xff]  ;;  %v2688_v28 = vsel %vm2653_vm1, %v7692_v27, %v15879_v9 }
 0x38a   :  { %2303 = vrot.lane.b32.xlu1 %v7314_v33, %s7731_s1  ;;  %2301 = vrot.lane.b32.xlu0 %v7313_v63, %s7731_s1  ;;  %v2946_v33 = vsel %vm2913_vm5, %v2881_v46, %v9835_v45  ;;  %v15875_v63 = vld [vmem:[#allocation88_spill] sm:$0xff]  ;;  %v2753_v18 = vsel %vm2718_vm2, %v2688_v28, %v15880_v38 }
 0x38b   :  { %7584 = vmatmul.mubr.msk.f32.gmra.mrb[28].mxu0 %vm3185_vm9, %v3138_v60  ;;  %v2752_v1 = vsel %vm2718_vm2, %v2687_v4, %v15875_v63  ;;  %v15876_v60 = vld [vmem:[#allocation147_spill] sm:$0xff]  ;;  %v2818_v47 = vsel %vm2783_vm3, %v2753_v18, %v15881_v10  ;;  %v7694_v46 = vld [vmem:[%s15348_s0 + $0x1e0] sm:$0xff] }
 0x38c   :  { %v2266_v56 = vpop.permute.xlu1 %2265  ;;  %v2012_v30 = vpop.permute.xlu0 %2011  ;;  %v2817_v59 = vsel %vm2783_vm3, %v2752_v1, %v15876_v60  ;;  %v2690_v4 = vsel %vm2653_vm1, %v7694_v46, %v15888_v54  ;;  %v7192_v1 = vld [vmem:[%s15348_s0 + $0x2da] sm:$0xff] }
 0x38d   :  { %v3074_v21 = vsel %vm3043_vm7, %v3009_v58, %v2266_v56  ;;  %v3010_v8 = vsel %vm2978_vm6, %v2945_v61, %v2012_v30  ;;  %v2882_v22 = vsel %vm2848_vm4, %v2817_v59, %v15877_v50  ;;  %v7190_v30 = vld [vmem:[%s15348_s0 + $0x2c2] sm:$0xff]  ;;  %v7254_v58 = vld [vmem:[%s15348_s0 + $0x2d8] sm:$0xff]  ;;  %v15892_v50 = vld [vmem:[#allocation34_spill] sm:$0xff] }
 0x38e   :  { %1793 = vrot.lane.b32.xlu1 %v7187_v42, %s7729_s12  ;;  %2557 = vrot.lane.b32.xlu0 %v7187_v42, %s7732_s11  ;;  %v2947_v52 = vsel %vm2913_vm5, %v2882_v22, %v15878_v16  ;;  %v15896_v38 = vld [vmem:[#allocation216_spill] sm:$0xff] }
 0x390   :  { %v2522_v49 = vpop.permute.xlu1 %2521  ;;  %v2268_v57 = vpop.permute.xlu0 %2267 }
 0x391   :  { %v3139_v14 = vsel %vm3108_vm8, %v3074_v21, %v2522_v49  ;;  %v3075_v2 = vsel %vm3043_vm7, %v3010_v8, %v2268_v57  ;;  %v15882_v57 = vld [vmem:[#allocation213_spill] sm:$0xff] }
 0x392   :  { %1795 = vrot.lane.b32.xlu1 %v7188_v43, %s7729_s12  ;;  %2559 = vrot.lane.b32.xlu0 %v7188_v43, %s7732_s11  ;;  %v7253_v43 = vld [vmem:[%s15348_s0 + $0x2d0] sm:$0xff]  ;;  %v2883_v12 = vsel %vm2848_vm4, %v2818_v47, %v15882_v57 }
 0x393   :  { %7586 = vmatprep.mubr.msk.f32.mxu0 %vm3185_vm9, %v3139_v14  ;;  %v15883_v14 = vld [vmem:[#allocation32_spill] sm:$0xff]  ;;  %v2948_v61 = vsel %vm2913_vm5, %v2883_v12, %v9848_v55  ;;  %v7320_v57 = vld [vmem:[%s15348_s0 + $0x2f1] sm:$0xff]  ;;  %v7319_v12 = vld [vmem:[%s15348_s0 + $0x2e9] sm:$0xff] }
 0x394   :  { %v2014_v37 = vpop.permute.xlu1 %2013  ;;  %v2524_v20 = vpop.permute.xlu0 %2523  ;;  %v2689_v53 = vsel %vm2653_vm1, %v7693_v29, %v15883_v14 }
 0x395   :  { %v3140_v11 = vsel %vm3108_vm8, %v3075_v2, %v2524_v20  ;;  %v3011_v39 = vsel %vm2978_vm6, %v2946_v33, %v2014_v37  ;;  %v2754_v8 = vsel %vm2718_vm2, %v2689_v53, %v15884_v23  ;;  %v7317_v2 = vld [vmem:[%s15348_s0 + $0x2d1] sm:$0xff]  ;;  %v15885_v37 = vld [vmem:[#allocation149_spill] sm:$0xff] }
 0x396   :  { %2051 = vrot.lane.b32.xlu1 %v7252_v3, %s7730_s8  ;;  %2049 = vrot.lane.b32.xlu0 %v7251_v35, %s7730_s8  ;;  %v7318_v35 = vld [vmem:[%s15348_s0 + $0x2d9] sm:$0xff]  ;;  %v2819_v55 = vsel %vm2783_vm3, %v2754_v8, %v15885_v37  ;;  %v15889_v33 = vld [vmem:[#allocation93_spill] sm:$0xff] }
 0x397   :  { %7587 = vmatmul.mubr.msk.f32.gmra.mrb[30].mxu0 %vm3185_vm9, %v3140_v11  ;;  %v2884_v5 = vsel %vm2848_vm4, %v2819_v55, %v15886_v44  ;;  %v2755_v63 = vsel %vm2718_vm2, %v2690_v4, %v15889_v33  ;;  %v7696_v23 = vld [vmem:[%s15348_s0 + $0x1f8] sm:$0xff]  ;;  %v15898_v8 = vld [vmem:[#allocation37_spill] sm:$0xff]  ;;  %v15900_v55 = vld [vmem:[#allocation154_spill] sm:$0xff] }
 0x398   :  { %v2270_v15 = vpop.permute.xlu1 %2269  ;;  %v2016_v48 = vpop.permute.xlu0 %2015  ;;  %v7193_v37 = vld [vmem:[%s15348_s0 + $0x2ea] sm:$0xff]  ;;  %v15901_v44 = vld [vmem:[#allocation219_spill] sm:$0xff] }
 0x399   :  { %v3076_v25 = vsel %vm3043_vm7, %v3011_v39, %v2270_v15  ;;  %v3012_v56 = vsel %vm2978_vm6, %v2947_v52, %v2016_v48  ;;  %v15890_v39 = vld [vmem:[#allocation152_spill] sm:$0xff]  ;;  %v15905_v33 = vld [vmem:[#allocation218_spill] sm:$0xff] }
 0x39a   :  { %2307 = vrot.lane.b32.xlu1 %v7316_v36, %s7731_s1  ;;  %2305 = vrot.lane.b32.xlu0 %v7315_v62, %s7731_s1  ;;  %v2949_v36 = vsel %vm2913_vm5, %v2884_v5, %v15887_v31  ;;  %v15894_v52 = vld [vmem:[#allocation92_spill] sm:$0xff] }
 0x39b   :  { %v15902_v31 = vld [vmem:[#allocation36_spill] sm:$0xff] }
 0x39c   :  { %v2526_v13 = vpop.permute.xlu1 %2525  ;;  %v2272_v45 = vpop.permute.xlu0 %2271 }
 0x39d   :  { %v3141_v42 = vsel %vm3108_vm8, %v3076_v25, %v2526_v13  ;;  %v3077_v19 = vsel %vm3043_vm7, %v3012_v56, %v2272_v45  ;;  %v15891_v25 = vld [vmem:[#allocation217_spill] sm:$0xff] }
 0x39e   :  { %1797 = vrot.lane.b32.xlu1 %v7189_v32, %s7729_s12  ;;  %2561 = vrot.lane.b32.xlu0 %v7189_v32, %s7732_s11  ;;  %v2820_v32 = vsel %vm2783_vm3, %v2755_v63, %v15890_v39  ;;  %v7695_v45 = vld [vmem:[%s15348_s0 + $0x1e8] sm:$0xff]  ;;  %v15906_v39 = vld [vmem:[#allocation259_spill] sm:$0xff] }
 0x39f   :  { %7589 = vmatprep.mubr.msk.f32.mxu1 %vm3185_vm9, %v3141_v42  ;;  %v2885_v13 = vsel %vm2848_vm4, %v2820_v32, %v15891_v25  ;;  %v2691_v22 = vsel %vm2653_vm1, %v7695_v45, %v15892_v50  ;;  %v15893_v42 = vld [vmem:[#allocation258_spill] sm:$0xff]  ;;  %v7257_v45 = vld [vmem:[%s15348_s0 + $0x300] sm:$0xff] }
 0x3a0   :  { %v2018_v6 = vpop.permute.xlu1 %2017  ;;  %v2528_v0 = vpop.permute.xlu0 %2527  ;;  %v2950_v16 = vsel %vm2913_vm5, %v2885_v13, %v15893_v42  ;;  %v2756_v56 = vsel %vm2718_vm2, %v2691_v22, %v15894_v52  ;;  %v7258_v13 = vld [vmem:[%s15348_s0 + $0x308] sm:$0xff]  ;;  %v7698_v52 = vld [vmem:[%s15348_s0 + $0x210] sm:$0xff] }
 0x3a1   :  { %v3142_v7 = vsel %vm3108_vm8, %v3077_v19, %v2528_v0  ;;  %v3013_v3 = vsel %vm2978_vm6, %v2948_v61, %v2018_v6  ;;  %v7256_v19 = vld [vmem:[%s15348_s0 + $0x2f0] sm:$0xff]  ;;  %v7255_v6 = vld [vmem:[%s15348_s0 + $0x2e8] sm:$0xff]  ;;  %v15895_v0 = vld [vmem:[#allocation151_spill] sm:$0xff] }
 0x3a2   :  { %1799 = vrot.lane.b32.xlu1 %v7190_v30, %s7729_s12  ;;  %2563 = vrot.lane.b32.xlu0 %v7190_v30, %s7732_s11 }
 0x3a3   :  { %7590 = vmatmul.mubr.msk.f32.vlgmr.msra.gmra.mrb[0].mxu1 %vm3185_vm9, %v3142_v7  ;;  %v2821_v7 = vsel %vm2783_vm3, %v2756_v56, %v15895_v0  ;;  %v15907_v56 = vld [vmem:[#allocation39_spill] sm:$0xff]  ;;  %v7322_v0 = vld [vmem:[%s15348_s0 + $0x309] sm:$0xff] }
 0x3a4   :  { %v2274_v21 = vpop.permute.xlu1 %2273  ;;  %v2020_v49 = vpop.permute.xlu0 %2019  ;;  %v2886_v18 = vsel %vm2848_vm4, %v2821_v7, %v15896_v38  ;;  %v7321_v7 = vld [vmem:[%s15348_s0 + $0x301] sm:$0xff] }
 0x3a5   :  { %v3078_v20 = vsel %vm3043_vm7, %v3013_v3, %v2274_v21  ;;  %v3014_v62 = vsel %vm2978_vm6, %v2949_v36, %v2020_v49  ;;  %v2692_v3 = vsel %vm2653_vm1, %v7696_v23, %v15898_v8 }
 0x3a6   :  { %2055 = vrot.lane.b32.xlu1 %v7254_v58, %s7730_s8  ;;  %2053 = vrot.lane.b32.xlu0 %v7253_v43, %s7730_s8  ;;  %v15897_v43 = vld [vmem:[#allocation257_spill] sm:$0xff] }
 0x3a7   :  { %v2951_v10 = vsel %vm2913_vm5, %v2886_v18, %v15897_v43  ;;  %v15910_v18 = vld [vmem:[#allocation223_spill] sm:$0xff] }
 0x3a8   :  { %v2530_v11 = vpop.permute.xlu1 %2529  ;;  %v2276_v24 = vpop.permute.xlu0 %2275  ;;  %v7699_v43 = vld [vmem:[%s15348_s0 + $0x218] sm:$0xff] }
 0x3a9   :  { %v3143_v40 = vsel %vm3108_vm8, %v3078_v20, %v2530_v11  ;;  %v3079_v51 = vsel %vm3043_vm7, %v3014_v62, %v2276_v24 }
 0x3aa   :  { %2311 = vrot.lane.b32.xlu1 %v7318_v35, %s7731_s1  ;;  %2309 = vrot.lane.b32.xlu0 %v7317_v2, %s7731_s1  ;;  %v15899_v35 = vld [vmem:[#allocation95_spill] sm:$0xff] }
 0x3ab   :  { %7592 = vmatprep.mubr.msk.f32.mxu1 %vm3185_vm9, %v3143_v40  ;;  %v2757_v2 = vsel %vm2718_vm2, %v2692_v3, %v15899_v35  ;;  %v7697_v40 = vld [vmem:[%s15348_s0 + $0x200] sm:$0xff]  ;;  %v15914_v35 = vld [vmem:[#allocation222_spill] sm:$0xff] }
 0x3ac   :  { %v2022_v15 = vpop.permute.xlu1 %2021  ;;  %v2532_v48 = vpop.permute.xlu0 %2531  ;;  %v2822_v20 = vsel %vm2783_vm3, %v2757_v2, %v15900_v55  ;;  %v2693_v36 = vsel %vm2653_vm1, %v7697_v40, %v15902_v31  ;;  %v15915_v55 = vld [vmem:[#allocation260_spill] sm:$0xff] }
 0x3ad   :  { %v3144_v26 = vsel %vm3108_vm8, %v3079_v51, %v2532_v48  ;;  %v3015_v30 = vsel %vm2978_vm6, %v2950_v16, %v2022_v15  ;;  %v2887_v5 = vsel %vm2848_vm4, %v2822_v20, %v15901_v44  ;;  %v7194_v48 = vld [vmem:[%s15348_s0 + $0x2f2] sm:$0xff] }
 0x3ae   :  { %1801 = vrot.lane.b32.xlu1 %v7191_v41, %s7729_s12  ;;  %2565 = vrot.lane.b32.xlu0 %v7191_v41, %s7732_s11  ;;  %v2952_v62 = vsel %vm2913_vm5, %v2887_v5, %v9867_v17  ;;  %v15903_v41 = vld [vmem:[#allocation94_spill] sm:$0xff] }
 0x3af   :  { %7593 = vmatmul.mubr.msk.f32.gmra.mrb[2].mxu1 %vm3185_vm9, %v3144_v26  ;;  %v2758_v51 = vsel %vm2718_vm2, %v2693_v36, %v15903_v41  ;;  %v15904_v26 = vld [vmem:[#allocation153_spill] sm:$0xff] }
 0x3b0   :  { %v2278_v60 = vpop.permute.xlu1 %2277  ;;  %v2024_v59 = vpop.permute.xlu0 %2023  ;;  %v2823_v46 = vsel %vm2783_vm3, %v2758_v51, %v15904_v26  ;;  %v7196_v5 = vld [vmem:[%s15348_s0 + $0x30a] sm:$0xff] }
 0x3b1   :  { %v3080_v27 = vsel %vm3043_vm7, %v3015_v30, %v2278_v60  ;;  %v3016_v21 = vsel %vm2978_vm6, %v2951_v10, %v2024_v59  ;;  %v2888_v63 = vsel %vm2848_vm4, %v2823_v46, %v15905_v33  ;;  %v2694_v30 = vsel %vm2653_vm1, %v7698_v52, %v15907_v56  ;;  %v15911_v10 = vld [vmem:[#allocation38_spill] sm:$0xff]  ;;  %v7700_v41 = vld [vmem:[%s15348_s0 + $0x228] sm:$0xff]  ;;  %v7260_v46 = vld [vmem:[%s15348_s0 + $0x320] sm:$0xff] }
 0x3b2   :  { %1803 = vrot.lane.b32.xlu1 %v7192_v1, %s7729_s12  ;;  %2567 = vrot.lane.b32.xlu0 %v7192_v1, %s7732_s11  ;;  %v2953_v32 = vsel %vm2913_vm5, %v2888_v63, %v15906_v39  ;;  %v15916_v51 = vld [vmem:[#allocation41_spill] sm:$0xff]  ;;  %v7323_v56 = vld [vmem:[%s15348_s0 + $0x319] sm:$0xff] }
 0x3b3   :  { %v7324_v52 = vld [vmem:[%s15348_s0 + $0x321] sm:$0xff] }
 0x3b4   :  { %v2534_v9 = vpop.permute.xlu1 %2533  ;;  %v2280_v28 = vpop.permute.xlu0 %2279 }
 0x3b5   :  { %v3145_v58 = vsel %vm3108_vm8, %v3080_v27, %v2534_v9  ;;  %v3081_v29 = vsel %vm3043_vm7, %v3016_v21, %v2280_v28  ;;  %v15909_v27 = vld [vmem:[#allocation156_spill] sm:$0xff]  ;;  %v2695_v21 = vsel %vm2653_vm1, %v7699_v43, %v15911_v10 }
 0x3b6   :  { %v10962_v47 = vpop.f32.mrb[0].mxu0  ;;  %2059 = vrot.lane.b32.xlu1 %v7256_v19, %s7730_s8  ;;  %2057 = vrot.lane.b32.xlu0 %v7255_v6, %s7730_s8  ;;  %v15908_v19 = vld [vmem:[#allocation97_spill] sm:$0xff] }
 0x3b7   :  { %v10967_v49 = vpop.f32.mrb[1].mxu0  ;;  %7595 = vmatprep.mubr.msk.f32.mxu1 %vm3185_vm9, %v3145_v58  ;;  %v2759_v6 = vsel %vm2718_vm2, %v2694_v30, %v15908_v19  ;;  %v15923_v30 = vld [vmem:[#allocation157_spill] sm:$0xff] }
 0x3b8   :  { %v2026_v14 = vpop.permute.xlu1 %2025  ;;  %v2536_v53 = vpop.permute.xlu0 %2535  ;;  %v2824_v9 = vsel %vm2783_vm3, %v2759_v6, %v15909_v27  ;;  %v15924_v27 = vld [vmem:[#allocation225_spill] sm:$0xff] }
 0x3b9   :  { %v3146_v61 = vsel %vm3108_vm8, %v3081_v29, %v2536_v53  ;;  %v3017_v15 = vsel %vm2978_vm6, %v2952_v62, %v2026_v14  ;;  %v2889_v58 = vsel %vm2848_vm4, %v2824_v9, %v15910_v18  ;;  %v7195_v53 = vld [vmem:[%s15348_s0 + $0x302] sm:$0xff] }
 0x3ba   :  { %2315 = vrot.lane.b32.xlu1 %v7320_v57, %s7731_s1  ;;  %2313 = vrot.lane.b32.xlu0 %v7319_v12, %s7731_s1  ;;  %v2954_v57 = vsel %vm2913_vm5, %v2889_v58, %v9880_v34  ;;  %v15912_v12 = vld [vmem:[#allocation96_spill] sm:$0xff] }
 0x3bb   :  { %7596 = vmatmul.mubr.msk.f32.gmra.mrb[4].mxu1 %vm3185_vm9, %v3146_v61  ;;  %v2760_v29 = vsel %vm2718_vm2, %v2695_v21, %v15912_v12  ;;  %v15913_v61 = vld [vmem:[#allocation155_spill] sm:$0xff] }
 0x3bc   :  { %v2282_v11 = vpop.permute.xlu1 %2281  ;;  %v2028_v24 = vpop.permute.xlu0 %2027  ;;  %v2825_v23 = vsel %vm2783_vm3, %v2760_v29, %v15913_v61  ;;  %v7197_v21 = vld [vmem:[%s15348_s0 + $0x31a] sm:$0xff] }
 0x3bd   :  { %v3082_v54 = vsel %vm3043_vm7, %v3017_v15, %v2282_v11  ;;  %v3018_v59 = vsel %vm2978_vm6, %v2953_v32, %v2028_v24  ;;  %v2890_v2 = vsel %vm2848_vm4, %v2825_v23, %v15914_v35  ;;  %v2696_v15 = vsel %vm2653_vm1, %v7700_v41, %v15916_v51  ;;  %v7701_v32 = vld [vmem:[%s15348_s0 + $0x230] sm:$0xff]  ;;  %v15926_v61 = vld [vmem:[#allocation43_spill] sm:$0xff]  ;;  %v15928_v35 = vld [vmem:[#allocation160_spill] sm:$0xff] }
 0x3be   :  { %1805 = vrot.lane.b32.xlu1 %v7193_v37, %s7729_s12  ;;  %2569 = vrot.lane.b32.xlu0 %v7193_v37, %s7732_s11  ;;  %v2955_v20 = vsel %vm2913_vm5, %v2890_v2, %v15915_v55  ;;  %v15932_v41 = vld [vmem:[#allocation100_spill] sm:$0xff] }
 0x3c0   :  { %v2538_v4 = vpop.permute.xlu1 %2537  ;;  %v2284_v17 = vpop.permute.xlu0 %2283 }
 0x3c1   :  { %v3147_v1 = vsel %vm3108_vm8, %v3082_v54, %v2538_v4  ;;  %v3083_v50 = vsel %vm3043_vm7, %v3018_v59, %v2284_v17  ;;  %v7259_v54 = vld [vmem:[%s15348_s0 + $0x318] sm:$0xff]  ;;  %v15918_v4 = vld [vmem:[#allocation158_spill] sm:$0xff]  ;;  %v15920_v59 = vld [vmem:[#allocation40_spill] sm:$0xff] }
 0x3c2   :  { %v11018_v60 = vpop.f32.mrb[2].mxu0  ;;  %1807 = vrot.lane.b32.xlu1 %v7194_v48, %s7729_s12  ;;  %2571 = vrot.lane.b32.xlu0 %v7194_v48, %s7732_s11  ;;  %v15917_v48 = vld [vmem:[#allocation99_spill] sm:$0xff] }
 0x3c3   :  { %v11023_v25 = vpop.f32.mrb[3].mxu0  ;;  %7598 = vmatprep.mubr.msk.f32.mxu1 %vm3185_vm9, %v3147_v1  ;;  %v2761_v26 = vsel %vm2718_vm2, %v2696_v15, %v15917_v48  ;;  %v15919_v1 = vld [vmem:[#allocation226_spill] sm:$0xff]  ;;  %v7262_v48 = vld [vmem:[%s15348_s0 + $0x338] sm:$0xff] }
 0x3c4   :  { %v2030_v22 = vpop.permute.xlu1 %2029  ;;  %v2540_v42 = vpop.permute.xlu0 %2539  ;;  %v2826_v17 = vsel %vm2783_vm3, %v2761_v26, %v15918_v4  ;;  %v7261_v26 = vld [vmem:[%s15348_s0 + $0x330] sm:$0xff] }
 0x3c5   :  { %v3148_v16 = vsel %vm3108_vm8, %v3083_v50, %v2540_v42  ;;  %v3019_v14 = vsel %vm2978_vm6, %v2954_v57, %v2030_v22  ;;  %v2891_v39 = vsel %vm2848_vm4, %v2826_v17, %v15919_v1  ;;  %v15922_v22 = vld [vmem:[#allocation98_spill] sm:$0xff] }
 0x3c6   :  { %2063 = vrot.lane.b32.xlu1 %v7258_v13, %s7730_s8  ;;  %2061 = vrot.lane.b32.xlu0 %v7257_v45, %s7730_s8  ;;  %v2697_v13 = vsel %vm2653_vm1, %v7701_v32, %v15920_v59  ;;  %v15921_v45 = vld [vmem:[#allocation262_spill] sm:$0xff]  ;;  %v15935_v32 = vld [vmem:[#allocation263_spill] sm:$0xff] }
 0x3c7   :  { %7599 = vmatmul.mubr.msk.f32.gmra.mrb[6].mxu1 %vm3185_vm9, %v3148_v16  ;;  %v2956_v50 = vsel %vm2913_vm5, %v2891_v39, %v15921_v45  ;;  %v2762_v42 = vsel %vm2718_vm2, %v2697_v13, %v15922_v22  ;;  %v7326_v22 = vld [vmem:[%s15348_s0 + $0x339] sm:$0xff] }
 0x3c8   :  { %v2286_v28 = vpop.permute.xlu1 %2285  ;;  %v2032_v38 = vpop.permute.xlu0 %2031  ;;  %v2827_v19 = vsel %vm2783_vm3, %v2762_v42, %v15923_v30  ;;  %v7325_v42 = vld [vmem:[%s15348_s0 + $0x331] sm:$0xff] }
 0x3c9   :  { %v3084_v8 = vsel %vm3043_vm7, %v3019_v14, %v2286_v28  ;;  %v3020_v24 = vsel %vm2978_vm6, %v2955_v20, %v2032_v38  ;;  %v2892_v9 = vsel %vm2848_vm4, %v2827_v19, %v15924_v27  ;;  %v15925_v38 = vld [vmem:[#allocation261_spill] sm:$0xff]  ;;  %v15929_v20 = vld [vmem:[#allocation228_spill] sm:$0xff]  ;;  %v7704_v19 = vld [vmem:[%s15348_s0 + $0x258] sm:$0xff] }
 0x3ca   :  { %2319 = vrot.lane.b32.xlu1 %v7322_v0, %s7731_s1  ;;  %2317 = vrot.lane.b32.xlu0 %v7321_v7, %s7731_s1  ;;  %v2957_v18 = vsel %vm2913_vm5, %v2892_v9, %v15925_v38  ;;  %v7199_v9 = vld [vmem:[%s15348_s0 + $0x332] sm:$0xff] }
 0x3cc   :  { %v2542_v3 = vpop.permute.xlu1 %2541  ;;  %v2288_v34 = vpop.permute.xlu0 %2287 }
 0x3cd   :  { %v3149_v37 = vsel %vm3108_vm8, %v3084_v8, %v2542_v3  ;;  %v3085_v40 = vsel %vm3043_vm7, %v3020_v24, %v2288_v34  ;;  %v15927_v8 = vld [vmem:[#allocation101_spill] sm:$0xff] }
 0x3ce   :  { %v11077_v11 = vpop.f32.mrb[4].mxu0  ;;  %1809 = vrot.lane.b32.xlu1 %v7195_v53, %s7729_s12  ;;  %2573 = vrot.lane.b32.xlu0 %v7195_v53, %s7732_s11  ;;  %v7702_v53 = vld [vmem:[%s15348_s0 + $0x240] sm:$0xff] }
 0x3cf   :  { %v11082_v44 = vpop.f32.mrb[5].mxu0  ;;  %7601 = vmatprep.mubr.msk.f32.mxu1 %vm3185_vm9, %v3149_v37  ;;  %v2698_v23 = vsel %vm2653_vm1, %v7702_v53, %v15926_v61  ;;  %v7198_v34 = vld [vmem:[%s15348_s0 + $0x322] sm:$0xff]  ;;  %v15941_v53 = vld [vmem:[#allocation266_spill] sm:$0xff] }
 0x3d0   :  { %v2034_v31 = vpop.permute.xlu1 %2033  ;;  %v2544_v36 = vpop.permute.xlu0 %2543  ;;  %v2763_v3 = vsel %vm2718_vm2, %v2698_v23, %v15927_v8  ;;  %v15942_v23 = vld [vmem:[#allocation102_spill] sm:$0xff] }
 0x3d1   :  { %v3150_v62 = vsel %vm3108_vm8, %v3085_v40, %v2544_v36  ;;  %v3021_v16 = vsel %vm2978_vm6, %v2956_v50, %v2034_v31  ;;  %v2828_v2 = vsel %vm2783_vm3, %v2763_v3, %v15928_v35  ;;  %v15930_v40 = vld [vmem:[#allocation42_spill] sm:$0xff]  ;;  %v15931_v36 = vld [vmem:[#allocation264_spill] sm:$0xff]  ;;  %v15943_v35 = vld [vmem:[#allocation161_spill] sm:$0xff] }
 0x3d2   :  { %1811 = vrot.lane.b32.xlu1 %v7196_v5, %s7729_s12  ;;  %2575 = vrot.lane.b32.xlu0 %v7196_v5, %s7732_s11  ;;  %v2893_v24 = vsel %vm2848_vm4, %v2828_v2, %v15929_v20  ;;  %v7703_v5 = vld [vmem:[%s15348_s0 + $0x248] sm:$0xff] }
 0x3d3   :  { %7602 = vmatmul.mubr.msk.f32.gmra.mrb[8].mxu1 %vm3185_vm9, %v3150_v62  ;;  %v2699_v31 = vsel %vm2653_vm1, %v7703_v5, %v15930_v40  ;;  %v2958_v62 = vsel %vm2913_vm5, %v2893_v24, %v15931_v36  ;;  %v15944_v24 = vld [vmem:[#allocation229_spill] sm:$0xff] }
 0x3d4   :  { %v2290_v33 = vpop.permute.xlu1 %2289  ;;  %v2036_v63 = vpop.permute.xlu0 %2035  ;;  %v2764_v51 = vsel %vm2718_vm2, %v2699_v31, %v15932_v41  ;;  %v15945_v31 = vld [vmem:[#allocation265_spill] sm:$0xff] }
 0x3d5   :  { %v3086_v6 = vsel %vm3043_vm7, %v3021_v16, %v2290_v33  ;;  %v3022_v43 = vsel %vm2978_vm6, %v2957_v18, %v2036_v63  ;;  %v15934_v63 = vld [vmem:[#allocation227_spill] sm:$0xff] }
 0x3d6   :  { %2067 = vrot.lane.b32.xlu1 %v7260_v46, %s7730_s8  ;;  %2065 = vrot.lane.b32.xlu0 %v7259_v54, %s7730_s8  ;;  %v15933_v46 = vld [vmem:[#allocation159_spill] sm:$0xff] }
 0x3d7   :  { %v2829_v54 = vsel %vm2783_vm3, %v2764_v51, %v15933_v46 }
 0x3d8   :  { %v2546_v0 = vpop.permute.xlu1 %2545  ;;  %v2292_v7 = vpop.permute.xlu0 %2291  ;;  %v2894_v1 = vsel %vm2848_vm4, %v2829_v54, %v15934_v63 }
 0x3d9   :  { %v3151_v28 = vsel %vm3108_vm8, %v3086_v6, %v2546_v0  ;;  %v3087_v57 = vsel %vm3043_vm7, %v3022_v43, %v2292_v7  ;;  %v2959_v59 = vsel %vm2913_vm5, %v2894_v1, %v15935_v32  ;;  %v15936_v6 = vld [vmem:[#allocation45_spill] sm:$0xff]  ;;  %v15937_v7 = vld [vmem:[#allocation103_spill] sm:$0xff] }
 0x3da   :  { %v11136_v58 = vpop.f32.mrb[6].mxu0  ;;  %2323 = vrot.lane.b32.xlu1 %v7324_v52, %s7731_s1  ;;  %2321 = vrot.lane.b32.xlu0 %v7323_v56, %s7731_s1  ;;  %v2700_v0 = vsel %vm2653_vm1, %v7704_v19, %v15936_v6  ;;  %v15946_v32 = vld [vmem:[#allocation47_spill] sm:$0xff]  ;;  %v15949_v6 = vld [vmem:[#allocation232_spill] sm:$0xff] }
 0x3db   :  { %v11141_v10 = vpop.f32.mrb[7].mxu0  ;;  %7604 = vmatprep.mubr.msk.f32.mxu1 %vm3185_vm9, %v3151_v28  ;;  %v2765_v27 = vsel %vm2718_vm2, %v2700_v0, %v15937_v7  ;;  %v15938_v28 = vld [vmem:[#allocation162_spill] sm:$0xff]  ;;  %v7707_v7 = vld [vmem:[%s15348_s0 + $0x278] sm:$0xff] }
 0x3dc   :  { %v2038_v12 = vpop.permute.xlu1 %2037  ;;  %v2548_v29 = vpop.permute.xlu0 %2547  ;;  %v2830_v38 = vsel %vm2783_vm3, %v2765_v27, %v15938_v28  ;;  %v15950_v27 = vld [vmem:[#allocation46_spill] sm:$0xff]  ;;  %v15951_v28 = vld [vmem:[#allocation267_spill] sm:$0xff] }
 0x3dd   :  { %v3152_v14 = vsel %vm3108_vm8, %v3087_v57, %v2548_v29  ;;  %v3023_v15 = vsel %vm2978_vm6, %v2958_v62, %v2038_v12  ;;  %v7705_v12 = vld [vmem:[%s15348_s0 + $0x260] sm:$0xff] }
 0x3de   :  { %1813 = vrot.lane.b32.xlu1 %v7197_v21, %s7729_s12  ;;  %2577 = vrot.lane.b32.xlu0 %v7197_v21, %s7732_s11  ;;  %v15939_v21 = vld [vmem:[#allocation230_spill] sm:$0xff]  ;;  %v15940_v29 = vld [vmem:[#allocation44_spill] sm:$0xff] }
 0x3df   :  { %7605 = vmatmul.mubr.msk.f32.gmra.mrb[10].mxu1 %vm3185_vm9, %v3152_v14  ;;  %v2895_v57 = vsel %vm2848_vm4, %v2830_v38, %v15939_v21  ;;  %v2701_v14 = vsel %vm2653_vm1, %v7705_v12, %v15940_v29  ;;  %v15953_v29 = vld [vmem:[#allocation163_spill] sm:$0xff] }
 0x3e0   :  { %v2294_v37 = vpop.permute.xlu1 %2293  ;;  %v2040_v55 = vpop.permute.xlu0 %2039  ;;  %v2960_v61 = vsel %vm2913_vm5, %v2895_v57, %v15941_v53  ;;  %v2766_v8 = vsel %vm2718_vm2, %v2701_v14, %v15942_v23 }
 0x3e1   :  { %v3088_v4 = vsel %vm3043_vm7, %v3023_v15, %v2294_v37  ;;  %v3024_v45 = vsel %vm2978_vm6, %v2959_v59, %v2040_v55  ;;  %v2831_v2 = vsel %vm2783_vm3, %v2766_v8, %v15943_v35  ;;  %v7264_v15 = vld [vmem:[%s15348_s0 + $0x350] sm:$0xff]  ;;  %v15954_v8 = vld [vmem:[#allocation231_spill] sm:$0xff] }
 0x3e2   :  { %1815 = vrot.lane.b32.xlu1 %v7198_v34, %s7729_s12  ;;  %2579 = vrot.lane.b32.xlu0 %v7198_v34, %s7732_s11  ;;  %v7200_v34 = vld [vmem:[%s15348_s0 + $0x33a] sm:$0xff]  ;;  %v2896_v5 = vsel %vm2848_vm4, %v2831_v2, %v15944_v24 }
 0x3e3   :  { %v2961_v36 = vsel %vm2913_vm5, %v2896_v5, %v15945_v31  ;;  %v7708_v31 = vld [vmem:[%s15348_s0 + $0x288] sm:$0xff] }
 0x3e4   :  { %v2550_v17 = vpop.permute.xlu1 %2549  ;;  %v2296_v33 = vpop.permute.xlu0 %2295 }
 0x3e5   :  { %v3153_v39 = vsel %vm3108_vm8, %v3088_v4, %v2550_v17  ;;  %v3089_v16 = vsel %vm3043_vm7, %v3024_v45, %v2296_v33  ;;  %v7328_v17 = vld [vmem:[%s15348_s0 + $0x351] sm:$0xff]  ;;  %v7327_v33 = vld [vmem:[%s15348_s0 + $0x349] sm:$0xff] }
 0x3e6   :  { %v11192_v13 = vpop.f32.mrb[8].mxu0  ;;  %2071 = vrot.lane.b32.xlu1 %v7262_v48, %s7730_s8  ;;  %2069 = vrot.lane.b32.xlu0 %v7261_v26, %s7730_s8  ;;  %v7263_v48 = vld [vmem:[%s15348_s0 + $0x348] sm:$0xff] }
 0x3e7   :  { %v11197_v50 = vpop.f32.mrb[9].mxu0  ;;  %7607 = vmatprep.mubr.msk.f32.mxu1 %vm3185_vm9, %v3153_v39  ;;  %v7706_v39 = vld [vmem:[%s15348_s0 + $0x270] sm:$0xff]  ;;  %v15947_v45 = vld [vmem:[#allocation105_spill] sm:$0xff] }
 0x3e8   :  { %v2042_v52 = vpop.permute.xlu1 %2041  ;;  %v2552_v56 = vpop.permute.xlu0 %2551  ;;  %v2702_v59 = vsel %vm2653_vm1, %v7706_v39, %v15946_v32  ;;  %v7709_v39 = vld [vmem:[%s15348_s0 + $0x290] sm:$0xff]  ;;  %v15959_v32 = vld [vmem:[#allocation48_spill] sm:$0xff] }
 0x3e9   :  { %v3154_v30 = vsel %vm3108_vm8, %v3089_v16, %v2552_v56  ;;  %v3025_v3 = vsel %vm2978_vm6, %v2960_v61, %v2042_v52  ;;  %v7391_v16 = vld [vmem:[%s15348_s0 + $0x34a] sm:$0xff]  ;;  %v15948_v52 = vld [vmem:[#allocation164_spill] sm:$0xff] }
 0x3ea   :  { %2327 = vrot.lane.b32.xlu1 %v7326_v22, %s7731_s1  ;;  %2325 = vrot.lane.b32.xlu0 %v7325_v42, %s7731_s1  ;;  %v2767_v22 = vsel %vm2718_vm2, %v2702_v59, %v15947_v45  ;;  %v7392_v42 = vld [vmem:[%s15348_s0 + $0x352] sm:$0xff]  ;;  %v2705_v59 = vsel %vm2653_vm1, %v7709_v39, %v15959_v32 }
 0x3eb   :  { %7608 = vmatmul.mubr.msk.f32.gmra.mrb[12].mxu1 %vm3185_vm9, %v3154_v30  ;;  %v2832_v56 = vsel %vm2783_vm3, %v2767_v22, %v15948_v52  ;;  %v15960_v22 = vld [vmem:[#allocation106_spill] sm:$0xff]  ;;  %v15961_v52 = vld [vmem:[#allocation165_spill] sm:$0xff]  ;;  %v15970_v39 = vld [vmem:[#allocation235_spill] sm:$0xff] }
 0x3ec   :  { %v2298_v18 = vpop.permute.xlu1 %2297  ;;  %v2044_v43 = vpop.permute.xlu0 %2043  ;;  %v2897_v0 = vsel %vm2848_vm4, %v2832_v56, %v15949_v6 }
 0x3ed   :  { %v3090_v37 = vsel %vm3043_vm7, %v3025_v3, %v2298_v18  ;;  %v3026_v41 = vsel %vm2978_vm6, %v2961_v36, %v2044_v43  ;;  %v2962_v38 = vsel %vm2913_vm5, %v2897_v0, %v15951_v28  ;;  %v15952_v43 = vld [vmem:[#allocation104_spill] sm:$0xff]  ;;  %v15955_v36 = vld [vmem:[#allocation49_spill] sm:$0xff] }
 0x3ee   :  { %1817 = vrot.lane.b32.xlu1 %v7199_v9, %s7729_s12  ;;  %2581 = vrot.lane.b32.xlu0 %v7199_v9, %s7732_s11  ;;  %v2703_v9 = vsel %vm2653_vm1, %v7707_v7, %v15950_v27  ;;  %v15962_v0 = vld [vmem:[#allocation233_spill] sm:$0xff] }
 0x3ef   :  { %v2768_v21 = vsel %vm2718_vm2, %v2703_v9, %v15952_v43 }
 0x3f0   :  { %v2554_v55 = vpop.permute.xlu1 %2553  ;;  %v2300_v20 = vpop.permute.xlu0 %2299  ;;  %v2833_v14 = vsel %vm2783_vm3, %v2768_v21, %v15953_v29 }
 0x3f1   :  { %v3155_v40 = vsel %vm3108_vm8, %v3090_v37, %v2554_v55  ;;  %v3091_v26 = vsel %vm3043_vm7, %v3026_v41, %v2300_v20  ;;  %v2898_v3 = vsel %vm2848_vm4, %v2833_v14, %v15954_v8  ;;  %v2704_v41 = vsel %vm2653_vm1, %v7708_v31, %v15955_v36  ;;  %v15963_v8 = vld [vmem:[#allocation51_spill] sm:$0xff]  ;;  %v15967_v31 = vld [vmem:[#allocation50_spill] sm:$0xff] }
 0x3f2   :  { %v11248_v62 = vpop.f32.mrb[10].mxu0  ;;  %1819 = vrot.lane.b32.xlu1 %v7200_v34, %s7729_s12  ;;  %2583 = vrot.lane.b32.xlu0 %v7200_v34, %s7732_s11 }
 0x3f3   :  { %v11253_v51 = vpop.f32.mrb[11].mxu0  ;;  %7610 = vmatprep.mubr.msk.f32.mxu1 %vm3185_vm9, %v3155_v40 }
 0x3f4   :  { %v1792_v46 = vpop.permute.xlu1 %1791  ;;  %v2556_v54 = vpop.permute.xlu0 %2555 }
 0x3f5   :  { %v3156_v4 = vsel %vm3108_vm8, %v3091_v26, %v2556_v54  ;;  %v2963_v35 = vsel %vm2913_vm5, %v2898_v3, %v1792_v46  ;;  %v15957_v54 = vld [vmem:[#allocation166_spill] sm:$0xff] }
 0x3f6   :  { %2075 = vrot.lane.b32.xlu1 %v7264_v15, %s7730_s8  ;;  %2073 = vrot.lane.b32.xlu0 %v7263_v48, %s7730_s8  ;;  %v15956_v48 = vld [vmem:[#allocation107_spill] sm:$0xff] }
 0x3f7   :  { %7611 = vmatmul.mubr.msk.f32.gmra.mrb[14].mxu1 %vm3185_vm9, %v3156_v4  ;;  %v2769_v26 = vsel %vm2718_vm2, %v2704_v41, %v15956_v48  ;;  %v15968_v48 = vld [vmem:[#allocation108_spill] sm:$0xff] }
 0x3f8   :  { %v2048_v63 = vpop.permute.xlu1 %2047  ;;  %v2046_v1 = vpop.permute.xlu0 %2045  ;;  %v2834_v4 = vsel %vm2783_vm3, %v2769_v26, %v15957_v54 }
 0x3f9   :  { %v3027_v57 = vsel %vm2978_vm6, %v2962_v38, %v2046_v1  ;;  %v3028_v2 = vsel %vm2978_vm6, %v2963_v35, %v2048_v63  ;;  %v15958_v63 = vld [vmem:[#allocation234_spill] sm:$0xff] }
 0x3fa   :  { %2331 = vrot.lane.b32.xlu1 %v7328_v17, %s7731_s1  ;;  %2329 = vrot.lane.b32.xlu0 %v7327_v33, %s7731_s1  ;;  %v2899_v1 = vsel %vm2848_vm4, %v2834_v4, %v15958_v63  ;;  %v15969_v4 = vld [vmem:[#allocation167_spill] sm:$0xff] }
 0x3fc   :  { %v2304_v30 = vpop.permute.xlu1 %2303  ;;  %v2302_v19 = vpop.permute.xlu0 %2301 }
 0x3fd   :  { %v3092_v53 = vsel %vm3043_vm7, %v3027_v57, %v2302_v19  ;;  %v3093_v37 = vsel %vm3043_vm7, %v3028_v2, %v2304_v30  ;;  %v15965_v2 = vld [vmem:[#allocation168_spill] sm:$0xff] }
 0x3fe   :  { %v11299_v18 = vpop.f32.mrb[12].mxu0  ;;  %2587 = vrot.lane.b32.xlu1 %v7392_v42, %s7732_s11  ;;  %2585 = vrot.lane.b32.xlu0 %v7391_v16, %s7732_s11  ;;  %v2770_v42 = vsel %vm2718_vm2, %v2705_v59, %v15960_v22 }
 0x3ff   :  { %v11306_v12 = vpop.f32.mrb[13].mxu0  ;;  %v2835_v56 = vsel %vm2783_vm3, %v2770_v42, %v15961_v52 }
 0x400   :  { %v1794_v61 = vpop.permute.xlu1 %1793  ;;  %v2558_v23 = vpop.permute.xlu0 %2557  ;;  %v2900_v7 = vsel %vm2848_vm4, %v2835_v56, %v15962_v0 }
 0x401   :  { %v3157_v34 = vsel %vm3108_vm8, %v3092_v53, %v2558_v23  ;;  %v2964_v45 = vsel %vm2913_vm5, %v2899_v1, %v1794_v61  ;;  %v7710_v23 = vld [vmem:[%s15348_s0 + $0x2a0] sm:$0xff] }
 0x402   :  { %7613 = vmatprep.mubr.msk.f32.mxu1 %vm3185_vm9, %v3157_v34  ;;  %v2706_v3 = vsel %vm2653_vm1, %v7710_v23, %v15963_v8  ;;  %v15964_v34 = vld [vmem:[#allocation109_spill] sm:$0xff]  ;;  %v7713_v8 = vld [vmem:[%s15348_s0 + $0x2c0] sm:$0xff] }
 0x403   :  { %v2771_v35 = vsel %vm2718_vm2, %v2706_v3, %v15964_v34  ;;  %v15975_v3 = vld [vmem:[#allocation52_spill] sm:$0xff] }
 0x404   :  { %v1796_v55 = vpop.permute.xlu1 %1795  ;;  %v2560_v20 = vpop.permute.xlu0 %2559  ;;  %v2709_v34 = vsel %vm2653_vm1, %v7713_v8, %v15975_v3  ;;  %v15985_v3 = vld [vmem:[#allocation171_spill] sm:$0xff] }
 0x405   :  { %v3158_v24 = vsel %vm3108_vm8, %v3093_v37, %v2560_v20  ;;  %v2965_v9 = vsel %vm2913_vm5, %v2900_v7, %v1796_v55  ;;  %v2836_v37 = vsel %vm2783_vm3, %v2771_v35, %v15965_v2  ;;  %v7712_v7 = vld [vmem:[%s15348_s0 + $0x2b8] sm:$0xff] }
 0x406   :  { %7614 = vmatmul.mubr.msk.f32.gmra.mrb[16].mxu1 %vm3185_vm9, %v3158_v24  ;;  %v15966_v24 = vld [vmem:[#allocation236_spill] sm:$0xff] }
 0x408   :  { %v2052_v5 = vpop.permute.xlu1 %2051  ;;  %v2050_v40 = vpop.permute.xlu0 %2049 }
 0x409   :  { %v3029_v16 = vsel %vm2978_vm6, %v2964_v45, %v2050_v40  ;;  %v3030_v28 = vsel %vm2978_vm6, %v2965_v9, %v2052_v5  ;;  %v2901_v5 = vsel %vm2848_vm4, %v2836_v37, %v15966_v24  ;;  %v7711_v40 = vld [vmem:[%s15348_s0 + $0x2a8] sm:$0xff]  ;;  %v15976_v37 = vld [vmem:[#allocation110_spill] sm:$0xff] }
 0x40a   :  { %v11325_v15 = vpop.f32.mrb[14].mxu0  ;;  %v2707_v36 = vsel %vm2653_vm1, %v7711_v40, %v15967_v31 }
 0x40b   :  { %v11329_v46 = vpop.f32.mrb[15].mxu0  ;;  %v2772_v26 = vsel %vm2718_vm2, %v2707_v36, %v15968_v48  ;;  %v15978_v48 = vld [vmem:[#allocation237_spill] sm:$0xff] }
 0x40c   :  { %v2308_v17 = vpop.permute.xlu1 %2307  ;;  %v2306_v33 = vpop.permute.xlu0 %2305 }
 0x40d   :  { %v3094_v30 = vsel %vm3043_vm7, %v3029_v16, %v2306_v33  ;;  %v3095_v38 = vsel %vm3043_vm7, %v3030_v28, %v2308_v17  ;;  %v2837_v17 = vsel %vm2783_vm3, %v2772_v26, %v15969_v4  ;;  %v15972_v28 = vld [vmem:[#allocation111_spill] sm:$0xff] }
 0x40e   :  { %v2902_v32 = vsel %vm2848_vm4, %v2837_v17, %v15970_v39 }
 0x410   :  { %v1798_v19 = vpop.permute.xlu1 %1797  ;;  %v2562_v6 = vpop.permute.xlu0 %2561 }
 0x411   :  { %v3159_v27 = vsel %vm3108_vm8, %v3094_v30, %v2562_v6  ;;  %v2966_v41 = vsel %vm2913_vm5, %v2901_v5, %v1798_v19  ;;  %v15977_v5 = vld [vmem:[#allocation169_spill] sm:$0xff] }
 0x412   :  { %7616 = vmatprep.mubr.msk.f32.mxu1 %vm3185_vm9, %v3159_v27  ;;  %v15971_v27 = vld [vmem:[#allocation53_spill] sm:$0xff] }
 0x413   :  { %v2708_v9 = vsel %vm2653_vm1, %v7712_v7, %v15971_v27 }
 0x414   :  { %v1800_v43 = vpop.permute.xlu1 %1799  ;;  %v2564_v21 = vpop.permute.xlu0 %2563 }
 0x415   :  { %v3160_v57 = vsel %vm3108_vm8, %v3095_v38, %v2564_v21  ;;  %v2967_v45 = vsel %vm2913_vm5, %v2902_v32, %v1800_v43  ;;  %v2773_v38 = vsel %vm2718_vm2, %v2708_v9, %v15972_v28  ;;  %v15973_v43 = vld [vmem:[#allocation170_spill] sm:$0xff]  ;;  %v15982_v28 = vld [vmem:[#allocation240_spill] sm:$0xff] }
 0x416   :  { %v11355_v29 = vpop.f32.mrb[16].mxu0  ;;  %7617 = vmatmul.mubr.msk.f32.gmra.mrb[18].mxu1 %vm3185_vm9, %v3160_v57  ;;  %v2838_v21 = vsel %vm2783_vm3, %v2773_v38, %v15973_v43  ;;  %v7715_v43 = vld [vmem:[%s15348_s0 + $0x2d8] sm:$0xff] }
 0x417   :  { %v11358_v14 = vpop.f32.mrb[17].mxu0 }
 0x418   :  { %v2056_v53 = vpop.permute.xlu1 %2055  ;;  %v2054_v61 = vpop.permute.xlu0 %2053 }
 0x419   :  { %v3031_v54 = vsel %vm2978_vm6, %v2966_v41, %v2054_v61  ;;  %v3032_v42 = vsel %vm2978_vm6, %v2967_v45, %v2056_v53  ;;  %v15974_v61 = vld [vmem:[#allocation238_spill] sm:$0xff] }
 0x41a   :  { %v2903_v23 = vsel %vm2848_vm4, %v2838_v21, %v15974_v61  ;;  %v7714_v45 = vld [vmem:[%s15348_s0 + $0x2d0] sm:$0xff]  ;;  %v15984_v61 = vld [vmem:[#allocation112_spill] sm:$0xff] }
 0x41b   :  { %v15983_v21 = vld [vmem:[#allocation54_spill] sm:$0xff] }
 0x41c   :  { %v2312_v55 = vpop.permute.xlu1 %2311  ;;  %v2310_v20 = vpop.permute.xlu0 %2309 }
 0x41d   :  { %v3096_v33 = vsel %vm3043_vm7, %v3031_v54, %v2310_v20  ;;  %v3097_v52 = vsel %vm3043_vm7, %v3032_v42, %v2312_v55  ;;  %v2774_v55 = vsel %vm2718_vm2, %v2709_v34, %v15976_v37  ;;  %v15979_v42 = vld [vmem:[#allocation55_spill] sm:$0xff] }
 0x41e   :  { %v2839_v40 = vsel %vm2783_vm3, %v2774_v55, %v15977_v5 }
 0x41f   :  { %v2904_v26 = vsel %vm2848_vm4, %v2839_v40, %v15978_v48 }
 0x420   :  { %v1802_v63 = vpop.permute.xlu1 %1801  ;;  %v2566_v1 = vpop.permute.xlu0 %2565 }
 0x421   :  { %v3161_v59 = vsel %vm3108_vm8, %v3096_v33, %v2566_v1  ;;  %v2968_v35 = vsel %vm2913_vm5, %v2903_v23, %v1802_v63 }
 0x422   :  { %v11387_v22 = vpop.f32.mrb[18].mxu0  ;;  %7619 = vmatprep.mubr.msk.f32.mxu1 %vm3185_vm9, %v3161_v59 }
 0x423   :  { %v11391_v16 = vpop.f32.mrb[19].mxu0 }
 0x424   :  { %v1804_v56 = vpop.permute.xlu1 %1803  ;;  %v2568_v30 = vpop.permute.xlu0 %2567 }
 0x425   :  { %v3162_v19 = vsel %vm3108_vm8, %v3097_v52, %v2568_v30  ;;  %v2969_v4 = vsel %vm2913_vm5, %v2904_v26, %v1804_v56  ;;  %v2710_v52 = vsel %vm2653_vm1, %v7714_v45, %v15979_v42  ;;  %v15980_v30 = vld [vmem:[#allocation113_spill] sm:$0xff]  ;;  %v15989_v42 = vld [vmem:[#allocation174_spill] sm:$0xff] }
 0x426   :  { %7620 = vmatmul.mubr.msk.f32.gmra.mrb[20].mxu1 %vm3185_vm9, %v3162_v19  ;;  %v2775_v19 = vsel %vm2718_vm2, %v2710_v52, %v15980_v30 }
 0x428   :  { %v2060_v6 = vpop.permute.xlu1 %2059  ;;  %v2058_v0 = vpop.permute.xlu0 %2057 }
 0x429   :  { %v3033_v20 = vsel %vm2978_vm6, %v2968_v35, %v2058_v0  ;;  %v3034_v17 = vsel %vm2978_vm6, %v2969_v4, %v2060_v6  ;;  %v15981_v0 = vld [vmem:[#allocation172_spill] sm:$0xff] }
 0x42a   :  { %v2840_v7 = vsel %vm2783_vm3, %v2775_v19, %v15981_v0  ;;  %v15990_v0 = vld [vmem:[#allocation242_spill] sm:$0xff] }
 0x42b   :  { %v2905_v38 = vsel %vm2848_vm4, %v2840_v7, %v15982_v28 }
 0x42c   :  { %v2316_v57 = vpop.permute.xlu1 %2315  ;;  %v2314_v53 = vpop.permute.xlu0 %2313 }
 0x42d   :  { %v3098_v31 = vsel %vm3043_vm7, %v3033_v20, %v2314_v53  ;;  %v3099_v33 = vsel %vm3043_vm7, %v3034_v17, %v2316_v57  ;;  %v2711_v57 = vsel %vm2653_vm1, %v7715_v43, %v15983_v21  ;;  %v15986_v20 = vld [vmem:[#allocation239_spill] sm:$0xff]  ;;  %v15992_v43 = vld [vmem:[#allocation114_spill] sm:$0xff] }
 0x42e   :  { %v11413_v2 = vpop.f32.mrb[20].mxu0  ;;  %v2776_v23 = vsel %vm2718_vm2, %v2711_v57, %v15984_v61 }
 0x42f   :  { %v11418_v24 = vpop.f32.mrb[21].mxu0  ;;  %v2841_v34 = vsel %vm2783_vm3, %v2776_v23, %v15985_v3 }
 0x430   :  { %v1806_v36 = vpop.permute.xlu1 %1805  ;;  %v2570_v41 = vpop.permute.xlu0 %2569  ;;  %v2906_v5 = vsel %vm2848_vm4, %v2841_v34, %v15986_v20  ;;  %v15994_v34 = vld [vmem:[#allocation241_spill] sm:$0xff] }
 0x431   :  { %v3163_v54 = vsel %vm3108_vm8, %v3098_v31, %v2570_v41  ;;  %v2970_v53 = vsel %vm2913_vm5, %v2905_v38, %v1806_v36 }
 0x432   :  { %7622 = vmatprep.mubr.msk.f32.mxu1 %vm3185_vm9, %v3163_v54 }
 0x434   :  { %v1808_v63 = vpop.permute.xlu1 %1807  ;;  %v2572_v1 = vpop.permute.xlu0 %2571 }
 0x435   :  { %v3164_v39 = vsel %vm3108_vm8, %v3099_v33, %v2572_v1  ;;  %v2971_v31 = vsel %vm2913_vm5, %v2906_v5, %v1808_v63  ;;  %v7716_v63 = vld [vmem:[%s15348_s0 + $0x2e8] sm:$0xff] }
 0x436   :  { %7623 = vmatmul.mubr.msk.f32.gmra.mrb[22].mxu1 %vm3185_vm9, %v3164_v39  ;;  %v15987_v39 = vld [vmem:[#allocation57_spill] sm:$0xff] }
 0x438   :  { %v2064_v32 = vpop.permute.xlu1 %2063  ;;  %v2062_v59 = vpop.permute.xlu0 %2061 }
 0x439   :  { %v3035_v8 = vsel %vm2978_vm6, %v2970_v53, %v2062_v59  ;;  %v3036_v36 = vsel %vm2978_vm6, %v2971_v31, %v2064_v32  ;;  %v2712_v32 = vsel %vm2653_vm1, %v7716_v63, %v15987_v39  ;;  %v15988_v59 = vld [vmem:[#allocation115_spill] sm:$0xff]  ;;  %v15993_v53 = vld [vmem:[#allocation173_spill] sm:$0xff] }
 0x43a   :  { %v11437_v56 = vpop.f32.mrb[22].mxu0  ;;  %v2777_v45 = vsel %vm2718_vm2, %v2712_v32, %v15988_v59  ;;  %v15995_v63 = vld [vmem:[#allocation59_spill] sm:$0xff]  ;;  %v15997_v59 = vld [vmem:[#allocation176_spill] sm:$0xff] }
 0x43b   :  { %v11441_v6 = vpop.f32.mrb[23].mxu0  ;;  %v2842_v52 = vsel %vm2783_vm3, %v2777_v45, %v15989_v42 }
 0x43c   :  { %v2320_v27 = vpop.permute.xlu1 %2319  ;;  %v2318_v9 = vpop.permute.xlu0 %2317  ;;  %v2907_v7 = vsel %vm2848_vm4, %v2842_v52, %v15990_v0  ;;  %v7719_v0 = vld [vmem:[%s15348_s0 + $0x308] sm:$0xff] }
 0x43d   :  { %v3100_v35 = vsel %vm3043_vm7, %v3035_v8, %v2318_v9  ;;  %v3101_v41 = vsel %vm3043_vm7, %v3036_v36, %v2320_v27  ;;  %v7717_v27 = vld [vmem:[%s15348_s0 + $0x2f0] sm:$0xff]  ;;  %v15991_v9 = vld [vmem:[#allocation56_spill] sm:$0xff] }
 0x43e   :  { %v2713_v28 = vsel %vm2653_vm1, %v7717_v27, %v15991_v9 }
 0x43f   :  { %v2778_v21 = vsel %vm2718_vm2, %v2713_v28, %v15992_v43 }
 0x440   :  { %v1810_v37 = vpop.permute.xlu1 %1809  ;;  %v2574_v55 = vpop.permute.xlu0 %2573  ;;  %v2843_v61 = vsel %vm2783_vm3, %v2778_v21, %v15993_v53  ;;  %v16001_v53 = vld [vmem:[#allocation175_spill] sm:$0xff] }
 0x441   :  { %v3165_v40 = vsel %vm3108_vm8, %v3100_v35, %v2574_v55  ;;  %v2972_v38 = vsel %vm2913_vm5, %v2907_v7, %v1810_v37  ;;  %v2908_v35 = vsel %vm2848_vm4, %v2843_v61, %v15994_v34  ;;  %v15999_v7 = vld [vmem:[#allocation58_spill] sm:$0xff] }
 0x442   :  { %7625 = vmatprep.mubr.msk.f32.mxu1 %vm3185_vm9, %v3165_v40  ;;  %v2715_v27 = vsel %vm2653_vm1, %v7719_v0, %v15999_v7  ;;  %v16007_v7 = vld [vmem:[#allocation177_spill] sm:$0xff] }
 0x444   :  { %v1812_v48 = vpop.permute.xlu1 %1811  ;;  %v2576_v26 = vpop.permute.xlu0 %2575 }
 0x445   :  { %v3166_v54 = vsel %vm3108_vm8, %v3101_v41, %v2576_v26  ;;  %v2973_v20 = vsel %vm2913_vm5, %v2908_v35, %v1812_v48  ;;  %v7718_v48 = vld [vmem:[%s15348_s0 + $0x300] sm:$0xff]  ;;  %v16002_v35 = vld [vmem:[#allocation243_spill] sm:$0xff] }
 0x446   :  { %v11467_v4 = vpop.f32.mrb[24].mxu0  ;;  %7626 = vmatmul.mubr.msk.f32.gmra.mrb[24].mxu1 %vm3185_vm9, %v3166_v54  ;;  %v2714_v39 = vsel %vm2653_vm1, %v7718_v48, %v15995_v63 }
 0x447   :  { %v11470_v17 = vpop.f32.mrb[25].mxu0 }
 0x448   :  { %v2068_v33 = vpop.permute.xlu1 %2067  ;;  %v2066_v1 = vpop.permute.xlu0 %2065 }
 0x449   :  { %v3037_v57 = vsel %vm2978_vm6, %v2972_v38, %v2066_v1  ;;  %v3038_v5 = vsel %vm2978_vm6, %v2973_v20, %v2068_v33  ;;  %v15996_v33 = vld [vmem:[#allocation117_spill] sm:$0xff]  ;;  %v16000_v38 = vld [vmem:[#allocation116_spill] sm:$0xff] }
 0x44a   :  { %v2779_v32 = vsel %vm2718_vm2, %v2714_v39, %v15996_v33  ;;  %v2780_v43 = vsel %vm2718_vm2, %v2715_v27, %v16000_v38  ;;  %v7720_v39 = vld [vmem:[%s15348_s0 + $0x320] sm:$0xff] }
 0x44b   :  { %v2844_v45 = vsel %vm2783_vm3, %v2779_v32, %v15997_v59  ;;  %v2845_v61 = vsel %vm2783_vm3, %v2780_v43, %v16001_v53  ;;  %v16003_v33 = vld [vmem:[#allocation60_spill] sm:$0xff]  ;;  %v16004_v32 = vld [vmem:[#allocation61_spill] sm:$0xff] }
 0x44c   :  { %v2324_v30 = vpop.permute.xlu1 %2323  ;;  %v2322_v19 = vpop.permute.xlu0 %2321  ;;  %v16009_v53 = vld [vmem:[#allocation245_spill] sm:$0xff] }
 0x44d   :  { %v3102_v23 = vsel %vm3043_vm7, %v3037_v57, %v2322_v19  ;;  %v3103_v31 = vsel %vm3043_vm7, %v3038_v5, %v2324_v30  ;;  %v15998_v30 = vld [vmem:[#allocation244_spill] sm:$0xff] }
 0x44e   :  { %v2909_v19 = vsel %vm2848_vm4, %v2844_v45, %v15998_v30  ;;  %v16006_v30 = vld [vmem:[#allocation119_spill] sm:$0xff] }
 0x450   :  { %v1814_v8 = vpop.permute.xlu1 %1813  ;;  %v2578_v3 = vpop.permute.xlu0 %2577 }
 0x451   :  { %v3167_v55 = vsel %vm3108_vm8, %v3102_v23, %v2578_v3  ;;  %v2974_v9 = vsel %vm2913_vm5, %v2909_v19, %v1814_v8 }
 0x452   :  { %v11499_v37 = vpop.f32.mrb[26].mxu0  ;;  %7628 = vmatprep.mubr.msk.f32.mxu1 %vm3185_vm9, %v3167_v55  ;;  %v2910_v55 = vsel %vm2848_vm4, %v2845_v61, %v16002_v35 }
 0x453   :  { %v11503_v40 = vpop.f32.mrb[27].mxu0 }
 0x454   :  { %v1816_v36 = vpop.permute.xlu1 %1815  ;;  %v2580_v41 = vpop.permute.xlu0 %2579 }
 0x455   :  { %v3168_v26 = vsel %vm3108_vm8, %v3103_v31, %v2580_v41  ;;  %v2975_v20 = vsel %vm2913_vm5, %v2910_v55, %v1816_v36  ;;  %v2717_v36 = vsel %vm2653_vm1, %v7720_v39, %v16003_v33 }
 0x456   :  { %7629 = vmatmul.mubr.msk.f32.gmra.mrb[26].mxu1 %vm3185_vm9, %v3168_v26 }
 0x458   :  { %v2072_v54 = vpop.permute.xlu1 %2071  ;;  %v2070_v1 = vpop.permute.xlu0 %2069 }
 0x459   :  { %v3039_v21 = vsel %vm2978_vm6, %v2974_v9, %v2070_v1  ;;  %v3040_v5 = vsel %vm2978_vm6, %v2975_v20, %v2072_v54  ;;  %v7721_v54 = vld [vmem:[%s15348_s0 + $0x318] sm:$0xff]  ;;  %v16008_v9 = vld [vmem:[#allocation178_spill] sm:$0xff] }
 0x45a   :  { %v2716_v59 = vsel %vm2653_vm1, %v7721_v54, %v16004_v32  ;;  %vm6970_vm1 = vcmask 1045509  }
 0x45b   :  { %v2781_v19 = vsel %vm2718_vm2, %v2716_v59, %v16006_v30 }
 0x45c   :  { %v2328_v42 = vpop.permute.xlu1 %2327  ;;  %v2326_v52 = vpop.permute.xlu0 %2325  ;;  %v2846_v38 = vsel %vm2783_vm3, %v2781_v19, %v16008_v9 }
 0x45d   :  { %v3104_v23 = vsel %vm3043_vm7, %v3039_v21, %v2326_v52  ;;  %v3105_v31 = vsel %vm3043_vm7, %v3040_v5, %v2328_v42  ;;  %v16005_v42 = vld [vmem:[#allocation118_spill] sm:$0xff] }
 0x45e   :  { %v11525_v28 = vpop.f32.mrb[28].mxu0  ;;  %v2782_v52 = vsel %vm2718_vm2, %v2717_v36, %v16005_v42  ;;  %vm6972_vm2 = vcmask 1046534  }
 0x45f   :  { %v11530_v57 = vpop.f32.mrb[29].mxu0  ;;  %v2847_v27 = vsel %vm2783_vm3, %v2782_v52, %v16007_v7  ;;  %vm6974_vm3 = vcmask 1047559  }
 0x460   :  { %v1818_v3 = vpop.permute.xlu1 %1817  ;;  %v2582_v34 = vpop.permute.xlu0 %2581  ;;  %v2912_v61 = vsel %vm2848_vm4, %v2847_v27, %v16009_v53 }
 0x461   :  { %v3169_v8 = vsel %vm3108_vm8, %v3104_v23, %v2582_v34  ;;  %v16010_v23 = vld [vmem:[#allocation246_spill] sm:$0xff] }
 0x462   :  { %7631 = vmatprep.mubr.msk.f32.mxu1 %vm3185_vm9, %v3169_v8  ;;  %v2911_v34 = vsel %vm2848_vm4, %v2846_v38, %v16010_v23 }
 0x463   :  { %v2976_v35 = vsel %vm2913_vm5, %v2911_v34, %v1818_v3 }
 0x464   :  { %v1820_v41 = vpop.permute.xlu1 %1819  ;;  %v2584_v26 = vpop.permute.xlu0 %2583 }
 0x465   :  { %v3170_v1 = vsel %vm3108_vm8, %v3105_v31, %v2584_v26  ;;  %v2977_v55 = vsel %vm2913_vm5, %v2912_v61, %v1820_v41 }
 0x466   :  { %7632 = vmatmul.mubr.msk.f32.gmra.mrb[28].mxu1 %vm3185_vm9, %v3170_v1 }
 0x468   :  { %v2076_v48 = vpop.permute.xlu1 %2075  ;;  %v2074_v63 = vpop.permute.xlu0 %2073 }
 0x469   :  { %v3042_v8 = vsel %vm2978_vm6, %v2977_v55, %v2076_v48  ;;  %v3041_v20 = vsel %vm2978_vm6, %v2976_v35, %v2074_v63  ;;  %v11587_v48 = vld [vmem:[%s15350_s2] ss:$0 sm:$0xff] }
 0x46a   :  { %v11554_v45 = vpop.f32.mrb[30].mxu0  ;;  %v11595_v54 = vadd.f32 %v10962_v47, %v11587_v48  ;;  %v11599_v32 = vadd.f32 %v11587_v48, %v10967_v49  ;;  %v11603_v59 = vadd.f32 %v11587_v48, %v11023_v25  ;;  %v11619_v7 = vadd.f32 %v11018_v60, %v11587_v48 }
 0x46b   :  { %v11560_v0 = vpop.f32.mrb[31].mxu0  ;;  %v11623_v27 = vadd.f32 %v11587_v48, %v11082_v44  ;;  %v11638_v35 = vadd.f32 %v11077_v11, %v11587_v48  ;;  %v11642_v55 = vadd.f32 %v11587_v48, %v11141_v10 }
 0x46c   :  { %v2332_v43 = vpop.permute.xlu1 %2331  ;;  %v2330_v21 = vpop.permute.xlu0 %2329  ;;  %v3902_v42 = vmul.f32 %v11595_v54, %v11595_v54  ;;  %v3901_v52 = vmul.f32 %v11599_v32, %v11599_v32  ;;  %v3903_v30 = vmul.f32 %v11603_v59, %v11603_v59  ;;  %v3768_v47 = vsel %vm3108_vm8, %v11595_v54, 0.0 }
 0x46d   :  { %v3107_v5 = vsel %vm3043_vm7, %v3042_v8, %v2332_v43  ;;  %v3106_v31 = vsel %vm3043_vm7, %v3041_v20, %v2330_v21  ;;  %v3767_v49 = vsel %vm3108_vm8, %v11599_v32, 0.0  ;;  %v3770_v9 = vsel %vm3108_vm8, %v11603_v59, 0.0 }
 0x46e   :  { %v3966_v19 = vsel %vm3108_vm8, %v3902_v42, 0.0  ;;  %v3965_v25 = vsel %vm3108_vm8, %v3901_v52, 0.0  ;;  %v3769_v38 = vadd.f32 %v3768_v47, %v3767_v49  ;;  %v3968_v43 = vsel %vm3108_vm8, %v3903_v30, 0.0 }
 0x46f   :  { %v3967_v53 = vadd.f32 %v3966_v19, %v3965_v25  ;;  %v3904_v23 = vmul.f32 %v11619_v7, %v11619_v7  ;;  %v3905_v34 = vmul.f32 %v11623_v27, %v11623_v27  ;;  %v3772_v8 = vsel %vm3108_vm8, %v11619_v7, 0.0 }
 0x470   :  { %v2588_v26 = vpop.permute.xlu1 %2587  ;;  %v2586_v1 = vpop.permute.xlu0 %2585  ;;  %v3771_v60 = vadd.f32 %v3770_v9, %v3769_v38  ;;  %v3774_v20 = vsel %vm3108_vm8, %v11623_v27, 0.0  ;;  %v3906_v11 = vmul.f32 %v11638_v35, %v11638_v35  ;;  %v3907_v10 = vmul.f32 %v11642_v55, %v11642_v55 }
 0x471   :  { %v3172_v39 = vsel %vm3108_vm8, %v3107_v5, %v2588_v26  ;;  %v3171_v33 = vsel %vm3108_vm8, %v3106_v31, %v2586_v1  ;;  %v3969_v44 = vadd.f32 %v3968_v43, %v3967_v53  ;;  %v3970_v5 = vsel %vm3108_vm8, %v3904_v23, 0.0 }
 0x472   :  { %7634 = vmatprep.mubr.msk.f32.mxu1 %vm3185_vm9, %v3171_v33  ;;  %v3773_v31 = vadd.f32 %v3772_v8, %v3771_v60  ;;  %v3972_v26 = vsel %vm3108_vm8, %v3905_v34, 0.0  ;;  %v11656_v42 = vadd.f32 %v11136_v58, %v11587_v48  ;;  %v11660_v52 = vadd.f32 %v11587_v48, %v11197_v50 }
 0x473   :  { %7635 = vmatmul.mubr.msk.f32.gmra.mrb[30].mxu1 %vm3185_vm9, %v3172_v39  ;;  %v3971_v1 = vadd.f32 %v3970_v5, %v3969_v44  ;;  %v3776_v30 = vsel %vm3108_vm8, %v11638_v35, 0.0  ;;  %v3778_v47 = vsel %vm3108_vm8, %v11642_v55, 0.0  ;;  %v3974_v49 = vsel %vm3108_vm8, %v3906_v11, 0.0 }
 0x474   :  { %v3775_v39 = vadd.f32 %v3774_v20, %v3773_v31  ;;  %v3976_v25 = vsel %vm3108_vm8, %v3907_v10, 0.0  ;;  %v3908_v50 = vmul.f32 %v11656_v42, %v11656_v42  ;;  %v3909_v53 = vmul.f32 %v11660_v52, %v11660_v52 }
 0x475   :  { %v3973_v33 = vadd.f32 %v3972_v26, %v3971_v1  ;;  %v11678_v60 = vadd.f32 %v11192_v13, %v11587_v48  ;;  %v11682_v34 = vadd.f32 %v11587_v48, %v11253_v51  ;;  %v3780_v44 = vsel %vm3108_vm8, %v11656_v42, 0.0 }
 0x476   :  { %v11580_v3 = vpop.f32.mrb[0].mxu1  ;;  %v3777_v19 = vadd.f32 %v3776_v30, %v3775_v39  ;;  %v3782_v8 = vsel %vm3108_vm8, %v11660_v52, 0.0  ;;  %v3978_v20 = vsel %vm3108_vm8, %v3908_v50, 0.0  ;;  %v3980_v31 = vsel %vm3108_vm8, %v3909_v53, 0.0 }
 0x477   :  { %v11582_v41 = vpop.f32.mrb[1].mxu1  ;;  %v3975_v38 = vadd.f32 %v3974_v49, %v3973_v33  ;;  %v3910_v13 = vmul.f32 %v11678_v60, %v11678_v60  ;;  %v3911_v51 = vmul.f32 %v11682_v34, %v11682_v34  ;;  %v11696_v39 = vadd.f32 %v11248_v62, %v11587_v48 }
 0x478   :  { %v3779_v43 = vadd.f32 %v3778_v47, %v3777_v19  ;;  %v11700_v10 = vadd.f32 %v11587_v48, %v11306_v12  ;;  %v3784_v33 = vsel %vm3108_vm8, %v11678_v60, 0.0  ;;  %v3786_v30 = vsel %vm3108_vm8, %v11682_v34, 0.0 }
 0x479   :  { %v3977_v23 = vadd.f32 %v3976_v25, %v3975_v38  ;;  %v3982_v47 = vsel %vm3108_vm8, %v3910_v13, 0.0  ;;  %v3984_v19 = vsel %vm3108_vm8, %v3911_v51, 0.0  ;;  %v3912_v12 = vmul.f32 %v11696_v39, %v11696_v39 }
 0x47a   :  { %v3781_v5 = vadd.f32 %v3780_v44, %v3779_v43  ;;  %v3913_v43 = vmul.f32 %v11700_v10, %v11700_v10  ;;  %v11722_v44 = vadd.f32 %v11587_v48, %v11329_v46 }
 0x47b   :  { %v3979_v26 = vadd.f32 %v3978_v20, %v3977_v23  ;;  %v11718_v23 = vadd.f32 %v11299_v18, %v11587_v48  ;;  %v3790_v20 = vsel %vm3108_vm8, %v11700_v10, 0.0 }
 0x47c   :  { %v3783_v1 = vadd.f32 %v3782_v8, %v3781_v5  ;;  %v3788_v8 = vsel %vm3108_vm8, %v11696_v39, 0.0  ;;  %v3986_v5 = vsel %vm3108_vm8, %v3912_v12, 0.0  ;;  %v3915_v46 = vmul.f32 %v11722_v44, %v11722_v44 }
 0x47d   :  { %v3981_v11 = vadd.f32 %v3980_v31, %v3979_v26  ;;  %v3988_v26 = vsel %vm3108_vm8, %v3913_v43, 0.0  ;;  %v3914_v18 = vmul.f32 %v11718_v23, %v11718_v23 }
 0x47e   :  { %v3785_v49 = vadd.f32 %v3784_v33, %v3783_v1  ;;  %v11740_v33 = vadd.f32 %v11587_v48, %v11358_v14 }
 0x47f   :  { %v3983_v38 = vadd.f32 %v3982_v47, %v3981_v11  ;;  %v11736_v11 = vadd.f32 %v11325_v15, %v11587_v48  ;;  %v3794_v47 = vsel %vm3108_vm8, %v11722_v44, 0.0 }
 0x480   :  { %v3787_v50 = vadd.f32 %v3786_v30, %v3785_v49  ;;  %v3792_v30 = vsel %vm3108_vm8, %v11718_v23, 0.0  ;;  %v3990_v49 = vsel %vm3108_vm8, %v3914_v18, 0.0 }
 0x481   :  { %v3985_v53 = vadd.f32 %v3984_v19, %v3983_v38  ;;  %v3992_v38 = vsel %vm3108_vm8, %v3915_v46, 0.0  ;;  %v3916_v14 = vmul.f32 %v11736_v11, %v11736_v11 }
 0x482   :  { %v11589_v63 = vpop.f32.mrb[2].mxu1  ;;  %v3789_v31 = vadd.f32 %v3788_v8, %v3787_v50 }
 0x483   :  { %v11591_v36 = vpop.f32.mrb[3].mxu1  ;;  %v3987_v13 = vadd.f32 %v3986_v5, %v3985_v53  ;;  %v3917_v53 = vmul.f32 %v11740_v33, %v11740_v33  ;;  %v11762_v5 = vadd.f32 %v11587_v48, %v11391_v16 }
 0x484   :  { %v3791_v1 = vadd.f32 %v3790_v20, %v3789_v31  ;;  %v11758_v20 = vadd.f32 %v11355_v29, %v11587_v48  ;;  %v3796_v31 = vsel %vm3108_vm8, %v11736_v11, 0.0 }
 0x485   :  { %v3989_v51 = vadd.f32 %v3988_v26, %v3987_v13  ;;  %v3798_v26 = vsel %vm3108_vm8, %v11740_v33, 0.0  ;;  %v3994_v13 = vsel %vm3108_vm8, %v3916_v14, 0.0  ;;  %v3919_v16 = vmul.f32 %v11762_v5, %v11762_v5 }
 0x486   :  { %v3793_v19 = vadd.f32 %v3792_v30, %v3791_v1  ;;  %v3996_v1 = vsel %vm3108_vm8, %v3917_v53, 0.0  ;;  %v3918_v29 = vmul.f32 %v11758_v20, %v11758_v20 }
 0x487   :  { %v3991_v50 = vadd.f32 %v3990_v49, %v3989_v51  ;;  %v11780_v49 = vadd.f32 %v11587_v48, %v11418_v24 }
 0x488   :  { %v3795_v43 = vadd.f32 %v3794_v47, %v3793_v19  ;;  %v11776_v47 = vadd.f32 %v11387_v22, %v11587_v48  ;;  %v3800_v19 = vsel %vm3108_vm8, %v11758_v20, 0.0 }
 0x489   :  { %v3993_v8 = vadd.f32 %v3992_v38, %v3991_v50  ;;  %v3802_v38 = vsel %vm3108_vm8, %v11762_v5, 0.0  ;;  %v3998_v50 = vsel %vm3108_vm8, %v3918_v29, 0.0  ;;  %v3806_v29 = vsel %vm3108_vm8, %v11780_v49, 0.0 }
 0x48a   :  { %v3797_v18 = vadd.f32 %v3796_v31, %v3795_v43  ;;  %v4000_v43 = vsel %vm3108_vm8, %v3919_v16, 0.0  ;;  %v3920_v24 = vmul.f32 %v11776_v47, %v11776_v47 }
 0x48b   :  { %v3995_v46 = vadd.f32 %v3994_v13, %v3993_v8 }
 0x48c   :  { %v3799_v51 = vadd.f32 %v3798_v26, %v3797_v18  ;;  %v3921_v26 = vmul.f32 %v11780_v49, %v11780_v49  ;;  %v11798_v18 = vadd.f32 %v11413_v2, %v11587_v48 }
 0x48d   :  { %v3997_v30 = vadd.f32 %v3996_v1, %v3995_v46  ;;  %v11802_v1 = vadd.f32 %v11587_v48, %v11441_v6  ;;  %v3804_v46 = vsel %vm3108_vm8, %v11776_v47, 0.0 }
 0x48e   :  { %v11628_v21 = vpop.f32.mrb[4].mxu1  ;;  %v3801_v14 = vadd.f32 %v3800_v19, %v3799_v51  ;;  %v4002_v51 = vsel %vm3108_vm8, %v3920_v24, 0.0  ;;  %v3922_v2 = vmul.f32 %v11798_v18, %v11798_v18 }
 0x48f   :  { %v11630_v61 = vpop.f32.mrb[5].mxu1  ;;  %v3999_v8 = vadd.f32 %v3998_v50, %v3997_v30  ;;  %v4004_v30 = vsel %vm3108_vm8, %v3921_v26, 0.0  ;;  %v3923_v6 = vmul.f32 %v11802_v1, %v11802_v1  ;;  %v3810_v24 = vsel %vm3108_vm8, %v11802_v1, 0.0 }
 0x490   :  { %v3803_v31 = vadd.f32 %v3802_v38, %v3801_v14  ;;  %v11816_v14 = vadd.f32 %v11437_v56, %v11587_v48 }
 0x491   :  { %v4001_v13 = vadd.f32 %v4000_v43, %v3999_v8  ;;  %v11820_v43 = vadd.f32 %v11587_v48, %v11470_v17  ;;  %v3808_v8 = vsel %vm3108_vm8, %v11798_v18, 0.0 }
 0x492   :  { %v3805_v16 = vadd.f32 %v3804_v46, %v3803_v31  ;;  %v4006_v31 = vsel %vm3108_vm8, %v3922_v2, 0.0  ;;  %v3924_v17 = vmul.f32 %v11816_v14, %v11816_v14  ;;  %v11842_v2 = vadd.f32 %v11587_v48, %v11503_v40 }
 0x493   :  { %v4003_v19 = vadd.f32 %v4002_v51, %v4001_v13  ;;  %16011 = vst [vmem:[#allocation120_spill] sm:$0xff] %v11820_v43  ;;  %v4008_v13 = vsel %vm3108_vm8, %v3923_v6, 0.0  ;;  %v3814_v6 = vsel %vm3108_vm8, %v11820_v43, 0.0 }
 0x494   :  { %v3807_v38 = vadd.f32 %v3806_v29, %v3805_v16  ;;  %v3925_v16 = vmul.f32 %v11820_v43, %v11820_v43  ;;  %v3927_v40 = vmul.f32 %v11842_v2, %v11842_v2  ;;  %v11860_v43 = vadd.f32 %v11587_v48, %v11530_v57 }
 0x495   :  { %v4005_v50 = vadd.f32 %v4004_v30, %v4003_v19  ;;  %v11838_v19 = vadd.f32 %v11467_v4, %v11587_v48 }
 0x496   :  { %v3809_v26 = vadd.f32 %v3808_v8, %v3807_v38  ;;  %v3812_v38 = vsel %vm3108_vm8, %v11816_v14, 0.0  ;;  %16013 = vst [vmem:[#allocation5_spill] sm:$0xff] %v11860_v43  ;;  %v3929_v57 = vmul.f32 %v11860_v43, %v11860_v43 }
 0x497   :  { %v4007_v29 = vadd.f32 %v4006_v31, %v4005_v50  ;;  %v4010_v50 = vsel %vm3108_vm8, %v3924_v17, 0.0  ;;  %v3926_v4 = vmul.f32 %v11838_v19, %v11838_v19  ;;  %v3816_v17 = vsel %vm3108_vm8, %v11838_v19, 0.0 }
 0x498   :  { %v3811_v51 = vadd.f32 %v3810_v24, %v3809_v26  ;;  %v4012_v24 = vsel %vm3108_vm8, %v3925_v16, 0.0 }
 0x499   :  { %v4009_v30 = vadd.f32 %v4008_v13, %v4007_v29  ;;  %v11856_v29 = vadd.f32 %v11499_v37, %v11587_v48  ;;  %v4014_v16 = vsel %vm3108_vm8, %v3926_v4, 0.0  ;;  %v11880_v4 = vadd.f32 %v11587_v48, %v11560_v0 }
 0x49a   :  { %v11668_v9 = vpop.f32.mrb[6].mxu1  ;;  %v3813_v8 = vadd.f32 %v3812_v38, %v3811_v51  ;;  %v3818_v51 = vsel %vm3108_vm8, %v11842_v2, 0.0  ;;  %v4016_v38 = vsel %vm3108_vm8, %v3927_v40, 0.0 }
 0x49b   :  { %v11670_v58 = vpop.f32.mrb[7].mxu1  ;;  %v4011_v31 = vadd.f32 %v4010_v50, %v4009_v30  ;;  %16012 = vst [vmem:[#allocation179_spill] sm:$0xff] %v11856_v29  ;;  %v3928_v37 = vmul.f32 %v11856_v29, %v11856_v29  ;;  %v3820_v40 = vsel %vm3108_vm8, %v11856_v29, 0.0  ;;  %v3931_v0 = vmul.f32 %v11880_v4, %v11880_v4 }
 0x49c   :  { %v3815_v26 = vadd.f32 %v3814_v6, %v3813_v8  ;;  %v11896_v29 = vadd.f32 %v11554_v45, %v11587_v48 }
 0x49d   :  { %v4013_v13 = vadd.f32 %v4012_v24, %v4011_v31  ;;  %v11876_v31 = vadd.f32 %v11525_v28, %v11587_v48 }
 0x49e   :  { %v3817_v30 = vadd.f32 %v3816_v17, %v3815_v26  ;;  %v4018_v17 = vsel %vm3108_vm8, %v3928_v37, 0.0  ;;  %v3932_v45 = vmul.f32 %v11896_v29, %v11896_v29 }
 0x49f   :  { %v4015_v6 = vadd.f32 %v4014_v16, %v4013_v13  ;;  %v3822_v13 = vsel %vm3108_vm8, %v11860_v43, 0.0  ;;  %v4020_v16 = vsel %vm3108_vm8, %v3929_v57, 0.0  ;;  %v3930_v28 = vmul.f32 %v11876_v31, %v11876_v31 }
 0x4a0   :  { %v3819_v50 = vadd.f32 %v3818_v51, %v3817_v30  ;;  %v11900_v43 = vadd.f32 %v11587_v48, %v11582_v41  ;;  %v3824_v37 = vsel %vm3108_vm8, %v11876_v31, 0.0 }
 0x4a1   :  { %v4017_v8 = vadd.f32 %v4016_v38, %v4015_v6  ;;  %v4022_v57 = vsel %vm3108_vm8, %v3930_v28, 0.0  ;;  %v3828_v28 = vsel %vm3108_vm8, %v11896_v29, 0.0 }
 0x4a2   :  { %v3821_v51 = vadd.f32 %v3820_v40, %v3819_v50  ;;  %16014 = vst [vmem:[#allocation207_spill] sm:$0xff] %v11900_v43  ;;  %v3826_v50 = vsel %vm3108_vm8, %v11880_v4, 0.0  ;;  %v4024_v40 = vsel %vm3108_vm8, %v3931_v0, 0.0  ;;  %v3933_v41 = vmul.f32 %v11900_v43, %v11900_v43 }
 0x4a3   :  { %v4019_v30 = vadd.f32 %v4018_v17, %v4017_v8  ;;  %v4026_v0 = vsel %vm3108_vm8, %v3932_v45, 0.0 }
 0x4a4   :  { %v3823_v38 = vadd.f32 %v3822_v13, %v3821_v51 }
 0x4a5   :  { %v4021_v6 = vadd.f32 %v4020_v16, %v4019_v30  ;;  %v11914_v16 = vadd.f32 %v11580_v3, %v11587_v48  ;;  %v11918_v30 = vadd.f32 %v11587_v48, %v11591_v36 }
 0x4a6   :  { %v11708_v25 = vpop.f32.mrb[8].mxu1  ;;  %v3825_v8 = vadd.f32 %v3824_v37, %v3823_v38  ;;  %v3830_v38 = vsel %vm3108_vm8, %v11900_v43, 0.0  ;;  %v4028_v37 = vsel %vm3108_vm8, %v3933_v41, 0.0  ;;  %v11936_v43 = vadd.f32 %v11589_v63, %v11587_v48 }
 0x4a7   :  { %v11710_v62 = vpop.f32.mrb[9].mxu1  ;;  %v4023_v13 = vadd.f32 %v4022_v57, %v4021_v6  ;;  %16015 = vst [vmem:[#allocation63_spill] sm:$0xff] %v11918_v30  ;;  %v3934_v3 = vmul.f32 %v11914_v16, %v11914_v16  ;;  %v3935_v36 = vmul.f32 %v11918_v30, %v11918_v30  ;;  %v3832_v45 = vsel %vm3108_vm8, %v11914_v16, 0.0 }
 0x4a8   :  { %v3827_v17 = vadd.f32 %v3826_v50, %v3825_v8  ;;  %v11944_v41 = vadd.f32 %v11587_v48, %v11630_v61  ;;  %v3936_v63 = vmul.f32 %v11936_v43, %v11936_v43  ;;  %v11956_v61 = vadd.f32 %v11628_v21, %v11587_v48 }
 0x4a9   :  { %v4025_v51 = vadd.f32 %v4024_v40, %v4023_v13 }
 0x4aa   :  { %v3829_v6 = vadd.f32 %v3828_v28, %v3827_v17  ;;  %v3834_v17 = vsel %vm3108_vm8, %v11918_v30, 0.0  ;;  %v3836_v30 = vsel %vm3108_vm8, %v11936_v43, 0.0  ;;  %v11974_v21 = vmul.f32 %v11956_v61, %v11956_v61 }
 0x4ab   :  { %v4027_v50 = vadd.f32 %v4026_v0, %v4025_v51  ;;  %v4030_v51 = vsel %vm3108_vm8, %v3934_v3, 0.0  ;;  %v3838_v3 = vsel %vm3108_vm8, %v11944_v41, 0.0 }
 0x4ac   :  { %v3831_v8 = vadd.f32 %v3830_v38, %v3829_v6  ;;  %v4032_v38 = vsel %vm3108_vm8, %v3935_v36, 0.0  ;;  %v4034_v36 = vsel %vm3108_vm8, %v3936_v63, 0.0 }
 0x4ad   :  { %v4029_v13 = vadd.f32 %v4028_v37, %v4027_v50  ;;  %v3937_v50 = vmul.f32 %v11944_v41, %v11944_v41 }
 0x4ae   :  { %v3833_v28 = vadd.f32 %v3832_v45, %v3831_v8  ;;  %v11962_v8 = vadd.f32 %v11587_v48, %v11670_v58 }
 0x4af   :  { %v4031_v0 = vadd.f32 %v4030_v51, %v4029_v13 }
 0x4b0   :  { %v3835_v6 = vadd.f32 %v3834_v17, %v3833_v28  ;;  %v11968_v17 = vsel %vm3108_vm8, %v3937_v50, 0.0  ;;  %v11978_v58 = vmul.f32 %v11962_v8, %v11962_v8  ;;  %v7733_v28 = vmov 0.0  }
 0x4b1   :  { %v4033_v37 = vadd.f32 %v4032_v38, %v4031_v0  ;;  %4438 = vst.msk [vmem:[#allocation2 + $0x8] sm:$0xff] %vm3108_vm8, %v7733_v28  ;;  %4437 = vst.msk [vmem:[#allocation2] sm:$0xff] %vm3108_vm8, %v7733_v28  ;;  %v3840_v38 = vsel %vm3108_vm8, %v11956_v61, 0.0  ;;  %v12138_v0 = vadd.f32 %v11668_v9, %v11587_v48  ;;  %v3842_v63 = vsel %vm3108_vm8, %v11962_v8, 0.0 }
 0x4b2   :  { %v11748_v12 = vpop.f32.mrb[10].mxu1  ;;  %v3837_v13 = vadd.f32 %v3836_v30, %v3835_v6  ;;  %4440 = vst.msk [vmem:[#allocation2 + $0x10] sm:$0x3] %vm4439_vm10, %v7733_v28  ;;  %4443 = vst.msk [vmem:[#allocation2 + $0x1c0] sm:$0x3] %vm4439_vm10, %v7733_v28  ;;  %v12144_v6 = vadd.f32 %v11587_v48, %v11710_v62  ;;  %v4040_v9 = vsel %vm3108_vm8, %v11978_v58, 0.0 }
 0x4b3   :  { %v11750_v15 = vpop.f32.mrb[11].mxu1  ;;  %v11965_v45 = vadd.f32 %v4034_v36, %v4033_v37  ;;  %4485 = vst.msk [vmem:[#allocation2 + $0x29] sm:$0x1] %vm4452_vm11, %v7733_v28  ;;  %4486 = vst.msk [vmem:[#allocation2 + $0x41] sm:$0x1] %vm4452_vm11, %v7733_v28  ;;  %v4038_v36 = vsel %vm3108_vm8, %v11974_v21, 0.0 }
 0x4b4   :  { %v11970_v51 = vadd.f32 %v3838_v3, %v3837_v13  ;;  %4441 = vst.msk [vmem:[#allocation2 + $0x1b0] sm:$0xff] %vm3108_vm8, %v7733_v28  ;;  %4442 = vst.msk [vmem:[#allocation2 + $0x1b8] sm:$0xff] %vm3108_vm8, %v7733_v28  ;;  %v3941_v62 = vmul.f32 %v12144_v6, %v12144_v6  ;;  %v3846_v21 = vsel %vm3108_vm8, %v12144_v6, 0.0  ;;  %v12169_v58 = vadd.f32 %v11587_v48, %v11750_v15 }
 0x4b5   :  { %4445 = vst.msk [vmem:[#allocation2 + $0x198] sm:$0xff] %vm3108_vm8, %v7733_v28  ;;  %4446 = vst.msk [vmem:[#allocation2 + $0x1a0] sm:$0xff] %vm3108_vm8, %v7733_v28  ;;  %v4037_v30 = vadd.f32 %v11968_v17, %v11965_v45  ;;  %v3940_v17 = vmul.f32 %v12138_v0, %v12138_v0  ;;  %v12181_v15 = vadd.f32 %v11748_v12, %v11587_v48 }
 0x4b6   :  { %4447 = vst.msk [vmem:[#allocation2 + $0x1a8] sm:$0x3] %vm4439_vm10, %v7733_v28  ;;  %4450 = vst.msk [vmem:[#allocation2 + $0x358] sm:$0x3] %vm4439_vm10, %v7733_v28  ;;  %v3841_v50 = vadd.f32 %v3840_v38, %v11970_v51  ;;  %v3844_v51 = vsel %vm3108_vm8, %v12138_v0, 0.0  ;;  %v12163_v38 = vadd.f32 %v11708_v25, %v11587_v48  ;;  %v3943_v25 = vmul.f32 %v12169_v58, %v12169_v58 }
 0x4b7   :  { %4448 = vst.msk [vmem:[#allocation2 + $0x348] sm:$0xff] %vm3108_vm8, %v7733_v28  ;;  %4449 = vst.msk [vmem:[#allocation2 + $0x350] sm:$0xff] %vm3108_vm8, %v7733_v28  ;;  %v4039_v45 = vadd.f32 %v4038_v36, %v4037_v30 }
 0x4b8   :  { %4453 = vst.msk [vmem:[#allocation2 + $0x18] sm:$0x1] %vm4452_vm11, %v7733_v28  ;;  %4454 = vst.msk [vmem:[#allocation2 + $0x30] sm:$0x1] %vm4452_vm11, %v7733_v28  ;;  %v3843_v13 = vadd.f32 %v3842_v63, %v3841_v50  ;;  %v4042_v63 = vsel %vm3108_vm8, %v3940_v17, 0.0  ;;  %v4044_v50 = vsel %vm3108_vm8, %v3941_v62, 0.0 }
 0x4b9   :  { %4455 = vst.msk [vmem:[#allocation2 + $0x48] sm:$0x1] %vm4452_vm11, %v7733_v28  ;;  %4456 = vst.msk [vmem:[#allocation2 + $0x60] sm:$0x1] %vm4452_vm11, %v7733_v28 }
 0x4ba   :  { %4457 = vst.msk [vmem:[#allocation2 + $0x78] sm:$0x1] %vm4452_vm11, %v7733_v28  ;;  %4458 = vst.msk [vmem:[#allocation2 + $0x90] sm:$0x1] %vm4452_vm11, %v7733_v28  ;;  %v3845_v30 = vadd.f32 %v3844_v51, %v3843_v13  ;;  %v3850_v13 = vsel %vm3108_vm8, %v12169_v58, 0.0  ;;  %v4048_v51 = vsel %vm3108_vm8, %v3943_v25, 0.0 }
 0x4bb   :  { %4459 = vst.msk [vmem:[#allocation2 + $0xa8] sm:$0x1] %vm4452_vm11, %v7733_v28  ;;  %4460 = vst.msk [vmem:[#allocation2 + $0xc0] sm:$0x1] %vm4452_vm11, %v7733_v28 }
 0x4bc   :  { %4461 = vst.msk [vmem:[#allocation2 + $0xd8] sm:$0x1] %vm4452_vm11, %v7733_v28  ;;  %4462 = vst.msk [vmem:[#allocation2 + $0xf0] sm:$0x1] %vm4452_vm11, %v7733_v28  ;;  %v3847_v36 = vadd.f32 %v3846_v21, %v3845_v30 }
 0x4bd   :  { %4463 = vst.msk [vmem:[#allocation2 + $0x108] sm:$0x1] %vm4452_vm11, %v7733_v28  ;;  %4464 = vst.msk [vmem:[#allocation2 + $0x120] sm:$0x1] %vm4452_vm11, %v7733_v28 }
 0x4be   :  { %v11788_v53 = vpop.f32.mrb[12].mxu1  ;;  %4465 = vst.msk [vmem:[#allocation2 + $0x138] sm:$0x1] %vm4452_vm11, %v7733_v28  ;;  %4466 = vst.msk [vmem:[#allocation2 + $0x150] sm:$0x1] %vm4452_vm11, %v7733_v28 }
 0x4bf   :  { %v11790_v22 = vpop.f32.mrb[13].mxu1  ;;  %4467 = vst.msk [vmem:[#allocation2 + $0x168] sm:$0x1] %vm4452_vm11, %v7733_v28  ;;  %4468 = vst.msk [vmem:[#allocation2 + $0x180] sm:$0x1] %vm4452_vm11, %v7733_v28 }
 0x4c0   :  { %4469 = vst.msk [vmem:[#allocation2 + $0x1c8] sm:$0x1] %vm4452_vm11, %v7733_v28  ;;  %4470 = vst.msk [vmem:[#allocation2 + $0x1e0] sm:$0x1] %vm4452_vm11, %v7733_v28  ;;  %v12187_v17 = vadd.f32 %v11587_v48, %v11790_v22  ;;  %v3852_v22 = vsel %vm3108_vm8, %v12181_v15, 0.0 }
 0x4c1   :  { %4471 = vst.msk [vmem:[#allocation2 + $0x1f8] sm:$0x1] %vm4452_vm11, %v7733_v28  ;;  %4472 = vst.msk [vmem:[#allocation2 + $0x210] sm:$0x1] %vm4452_vm11, %v7733_v28 }
 0x4c2   :  { %4473 = vst.msk [vmem:[#allocation2 + $0x228] sm:$0x1] %vm4452_vm11, %v7733_v28  ;;  %4474 = vst.msk [vmem:[#allocation2 + $0x240] sm:$0x1] %vm4452_vm11, %v7733_v28  ;;  %v3945_v12 = vmul.f32 %v12187_v17, %v12187_v17 }
 0x4c3   :  { %4475 = vst.msk [vmem:[#allocation2 + $0x258] sm:$0x1] %vm4452_vm11, %v7733_v28  ;;  %4476 = vst.msk [vmem:[#allocation2 + $0x270] sm:$0x1] %vm4452_vm11, %v7733_v28 }
 0x4c4   :  { %4477 = vst.msk [vmem:[#allocation2 + $0x288] sm:$0x1] %vm4452_vm11, %v7733_v28  ;;  %4478 = vst.msk [vmem:[#allocation2 + $0x2a0] sm:$0x1] %vm4452_vm11, %v7733_v28 }
 0x4c5   :  { %4479 = vst.msk [vmem:[#allocation2 + $0x2b8] sm:$0x1] %vm4452_vm11, %v7733_v28  ;;  %4480 = vst.msk [vmem:[#allocation2 + $0x2d0] sm:$0x1] %vm4452_vm11, %v7733_v28 }
 0x4c6   :  { %4481 = vst.msk [vmem:[#allocation2 + $0x2e8] sm:$0x1] %vm4452_vm11, %v7733_v28  ;;  %4482 = vst.msk [vmem:[#allocation2 + $0x300] sm:$0x1] %vm4452_vm11, %v7733_v28 }
 0x4c7   :  { %4483 = vst.msk [vmem:[#allocation2 + $0x318] sm:$0x1] %vm4452_vm11, %v7733_v28  ;;  %4484 = vst.msk [vmem:[#allocation2 + $0x330] sm:$0x1] %vm4452_vm11, %v7733_v28 }
 0x4c8   :  { %4487 = vst.msk [vmem:[#allocation2 + $0x59] sm:$0x1] %vm4452_vm11, %v7733_v28  ;;  %4488 = vst.msk [vmem:[#allocation2 + $0x71] sm:$0x1] %vm4452_vm11, %v7733_v28 }
 0x4c9   :  { %4489 = vst.msk [vmem:[#allocation2 + $0x89] sm:$0x1] %vm4452_vm11, %v7733_v28  ;;  %4490 = vst.msk [vmem:[#allocation2 + $0xa1] sm:$0x1] %vm4452_vm11, %v7733_v28 }
 0x4ca   :  { %v11828_v46 = vpop.f32.mrb[14].mxu1  ;;  %4491 = vst.msk [vmem:[#allocation2 + $0xb9] sm:$0x1] %vm4452_vm11, %v7733_v28  ;;  %4492 = vst.msk [vmem:[#allocation2 + $0xd1] sm:$0x1] %vm4452_vm11, %v7733_v28 }
 0x4cb   :  { %v11830_v56 = vpop.f32.mrb[15].mxu1  ;;  %4493 = vst.msk [vmem:[#allocation2 + $0xe9] sm:$0x1] %vm4452_vm11, %v7733_v28  ;;  %4494 = vst.msk [vmem:[#allocation2 + $0x101] sm:$0x1] %vm4452_vm11, %v7733_v28 }
 0x4cc   :  { %4495 = vst.msk [vmem:[#allocation2 + $0x119] sm:$0x1] %vm4452_vm11, %v7733_v28  ;;  %4496 = vst.msk [vmem:[#allocation2 + $0x131] sm:$0x1] %vm4452_vm11, %v7733_v28 }
 0x4cd   :  { %4497 = vst.msk [vmem:[#allocation2 + $0x149] sm:$0x1] %vm4452_vm11, %v7733_v28  ;;  %4498 = vst.msk [vmem:[#allocation2 + $0x161] sm:$0x1] %vm4452_vm11, %v7733_v28 }
 0x4ce   :  { %4499 = vst.msk [vmem:[#allocation2 + $0x179] sm:$0x1] %vm4452_vm11, %v7733_v28  ;;  %4500 = vst.msk [vmem:[#allocation2 + $0x191] sm:$0x1] %vm4452_vm11, %v7733_v28 }
 0x4cf   :  { %4501 = vst.msk [vmem:[#allocation2 + $0x1d9] sm:$0x1] %vm4452_vm11, %v7733_v28  ;;  %4502 = vst.msk [vmem:[#allocation2 + $0x1f1] sm:$0x1] %vm4452_vm11, %v7733_v28 }
 0x4d0   :  { %4503 = vst.msk [vmem:[#allocation2 + $0x209] sm:$0x1] %vm4452_vm11, %v7733_v28  ;;  %4504 = vst.msk [vmem:[#allocation2 + $0x221] sm:$0x1] %vm4452_vm11, %v7733_v28 }
 0x4d1   :  { %4505 = vst.msk [vmem:[#allocation2 + $0x239] sm:$0x1] %vm4452_vm11, %v7733_v28  ;;  %4506 = vst.msk [vmem:[#allocation2 + $0x251] sm:$0x1] %vm4452_vm11, %v7733_v28 }
 0x4d2   :  { %4507 = vst.msk [vmem:[#allocation2 + $0x269] sm:$0x1] %vm4452_vm11, %v7733_v28  ;;  %4508 = vst.msk [vmem:[#allocation2 + $0x281] sm:$0x1] %vm4452_vm11, %v7733_v28 }
 0x4d3   :  { %4509 = vst.msk [vmem:[#allocation2 + $0x299] sm:$0x1] %vm4452_vm11, %v7733_v28  ;;  %4510 = vst.msk [vmem:[#allocation2 + $0x2b1] sm:$0x1] %vm4452_vm11, %v7733_v28 }
 0x4d4   :  { %4511 = vst.msk [vmem:[#allocation2 + $0x2c9] sm:$0x1] %vm4452_vm11, %v7733_v28  ;;  %4512 = vst.msk [vmem:[#allocation2 + $0x2e1] sm:$0x1] %vm4452_vm11, %v7733_v28 }
 0x4d5   :  { %4513 = vst.msk [vmem:[#allocation2 + $0x2f9] sm:$0x1] %vm4452_vm11, %v7733_v28  ;;  %4514 = vst.msk [vmem:[#allocation2 + $0x311] sm:$0x1] %vm4452_vm11, %v7733_v28 }
 0x4d6   :  { %4515 = vst.msk [vmem:[#allocation2 + $0x329] sm:$0x1] %vm4452_vm11, %v7733_v28  ;;  %4516 = vst.msk [vmem:[#allocation2 + $0x341] sm:$0x1] %vm4452_vm11, %v7733_v28  ;;  %v4041_v28 = vadd.f32 %v4040_v9, %v4039_v45  ;;  %v3942_v45 = vmul.f32 %v12163_v38, %v12163_v38 }
 0x4d7   :  { %16016 = vst [vmem:[#allocation122_spill] sm:$0xff] %v12138_v0  ;;  %16017 = vst [vmem:[#allocation181_spill] sm:$0xff] %v12144_v6  ;;  %v3848_v6 = vsel %vm3108_vm8, %v12163_v38, 0.0 }
 0x4d8   :  { %16018 = vst [vmem:[#allocation4_spill] sm:$0xff] %v12169_v58  ;;  %v4043_v9 = vadd.f32 %v4042_v63, %v4041_v28  ;;  %16019 = vst [vmem:[#allocation206_spill] sm:$0xff] %v12181_v15  ;;  %v3849_v62 = vadd.f32 %v3848_v6, %v3847_v36  ;;  %v4046_v28 = vsel %vm3108_vm8, %v3942_v45, 0.0  ;;  %v3944_v63 = vmul.f32 %v12181_v15, %v12181_v15 }
 0x4d9   :  { %v11872_v24 = vpop.f32.mrb[16].mxu1  ;;  %16020 = vst [vmem:[#allocation62_spill] sm:$0xff] %v12187_v17  ;;  %v12201_v6 = vadd.f32 %v11788_v53, %v11587_v48  ;;  %v12207_v36 = vadd.f32 %v11587_v48, %v11830_v56  ;;  %v12219_v56 = vadd.f32 %v11828_v46, %v11587_v48 }
 0x4da   :  { %v11882_v26 = vpop.f32.mrb[17].mxu1  ;;  %v4045_v0 = vadd.f32 %v4044_v50, %v4043_v9  ;;  %v3851_v21 = vadd.f32 %v3850_v13, %v3849_v62  ;;  %v4050_v25 = vsel %vm3108_vm8, %v3944_v63, 0.0  ;;  %v4052_v13 = vsel %vm3108_vm8, %v3945_v12, 0.0 }
 0x4db   :  { %16021 = vst [vmem:[#allocation121_spill] sm:$0xff] %v12201_v6  ;;  %16022 = vst [vmem:[#allocation180_spill] sm:$0xff] %v12207_v36  ;;  %v3947_v53 = vmul.f32 %v12207_v36, %v12207_v36  ;;  %v12225_v63 = vadd.f32 %v11587_v48, %v11882_v26  ;;  %v12237_v26 = vadd.f32 %v11872_v24, %v11587_v48 }
 0x4dc   :  { %v4047_v30 = vadd.f32 %v4046_v28, %v4045_v0  ;;  %v3854_v0 = vsel %vm3108_vm8, %v12187_v17, 0.0  ;;  %v3853_v45 = vadd.f32 %v3852_v22, %v3851_v21  ;;  %v3856_v17 = vsel %vm3108_vm8, %v12201_v6, 0.0  ;;  %16023 = vst [vmem:[#allocation7_spill] sm:$0xff] %v12219_v56 }
 0x4dd   :  { %v3858_v21 = vsel %vm3108_vm8, %v12207_v36, 0.0  ;;  %16024 = vst [vmem:[#allocation211_spill] sm:$0xff] %v12225_v63  ;;  %v4056_v22 = vsel %vm3108_vm8, %v3947_v53, 0.0  ;;  %v3949_v46 = vmul.f32 %v12225_v63, %v12225_v63  ;;  %16025 = vst [vmem:[#allocation65_spill] sm:$0xff] %v12237_v26  ;;  %v3950_v24 = vmul.f32 %v12237_v26, %v12237_v26 }
 0x4de   :  { %v4049_v9 = vadd.f32 %v4048_v51, %v4047_v30  ;;  %v3855_v62 = vadd.f32 %v3854_v0, %v3853_v45  ;;  %v3946_v51 = vmul.f32 %v12201_v6, %v12201_v6 }
 0x4e0   :  { %v4051_v28 = vadd.f32 %v4050_v25, %v4049_v9  ;;  %v3857_v12 = vadd.f32 %v3856_v17, %v3855_v62  ;;  %v4054_v9 = vsel %vm3108_vm8, %v3946_v51, 0.0  ;;  %v3948_v25 = vmul.f32 %v12219_v56, %v12219_v56 }
 0x4e1   :  { %v3862_v17 = vsel %vm3108_vm8, %v12225_v63, 0.0 }
 0x4e2   :  { %v4053_v30 = vadd.f32 %v4052_v13, %v4051_v28  ;;  %v3859_v0 = vadd.f32 %v3858_v21, %v3857_v12  ;;  %v3860_v28 = vsel %vm3108_vm8, %v12219_v56, 0.0  ;;  %v4058_v53 = vsel %vm3108_vm8, %v3948_v25, 0.0  ;;  %v4975_v56 = vld [vmem:[#allocation2 + $0x2] sm:$0xff] }
 0x4e4   :  { %v4055_v45 = vadd.f32 %v4054_v9, %v4053_v30  ;;  %v3861_v51 = vadd.f32 %v3860_v28, %v3859_v0  ;;  %v4060_v30 = vsel %vm3108_vm8, %v3949_v46, 0.0  ;;  %v4062_v28 = vsel %vm3108_vm8, %v3950_v24, 0.0 }
 0x4e6   :  { %v4057_v13 = vadd.f32 %v4056_v22, %v4055_v45  ;;  %v3863_v12 = vadd.f32 %v3862_v17, %v3861_v51 }
 0x4e8   :  { %v4059_v9 = vadd.f32 %v4058_v53, %v4057_v13 }
 0x4e9   :  { %v11926_v57 = vpop.f32.mrb[18].mxu1 }
 0x4ea   :  { %v11932_v40 = vpop.f32.mrb[19].mxu1  ;;  %v4061_v63 = vadd.f32 %v4060_v30, %v4059_v9  ;;  %v12255_v0 = vadd.f32 %v11926_v57, %v11587_v48 }
 0x4eb   :  { %v12243_v62 = vadd.f32 %v11587_v48, %v11932_v40  ;;  %v3864_v40 = vsel %vm3108_vm8, %v12237_v26, 0.0  ;;  %v4583_v26 = vld [vmem:[#allocation2] sm:$0xff] }
 0x4ec   :  { %16027 = vst [vmem:[#allocation183_spill] sm:$0xff] %v12255_v0  ;;  %v3865_v13 = vadd.f32 %v3864_v40, %v3863_v12  ;;  %v4063_v53 = vadd.f32 %v4062_v28, %v4061_v63  ;;  %v3952_v30 = vmul.f32 %v12255_v0, %v12255_v0 }
 0x4ed   :  { %16026 = vst [vmem:[#allocation124_spill] sm:$0xff] %v12243_v62  ;;  %v3951_v45 = vmul.f32 %v12243_v62, %v12243_v62  ;;  %v3866_v25 = vsel %vm3108_vm8, %v12243_v62, 0.0  ;;  %v3868_v62 = vsel %vm3108_vm8, %v12255_v0, 0.0 }
 0x4ee   :  { %v3867_v51 = vadd.f32 %v3866_v25, %v3865_v13 }
 0x4ef   :  { %v4064_v17 = vsel %vm3108_vm8, %v3951_v45, 0.0  ;;  %v4066_v45 = vsel %vm3108_vm8, %v3952_v30, 0.0 }
 0x4f0   :  { %v4065_v9 = vadd.f32 %v4064_v17, %v4063_v53  ;;  %v3869_v63 = vadd.f32 %v3868_v62, %v3867_v51 }
 0x4f2   :  { %v4067_v13 = vadd.f32 %v4066_v45, %v4065_v9 }
 0x4f9   :  { %v12146_v37 = vpop.f32.mrb[20].mxu1 }
 0x4fa   :  { %v12149_v3 = vpop.f32.mrb[21].mxu1 }
 0x4fb   :  { %v12261_v46 = vadd.f32 %v11587_v48, %v12149_v3  ;;  %v12273_v3 = vadd.f32 %v12146_v37, %v11587_v48 }
 0x4fd   :  { %16028 = vst [vmem:[#allocation6_spill] sm:$0xff] %v12261_v46  ;;  %v3953_v57 = vmul.f32 %v12261_v46, %v12261_v46  ;;  %16029 = vst [vmem:[#allocation210_spill] sm:$0xff] %v12273_v3  ;;  %v3870_v12 = vsel %vm3108_vm8, %v12261_v46, 0.0  ;;  %v3954_v28 = vmul.f32 %v12273_v3, %v12273_v3  ;;  %v3872_v53 = vsel %vm3108_vm8, %v12273_v3, 0.0 }
 0x4fe   :  { %v3871_v25 = vadd.f32 %v3870_v12, %v3869_v63 }
 0x4ff   :  { %v4068_v40 = vsel %vm3108_vm8, %v3953_v57, 0.0  ;;  %v4070_v12 = vsel %vm3108_vm8, %v3954_v28, 0.0 }
 0x500   :  { %v4069_v17 = vadd.f32 %v4068_v40, %v4067_v13  ;;  %v3873_v57 = vadd.f32 %v3872_v53, %v3871_v25 }
 0x502   :  { %v4071_v40 = vadd.f32 %v4070_v12, %v4069_v17 }
 0x509   :  { %v12195_v50 = vpop.f32.mrb[22].mxu1 }
 0x50a   :  { %v3718_v58 = vpop.f32.mrb[23].mxu1 }
 0x50b   :  { %v12278_v24 = vadd.f32 %v11587_v48, %v3718_v58  ;;  %v12290_v58 = vadd.f32 %v12195_v50, %v11587_v48 }
 0x50d   :  { %16030 = vst [vmem:[#allocation64_spill] sm:$0xff] %v12278_v24  ;;  %v3955_v37 = vmul.f32 %v12278_v24, %v12278_v24  ;;  %16031 = vst [vmem:[#allocation123_spill] sm:$0xff] %v12290_v58  ;;  %v3874_v62 = vsel %vm3108_vm8, %v12278_v24, 0.0  ;;  %v3956_v13 = vmul.f32 %v12290_v58, %v12290_v58 }
 0x50e   :  { %v3875_v45 = vadd.f32 %v3874_v62, %v3873_v57 }
 0x50f   :  { %v4072_v63 = vsel %vm3108_vm8, %v3955_v37, 0.0  ;;  %v4074_v17 = vsel %vm3108_vm8, %v3956_v13, 0.0 }
 0x510   :  { %v4073_v3 = vadd.f32 %v4072_v63, %v4071_v40 }
 0x512   :  { %v4075_v57 = vadd.f32 %v4074_v17, %v4073_v3 }
 0x519   :  { %v7627_v21 = vpop.f32.mrb[24].mxu1 }
 0x51a   :  { %v3728_v22 = vpop.f32.mrb[25].mxu1  ;;  %v12306_v24 = vadd.f32 %v7627_v21, %v11587_v48 }
 0x51b   :  { %v12295_v51 = vadd.f32 %v11587_v48, %v3728_v22  ;;  %v3876_v22 = vsel %vm3108_vm8, %v12290_v58, 0.0  ;;  %v4780_v58 = vld [vmem:[#allocation2 + $0x9] sm:$0xff] }
 0x51c   :  { %16033 = vst [vmem:[#allocation9_spill] sm:$0xff] %v12306_v24  ;;  %v3877_v37 = vadd.f32 %v3876_v22, %v3875_v45  ;;  %v3958_v12 = vmul.f32 %v12306_v24, %v12306_v24  ;;  %v3880_v40 = vsel %vm3108_vm8, %v12306_v24, 0.0 }
 0x51d   :  { %16032 = vst [vmem:[#allocation182_spill] sm:$0xff] %v12295_v51  ;;  %v3957_v50 = vmul.f32 %v12295_v51, %v12295_v51  ;;  %v3878_v25 = vsel %vm3108_vm8, %v12295_v51, 0.0 }
 0x51e   :  { %v3879_v62 = vadd.f32 %v3878_v25, %v3877_v37 }
 0x51f   :  { %v4076_v53 = vsel %vm3108_vm8, %v3957_v50, 0.0  ;;  %v4078_v50 = vsel %vm3108_vm8, %v3958_v12, 0.0 }
 0x520   :  { %v4077_v63 = vadd.f32 %v4076_v53, %v4075_v57  ;;  %v3881_v13 = vadd.f32 %v3880_v40, %v3879_v62 }
 0x522   :  { %v4079_v25 = vadd.f32 %v4078_v50, %v4077_v63 }
 0x529   :  { %v7630_v30 = vpop.f32.mrb[26].mxu1 }
 0x52a   :  { %v3738_v9 = vpop.f32.mrb[27].mxu1 }
 0x52b   :  { %v12311_v28 = vadd.f32 %v11587_v48, %v3738_v9  ;;  %v12322_v9 = vadd.f32 %v7630_v30, %v11587_v48 }
 0x52d   :  { %16034 = vst [vmem:[#allocation215_spill] sm:$0xff] %v12311_v28  ;;  %v3959_v21 = vmul.f32 %v12311_v28, %v12311_v28  ;;  %16035 = vst [vmem:[#allocation67_spill] sm:$0xff] %v12322_v9  ;;  %v3882_v45 = vsel %vm3108_vm8, %v12311_v28, 0.0  ;;  %v3960_v37 = vmul.f32 %v12322_v9, %v12322_v9  ;;  %v3884_v24 = vsel %vm3108_vm8, %v12322_v9, 0.0 }
 0x52e   :  { %v3883_v22 = vadd.f32 %v3882_v45, %v3881_v13 }
 0x52f   :  { %v4080_v3 = vsel %vm3108_vm8, %v3959_v21, 0.0  ;;  %v4082_v21 = vsel %vm3108_vm8, %v3960_v37, 0.0  ;;  %v15399_v37 = vlaneseq }
 0x530   :  { %v4081_v53 = vadd.f32 %v4080_v3, %v4079_v25  ;;  %v3885_v12 = vadd.f32 %v3884_v24, %v3883_v22 }
 0x531   :  { %v12350_v9 = vshrl.u32 %v15399_v37, 7 }
 0x532   :  { %v4083_v50 = vadd.f32 %v4082_v21, %v4081_v53 }
 0x533   :  { %16038 = vst [vmem:[#allocation8_spill] sm:$0xff] %v12350_v9  ;;  %v4649_v21 = vsub.s32 0, %v12350_v9  ;;  %v5237_v36 = vsub.s32 3, %v12350_v9 }
 0x539   :  { %v7633_v17 = vpop.f32.mrb[28].mxu1 }
 0x53a   :  { %v12331_v57 = vadd.f32 %v7633_v17, %v11587_v48  ;;  %v3748_v30 = vpop.f32.mrb[29].mxu1 }
 0x53b   :  { %v12336_v62 = vadd.f32 %v11587_v48, %v3748_v30 }
 0x53c   :  { %16036 = vst [vmem:[#allocation126_spill] sm:$0xff] %v12331_v57  ;;  %v3962_v63 = vmul.f32 %v12331_v57, %v12331_v57  ;;  %v3888_v3 = vsel %vm3108_vm8, %v12331_v57, 0.0  ;;  %v5041_v57 = vsub.s32 2, %v12350_v9 }
 0x53d   :  { %16037 = vst [vmem:[#allocation185_spill] sm:$0xff] %v12336_v62  ;;  %v3886_v40 = vsel %vm3108_vm8, %v12336_v62, 0.0  ;;  %v3961_v45 = vmul.f32 %v12336_v62, %v12336_v62  ;;  %v4584_v62 = vld [vmem:[#allocation2 + $0x8] sm:$0xff] }
 0x53e   :  { %v3887_v13 = vadd.f32 %v3886_v40, %v3885_v12  ;;  %v4086_v22 = vsel %vm3108_vm8, %v3962_v63, 0.0 }
 0x53f   :  { %v4084_v25 = vsel %vm3108_vm8, %v3961_v45, 0.0 }
 0x540   :  { %v4085_v17 = vadd.f32 %v4084_v25, %v4083_v50  ;;  %v3889_v24 = vadd.f32 %v3888_v3, %v3887_v13  ;;  %v4845_v13 = vsub.s32 1, %v12350_v9 }
 0x542   :  { %v4087_v30 = vadd.f32 %v4086_v22, %v4085_v17 }
 0x546   :  { %v7636_v28 = vpop.f32.mrb[30].mxu1 }
 0x547   :  { %v12353_v51 = vadd.f32 %v7636_v28, %v11587_v48  ;;  %v3758_v12 = vpop.f32.mrb[31].mxu1  ;;  %v4581_v28 = vld [vmem:[%s15351_s5] sm:$0xff] }
 0x548   :  { %v12356_v53 = vadd.f32 %v11587_v48, %v3758_v12  ;;  %v12373_v12 = vrot.slane %v4581_v28, %v4649_v21  ;;  %v12375_v37 = vrot.slane %v4581_v28, %v4845_v13  ;;  %v4976_v13 = vld [vmem:[#allocation2 + $0xa] sm:$0xff] }
 0x549   :  { %16039 = vst [vmem:[#allocation214_spill] sm:$0xff] %v12353_v51  ;;  %v3964_v40 = vmul.f32 %v12353_v51, %v12353_v51  ;;  %v3892_v48 = vsel %vm3108_vm8, %v12353_v51, 0.0  ;;  %v4779_v51 = vld [vmem:[#allocation2 + $0x1] sm:$0xff] }
 0x54a   :  { %v3890_v63 = vsel %vm3108_vm8, %v12356_v53, 0.0  ;;  %v3963_v45 = vmul.f32 %v12356_v53, %v12356_v53  ;;  %16040 = vst [vmem:[#allocation66_spill] sm:$0xff] %v12373_v12  ;;  %16041 = vst [vmem:[#allocation125_spill] sm:$0xff] %v12375_v37 }
 0x54b   :  { %v3891_v50 = vadd.f32 %v3890_v63, %v3889_v24  ;;  %v4090_v22 = vsel %vm3108_vm8, %v3964_v40, 0.0 }
 0x54c   :  { %v4088_v3 = vsel %vm3108_vm8, %v3963_v45, 0.0  ;;  %v4652_v45 = vmul.f32 %v12373_v12, %v4584_v62 }
 0x54d   :  { %v3893_v25 = vadd.f32 %v3892_v48, %v3891_v50  ;;  %v4089_v17 = vadd.f32 %v4088_v3, %v4087_v30  ;;  %v4848_v30 = vmul.f32 %v12375_v37, %v4780_v58  ;;  %v12380_v50 = vrot.slane %v4581_v28, %v5041_v57 }
 0x54e   :  { %v4651_v48 = vmul.f32 %v12373_v12, %v4583_v26  ;;  %v4847_v3 = vmul.f32 %v12375_v37, %v4779_v51  ;;  %v5433_v58 = vsub.s32 4, %v12350_v9  ;;  %v5629_v57 = vsub.s32 5, %v12350_v9 }
 0x54f   :  { %v3894_v24 = vrot.slane %v3893_v25, 4  ;;  %v4091_v63 = vadd.f32 %v4090_v22, %v4089_v17  ;;  %16042 = vst [vmem:[#allocation184_spill] sm:$0xff] %v12380_v50  ;;  %v6022_v26 = vsub.s32 7, %v12350_v9 }
 0x551   :  { %v3895_v46 = vadd.f32 %v3894_v24, %v3893_v25  ;;  %v4092_v0 = vrot.slane %v4091_v63, 4  ;;  %v4912_v25 = vadd.f32 %v4848_v30, %v4652_v45  ;;  %v5044_v24 = vmul.f32 %v12380_v50, %v4976_v13 }
 0x552   :  { %v12391_v45 = vrot.slane %v4581_v28, %v5237_v36  ;;  %v12403_v15 = vrot.slane %v4581_v28, %v6022_v26  ;;  %v16058_v26 = vld [vmem:[#allocation206_spill] sm:$0xff] }
 0x553   :  { %v3896_v21 = vrot.slane %v3895_v46, 2  ;;  %v4093_v40 = vadd.f32 %v4092_v0, %v4091_v63  ;;  %v5826_v0 = vsub.s32 6, %v12350_v9  ;;  %v4911_v63 = vadd.f32 %v4847_v3, %v4651_v48 }
 0x554   :  { %16043 = vst [vmem:[#allocation11_spill] sm:$0xff] %v12391_v45  ;;  %v12395_v37 = vadd.f32 %v5044_v24, %v4912_v25  ;;  %16048 = vst [vmem:[#allocation68_spill] sm:$0xff] %v12403_v15  ;;  %v16061_v24 = vld [vmem:[#allocation180_spill] sm:$0xff]  ;;  %v16076_v25 = vld [vmem:[#allocation126_spill] sm:$0xff] }
 0x555   :  { %v3897_v17 = vadd.f32 %v3896_v21, %v3895_v46  ;;  %v4094_v22 = vrot.slane %v4093_v40, 2  ;;  %v5043_v46 = vmul.f32 %v12380_v50, %v4975_v56  ;;  %v12401_v12 = vrot.slane %v4581_v28, %v5826_v0  ;;  %v16057_v0 = vld [vmem:[#allocation4_spill] sm:$0xff] }
 0x556   :  { %16044 = vst [vmem:[#allocation69_spill] sm:$0xff] %v12395_v37  ;;  %v12559_v37 = vld [vmem:[%s15353_s4] ss:$0 sm:$0xff] }
 0x557   :  { %v3898_v62 = vrot.slane %v3897_v17, 1  ;;  %v4095_v6 = vadd.f32 %v4094_v22, %v4093_v40  ;;  %v12397_v40 = vrot.slane %v4581_v28, %v5433_v58  ;;  %v12399_v22 = vrot.slane %v4581_v28, %v5629_v57  ;;  %16047 = vst [vmem:[#allocation10_spill] sm:$0xff] %v12401_v12  ;;  %v16055_v57 = vld [vmem:[#allocation122_spill] sm:$0xff]  ;;  %v16074_v28 = vld [vmem:[#allocation67_spill] sm:$0xff]  ;;  %v16075_v58 = vld [vmem:[#allocation185_spill] sm:$0xff] }
 0x558   :  { %v12405_v48 = vadd.f32 %v5043_v46, %v4911_v63  ;;  %v16050_v46 = vld [vmem:[#allocation120_spill] sm:$0xff]  ;;  %v16059_v63 = vld [vmem:[#allocation62_spill] sm:$0xff]  ;;  %16081 = vst [vmem:[#allocation186_spill] sm:$0xff] %v12559_v37 }
 0x559   :  { %v3899_v51 = vadd.f32 %v3898_v62, %v3897_v17  ;;  %v4096_v21 = vrot.slane %v4095_v6, 1  ;;  %16045 = vst [vmem:[#allocation128_spill] sm:$0xff] %v12397_v40  ;;  %16046 = vst [vmem:[#allocation187_spill] sm:$0xff] %v12399_v22  ;;  %v12532_v22 = vld [vmem:[%s15352_s3] ss:$0 sm:$0xff] }
 0x55a   :  { %16049 = vst [vmem:[#allocation127_spill] sm:$0xff] %v12405_v48 }
 0x55b   :  { %v12393_v30 = vmul.f32 0.001953125, %v3899_v51  ;;  %v4097_v13 = vadd.f32 %v4096_v21, %v4095_v6  ;;  %v16060_v51 = vld [vmem:[#allocation121_spill] sm:$0xff]  ;;  %v16066_v6 = vld [vmem:[#allocation183_spill] sm:$0xff] }
 0x55d   :  { %v4098_v56 = vmul.f32 0.001953125, %v4097_v13  ;;  %v4099_v36 = vmul.f32 %v12393_v30, %v12393_v30  ;;  %v16056_v13 = vld [vmem:[#allocation181_spill] sm:$0xff]  ;;  %v16077_v17 = vsub.f32 %v12356_v53, %v12393_v30  ;;  %v16079_v12 = vsub.f32 %v11599_v32, %v12393_v30 }
 0x55e   :  { %v16080_v50 = vsub.f32 %v11595_v54, %v12393_v30  ;;  %v16082_v53 = vsub.f32 %v11603_v59, %v12393_v30  ;;  %v16083_v32 = vsub.f32 %v11619_v7, %v12393_v30  ;;  %v16084_v54 = vsub.f32 %v11623_v27, %v12393_v30 }
 0x55f   :  { %v4100_v62 = vsub.f32 %v4098_v56, %v4099_v36  ;;  %v16051_v56 = vld [vmem:[#allocation179_spill] sm:$0xff]  ;;  %v16052_v36 = vld [vmem:[#allocation5_spill] sm:$0xff]  ;;  %v16086_v3 = vsub.f32 %v11638_v35, %v12393_v30  ;;  %v16088_v35 = vsub.f32 %v11656_v42, %v12393_v30 }
 0x561   :  { %v4165_v21 = vadd.f32 1e-05, %v4100_v62  ;;  %v16054_v62 = vld [vmem:[#allocation63_spill] sm:$0xff] }
 0x563   :  { %7660 = vrsqrt.f32 %v4165_v21  ;;  %v16053_v21 = vld [vmem:[#allocation207_spill] sm:$0xff] }
 0x56d   :  { %v12527_v45 = vpop.eup %7660 }
 0x56e   :  { %v4229_v15 = vmul.f32 %v12527_v45, %v16077_v17  ;;  %v4167_v40 = vmul.f32 %v12527_v45, %v16079_v12  ;;  %v4168_v48 = vmul.f32 %v12527_v45, %v16080_v50  ;;  %v4169_v17 = vmul.f32 %v12527_v45, %v16082_v53 }
 0x56f   :  { %v4170_v12 = vmul.f32 %v12527_v45, %v16083_v32  ;;  %v12573_v50 = vmul.f32 %v12527_v45, %v16084_v54  ;;  %v12579_v9 = vmul.f32 %v12527_v45, %v16086_v3  ;;  %v16087_v32 = vsub.f32 %v11642_v55, %v12393_v30 }
 0x570   :  { %v4300_v59 = vmul.f32 %v12532_v22, %v4229_v15  ;;  %v4238_v53 = vmul.f32 %v12532_v22, %v4167_v40  ;;  %v4239_v7 = vmul.f32 %v12532_v22, %v4168_v48  ;;  %v4240_v54 = vmul.f32 %v12532_v22, %v4169_v17 }
 0x571   :  { %16085 = vst [vmem:[#allocation13_spill] sm:$0xff] %v12573_v50  ;;  %v12588_v27 = vmul.f32 %v12527_v45, %v16087_v32  ;;  %v4241_v50 = vmul.f32 %v12532_v22, %v4170_v12  ;;  %v12596_v3 = vmul.f32 %v12527_v45, %v16088_v35  ;;  %v16089_v15 = vsub.f32 %v11660_v52, %v12393_v30 }
 0x572   :  { %v4371_v55 = vadd.f32 %v12559_v37, %v4300_v59  ;;  %v4309_v48 = vadd.f32 %v12559_v37, %v4238_v53  ;;  %v4310_v17 = vadd.f32 %v12559_v37, %v4239_v7  ;;  %v16090_v12 = vsub.f32 %v11678_v60, %v12393_v30 }
 0x573   :  { %v12602_v40 = vmul.f32 %v12527_v45, %v16089_v15  ;;  %v4311_v32 = vadd.f32 %v12559_v37, %v4240_v54  ;;  %v4312_v35 = vadd.f32 %v12559_v37, %v4241_v50  ;;  %v16091_v52 = vsub.f32 %v11682_v34, %v12393_v30 }
 0x574   :  { %v12611_v42 = vmul.f32 %v12527_v45, %v16090_v12  ;;  %v16093_v59 = vsub.f32 %v11696_v39, %v12393_v30  ;;  %v4435_v60 = vmax.f32 %v4371_v55, 0.0  ;;  %v4373_v7 = vmax.f32 %v4309_v48, 0.0 }
 0x575   :  { %v12619_v15 = vmul.f32 %v12527_v45, %v16091_v52  ;;  %v4374_v12 = vmax.f32 %v4310_v17, 0.0  ;;  %v16094_v54 = vsub.f32 %v11700_v10, %v12393_v30  ;;  %v4375_v37 = vmax.f32 %v4311_v32, 0.0 }
 0x576   :  { %v12625_v53 = vmul.f32 %v12527_v45, %v16093_v59  ;;  %v4376_v34 = vmax.f32 %v4312_v35, 0.0  ;;  %v16095_v52 = vsub.f32 %v11718_v23, %v12393_v30  ;;  %v16096_v39 = vsub.f32 %v11722_v44, %v12393_v30  ;;  %4579 = vst.msk [vmem:[#allocation2 + $0x331] sm:$0xff] %vm3108_vm8, %v4435_v60  ;;  %4517 = vst.msk [vmem:[#allocation2 + $0x19] sm:$0xff] %vm3108_vm8, %v4373_v7 }
 0x577   :  { %16092 = vst [vmem:[#allocation221_spill] sm:$0xff] %v12619_v15  ;;  %v12631_v50 = vmul.f32 %v12527_v45, %v16094_v54  ;;  %4518 = vst.msk [vmem:[#allocation2 + $0x21] sm:$0xff] %vm3108_vm8, %v4374_v12  ;;  %v16097_v10 = vsub.f32 %v11736_v11, %v12393_v30  ;;  %v16098_v48 = vsub.f32 %v11740_v33, %v12393_v30 }
 0x578   :  { %v12637_v15 = vmul.f32 %v12527_v45, %v16095_v52  ;;  %v12643_v55 = vmul.f32 %v12527_v45, %v16096_v39  ;;  %v16099_v17 = vsub.f32 %v11758_v20, %v12393_v30  ;;  %v16100_v35 = vsub.f32 %v11762_v5, %v12393_v30  ;;  %4519 = vst.msk [vmem:[#allocation2 + $0x31] sm:$0xff] %vm3108_vm8, %v4375_v37 }
 0x579   :  { %v12652_v23 = vmul.f32 %v12527_v45, %v16097_v10  ;;  %v12658_v44 = vmul.f32 %v12527_v45, %v16098_v48  ;;  %4520 = vst.msk [vmem:[#allocation2 + $0x39] sm:$0xff] %vm3108_vm8, %v4376_v34  ;;  %v16101_v33 = vsub.f32 %v11776_v47, %v12393_v30  ;;  %v16102_v20 = vsub.f32 %v11780_v49, %v12393_v30 }
 0x57a   :  { %v12664_v32 = vmul.f32 %v12527_v45, %v16099_v17  ;;  %v12670_v11 = vmul.f32 %v12527_v45, %v16100_v35  ;;  %v16103_v5 = vsub.f32 %v11798_v18, %v12393_v30  ;;  %v16104_v37 = vsub.f32 %v11802_v1, %v12393_v30 }
 0x57b   :  { %v12678_v59 = vmul.f32 %v12527_v45, %v16101_v33  ;;  %v12684_v60 = vmul.f32 %v12527_v45, %v16102_v20  ;;  %v16105_v12 = vsub.f32 %v11816_v14, %v12393_v30  ;;  %v16106_v54 = vsub.f32 %v16050_v46, %v12393_v30 }
 0x57c   :  { %v12690_v7 = vmul.f32 %v12527_v45, %v16103_v5  ;;  %v12696_v47 = vmul.f32 %v12527_v45, %v16104_v37  ;;  %v16107_v34 = vsub.f32 %v11838_v19, %v12393_v30  ;;  %v16108_v52 = vsub.f32 %v11842_v2, %v12393_v30 }
 0x57d   :  { %v12702_v49 = vmul.f32 %v12527_v45, %v16105_v12  ;;  %v12708_v18 = vmul.f32 %v12527_v45, %v16106_v54  ;;  %v16109_v39 = vsub.f32 %v16051_v56, %v12393_v30  ;;  %v16110_v10 = vsub.f32 %v16052_v36, %v12393_v30 }
 0x57e   :  { %v12714_v1 = vmul.f32 %v12527_v45, %v16107_v34  ;;  %v12720_v14 = vmul.f32 %v12527_v45, %v16108_v52  ;;  %v16111_v48 = vsub.f32 %v11876_v31, %v12393_v30  ;;  %v16112_v17 = vsub.f32 %v11880_v4, %v12393_v30  ;;  %v12797_v52 = vld [vmem:[%s15351_s5 + $0x8] ss:$0 sm:$0xff] }
 0x57f   :  { %v12726_v46 = vmul.f32 %v12527_v45, %v16109_v39  ;;  %v12732_v19 = vmul.f32 %v12527_v45, %v16110_v10  ;;  %v16113_v35 = vsub.f32 %v11896_v29, %v12393_v30  ;;  %v16114_v33 = vsub.f32 %v16053_v21, %v12393_v30  ;;  %16122 = vst [vmem:[#allocation130_spill] sm:$0xff] %v12797_v52 }
 0x580   :  { %v12738_v2 = vmul.f32 %v12527_v45, %v16111_v48  ;;  %v12744_v56 = vmul.f32 %v12527_v45, %v16112_v17  ;;  %v16115_v20 = vsub.f32 %v11914_v16, %v12393_v30  ;;  %v16116_v5 = vsub.f32 %v16054_v62, %v12393_v30 }
 0x581   :  { %v12750_v36 = vmul.f32 %v12527_v45, %v16113_v35  ;;  %v12756_v31 = vmul.f32 %v12527_v45, %v16114_v33  ;;  %v16117_v37 = vsub.f32 %v11936_v43, %v12393_v30  ;;  %v16118_v12 = vsub.f32 %v11944_v41, %v12393_v30  ;;  %v12823_v35 = vld [vmem:[#allocation2 + $0x20] sm:$0xff] }
 0x582   :  { %v12762_v4 = vmul.f32 %v12527_v45, %v16115_v20  ;;  %v12768_v29 = vmul.f32 %v12527_v45, %v16116_v5  ;;  %v16119_v54 = vsub.f32 %v11956_v61, %v12393_v30  ;;  %v16120_v34 = vsub.f32 %v11962_v8, %v12393_v30  ;;  %16131 = vst [vmem:[#allocation129_spill] sm:$0xff] %v12823_v35  ;;  %v12825_v33 = vld [vmem:[#allocation2 + $0x21] sm:$0xff] }
 0x583   :  { %v12774_v21 = vmul.f32 %v12527_v45, %v16117_v37  ;;  %v12780_v16 = vmul.f32 %v12527_v45, %v16118_v12  ;;  %v16123_v41 = vsub.f32 %v16055_v57, %v12393_v30  ;;  %v16125_v61 = vsub.f32 %v16056_v13, %v12393_v30  ;;  %16132 = vst [vmem:[#allocation188_spill] sm:$0xff] %v12825_v33  ;;  %v12827_v13 = vld [vmem:[#allocation2 + $0x22] sm:$0xff] }
 0x584   :  { %v12786_v62 = vmul.f32 %v12527_v45, %v16119_v54  ;;  %v12792_v43 = vmul.f32 %v12527_v45, %v16120_v34  ;;  %v16127_v8 = vsub.f32 %v12163_v38, %v12393_v30  ;;  %v16129_v17 = vsub.f32 %v16057_v0, %v12393_v30  ;;  %16133 = vst [vmem:[#allocation15_spill] sm:$0xff] %v12827_v13  ;;  %v16142_v34 = vld [vmem:[#allocation11_spill] sm:$0xff] }
 0x585   :  { %v12803_v39 = vmul.f32 %v12527_v45, %v16123_v41  ;;  %v12809_v10 = vmul.f32 %v12527_v45, %v16125_v61  ;;  %v16134_v20 = vsub.f32 %v16058_v26, %v12393_v30  ;;  %v16136_v5 = vsub.f32 %v16059_v63, %v12393_v30  ;;  %v16143_v63 = vld [vmem:[#allocation128_spill] sm:$0xff] }
 0x586   :  { %16121 = vst [vmem:[#allocation71_spill] sm:$0xff] %v12792_v43  ;;  %v12815_v48 = vmul.f32 %v12527_v45, %v16127_v8  ;;  %v12821_v57 = vmul.f32 %v12527_v45, %v16129_v17  ;;  %v16138_v37 = vsub.f32 %v16060_v51, %v12393_v30  ;;  %v16140_v54 = vsub.f32 %v16061_v24, %v12393_v30  ;;  %v16144_v8 = vld [vmem:[#allocation187_spill] sm:$0xff]  ;;  %v12950_v43 = vld [vmem:[#allocation2 + $0x30] sm:$0xff] }
 0x587   :  { %16124 = vst [vmem:[#allocation189_spill] sm:$0xff] %v12803_v39  ;;  %16126 = vst [vmem:[#allocation12_spill] sm:$0xff] %v12809_v10  ;;  %v12833_v38 = vmul.f32 %v12527_v45, %v16134_v20  ;;  %v12839_v0 = vmul.f32 %v12527_v45, %v16136_v5  ;;  %v5240_v41 = vmul.f32 %v16142_v34, %v12823_v35  ;;  %v12859_v20 = vld [vmem:[#allocation2 + $0x38] sm:$0xff]  ;;  %v16151_v35 = vld [vmem:[#allocation10_spill] sm:$0xff] }
 0x588   :  { %16128 = vst [vmem:[#allocation220_spill] sm:$0xff] %v12815_v48  ;;  %16130 = vst [vmem:[#allocation70_spill] sm:$0xff] %v12821_v57  ;;  %v12845_v12 = vmul.f32 %v12527_v45, %v16138_v37  ;;  %v12851_v26 = vmul.f32 %v12527_v45, %v16140_v54  ;;  %v5436_v61 = vmul.f32 %v16143_v63, %v12825_v33  ;;  %v12861_v51 = vld [vmem:[#allocation2 + $0x39] sm:$0xff]  ;;  %v16156_v48 = vld [vmem:[#allocation69_spill] sm:$0xff] }
 0x589   :  { %16135 = vst [vmem:[#allocation224_spill] sm:$0xff] %v12833_v38  ;;  %16137 = vst [vmem:[#allocation73_spill] sm:$0xff] %v12839_v0  ;;  %v5632_v17 = vmul.f32 %v16144_v8, %v12827_v13  ;;  %v12863_v5 = vld [vmem:[#allocation2 + $0x3a] sm:$0xff]  ;;  %v16157_v10 = vld [vmem:[#allocation65_spill] sm:$0xff] }
 0x58a   :  { %16139 = vst [vmem:[#allocation132_spill] sm:$0xff] %v12845_v12  ;;  %16141 = vst [vmem:[#allocation191_spill] sm:$0xff] %v12851_v26  ;;  %v16148_v37 = vld [vmem:[#allocation7_spill] sm:$0xff]  ;;  %v5829_v26 = vmul.f32 %v16151_v35, %v12859_v20  ;;  %v16152_v33 = vld [vmem:[#allocation68_spill] sm:$0xff]  ;;  %v6221_v13 = vmul.f32 %v12797_v52, %v12863_v5 }
 0x58b   :  { %16145 = vst [vmem:[#allocation14_spill] sm:$0xff] %v12859_v20  ;;  %16146 = vst [vmem:[#allocation72_spill] sm:$0xff] %v12861_v51  ;;  %v16149_v24 = vsub.f32 %v16148_v37, %v12393_v30  ;;  %v6025_v12 = vmul.f32 %v16152_v33, %v12861_v51  ;;  %v16153_v0 = vld [vmem:[#allocation211_spill] sm:$0xff]  ;;  %v5304_v37 = vadd.f32 %v5240_v41, %v16156_v48  ;;  %v16160_v20 = vld [vmem:[#allocation124_spill] sm:$0xff] }
 0x58c   :  { %16147 = vst [vmem:[#allocation131_spill] sm:$0xff] %v12863_v5  ;;  %v16154_v38 = vsub.f32 %v16153_v0, %v12393_v30  ;;  %v16161_v51 = vsub.f32 %v16160_v20, %v12393_v30  ;;  %v16163_v0 = vsub.f32 %v16066_v6, %v12393_v30  ;;  %v16165_v5 = vld [vmem:[#allocation6_spill] sm:$0xff]  ;;  %16188 = vst [vmem:[#allocation76_spill] sm:$0xff] %v12950_v43 }
 0x58d   :  { %v12869_v54 = vmul.f32 %v12527_v45, %v16149_v24  ;;  %v16158_v24 = vsub.f32 %v16157_v10, %v12393_v30  ;;  %v16166_v48 = vsub.f32 %v16165_v5, %v12393_v30  ;;  %v16168_v41 = vld [vmem:[#allocation210_spill] sm:$0xff] }
 0x58e   :  { %v12881_v57 = vmul.f32 %v12527_v45, %v16154_v38  ;;  %v12894_v39 = vmul.f32 %v12527_v45, %v16161_v51  ;;  %v12900_v38 = vmul.f32 %v12527_v45, %v16163_v0  ;;  %v16171_v51 = vld [vmem:[#allocation64_spill] sm:$0xff]  ;;  %v16174_v0 = vld [vmem:[#allocation123_spill] sm:$0xff] }
 0x58f   :  { %16150 = vst [vmem:[#allocation190_spill] sm:$0xff] %v12869_v54  ;;  %v12888_v54 = vmul.f32 %v12527_v45, %v16158_v24  ;;  %v12906_v10 = vmul.f32 %v12527_v45, %v16166_v48  ;;  %v16169_v24 = vsub.f32 %v16168_v41, %v12393_v30  ;;  %v12926_v48 = vld [vmem:[#allocation2 + $0x18] sm:$0xff] }
 0x590   :  { %16155 = vst [vmem:[#allocation17_spill] sm:$0xff] %v12881_v57  ;;  %16162 = vst [vmem:[#allocation134_spill] sm:$0xff] %v12894_v39  ;;  %v16172_v39 = vsub.f32 %v16171_v51, %v12393_v30  ;;  %v12930_v41 = vld [vmem:[#allocation2 + $0x1a] sm:$0xff] }
 0x591   :  { %16159 = vst [vmem:[#allocation75_spill] sm:$0xff] %v12888_v54  ;;  %16164 = vst [vmem:[#allocation193_spill] sm:$0xff] %v12900_v38  ;;  %v12912_v20 = vmul.f32 %v12527_v45, %v16169_v24  ;;  %v16175_v38 = vsub.f32 %v16174_v0, %v12393_v30  ;;  %v5500_v24 = vadd.f32 %v5436_v61, %v5304_v37  ;;  %v12952_v61 = vld [vmem:[#allocation2 + $0x31] sm:$0xff] }
 0x592   :  { %16167 = vst [vmem:[#allocation16_spill] sm:$0xff] %v12906_v10  ;;  %v12918_v6 = vmul.f32 %v12527_v45, %v16172_v39  ;;  %16177 = vst [vmem:[#allocation19_spill] sm:$0xff] %v12926_v48  ;;  %v12928_v10 = vld [vmem:[#allocation2 + $0x19] sm:$0xff]  ;;  %v16182_v39 = vld [vmem:[#allocation9_spill] sm:$0xff] }
 0x593   :  { %16170 = vst [vmem:[#allocation74_spill] sm:$0xff] %v12912_v20  ;;  %v12924_v5 = vmul.f32 %v12527_v45, %v16175_v38  ;;  %16178 = vst [vmem:[#allocation77_spill] sm:$0xff] %v12928_v10  ;;  %v16180_v20 = vld [vmem:[#allocation182_spill] sm:$0xff]  ;;  %v16185_v38 = vld [vmem:[#allocation215_spill] sm:$0xff] }
 0x594   :  { %16173 = vst [vmem:[#allocation133_spill] sm:$0xff] %v12918_v6  ;;  %16179 = vst [vmem:[#allocation136_spill] sm:$0xff] %v12930_v41  ;;  %v16181_v54 = vsub.f32 %v16180_v20, %v12393_v30  ;;  %v16183_v6 = vsub.f32 %v16182_v39, %v12393_v30  ;;  %v12954_v37 = vld [vmem:[#allocation2 + $0x32] sm:$0xff] }
 0x595   :  { %16176 = vst [vmem:[#allocation192_spill] sm:$0xff] %v12924_v5  ;;  %v16186_v5 = vsub.f32 %v16185_v38, %v12393_v30 }
 0x596   :  { %v12936_v51 = vmul.f32 %v12527_v45, %v16181_v54  ;;  %v12942_v0 = vmul.f32 %v12527_v45, %v16183_v6  ;;  %v16189_v54 = vsub.f32 %v16074_v28, %v12393_v30  ;;  %v16191_v6 = vsub.f32 %v16075_v58, %v12393_v30 }
 0x597   :  { %v12948_v57 = vmul.f32 %v12527_v45, %v16186_v5  ;;  %v16192_v5 = vsub.f32 %v16076_v25, %v12393_v30  ;;  %v5435_v58 = vmul.f32 %v16143_v63, %v12928_v10  ;;  %v5828_v25 = vmul.f32 %v16151_v35, %v12950_v43 }
 0x598   :  { %16184 = vst [vmem:[#allocation195_spill] sm:$0xff] %v12942_v0  ;;  %v12960_v20 = vmul.f32 %v12527_v45, %v16189_v54  ;;  %v12966_v39 = vmul.f32 %v12527_v45, %v16191_v6  ;;  %v5696_v54 = vadd.f32 %v5632_v17, %v5500_v24  ;;  %v5631_v6 = vmul.f32 %v16144_v8, %v12930_v41  ;;  %v16196_v24 = vld [vmem:[#allocation127_spill] sm:$0xff] }
 0x599   :  { %16187 = vst [vmem:[#allocation18_spill] sm:$0xff] %v12948_v57  ;;  %v12972_v38 = vmul.f32 %v12527_v45, %v16192_v5  ;;  %v16193_v57 = vld [vmem:[#allocation214_spill] sm:$0xff]  ;;  %v6024_v5 = vmul.f32 %v16152_v33, %v12952_v61  ;;  %v12999_v10 = vmul.f32 %v12532_v22, %v12579_v9  ;;  %v13003_v41 = vmul.f32 %v12532_v22, %v12588_v27 }
 0x59a   :  { %16190 = vst [vmem:[#allocation135_spill] sm:$0xff] %v12960_v20  ;;  %v16194_v0 = vsub.f32 %v16193_v57, %v12393_v30  ;;  %v5239_v20 = vmul.f32 %v16142_v34, %v12926_v48  ;;  %v16195_v30 = vld [vmem:[#allocation13_spill] sm:$0xff]  ;;  %v5893_v17 = vadd.f32 %v5829_v26, %v5696_v54  ;;  %v13007_v48 = vmul.f32 %v12532_v22, %v12596_v3 }
 0x59b   :  { %v12994_v57 = vmul.f32 %v12532_v22, %v16195_v30  ;;  %v13015_v26 = vmul.f32 %v12532_v22, %v12611_v42  ;;  %v13023_v27 = vmul.f32 %v12532_v22, %v12625_v53  ;;  %v13027_v3 = vmul.f32 %v12532_v22, %v12631_v50 }
 0x59c   :  { %v12978_v28 = vmul.f32 %v12527_v45, %v16194_v0  ;;  %v6220_v45 = vmul.f32 %v12797_v52, %v12954_v37  ;;  %v5303_v0 = vadd.f32 %v5239_v20, %v16196_v24  ;;  %v13011_v52 = vmul.f32 %v12532_v22, %v12602_v40  ;;  %v16197_v20 = vld [vmem:[#allocation221_spill] sm:$0xff]  ;;  %v16198_v24 = vld [vmem:[#allocation71_spill] sm:$0xff] }
 0x59d   :  { %v13019_v9 = vmul.f32 %v12532_v22, %v16197_v20  ;;  %v6089_v54 = vadd.f32 %v6025_v12, %v5893_v17  ;;  %v13031_v40 = vmul.f32 %v12532_v22, %v12637_v15  ;;  %v13035_v42 = vmul.f32 %v12532_v22, %v12643_v55  ;;  %v16200_v20 = vld [vmem:[#allocation12_spill] sm:$0xff] }
 0x59e   :  { %v5499_v30 = vadd.f32 %v5435_v58, %v5303_v0  ;;  %v13039_v12 = vmul.f32 %v12532_v22, %v12652_v23  ;;  %v13043_v53 = vmul.f32 %v12532_v22, %v12658_v44  ;;  %v13047_v50 = vmul.f32 %v12532_v22, %v12664_v32  ;;  %v16199_v0 = vld [vmem:[#allocation189_spill] sm:$0xff] }
 0x59f   :  { %v6285_v58 = vadd.f32 %v6221_v13, %v6089_v54  ;;  %v13051_v15 = vmul.f32 %v12532_v22, %v12670_v11  ;;  %v13055_v55 = vmul.f32 %v12532_v22, %v12678_v59  ;;  %v13059_v23 = vmul.f32 %v12532_v22, %v12684_v60  ;;  %v16202_v54 = vld [vmem:[#allocation70_spill] sm:$0xff] }
 0x5a0   :  { %v5695_v17 = vadd.f32 %v5631_v6, %v5499_v30  ;;  %v13063_v44 = vmul.f32 %v12532_v22, %v12690_v7  ;;  %v13067_v32 = vmul.f32 %v12532_v22, %v12696_v47  ;;  %v13072_v6 = vmul.f32 %v12532_v22, %v12702_v49 }
 0x5a1   :  { %v6351_v13 = vsel %vm3108_vm8, %v6285_v58, 0.0  ;;  %v13076_v59 = vmul.f32 %v12532_v22, %v12708_v18  ;;  %v13080_v60 = vmul.f32 %v12532_v22, %v12714_v1  ;;  %v13084_v7 = vmul.f32 %v12532_v22, %v12720_v14  ;;  %v16203_v58 = vld [vmem:[#allocation224_spill] sm:$0xff] }
 0x5a2   :  { %v5892_v11 = vadd.f32 %v5828_v25, %v5695_v17  ;;  %6352 = vadd.xlane.f32.xlu1 %v6351_v13  ;;  %v13088_v47 = vmul.f32 %v12532_v22, %v12726_v46  ;;  %v13092_v49 = vmul.f32 %v12532_v22, %v12732_v19  ;;  %v13096_v18 = vmul.f32 %v12532_v22, %v12738_v2  ;;  %v16205_v13 = vld [vmem:[#allocation73_spill] sm:$0xff] }
 0x5a3   :  { %v13100_v1 = vmul.f32 %v12532_v22, %v12744_v56  ;;  %v13104_v14 = vmul.f32 %v12532_v22, %v12750_v36  ;;  %v13108_v46 = vmul.f32 %v12532_v22, %v12756_v31  ;;  %v13112_v19 = vmul.f32 %v12532_v22, %v12762_v4 }
 0x5a4   :  { %v6088_v25 = vadd.f32 %v6024_v5, %v5892_v11  ;;  %v13116_v2 = vmul.f32 %v12532_v22, %v12768_v29  ;;  %v13120_v56 = vmul.f32 %v12532_v22, %v12774_v21  ;;  %v13124_v36 = vmul.f32 %v12532_v22, %v12780_v16 }
 0x5a5   :  { %v13128_v31 = vmul.f32 %v12532_v22, %v12786_v62  ;;  %v13132_v4 = vmul.f32 %v12532_v22, %v16198_v24  ;;  %v13136_v29 = vmul.f32 %v12532_v22, %v16199_v0  ;;  %v13140_v21 = vmul.f32 %v12532_v22, %v16200_v20  ;;  %v16208_v0 = vld [vmem:[#allocation191_spill] sm:$0xff] }
 0x5a6   :  { %v6284_v5 = vadd.f32 %v6220_v45, %v6088_v25  ;;  %v16201_v45 = vld [vmem:[#allocation220_spill] sm:$0xff]  ;;  %v13148_v62 = vmul.f32 %v12532_v22, %v16202_v54  ;;  %v13153_v17 = vmul.f32 %v12532_v22, %v16203_v58  ;;  %v13157_v11 = vmul.f32 %v12532_v22, %v16205_v13  ;;  %v16212_v54 = vld [vmem:[#allocation17_spill] sm:$0xff] }
 0x5a7   :  { %v13144_v16 = vmul.f32 %v12532_v22, %v16201_v45  ;;  %v16207_v25 = vld [vmem:[#allocation132_spill] sm:$0xff]  ;;  %v13165_v20 = vmul.f32 %v12532_v22, %v16208_v0  ;;  %v16210_v45 = vld [vmem:[#allocation190_spill] sm:$0xff]  ;;  %v13173_v58 = vmul.f32 %v12532_v22, %v16212_v54 }
 0x5a8   :  { %v6348_v30 = vsel %vm3108_vm8, %v6284_v5, 0.0  ;;  %16204 = vst [vmem:[#allocation194_spill] sm:$0xff] %v13153_v17  ;;  %16206 = vst [vmem:[#allocation247_spill] sm:$0xff] %v13157_v11  ;;  %v13161_v24 = vmul.f32 %v12532_v22, %v16207_v25  ;;  %v13169_v5 = vmul.f32 %v12532_v22, %v16210_v45  ;;  %v16214_v17 = vld [vmem:[#allocation75_spill] sm:$0xff]  ;;  %v16216_v11 = vld [vmem:[#allocation134_spill] sm:$0xff] }
 0x5a9   :  { %6349 = vadd.xlane.f32.xlu0 %v6348_v30  ;;  %16209 = vst [vmem:[#allocation21_spill] sm:$0xff] %v13165_v20  ;;  %16213 = vst [vmem:[#allocation138_spill] sm:$0xff] %v13173_v58  ;;  %v13177_v13 = vmul.f32 %v12532_v22, %v16214_v17  ;;  %v13181_v25 = vmul.f32 %v12532_v22, %v16216_v11  ;;  %v16217_v30 = vld [vmem:[#allocation193_spill] sm:$0xff]  ;;  %v16219_v20 = vld [vmem:[#allocation16_spill] sm:$0xff] }
 0x5aa   :  { %16211 = vst [vmem:[#allocation79_spill] sm:$0xff] %v13169_v5  ;;  %v13185_v0 = vmul.f32 %v12532_v22, %v16217_v30  ;;  %v13189_v45 = vmul.f32 %v12532_v22, %v16219_v20  ;;  %v16221_v5 = vld [vmem:[#allocation74_spill] sm:$0xff]  ;;  %v16223_v58 = vld [vmem:[#allocation133_spill] sm:$0xff]  ;;  %v13205_v30 = vmul.f32 %v12532_v22, %v12936_v51  ;;  %v13225_v51 = vmul.f32 %v12532_v22, %v12972_v38 }
 0x5ab   :  { %16215 = vst [vmem:[#allocation197_spill] sm:$0xff] %v13177_v13  ;;  %v13193_v54 = vmul.f32 %v12532_v22, %v16221_v5  ;;  %v13197_v17 = vmul.f32 %v12532_v22, %v16223_v58  ;;  %v16224_v13 = vld [vmem:[#allocation192_spill] sm:$0xff] }
 0x5ac   :  { %16218 = vst [vmem:[#allocation20_spill] sm:$0xff] %v13185_v0  ;;  %16220 = vst [vmem:[#allocation78_spill] sm:$0xff] %v13189_v45  ;;  %v13201_v11 = vmul.f32 %v12532_v22, %v16224_v13  ;;  %v16227_v0 = vld [vmem:[#allocation195_spill] sm:$0xff]  ;;  %v16229_v45 = vld [vmem:[#allocation18_spill] sm:$0xff]  ;;  %v13221_v13 = vmul.f32 %v12532_v22, %v12966_v39 }
 0x5ad   :  { %16222 = vst [vmem:[#allocation137_spill] sm:$0xff] %v13193_v54  ;;  %16226 = vst [vmem:[#allocation248_spill] sm:$0xff] %v13205_v30  ;;  %v13209_v20 = vmul.f32 %v12532_v22, %v16227_v0  ;;  %v13213_v5 = vmul.f32 %v12532_v22, %v16229_v45  ;;  %v16231_v54 = vld [vmem:[#allocation135_spill] sm:$0xff]  ;;  %v13229_v0 = vmul.f32 %v12532_v22, %v12978_v28 }
 0x5ae   :  { %16225 = vst [vmem:[#allocation196_spill] sm:$0xff] %v13201_v11  ;;  %v13217_v58 = vmul.f32 %v12532_v22, %v16231_v54  ;;  %16233 = vst [vmem:[#allocation199_spill] sm:$0xff] %v13221_v13  ;;  %v16237_v13 = vld [vmem:[#allocation66_spill] sm:$0xff]  ;;  %v16239_v22 = vld [vmem:[#allocation184_spill] sm:$0xff] }
 0x5af   :  { %16228 = vst [vmem:[#allocation23_spill] sm:$0xff] %v13209_v20  ;;  %16230 = vst [vmem:[#allocation81_spill] sm:$0xff] %v13213_v5  ;;  %v16236_v20 = vld [vmem:[#allocation186_spill] sm:$0xff]  ;;  %v4655_v38 = vmul.f32 %v12950_v43, %v16237_v13  ;;  %v5047_v28 = vmul.f32 %v12954_v37, %v16239_v22 }
 0x5b0   :  { %16232 = vst [vmem:[#allocation140_spill] sm:$0xff] %v13217_v58  ;;  %16234 = vst [vmem:[#allocation22_spill] sm:$0xff] %v13225_v51  ;;  %v4313_v45 = vadd.f32 %v16236_v20, %v12994_v57  ;;  %v4314_v5 = vadd.f32 %v16236_v20, %v12999_v10  ;;  %v4315_v54 = vadd.f32 %v16236_v20, %v13003_v41  ;;  %v16238_v51 = vld [vmem:[#allocation125_spill] sm:$0xff] }
 0x5b1   :  { %16235 = vst [vmem:[#allocation250_spill] sm:$0xff] %v13229_v0  ;;  %v4316_v39 = vadd.f32 %v16236_v20, %v13007_v48  ;;  %v4851_v58 = vmul.f32 %v12952_v61, %v16238_v51  ;;  %v13247_v10 = vadd.f32 %v16236_v20, %v13011_v52  ;;  %v13251_v48 = vadd.f32 %v16236_v20, %v13015_v26 }
 0x5b2   :  { %v4377_v0 = vmax.f32 %v4313_v45, 0.0  ;;  %v4378_v57 = vmax.f32 %v4314_v5, 0.0  ;;  %v4379_v30 = vmax.f32 %v4315_v54, 0.0  ;;  %v13255_v43 = vadd.f32 %v16236_v20, %v13019_v9 }
 0x5b3   :  { %v4380_v41 = vmax.f32 %v4316_v39, 0.0  ;;  %v4915_v11 = vadd.f32 %v4851_v58, %v4655_v38  ;;  %v13262_v52 = vadd.f32 %v16236_v20, %v13023_v27  ;;  %v13266_v5 = vadd.f32 %v16236_v20, %v13027_v3 }
 0x5b4   :  { %4521 = vst.msk [vmem:[#allocation2 + $0x49] sm:$0xff] %vm3108_vm8, %v4377_v0  ;;  %4522 = vst.msk [vmem:[#allocation2 + $0x51] sm:$0xff] %vm3108_vm8, %v4378_v57  ;;  %v13270_v26 = vadd.f32 %v16236_v20, %v13031_v40  ;;  %v13274_v9 = vadd.f32 %v16236_v20, %v13035_v42  ;;  %v13283_v27 = vadd.f32 %v16236_v20, %v13043_v53  ;;  %v16250_v57 = vld [vmem:[#allocation130_spill] sm:$0xff] }
 0x5b5   :  { %4523 = vst.msk [vmem:[#allocation2 + $0x61] sm:$0xff] %vm3108_vm8, %v4379_v30  ;;  %4524 = vst.msk [vmem:[#allocation2 + $0x69] sm:$0xff] %vm3108_vm8, %v4380_v41  ;;  %v5111_v58 = vadd.f32 %v5047_v28, %v4915_v11  ;;  %v13279_v30 = vadd.f32 %v16236_v20, %v13039_v12  ;;  %v13287_v3 = vadd.f32 %v16236_v20, %v13047_v50 }
 0x5b6   :  { %v13291_v40 = vadd.f32 %v16236_v20, %v13051_v15  ;;  %v13295_v42 = vadd.f32 %v16236_v20, %v13055_v55  ;;  %v13299_v12 = vadd.f32 %v16236_v20, %v13059_v23  ;;  %v13303_v53 = vadd.f32 %v16236_v20, %v13063_v44 }
 0x5b7   :  { %v13307_v50 = vadd.f32 %v16236_v20, %v13067_v32  ;;  %v13311_v15 = vadd.f32 %v16236_v20, %v13072_v6  ;;  %v13315_v55 = vadd.f32 %v16236_v20, %v13076_v59  ;;  %v13319_v23 = vadd.f32 %v16236_v20, %v13080_v60 }
 0x5b8   :  { %v13323_v44 = vadd.f32 %v16236_v20, %v13084_v7  ;;  %v13327_v32 = vadd.f32 %v16236_v20, %v13088_v47  ;;  %v13331_v6 = vadd.f32 %v16236_v20, %v13092_v49  ;;  %v13335_v59 = vadd.f32 %v16236_v20, %v13096_v18 }
 0x5b9   :  { %v13339_v60 = vadd.f32 %v16236_v20, %v13100_v1  ;;  %v13343_v7 = vadd.f32 %v16236_v20, %v13104_v14  ;;  %v13347_v47 = vadd.f32 %v16236_v20, %v13108_v46  ;;  %v13351_v49 = vadd.f32 %v16236_v20, %v13112_v19 }
 0x5ba   :  { %v13355_v18 = vadd.f32 %v16236_v20, %v13116_v2  ;;  %v13359_v1 = vadd.f32 %v16236_v20, %v13120_v56  ;;  %v13363_v14 = vadd.f32 %v16236_v20, %v13124_v36  ;;  %v13367_v46 = vadd.f32 %v16236_v20, %v13128_v31 }
 0x5bb   :  { %v13369_v11 = vld [vmem:[#allocation2 + $0x48] sm:$0xff]  ;;  %v13377_v2 = vadd.f32 %v16236_v20, %v13132_v4  ;;  %v13381_v56 = vadd.f32 %v16236_v20, %v13136_v29  ;;  %v13385_v36 = vadd.f32 %v16236_v20, %v13140_v21  ;;  %v13389_v31 = vadd.f32 %v16236_v20, %v13144_v16 }
 0x5bc   :  { %16240 = vst [vmem:[#allocation80_spill] sm:$0xff] %v13363_v14  ;;  %16241 = vst [vmem:[#allocation139_spill] sm:$0xff] %v13367_v46  ;;  %v13371_v19 = vld [vmem:[#allocation2 + $0x49] sm:$0xff]  ;;  %v5243_v45 = vmul.f32 %v16142_v34, %v13369_v11  ;;  %v13397_v39 = vld [vmem:[#allocation2 + $0x60] sm:$0xff]  ;;  %v13405_v21 = vadd.f32 %v16236_v20, %v13148_v62  ;;  %v13423_v62 = vadd.f32 %v16236_v20, %v13161_v24 }
 0x5bd   :  { %v13373_v0 = vld [vmem:[#allocation2 + $0x4a] sm:$0xff]  ;;  %16242 = vst [vmem:[#allocation198_spill] sm:$0xff] %v13377_v2  ;;  %16243 = vst [vmem:[#allocation249_spill] sm:$0xff] %v13381_v56  ;;  %v5439_v54 = vmul.f32 %v16143_v63, %v13371_v19  ;;  %v13399_v29 = vld [vmem:[#allocation2 + $0x61] sm:$0xff]  ;;  %v5832_v16 = vmul.f32 %v16151_v35, %v13397_v39  ;;  %v13443_v24 = vadd.f32 %v16236_v20, %v13181_v25 }
 0x5be   :  { %16244 = vst [vmem:[#allocation25_spill] sm:$0xff] %v13385_v36  ;;  %16245 = vst [vmem:[#allocation83_spill] sm:$0xff] %v13389_v31  ;;  %v5635_v4 = vmul.f32 %v16144_v8, %v13373_v0  ;;  %v13401_v38 = vld [vmem:[#allocation2 + $0x62] sm:$0xff]  ;;  %v6028_v28 = vmul.f32 %v16152_v33, %v13399_v29  ;;  %v16251_v31 = vld [vmem:[#allocation194_spill] sm:$0xff]  ;;  %v5307_v56 = vadd.f32 %v5243_v45, %v5111_v58 }
 0x5bf   :  { %16246 = vst [vmem:[#allocation142_spill] sm:$0xff] %v13397_v39  ;;  %16247 = vst [vmem:[#allocation201_spill] sm:$0xff] %v13399_v29  ;;  %v6224_v41 = vmul.f32 %v16250_v57, %v13401_v38  ;;  %v13415_v36 = vadd.f32 %v16236_v20, %v16251_v31  ;;  %v16252_v2 = vld [vmem:[#allocation247_spill] sm:$0xff]  ;;  %v16254_v39 = vld [vmem:[#allocation21_spill] sm:$0xff] }
 0x5c0   :  { %16248 = vst [vmem:[#allocation24_spill] sm:$0xff] %v13401_v38  ;;  %16249 = vst [vmem:[#allocation82_spill] sm:$0xff] %v13405_v21  ;;  %v13419_v46 = vadd.f32 %v16236_v20, %v16252_v2  ;;  %v13427_v21 = vadd.f32 %v16236_v20, %v16254_v39  ;;  %v16256_v29 = vld [vmem:[#allocation79_spill] sm:$0xff]  ;;  %v16258_v14 = vld [vmem:[#allocation138_spill] sm:$0xff]  ;;  %v5503_v45 = vadd.f32 %v5439_v54, %v5307_v56 }
 0x5c1   :  { %16253 = vst [vmem:[#allocation141_spill] sm:$0xff] %v13423_v62  ;;  %v13431_v38 = vadd.f32 %v16236_v20, %v16256_v29  ;;  %v13435_v31 = vadd.f32 %v16236_v20, %v16258_v14  ;;  %v16259_v58 = vld [vmem:[#allocation197_spill] sm:$0xff]  ;;  %v16261_v62 = vld [vmem:[#allocation20_spill] sm:$0xff] }
 0x5c2   :  { %16255 = vst [vmem:[#allocation200_spill] sm:$0xff] %v13427_v21  ;;  %v13439_v2 = vadd.f32 %v16236_v20, %v16259_v58  ;;  %v13447_v39 = vadd.f32 %v16236_v20, %v16261_v62  ;;  %v16263_v21 = vld [vmem:[#allocation78_spill] sm:$0xff]  ;;  %v13459_v58 = vadd.f32 %v16236_v20, %v13197_v17  ;;  %v16270_v56 = vld [vmem:[#allocation248_spill] sm:$0xff]  ;;  %v16272_v62 = vld [vmem:[#allocation23_spill] sm:$0xff] }
 0x5c3   :  { %16257 = vst [vmem:[#allocation251_spill] sm:$0xff] %v13431_v38  ;;  %v13451_v29 = vadd.f32 %v16236_v20, %v16263_v21  ;;  %v16265_v38 = vld [vmem:[#allocation137_spill] sm:$0xff]  ;;  %v13467_v54 = vadd.f32 %v16236_v20, %v16270_v56  ;;  %v13471_v21 = vadd.f32 %v16236_v20, %v16272_v62 }
 0x5c4   :  { %16260 = vst [vmem:[#allocation27_spill] sm:$0xff] %v13439_v2  ;;  %16262 = vst [vmem:[#allocation85_spill] sm:$0xff] %v13447_v39  ;;  %v13455_v14 = vadd.f32 %v16236_v20, %v16265_v38  ;;  %v16268_v2 = vld [vmem:[#allocation196_spill] sm:$0xff]  ;;  %v16274_v39 = vld [vmem:[#allocation81_spill] sm:$0xff] }
 0x5c5   :  { %16264 = vst [vmem:[#allocation144_spill] sm:$0xff] %v13451_v29  ;;  %16267 = vst [vmem:[#allocation26_spill] sm:$0xff] %v13459_v58  ;;  %v13463_v25 = vadd.f32 %v16236_v20, %v16268_v2  ;;  %v5699_v29 = vadd.f32 %v5635_v4, %v5503_v45  ;;  %v13475_v38 = vadd.f32 %v16236_v20, %v16274_v39  ;;  %v16278_v58 = vld [vmem:[#allocation199_spill] sm:$0xff]  ;;  %v16284_v39 = vld [vmem:[#allocation77_spill] sm:$0xff] }
 0x5c6   :  { %16266 = vst [vmem:[#allocation203_spill] sm:$0xff] %v13455_v14  ;;  %16271 = vst [vmem:[#allocation143_spill] sm:$0xff] %v13467_v54  ;;  %v16276_v14 = vld [vmem:[#allocation140_spill] sm:$0xff]  ;;  %v13483_v2 = vadd.f32 %v16236_v20, %v16278_v58  ;;  %v16282_v54 = vld [vmem:[#allocation250_spill] sm:$0xff] }
 0x5c7   :  { %16269 = vst [vmem:[#allocation84_spill] sm:$0xff] %v13463_v25  ;;  %16273 = vst [vmem:[#allocation202_spill] sm:$0xff] %v13471_v21  ;;  %v13479_v17 = vadd.f32 %v16236_v20, %v16276_v14  ;;  %v16280_v25 = vld [vmem:[#allocation22_spill] sm:$0xff]  ;;  %v13491_v62 = vadd.f32 %v16236_v20, %v16282_v54  ;;  %v16283_v4 = vld [vmem:[#allocation19_spill] sm:$0xff]  ;;  %v5896_v14 = vadd.f32 %v5832_v16, %v5699_v29 }
 0x5c8   :  { %16275 = vst [vmem:[#allocation252_spill] sm:$0xff] %v13475_v38  ;;  %16279 = vst [vmem:[#allocation87_spill] sm:$0xff] %v13483_v2  ;;  %v13487_v56 = vadd.f32 %v16236_v20, %v16280_v25  ;;  %v4653_v45 = vmul.f32 %v16283_v4, %v16237_v13  ;;  %v4849_v38 = vmul.f32 %v16284_v39, %v16238_v51  ;;  %v16286_v58 = vld [vmem:[#allocation76_spill] sm:$0xff]  ;;  %v4385_v39 = vmax.f32 %v13266_v5, 0.0 }
 0x5c9   :  { %16277 = vst [vmem:[#allocation29_spill] sm:$0xff] %v13479_v17  ;;  %v16285_v17 = vld [vmem:[#allocation136_spill] sm:$0xff]  ;;  %v5241_v2 = vmul.f32 %v16286_v58, %v16142_v34  ;;  %v5437_v25 = vmul.f32 %v12952_v61, %v16143_v63  ;;  %v5633_v20 = vmul.f32 %v12954_v37, %v16144_v8  ;;  %v5830_v54 = vmul.f32 %v16151_v35, %v13369_v11 }
 0x5ca   :  { %16281 = vst [vmem:[#allocation146_spill] sm:$0xff] %v13487_v56  ;;  %v5045_v21 = vmul.f32 %v16285_v17, %v16239_v22  ;;  %v4913_v56 = vadd.f32 %v4849_v38, %v4653_v45  ;;  %v13509_v4 = vmul.f32 %v16152_v33, %v13371_v19  ;;  %v6092_v16 = vadd.f32 %v6028_v28, %v5896_v14 }
 0x5cb   :  { %v13513_v29 = vmul.f32 %v16250_v57, %v13373_v0  ;;  %v4381_v17 = vmax.f32 %v13247_v10, 0.0  ;;  %v4382_v61 = vmax.f32 %v13251_v48, 0.0  ;;  %v4383_v45 = vmax.f32 %v13255_v43, 0.0  ;;  %4529 = vst.msk [vmem:[#allocation2 + $0xa9] sm:$0xff] %vm3108_vm8, %v4385_v39  ;;  %v16294_v39 = vld [vmem:[#allocation141_spill] sm:$0xff] }
 0x5cc   :  { %v5109_v38 = vadd.f32 %v5045_v21, %v4913_v56  ;;  %v4384_v37 = vmax.f32 %v13262_v52, 0.0  ;;  %v6288_v58 = vadd.f32 %v6224_v41, %v6092_v16  ;;  %v4386_v33 = vmax.f32 %v13270_v26, 0.0  ;;  %v16292_v16 = vld [vmem:[#allocation83_spill] sm:$0xff] }
 0x5cd   :  { %v4387_v28 = vmax.f32 %v13274_v9, 0.0  ;;  %v4388_v14 = vmax.f32 %v13279_v30, 0.0  ;;  %4525 = vst.msk [vmem:[#allocation2 + $0x79] sm:$0xff] %vm3108_vm8, %v4381_v17  ;;  %4526 = vst.msk [vmem:[#allocation2 + $0x81] sm:$0xff] %vm3108_vm8, %v4382_v61  ;;  %v4389_v48 = vmax.f32 %v13283_v27, 0.0  ;;  %v4390_v43 = vmax.f32 %v13287_v3, 0.0 }
 0x5ce   :  { %v5305_v10 = vadd.f32 %v5241_v2, %v5109_v38  ;;  %v4391_v52 = vmax.f32 %v13291_v40, 0.0  ;;  %4527 = vst.msk [vmem:[#allocation2 + $0x91] sm:$0xff] %vm3108_vm8, %v4383_v45  ;;  %4528 = vst.msk [vmem:[#allocation2 + $0x99] sm:$0xff] %vm3108_vm8, %v4384_v37  ;;  %v6360_v5 = vsel %vm3108_vm8, %v6288_v58, 0.0  ;;  %v4392_v26 = vmax.f32 %v13295_v42, 0.0  ;;  %v16288_v2 = vld [vmem:[#allocation139_spill] sm:$0xff] }
 0x5cf   :  { %v4393_v9 = vmax.f32 %v13299_v12, 0.0  ;;  %v4394_v30 = vmax.f32 %v13303_v53, 0.0  ;;  %4530 = vst.msk [vmem:[#allocation2 + $0xb1] sm:$0xff] %vm3108_vm8, %v4386_v33  ;;  %4531 = vst.msk [vmem:[#allocation2 + $0xc1] sm:$0xff] %vm3108_vm8, %v4387_v28  ;;  %6361 = vadd.xlane.f32.xlu1 %v6360_v5  ;;  %v4395_v3 = vmax.f32 %v13307_v50, 0.0  ;;  %v4396_v40 = vmax.f32 %v13311_v15, 0.0 }
 0x5d0   :  { %4532 = vst.msk [vmem:[#allocation2 + $0xc9] sm:$0xff] %vm3108_vm8, %v4388_v14  ;;  %v5501_v27 = vadd.f32 %v5437_v25, %v5305_v10  ;;  %v4397_v41 = vmax.f32 %v13315_v55, 0.0  ;;  %4533 = vst.msk [vmem:[#allocation2 + $0xd9] sm:$0xff] %vm3108_vm8, %v4389_v48  ;;  %v4398_v33 = vmax.f32 %v13319_v23, 0.0  ;;  %v4399_v42 = vmax.f32 %v13323_v44, 0.0  ;;  %v16293_v61 = vld [vmem:[#allocation82_spill] sm:$0xff] }
 0x5d1   :  { %4534 = vst.msk [vmem:[#allocation2 + $0xe1] sm:$0xff] %vm3108_vm8, %v4390_v43  ;;  %4535 = vst.msk [vmem:[#allocation2 + $0xf1] sm:$0xff] %vm3108_vm8, %v4391_v52  ;;  %v4400_v12 = vmax.f32 %v13327_v32, 0.0  ;;  %v4401_v53 = vmax.f32 %v13331_v6, 0.0  ;;  %v4402_v15 = vmax.f32 %v13335_v59, 0.0  ;;  %v4403_v55 = vmax.f32 %v13339_v60, 0.0 }
 0x5d2   :  { %4536 = vst.msk [vmem:[#allocation2 + $0xf9] sm:$0xff] %vm3108_vm8, %v4392_v26  ;;  %4537 = vst.msk [vmem:[#allocation2 + $0x109] sm:$0xff] %vm3108_vm8, %v4393_v9  ;;  %v5697_v50 = vadd.f32 %v5633_v20, %v5501_v27  ;;  %v4404_v21 = vmax.f32 %v13343_v7, 0.0  ;;  %v4405_v23 = vmax.f32 %v13347_v47, 0.0  ;;  %v4406_v44 = vmax.f32 %v13351_v49, 0.0  ;;  %v16287_v60 = vld [vmem:[#allocation80_spill] sm:$0xff] }
 0x5d3   :  { %4538 = vst.msk [vmem:[#allocation2 + $0x111] sm:$0xff] %vm3108_vm8, %v4394_v30  ;;  %4539 = vst.msk [vmem:[#allocation2 + $0x121] sm:$0xff] %vm3108_vm8, %v4395_v3  ;;  %v4407_v32 = vmax.f32 %v13355_v18, 0.0  ;;  %v4408_v6 = vmax.f32 %v13359_v1, 0.0  ;;  %v4409_v7 = vmax.f32 %v16287_v60, 0.0  ;;  %v4410_v56 = vmax.f32 %v16288_v2, 0.0 }
 0x5d4   :  { %4540 = vst.msk [vmem:[#allocation2 + $0x129] sm:$0xff] %vm3108_vm8, %v4396_v40  ;;  %4541 = vst.msk [vmem:[#allocation2 + $0x139] sm:$0xff] %vm3108_vm8, %v4397_v41  ;;  %v5894_v59 = vadd.f32 %v5830_v54, %v5697_v50  ;;  %v16289_v47 = vld [vmem:[#allocation198_spill] sm:$0xff]  ;;  %v16290_v49 = vld [vmem:[#allocation249_spill] sm:$0xff]  ;;  %v4414_v17 = vmax.f32 %v16292_v16, 0.0  ;;  %v4415_v54 = vmax.f32 %v16293_v61, 0.0  ;;  %v4657_v60 = vmul.f32 %v13369_v11, %v16237_v13 }
 0x5d5   :  { %4542 = vst.msk [vmem:[#allocation2 + $0x141] sm:$0xff] %vm3108_vm8, %v4398_v33  ;;  %4543 = vst.msk [vmem:[#allocation2 + $0x151] sm:$0xff] %vm3108_vm8, %v4399_v42  ;;  %v4411_v25 = vmax.f32 %v16289_v47, 0.0  ;;  %v4412_v18 = vmax.f32 %v16290_v49, 0.0  ;;  %v16291_v1 = vld [vmem:[#allocation25_spill] sm:$0xff]  ;;  %v4416_v45 = vmax.f32 %v13415_v36, 0.0  ;;  %v4853_v2 = vmul.f32 %v13371_v19, %v16238_v51 }
 0x5d6   :  { %4544 = vst.msk [vmem:[#allocation2 + $0x159] sm:$0xff] %vm3108_vm8, %v4400_v12  ;;  %4545 = vst.msk [vmem:[#allocation2 + $0x169] sm:$0xff] %vm3108_vm8, %v4401_v53  ;;  %v4413_v20 = vmax.f32 %v16291_v1, 0.0  ;;  %v6090_v38 = vadd.f32 %v13509_v4, %v5894_v59  ;;  %v4417_v37 = vmax.f32 %v13419_v46, 0.0  ;;  %v4418_v58 = vmax.f32 %v16294_v39, 0.0  ;;  %v16295_v28 = vld [vmem:[#allocation200_spill] sm:$0xff] }
 0x5d7   :  { %4546 = vst.msk [vmem:[#allocation2 + $0x171] sm:$0xff] %vm3108_vm8, %v4402_v15  ;;  %4547 = vst.msk [vmem:[#allocation2 + $0x181] sm:$0xff] %vm3108_vm8, %v4403_v55  ;;  %v4419_v14 = vmax.f32 %v16295_v28, 0.0  ;;  %v16296_v10 = vld [vmem:[#allocation251_spill] sm:$0xff]  ;;  %v4421_v43 = vmax.f32 %v13435_v31, 0.0  ;;  %v4423_v36 = vmax.f32 %v13443_v24, 0.0  ;;  %v5049_v11 = vmul.f32 %v13373_v0, %v16239_v22 }
 0x5d8   :  { %4548 = vst.msk [vmem:[#allocation2 + $0x189] sm:$0xff] %vm3108_vm8, %v4404_v21  ;;  %4549 = vst.msk [vmem:[#allocation2 + $0x1c9] sm:$0xff] %vm3108_vm8, %v4405_v23  ;;  %v4420_v48 = vmax.f32 %v16296_v10, 0.0  ;;  %v16297_v52 = vld [vmem:[#allocation27_spill] sm:$0xff]  ;;  %v6286_v46 = vadd.f32 %v13513_v29, %v6090_v38  ;;  %v16298_v5 = vld [vmem:[#allocation85_spill] sm:$0xff]  ;;  %v4436_v59 = vmax.f32 %v13491_v62, 0.0 }
 0x5d9   :  { %4550 = vst.msk [vmem:[#allocation2 + $0x1d1] sm:$0xff] %vm3108_vm8, %v4406_v44  ;;  %4551 = vst.msk [vmem:[#allocation2 + $0x1e1] sm:$0xff] %vm3108_vm8, %v4407_v32  ;;  %v4422_v4 = vmax.f32 %v16297_v52, 0.0  ;;  %v4424_v26 = vmax.f32 %v16298_v5, 0.0  ;;  %v16299_v9 = vld [vmem:[#allocation144_spill] sm:$0xff]  ;;  %v16300_v31 = vld [vmem:[#allocation203_spill] sm:$0xff] }
 0x5da   :  { %4552 = vst.msk [vmem:[#allocation2 + $0x1e9] sm:$0xff] %vm3108_vm8, %v4408_v6  ;;  %4553 = vst.msk [vmem:[#allocation2 + $0x1f9] sm:$0xff] %vm3108_vm8, %v4409_v7  ;;  %v4425_v30 = vmax.f32 %v16299_v9, 0.0  ;;  %v4426_v27 = vmax.f32 %v16300_v31, 0.0  ;;  %v16301_v3 = vld [vmem:[#allocation26_spill] sm:$0xff]  ;;  %v16302_v41 = vld [vmem:[#allocation84_spill] sm:$0xff] }
 0x5db   :  { %4554 = vst.msk [vmem:[#allocation2 + $0x201] sm:$0xff] %vm3108_vm8, %v4410_v56  ;;  %4555 = vst.msk [vmem:[#allocation2 + $0x211] sm:$0xff] %vm3108_vm8, %v4411_v25  ;;  %v4427_v40 = vmax.f32 %v16301_v3, 0.0  ;;  %v4428_v33 = vmax.f32 %v16302_v41, 0.0  ;;  %v16303_v42 = vld [vmem:[#allocation143_spill] sm:$0xff]  ;;  %v6354_v24 = vsel %vm3108_vm8, %v6286_v46, 0.0 }
 0x5dc   :  { %4556 = vst.msk [vmem:[#allocation2 + $0x219] sm:$0xff] %vm3108_vm8, %v4412_v18  ;;  %4557 = vst.msk [vmem:[#allocation2 + $0x229] sm:$0xff] %vm3108_vm8, %v4413_v20  ;;  %v4429_v29 = vmax.f32 %v16303_v42, 0.0  ;;  %v16304_v12 = vld [vmem:[#allocation202_spill] sm:$0xff]  ;;  %v16305_v50 = vld [vmem:[#allocation252_spill] sm:$0xff]  ;;  %6355 = vadd.xlane.f32.xlu0 %v6354_v24  ;;  %v4917_v20 = vadd.f32 %v4853_v2, %v4657_v60 }
 0x5dd   :  { %4558 = vst.msk [vmem:[#allocation2 + $0x231] sm:$0xff] %vm3108_vm8, %v4414_v17  ;;  %4559 = vst.msk [vmem:[#allocation2 + $0x241] sm:$0xff] %vm3108_vm8, %v4415_v54  ;;  %v4430_v53 = vmax.f32 %v16304_v12, 0.0  ;;  %v4431_v15 = vmax.f32 %v16305_v50, 0.0  ;;  %v16306_v55 = vld [vmem:[#allocation29_spill] sm:$0xff]  ;;  %v16307_v23 = vld [vmem:[#allocation87_spill] sm:$0xff] }
 0x5de   :  { %4560 = vst.msk [vmem:[#allocation2 + $0x249] sm:$0xff] %vm3108_vm8, %v4416_v45  ;;  %4561 = vst.msk [vmem:[#allocation2 + $0x259] sm:$0xff] %vm3108_vm8, %v4417_v37  ;;  %v4432_v21 = vmax.f32 %v16306_v55, 0.0  ;;  %v4433_v44 = vmax.f32 %v16307_v23, 0.0  ;;  %v16308_v32 = vld [vmem:[#allocation146_spill] sm:$0xff]  ;;  %v13621_v7 = vld [vmem:[#allocation2 + $0x78] sm:$0xff]  ;;  %v5113_v52 = vadd.f32 %v5049_v11, %v4917_v20 }
 0x5df   :  { %4562 = vst.msk [vmem:[#allocation2 + $0x261] sm:$0xff] %vm3108_vm8, %v4418_v58  ;;  %4563 = vst.msk [vmem:[#allocation2 + $0x271] sm:$0xff] %vm3108_vm8, %v4419_v14  ;;  %v4434_v6 = vmax.f32 %v16308_v32, 0.0  ;;  %v13629_v56 = vld [vmem:[#allocation2 + $0x79] sm:$0xff]  ;;  %v16309_v62 = vld [vmem:[#allocation142_spill] sm:$0xff]  ;;  %v5834_v16 = vmul.f32 %v16151_v35, %v13621_v7 }
 0x5e0   :  { %4564 = vst.msk [vmem:[#allocation2 + $0x279] sm:$0xff] %vm3108_vm8, %v4420_v48  ;;  %4565 = vst.msk [vmem:[#allocation2 + $0x289] sm:$0xff] %vm3108_vm8, %v4421_v43  ;;  %v13631_v47 = vld [vmem:[#allocation2 + $0x7a] sm:$0xff]  ;;  %v5245_v25 = vmul.f32 %v16309_v62, %v16142_v34  ;;  %v16310_v49 = vld [vmem:[#allocation201_spill] sm:$0xff]  ;;  %v4659_v31 = vmul.f32 %v16309_v62, %v16237_v13  ;;  %v5443_v55 = vmul.f32 %v13629_v56, %v16143_v63 }
 0x5e1   :  { %4566 = vst.msk [vmem:[#allocation2 + $0x291] sm:$0xff] %vm3108_vm8, %v4422_v4  ;;  %4567 = vst.msk [vmem:[#allocation2 + $0x2a1] sm:$0xff] %vm3108_vm8, %v4423_v36  ;;  %v5441_v18 = vmul.f32 %v16310_v49, %v16143_v63  ;;  %v16311_v19 = vld [vmem:[#allocation24_spill] sm:$0xff]  ;;  %v16312_v0 = vld [vmem:[#allocation129_spill] sm:$0xff]  ;;  %v6226_v58 = vmul.f32 %v16250_v57, %v13631_v47 }
 0x5e2   :  { %4568 = vst.msk [vmem:[#allocation2 + $0x2a9] sm:$0xff] %vm3108_vm8, %v4424_v26  ;;  %4569 = vst.msk [vmem:[#allocation2 + $0x2b9] sm:$0xff] %vm3108_vm8, %v4425_v30  ;;  %v5637_v1 = vmul.f32 %v16311_v19, %v16144_v8  ;;  %v4654_v17 = vmul.f32 %v16312_v0, %v16237_v13  ;;  %v16313_v61 = vld [vmem:[#allocation188_spill] sm:$0xff]  ;;  %v13653_v38 = vld [vmem:[#allocation2 + $0x50] sm:$0xff]  ;;  %v5309_v41 = vadd.f32 %v5245_v25, %v5113_v52 }
 0x5e3   :  { %4570 = vst.msk [vmem:[#allocation2 + $0x2c1] sm:$0xff] %vm3108_vm8, %v4426_v27  ;;  %4571 = vst.msk [vmem:[#allocation2 + $0x2d1] sm:$0xff] %vm3108_vm8, %v4427_v40  ;;  %v4850_v54 = vmul.f32 %v16313_v61, %v16238_v51  ;;  %v13655_v45 = vld [vmem:[#allocation2 + $0x51] sm:$0xff]  ;;  %v16314_v37 = vld [vmem:[#allocation68_spill] sm:$0xff]  ;;  %v5831_v9 = vmul.f32 %v16151_v35, %v13653_v38  ;;  %v4855_v27 = vmul.f32 %v16310_v49, %v16238_v51 }
 0x5e4   :  { %4572 = vst.msk [vmem:[#allocation2 + $0x2d9] sm:$0xff] %vm3108_vm8, %v4428_v33  ;;  %4573 = vst.msk [vmem:[#allocation2 + $0x2e9] sm:$0xff] %vm3108_vm8, %v4429_v29  ;;  %v6030_v39 = vmul.f32 %v16314_v37, %v13629_v56  ;;  %v16315_v28 = vld [vmem:[#allocation15_spill] sm:$0xff]  ;;  %v16316_v10 = vld [vmem:[#allocation14_spill] sm:$0xff]  ;;  %v6027_v30 = vmul.f32 %v16314_v37, %v13655_v45  ;;  %v5051_v29 = vmul.f32 %v16311_v19, %v16239_v22 }
 0x5e5   :  { %4574 = vst.msk [vmem:[#allocation2 + $0x2f1] sm:$0xff] %vm3108_vm8, %v4430_v53  ;;  %4575 = vst.msk [vmem:[#allocation2 + $0x301] sm:$0xff] %vm3108_vm8, %v4431_v15  ;;  %v5046_v14 = vmul.f32 %v16315_v28, %v16239_v22  ;;  %v5242_v48 = vmul.f32 %v16316_v10, %v16142_v34  ;;  %v13665_v43 = vld [vmem:[#allocation2 + $0x52] sm:$0xff]  ;;  %v4914_v4 = vadd.f32 %v4850_v54, %v4654_v17  ;;  %v16317_v46 = vld [vmem:[#allocation72_spill] sm:$0xff] }
 0x5e6   :  { %4576 = vst.msk [vmem:[#allocation2 + $0x309] sm:$0xff] %vm3108_vm8, %v4432_v21  ;;  %4577 = vst.msk [vmem:[#allocation2 + $0x319] sm:$0xff] %vm3108_vm8, %v4433_v44  ;;  %v5438_v36 = vmul.f32 %v16317_v46, %v16143_v63  ;;  %v16318_v5 = vld [vmem:[#allocation131_spill] sm:$0xff]  ;;  %v6223_v42 = vmul.f32 %v16250_v57, %v13665_v43  ;;  %v13683_v24 = vld [vmem:[#allocation2 + $0x90] sm:$0xff]  ;;  %v4919_v50 = vadd.f32 %v4855_v27, %v4659_v31 }
 0x5e7   :  { %4578 = vst.msk [vmem:[#allocation2 + $0x321] sm:$0xff] %vm3108_vm8, %v4434_v6  ;;  %4580 = vst.msk [vmem:[#allocation2 + $0x339] sm:$0xff] %vm3108_vm8, %v4436_v59  ;;  %v5634_v26 = vmul.f32 %v16318_v5, %v16144_v8  ;;  %v4588_v3 = vld [vmem:[#allocation2 + $0x38] sm:$0xff]  ;;  %v5110_v33 = vadd.f32 %v5046_v14, %v4914_v4  ;;  %v5247_v15 = vmul.f32 %v13621_v7, %v16142_v34  ;;  %v13704_v20 = vld [vmem:[#allocation2 + $0x68] sm:$0xff] }
 0x5e8   :  { %v4784_v40 = vld [vmem:[#allocation2 + $0x39] sm:$0xff]  ;;  %v13685_v12 = vld [vmem:[#allocation2 + $0x91] sm:$0xff]  ;;  %v5639_v21 = vmul.f32 %v13631_v47, %v16144_v8  ;;  %v5505_v44 = vadd.f32 %v5441_v18, %v5309_v41  ;;  %v4656_v6 = vmul.f32 %v16237_v13, %v4588_v3  ;;  %v5115_v60 = vadd.f32 %v5051_v29, %v4919_v50  ;;  %v13706_v0 = vld [vmem:[#allocation2 + $0x69] sm:$0xff] }
 0x5e9   :  { %v13687_v53 = vld [vmem:[#allocation2 + $0x92] sm:$0xff]  ;;  %v4980_v23 = vld [vmem:[#allocation2 + $0x3a] sm:$0xff]  ;;  %v5306_v32 = vadd.f32 %v5242_v48, %v5110_v33  ;;  %v4852_v59 = vmul.f32 %v16238_v51, %v4784_v40  ;;  %v5836_v2 = vmul.f32 %v16151_v35, %v13683_v24  ;;  %v6032_v11 = vmul.f32 %v16314_v37, %v13685_v12  ;;  %v13714_v14 = vld [vmem:[#allocation2 + $0x6a] sm:$0xff] }
 0x5ea   :  { %v6228_v62 = vmul.f32 %v16250_v57, %v13687_v53  ;;  %v5701_v25 = vadd.f32 %v5637_v1, %v5505_v44  ;;  %v5048_v18 = vmul.f32 %v16239_v22, %v4980_v23  ;;  %v5311_v17 = vadd.f32 %v5247_v15, %v5115_v60  ;;  %v13741_v44 = vld [vmem:[#allocation2 + $0xaa] sm:$0xff] }
 0x5eb   :  { %v5502_v49 = vadd.f32 %v5438_v36, %v5306_v32  ;;  %v4916_v19 = vadd.f32 %v4852_v59, %v4656_v6  ;;  %v5244_v61 = vmul.f32 %v13653_v38, %v16142_v34  ;;  %v5440_v54 = vmul.f32 %v13655_v45, %v16143_v63 }
 0x5ec   :  { %v5636_v28 = vmul.f32 %v13665_v43, %v16144_v8  ;;  %v5898_v1 = vadd.f32 %v5834_v16, %v5701_v25  ;;  %v4661_v52 = vmul.f32 %v13621_v7, %v16237_v13  ;;  %v5507_v4 = vadd.f32 %v5443_v55, %v5311_v17  ;;  %v13756_v17 = vld [vmem:[#allocation2 + $0x80] sm:$0xff] }
 0x5ed   :  { %v5698_v10 = vadd.f32 %v5634_v26, %v5502_v49  ;;  %v5112_v48 = vadd.f32 %v5048_v18, %v4916_v19  ;;  %v5833_v46 = vmul.f32 %v16151_v35, %v13704_v20  ;;  %v6029_v36 = vmul.f32 %v16314_v37, %v13706_v0 }
 0x5ee   :  { %v4857_v5 = vmul.f32 %v13629_v56, %v16238_v51  ;;  %v6094_v31 = vadd.f32 %v6030_v39, %v5898_v1  ;;  %v6225_v16 = vmul.f32 %v16250_v57, %v13714_v14  ;;  %v5703_v26 = vadd.f32 %v5639_v21, %v5507_v4  ;;  %v13732_v39 = vld [vmem:[#allocation2 + $0xa8] sm:$0xff] }
 0x5ef   :  { %v5895_v27 = vadd.f32 %v5831_v9, %v5698_v10  ;;  %v5308_v3 = vadd.f32 %v5244_v61, %v5112_v48  ;;  %v5053_v7 = vmul.f32 %v13631_v47, %v16239_v22  ;;  %v5249_v41 = vmul.f32 %v13683_v24, %v16142_v34  ;;  %v13734_v9 = vld [vmem:[#allocation2 + $0xa9] sm:$0xff]  ;;  %v13758_v61 = vld [vmem:[#allocation2 + $0x81] sm:$0xff] }
 0x5f0   :  { %v4921_v40 = vadd.f32 %v4857_v5, %v4661_v52  ;;  %v6290_v33 = vadd.f32 %v6226_v58, %v6094_v31  ;;  %v5445_v56 = vmul.f32 %v13685_v12, %v16143_v63  ;;  %v5900_v15 = vadd.f32 %v5836_v2, %v5703_v26 }
 0x5f1   :  { %v6091_v29 = vadd.f32 %v6027_v30, %v5895_v27  ;;  %v5504_v50 = vadd.f32 %v5440_v54, %v5308_v3  ;;  %v5641_v21 = vmul.f32 %v13687_v53, %v16144_v8  ;;  %v4658_v47 = vmul.f32 %v13653_v38, %v16237_v13 }
 0x5f2   :  { %v5117_v55 = vadd.f32 %v5053_v7, %v4921_v40  ;;  %v6366_v23 = vsel %vm3108_vm8, %v6290_v33, 0.0  ;;  %v4854_v32 = vmul.f32 %v13655_v45, %v16238_v51  ;;  %v6096_v6 = vadd.f32 %v6032_v11, %v5900_v15  ;;  %v13779_v40 = vld [vmem:[#allocation2 + $0xc0] sm:$0xff] }
 0x5f3   :  { %v6287_v58 = vadd.f32 %v6223_v42, %v6091_v29  ;;  %v5700_v30 = vadd.f32 %v5636_v28, %v5504_v50  ;;  %6367 = vadd.xlane.f32.xlu1 %v6366_v23  ;;  %v5838_v60 = vmul.f32 %v16151_v35, %v13732_v39  ;;  %v6034_v2 = vmul.f32 %v16314_v37, %v13734_v9  ;;  %v13788_v29 = vld [vmem:[#allocation2 + $0xc2] sm:$0xff] }
 0x5f4   :  { %v5313_v59 = vadd.f32 %v5249_v41, %v5117_v55  ;;  %v4918_v49 = vadd.f32 %v4854_v32, %v4658_v47  ;;  %v5050_v42 = vmul.f32 %v13665_v43, %v16239_v22  ;;  %v6292_v19 = vadd.f32 %v6228_v62, %v6096_v6  ;;  %v13764_v62 = vld [vmem:[#allocation2 + $0x82] sm:$0xff] }
 0x5f5   :  { %v6357_v38 = vsel %vm3108_vm8, %v6287_v58, 0.0  ;;  %v5897_v25 = vadd.f32 %v5833_v46, %v5700_v30  ;;  %v6230_v45 = vmul.f32 %v16250_v57, %v13741_v44  ;;  %v5246_v11 = vmul.f32 %v13704_v20, %v16142_v34 }
 0x5f6   :  { %6358 = vadd.xlane.f32.xlu0 %v6357_v38  ;;  %v5509_v18 = vadd.f32 %v5445_v56, %v5313_v59  ;;  %v5114_v28 = vadd.f32 %v5050_v42, %v4918_v49  ;;  %v5442_v1 = vmul.f32 %v13706_v0, %v16143_v63  ;;  %v5638_v43 = vmul.f32 %v13714_v14, %v16144_v8  ;;  %v13804_v59 = vld [vmem:[#allocation2 + $0x98] sm:$0xff] }
 0x5f7   :  { %v6093_v54 = vadd.f32 %v6029_v36, %v5897_v25  ;;  %v6372_v10 = vsel %vm3108_vm8, %v6292_v19, 0.0  ;;  %v4663_v52 = vmul.f32 %v13683_v24, %v16237_v13  ;;  %v4859_v4 = vmul.f32 %v13685_v12, %v16238_v51  ;;  %v13781_v12 = vld [vmem:[#allocation2 + $0xc1] sm:$0xff]  ;;  %v13810_v25 = vld [vmem:[#allocation2 + $0x99] sm:$0xff] }
 0x5f8   :  { %v5705_v48 = vadd.f32 %v5641_v21, %v5509_v18  ;;  %6373 = vadd.xlane.f32.xlu1 %v6372_v10  ;;  %v5310_v36 = vadd.f32 %v5246_v11, %v5114_v28  ;;  %v5835_v5 = vmul.f32 %v16151_v35, %v13756_v17  ;;  %v6031_v31 = vmul.f32 %v16314_v37, %v13758_v61 }
 0x5f9   :  { %v6289_v46 = vadd.f32 %v6225_v16, %v6093_v54  ;;  %v6227_v3 = vmul.f32 %v16250_v57, %v13764_v62  ;;  %v4923_v26 = vadd.f32 %v4859_v4, %v4663_v52  ;;  %v5055_v24 = vmul.f32 %v13687_v53, %v16239_v22 }
 0x5fa   :  { %v5902_v27 = vadd.f32 %v5838_v60, %v5705_v48  ;;  %v5506_v7 = vadd.f32 %v5442_v1, %v5310_v36  ;;  %v5251_v41 = vmul.f32 %v13732_v39, %v16142_v34  ;;  %v5447_v33 = vmul.f32 %v13734_v9, %v16143_v63  ;;  %v13833_v36 = vld [vmem:[#allocation2 + $0xd9] sm:$0xff] }
 0x5fb   :  { %v6363_v16 = vsel %vm3108_vm8, %v6289_v46, 0.0  ;;  %v5119_v56 = vadd.f32 %v5055_v24, %v4923_v26  ;;  %v5643_v53 = vmul.f32 %v13741_v44, %v16144_v8  ;;  %v4660_v15 = vmul.f32 %v13704_v20, %v16237_v13  ;;  %v13831_v46 = vld [vmem:[#allocation2 + $0xd8] sm:$0xff] }
 0x5fc   :  { %6364 = vadd.xlane.f32.xlu0 %v6363_v16  ;;  %v6098_v50 = vadd.f32 %v6034_v2, %v5902_v27  ;;  %v5702_v55 = vadd.f32 %v5638_v43, %v5506_v7  ;;  %v5840_v21 = vmul.f32 %v16151_v35, %v13779_v40  ;;  %v6036_v47 = vmul.f32 %v16314_v37, %v13781_v12 }
 0x5fd   :  { %v4856_v23 = vmul.f32 %v13706_v0, %v16238_v51  ;;  %v5315_v30 = vadd.f32 %v5251_v41, %v5119_v56  ;;  %v6232_v32 = vmul.f32 %v16250_v57, %v13788_v29  ;;  %v5052_v6 = vmul.f32 %v13714_v14, %v16239_v22  ;;  %v13812_v0 = vld [vmem:[#allocation2 + $0x9a] sm:$0xff] }
 0x5fe   :  { %v6294_v58 = vadd.f32 %v6230_v45, %v6098_v50  ;;  %v5899_v20 = vadd.f32 %v5835_v5, %v5702_v55  ;;  %v5248_v2 = vmul.f32 %v13756_v17, %v16142_v34  ;;  %v5444_v38 = vmul.f32 %v13758_v61, %v16143_v63  ;;  %v13861_v55 = vld [vmem:[#allocation2 + $0xb1] sm:$0xff] }
 0x5ff   :  { %v4920_v60 = vadd.f32 %v4856_v23, %v4660_v15  ;;  %v5511_v42 = vadd.f32 %v5447_v33, %v5315_v30  ;;  %v5640_v14 = vmul.f32 %v13764_v62, %v16144_v8  ;;  %v4665_v19 = vmul.f32 %v13732_v39, %v16237_v13  ;;  %v13853_v33 = vld [vmem:[%s15351_s5 + $0x8] ss:$0 sm:$0xff]  ;;  %v13859_v15 = vld [vmem:[#allocation2 + $0xb0] sm:$0xff] }
 0x600   :  { %v6378_v49 = vsel %vm3108_vm8, %v6294_v58, 0.0  ;;  %v6095_v18 = vadd.f32 %v6031_v31, %v5899_v20  ;;  %v5837_v11 = vmul.f32 %v16151_v35, %v13804_v59  ;;  %v4861_v54 = vmul.f32 %v13734_v9, %v16238_v51  ;;  %v13835_v9 = vld [vmem:[#allocation2 + $0xda] sm:$0xff]  ;;  %v13869_v30 = vld [vmem:[#allocation2 + $0xb2] sm:$0xff] }
 0x601   :  { %6379 = vadd.xlane.f32.xlu1 %v6378_v49  ;;  %v5116_v45 = vadd.f32 %v5052_v6, %v4920_v60  ;;  %v5707_v28 = vadd.f32 %v5643_v53, %v5511_v42  ;;  %v6033_v1 = vmul.f32 %v16314_v37, %v13810_v25  ;;  %v6229_v43 = vmul.f32 %v16250_v57, %v13812_v0 }
 0x602   :  { %v5057_v10 = vmul.f32 %v13741_v44, %v16239_v22  ;;  %v6291_v39 = vadd.f32 %v6227_v3, %v6095_v18  ;;  %v4925_v52 = vadd.f32 %v4861_v54, %v4665_v19  ;;  %v5253_v4 = vmul.f32 %v13779_v40, %v16142_v34 }
 0x603   :  { %v5312_v48 = vadd.f32 %v5248_v2, %v5116_v45  ;;  %v5904_v5 = vadd.f32 %v5840_v21, %v5707_v28  ;;  %v5449_v31 = vmul.f32 %v13781_v12, %v16143_v63  ;;  %v5645_v57 = vmul.f32 %v13788_v29, %v16144_v8  ;;  %v13882_v45 = vld [vmem:[#allocation2 + $0xf0] sm:$0xff] }
 0x604   :  { %v4662_v44 = vmul.f32 %v13756_v17, %v16237_v13  ;;  %v6369_v27 = vsel %vm3108_vm8, %v6291_v39, 0.0  ;;  %v5121_v26 = vadd.f32 %v5057_v10, %v4925_v52  ;;  %v4858_v24 = vmul.f32 %v13758_v61, %v16238_v51  ;;  %v13894_v52 = vld [vmem:[#allocation2 + $0xf2] sm:$0xff] }
 0x605   :  { %v5508_v3 = vadd.f32 %v5444_v38, %v5312_v48  ;;  %6370 = vadd.xlane.f32.xlu0 %v6369_v27  ;;  %v6100_v16 = vadd.f32 %v6036_v47, %v5904_v5  ;;  %v5842_v7 = vmul.f32 %v16151_v35, %v13831_v46  ;;  %v6038_v41 = vmul.f32 %v16314_v37, %v13833_v36 }
 0x606   :  { %v6234_v17 = vmul.f32 %v13853_v33, %v13835_v9  ;;  %v5317_v56 = vadd.f32 %v5253_v4, %v5121_v26  ;;  %v4922_v53 = vadd.f32 %v4858_v24, %v4662_v44  ;;  %v5054_v61 = vmul.f32 %v13764_v62, %v16239_v22 }
 0x607   :  { %v5704_v50 = vadd.f32 %v5640_v14, %v5508_v3  ;;  %v6296_v21 = vadd.f32 %v6232_v32, %v6100_v16  ;;  %v5250_v47 = vmul.f32 %v13804_v59, %v16142_v34  ;;  %v5446_v23 = vmul.f32 %v13810_v25, %v16143_v63 }
 0x608   :  { %v5642_v58 = vmul.f32 %v13812_v0, %v16144_v8  ;;  %v5513_v20 = vadd.f32 %v5449_v31, %v5317_v56  ;;  %v5118_v60 = vadd.f32 %v5054_v61, %v4922_v53  ;;  %v4667_v62 = vmul.f32 %v13779_v40, %v16237_v13  ;;  %v13915_v56 = vld [vmem:[#allocation2 + $0xc9] sm:$0xff] }
 0x609   :  { %v5901_v6 = vadd.f32 %v5837_v11, %v5704_v50  ;;  %v6384_v2 = vsel %vm3108_vm8, %v6296_v21, 0.0  ;;  %v5839_v32 = vmul.f32 %v16151_v35, %v13859_v15  ;;  %v6035_v38 = vmul.f32 %v16314_v37, %v13861_v55  ;;  %v13917_v53 = vld [vmem:[#allocation2 + $0xca] sm:$0xff] }
 0x60a   :  { %v4863_v49 = vmul.f32 %v13781_v12, %v16238_v51  ;;  %6385 = vadd.xlane.f32.xlu1 %v6384_v2  ;;  %v5709_v14 = vadd.f32 %v5645_v57, %v5513_v20  ;;  %v5314_v19 = vadd.f32 %v5250_v47, %v5118_v60  ;;  %v6231_v18 = vmul.f32 %v13853_v33, %v13869_v30  ;;  %v13890_v12 = vld [vmem:[#allocation2 + $0xf1] sm:$0xff] }
 0x60b   :  { %v6097_v42 = vadd.f32 %v6033_v1, %v5901_v6  ;;  %v5059_v11 = vmul.f32 %v13788_v29, %v16239_v22  ;;  %v5255_v54 = vmul.f32 %v13831_v46, %v16142_v34  ;;  %v5451_v28 = vmul.f32 %v13833_v36, %v16143_v63 }
 0x60c   :  { %v4927_v40 = vadd.f32 %v4863_v49, %v4667_v62  ;;  %v5906_v10 = vadd.f32 %v5842_v7, %v5709_v14  ;;  %v5510_v39 = vadd.f32 %v5446_v23, %v5314_v19  ;;  %v5647_v48 = vmul.f32 %v13835_v9, %v16144_v8 }
 0x60d   :  { %v6293_v1 = vadd.f32 %v6229_v43, %v6097_v42  ;;  %v5844_v29 = vmul.f32 %v16151_v35, %v13882_v45  ;;  %v4664_v5 = vmul.f32 %v13804_v59, %v16237_v13  ;;  %v4860_v31 = vmul.f32 %v13810_v25, %v16238_v51  ;;  %v13909_v59 = vld [vmem:[#allocation2 + $0xc8] sm:$0xff] }
 0x60e   :  { %v5123_v4 = vadd.f32 %v5059_v11, %v4927_v40  ;;  %v6102_v43 = vadd.f32 %v6038_v41, %v5906_v10  ;;  %v5706_v44 = vadd.f32 %v5642_v58, %v5510_v39  ;;  %v6040_v27 = vmul.f32 %v16314_v37, %v13890_v12  ;;  %v13936_v42 = vld [vmem:[#allocation2 + $0x108] sm:$0xff] }
 0x60f   :  { %v6375_v57 = vsel %vm3108_vm8, %v6293_v1, 0.0  ;;  %v6236_v26 = vmul.f32 %v13853_v33, %v13894_v52  ;;  %v4924_v24 = vadd.f32 %v4860_v31, %v4664_v5  ;;  %v5056_v16 = vmul.f32 %v13812_v0, %v16239_v22 }
 0x610   :  { %6376 = vadd.xlane.f32.xlu0 %v6375_v57  ;;  %v5319_v3 = vadd.f32 %v5255_v54, %v5123_v4  ;;  %v6298_v7 = vadd.f32 %v6234_v17, %v6102_v43  ;;  %v5903_v25 = vadd.f32 %v5839_v32, %v5706_v44  ;;  %v5252_v41 = vmul.f32 %v13859_v15, %v16142_v34  ;;  %v13959_v57 = vld [vmem:[#allocation2 + $0xe0] sm:$0xff] }
 0x611   :  { %v5448_v50 = vmul.f32 %v13861_v55, %v16143_v63  ;;  %v5120_v21 = vadd.f32 %v5056_v16, %v4924_v24  ;;  %v5644_v47 = vmul.f32 %v13869_v30, %v16144_v8  ;;  %v4669_v0 = vmul.f32 %v13831_v46, %v16237_v13  ;;  %v13967_v24 = vld [vmem:[#allocation2 + $0xe2] sm:$0xff] }
 0x612   :  { %v5515_v61 = vadd.f32 %v5451_v28, %v5319_v3  ;;  %v6390_v17 = vsel %vm3108_vm8, %v6298_v7, 0.0  ;;  %v6099_v23 = vadd.f32 %v6035_v38, %v5903_v25  ;;  %v5841_v58 = vmul.f32 %v16151_v35, %v13909_v59  ;;  %v13965_v3 = vld [vmem:[#allocation2 + $0xe1] sm:$0xff] }
 0x613   :  { %v4865_v6 = vmul.f32 %v13833_v36, %v16238_v51  ;;  %6391 = vadd.xlane.f32.xlu1 %v6390_v17  ;;  %v5316_v60 = vadd.f32 %v5252_v41, %v5120_v21  ;;  %v6037_v62 = vmul.f32 %v16314_v37, %v13915_v56  ;;  %v6233_v2 = vmul.f32 %v13853_v33, %v13917_v53  ;;  %v13938_v36 = vld [vmem:[#allocation2 + $0x109] sm:$0xff] }
 0x614   :  { %v5711_v20 = vadd.f32 %v5647_v48, %v5515_v61  ;;  %v6295_v32 = vadd.f32 %v6231_v18, %v6099_v23  ;;  %v5061_v38 = vmul.f32 %v13835_v9, %v16239_v22  ;;  %v5257_v49 = vmul.f32 %v13882_v45, %v16142_v34  ;;  %v13944_v18 = vld [vmem:[#allocation2 + $0x10a] sm:$0xff] }
 0x615   :  { %v4929_v46 = vadd.f32 %v4865_v6, %v4669_v0  ;;  %v5512_v19 = vadd.f32 %v5448_v50, %v5316_v60  ;;  %v5453_v40 = vmul.f32 %v13890_v12, %v16143_v63  ;;  %v5649_v11 = vmul.f32 %v13894_v52, %v16144_v8 }
 0x616   :  { %v5908_v14 = vadd.f32 %v5844_v29, %v5711_v20  ;;  %v6381_v54 = vsel %vm3108_vm8, %v6295_v32, 0.0  ;;  %v4666_v28 = vmul.f32 %v13859_v15, %v16237_v13  ;;  %v4862_v1 = vmul.f32 %v13861_v55, %v16238_v51  ;;  %v13986_v20 = vld [vmem:[#allocation2 + $0x120] sm:$0xff] }
 0x617   :  { %v5125_v9 = vadd.f32 %v5061_v38, %v4929_v46  ;;  %6382 = vadd.xlane.f32.xlu0 %v6381_v54  ;;  %v5708_v39 = vadd.f32 %v5644_v47, %v5512_v19  ;;  %v5846_v48 = vmul.f32 %v16151_v35, %v13936_v42  ;;  %v6042_v4 = vmul.f32 %v16314_v37, %v13938_v36 }
 0x618   :  { %v6104_v10 = vadd.f32 %v6040_v27, %v5908_v14  ;;  %v6238_v5 = vmul.f32 %v13853_v33, %v13944_v18  ;;  %v4926_v31 = vadd.f32 %v4862_v1, %v4666_v28  ;;  %v5058_v15 = vmul.f32 %v13869_v30, %v16239_v22 }
 0x619   :  { %v5321_v29 = vadd.f32 %v5257_v49, %v5125_v9  ;;  %v5905_v43 = vadd.f32 %v5841_v58, %v5708_v39  ;;  %v5254_v44 = vmul.f32 %v13909_v59, %v16142_v34  ;;  %v5450_v27 = vmul.f32 %v13915_v56, %v16143_v63  ;;  %v4615_v9 = vld [vmem:[#allocation2 + $0x1b0] sm:$0xff] }
 0x61a   :  { %v6300_v55 = vadd.f32 %v6236_v26, %v6104_v10  ;;  %v5122_v7 = vadd.f32 %v5058_v15, %v4926_v31  ;;  %v5646_v25 = vmul.f32 %v13917_v53, %v16144_v8  ;;  %v4671_v30 = vmul.f32 %v13882_v45, %v16237_v13  ;;  %v4811_v39 = vld [vmem:[#allocation2 + $0x1b1] sm:$0xff] }
 0x61b   :  { %v5517_v16 = vadd.f32 %v5453_v40, %v5321_v29  ;;  %v6101_v41 = vadd.f32 %v6037_v62, %v5905_v43  ;;  %v5843_v50 = vmul.f32 %v16151_v35, %v13959_v57  ;;  %v4867_v61 = vmul.f32 %v13890_v12, %v16238_v51  ;;  %v13988_v12 = vld [vmem:[#allocation2 + $0x121] sm:$0xff]  ;;  %v14013_v15 = vld [vmem:[#allocation2 + $0xf8] sm:$0xff] }
 0x61c   :  { %v6396_v26 = vsel %vm3108_vm8, %v6300_v55, 0.0  ;;  %v5318_v47 = vadd.f32 %v5254_v44, %v5122_v7  ;;  %v6039_v0 = vmul.f32 %v16314_v37, %v13965_v3  ;;  %v6235_v17 = vmul.f32 %v13853_v33, %v13967_v24  ;;  %v14015_v55 = vld [vmem:[#allocation2 + $0xf9] sm:$0xff] }
 0x61d   :  { %6397 = vadd.xlane.f32.xlu1 %v6396_v26  ;;  %v5713_v21 = vadd.f32 %v5649_v11, %v5517_v16  ;;  %v6297_v23 = vadd.f32 %v6233_v2, %v6101_v41  ;;  %v4931_v45 = vadd.f32 %v4867_v61, %v4671_v30  ;;  %v5063_v58 = vmul.f32 %v13894_v52, %v16239_v22  ;;  %v13994_v2 = vld [vmem:[#allocation2 + $0x122] sm:$0xff] }
 0x61e   :  { %v5259_v6 = vmul.f32 %v13936_v42, %v16142_v34  ;;  %v5514_v62 = vadd.f32 %v5450_v27, %v5318_v47  ;;  %v5455_v32 = vmul.f32 %v13938_v36, %v16143_v63  ;;  %v5651_v46 = vmul.f32 %v13944_v18, %v16144_v8  ;;  %v5203_v16 = vld [vmem:[#allocation2 + $0x1c8] sm:$0xff] }
 0x61f   :  { %v5910_v60 = vadd.f32 %v5846_v48, %v5713_v21  ;;  %v6387_v38 = vsel %vm3108_vm8, %v6297_v23, 0.0  ;;  %v5127_v52 = vadd.f32 %v5063_v58, %v4931_v45  ;;  %v4668_v49 = vmul.f32 %v13909_v59, %v16237_v13  ;;  %v5399_v41 = vld [vmem:[#allocation2 + $0x1c9] sm:$0xff] }
 0x620   :  { %v4864_v14 = vmul.f32 %v13915_v56, %v16238_v51  ;;  %6388 = vadd.xlane.f32.xlu0 %v6387_v38  ;;  %v5710_v40 = vadd.f32 %v5646_v25, %v5514_v62  ;;  %v5848_v11 = vmul.f32 %v16151_v35, %v13986_v20  ;;  %v6044_v54 = vmul.f32 %v16314_v37, %v13988_v12  ;;  %v5007_v56 = vld [vmem:[#allocation2 + $0x1b2] sm:$0xff]  ;;  %v14034_v62 = vld [vmem:[#allocation2 + $0x1e1] sm:$0xff] }
 0x621   :  { %v6106_v19 = vadd.f32 %v6042_v4, %v5910_v60  ;;  %v5323_v28 = vadd.f32 %v5259_v6, %v5127_v52  ;;  %v6240_v1 = vmul.f32 %v13853_v33, %v13994_v2  ;;  %v5060_v59 = vmul.f32 %v13917_v53, %v16239_v22  ;;  %v14019_v53 = vld [vmem:[#allocation2 + $0xfa] sm:$0xff] }
 0x622   :  { %v4928_v10 = vadd.f32 %v4864_v14, %v4668_v49  ;;  %v5907_v4 = vadd.f32 %v5843_v50, %v5710_v40  ;;  %v5256_v29 = vmul.f32 %v13959_v57, %v16142_v34  ;;  %v5452_v31 = vmul.f32 %v13965_v3, %v16143_v63  ;;  %v5595_v50 = vld [vmem:[#allocation2 + $0x1ca] sm:$0xff]  ;;  %v14032_v60 = vld [vmem:[#allocation2 + $0x1e0] sm:$0xff] }
 0x623   :  { %v6302_v48 = vadd.f32 %v6238_v5, %v6106_v19  ;;  %v5519_v43 = vadd.f32 %v5455_v32, %v5323_v28  ;;  %v5648_v27 = vmul.f32 %v13967_v24, %v16144_v8  ;;  %v4683_v5 = vmul.f32 %v16237_v13, %v4615_v9  ;;  %v14038_v49 = vld [vmem:[#allocation2 + $0x1e2] sm:$0xff] }
 0x624   :  { %v5124_v44 = vadd.f32 %v5060_v59, %v4928_v10  ;;  %v6103_v25 = vadd.f32 %v6039_v0, %v5907_v4  ;;  %v4879_v30 = vmul.f32 %v16238_v51, %v4811_v39  ;;  %v5075_v26 = vmul.f32 %v16239_v22, %v5007_v56 }
 0x625   :  { %v6402_v7 = vsel %vm3108_vm8, %v6302_v48, 0.0  ;;  %v5715_v61 = vadd.f32 %v5651_v46, %v5519_v43  ;;  %v5845_v47 = vmul.f32 %v16151_v35, %v14013_v15  ;;  %v6041_v23 = vmul.f32 %v16314_v37, %v14015_v55  ;;  %v14053_v48 = vld [vmem:[#allocation2 + $0x110] sm:$0xff] }
 0x626   :  { %6403 = vadd.xlane.f32.xlu1 %v6402_v7  ;;  %v5320_v21 = vadd.f32 %v5256_v29, %v5124_v44  ;;  %v6299_v45 = vadd.f32 %v6235_v17, %v6103_v25  ;;  %v6237_v58 = vmul.f32 %v13853_v33, %v14019_v53  ;;  %v4943_v0 = vadd.f32 %v4879_v30, %v4683_v5  ;;  %v14061_v43 = vld [vmem:[#allocation2 + $0x112] sm:$0xff] }
 0x627   :  { %v5271_v6 = vmul.f32 %v16142_v34, %v5203_v16  ;;  %v5912_v32 = vadd.f32 %v5848_v11, %v5715_v61  ;;  %v5467_v38 = vmul.f32 %v16143_v63, %v5399_v41  ;;  %v5663_v52 = vmul.f32 %v16144_v8, %v5595_v50  ;;  %16319 = vst [vmem:[#allocation205_spill] sm:$0xff] %v14053_v48 }
 0x628   :  { %v5516_v46 = vadd.f32 %v5452_v31, %v5320_v21  ;;  %v6393_v17 = vsel %vm3108_vm8, %v6299_v45, 0.0  ;;  %v5139_v14 = vadd.f32 %v5075_v26, %v4943_v0  ;;  %v4670_v19 = vmul.f32 %v13959_v57, %v16237_v13  ;;  %v14059_v31 = vld [vmem:[#allocation2 + $0x111] sm:$0xff]  ;;  %16321 = vst [vmem:[#allocation254_spill] sm:$0xff] %v14061_v43 }
 0x629   :  { %v4866_v40 = vmul.f32 %v13965_v3, %v16238_v51  ;;  %6394 = vadd.xlane.f32.xlu0 %v6393_v17  ;;  %v6108_v9 = vadd.f32 %v6044_v54, %v5912_v32  ;;  %v5860_v11 = vmul.f32 %v16151_v35, %v14032_v60  ;;  %v6056_v10 = vmul.f32 %v16314_v37, %v14034_v62  ;;  %v14079_v32 = vld [vmem:[#allocation2 + $0x1f9] sm:$0xff] }
 0x62a   :  { %v5712_v28 = vadd.f32 %v5648_v27, %v5516_v46  ;;  %v5335_v59 = vadd.f32 %v5271_v6, %v5139_v14  ;;  %v6252_v39 = vmul.f32 %v13853_v33, %v14038_v49  ;;  %v5062_v57 = vmul.f32 %v13967_v24, %v16239_v22  ;;  %16320 = vst [vmem:[#allocation28_spill] sm:$0xff] %v14059_v31  ;;  %v14077_v6 = vld [vmem:[#allocation2 + $0x1f8] sm:$0xff] }
 0x62b   :  { %v4930_v56 = vadd.f32 %v4866_v40, %v4670_v19  ;;  %v6304_v3 = vadd.f32 %v6240_v1, %v6108_v9  ;;  %v5258_v54 = vmul.f32 %v14013_v15, %v16142_v34  ;;  %v5454_v29 = vmul.f32 %v14015_v55, %v16143_v63  ;;  %v14085_v17 = vld [vmem:[#allocation2 + $0x1fa] sm:$0xff] }
 0x62c   :  { %v5909_v4 = vadd.f32 %v5845_v47, %v5712_v28  ;;  %v5531_v44 = vadd.f32 %v5467_v38, %v5335_v59  ;;  %v5650_v5 = vmul.f32 %v14019_v53, %v16144_v8  ;;  %v4685_v24 = vmul.f32 %v5203_v16, %v16237_v13  ;;  %v4631_v59 = vld [vmem:[#allocation2 + $0x270] sm:$0xff] }
 0x62d   :  { %v5126_v27 = vadd.f32 %v5062_v57, %v4930_v56  ;;  %v6408_v1 = vsel %vm3108_vm8, %v6304_v3, 0.0  ;;  %v5847_v25 = vmul.f32 %v16151_v35, %v14053_v48  ;;  %v4881_v30 = vmul.f32 %v5399_v41, %v16238_v51 }
 0x62e   :  { %v6105_v7 = vadd.f32 %v6041_v23, %v5909_v4  ;;  %6409 = vadd.xlane.f32.xlu1 %v6408_v1  ;;  %v5727_v26 = vadd.f32 %v5663_v52, %v5531_v44  ;;  %v6043_v21 = vmul.f32 %v16314_v37, %v14059_v31  ;;  %v6239_v47 = vmul.f32 %v13853_v33, %v14061_v43  ;;  %v14100_v4 = vld [vmem:[#allocation2 + $0x128] sm:$0xff] }
 0x62f   :  { %v5322_v61 = vadd.f32 %v5258_v54, %v5126_v27  ;;  %v4945_v0 = vadd.f32 %v4881_v30, %v4685_v24  ;;  %v5077_v16 = vmul.f32 %v5595_v50, %v16239_v22  ;;  %v5273_v23 = vmul.f32 %v14032_v60, %v16142_v34  ;;  %16322 = vst [vmem:[#allocation86_spill] sm:$0xff] %v14100_v4  ;;  %v14106_v27 = vld [vmem:[#allocation2 + $0x129] sm:$0xff]  ;;  %v5023_v30 = vld [vmem:[#allocation2 + $0x272] sm:$0xff] }
 0x630   :  { %v6301_v45 = vadd.f32 %v6237_v58, %v6105_v7  ;;  %v5924_v41 = vadd.f32 %v5860_v11, %v5727_v26  ;;  %v5469_v38 = vmul.f32 %v14034_v62, %v16143_v63  ;;  %v5665_v52 = vmul.f32 %v14038_v49, %v16144_v8  ;;  %16323 = vst [vmem:[#allocation145_spill] sm:$0xff] %v14106_v27 }
 0x631   :  { %v5518_v46 = vadd.f32 %v5454_v29, %v5322_v61  ;;  %v5141_v50 = vadd.f32 %v5077_v16, %v4945_v0  ;;  %v4672_v14 = vmul.f32 %v14013_v15, %v16237_v13  ;;  %v4868_v19 = vmul.f32 %v14015_v55, %v16238_v51  ;;  %v4827_v55 = vld [vmem:[#allocation2 + $0x271] sm:$0xff]  ;;  %v5415_v0 = vld [vmem:[#allocation2 + $0x289] sm:$0xff] }
 0x632   :  { %v6399_v58 = vsel %vm3108_vm8, %v6301_v45, 0.0  ;;  %v6120_v40 = vadd.f32 %v6056_v10, %v5924_v41  ;;  %v5862_v28 = vmul.f32 %v16151_v35, %v14077_v6  ;;  %v6058_v11 = vmul.f32 %v16314_v37, %v14079_v32  ;;  %v5611_v16 = vld [vmem:[#allocation2 + $0x28a] sm:$0xff] }
 0x633   :  { %6400 = vadd.xlane.f32.xlu0 %v6399_v58  ;;  %v5714_v9 = vadd.f32 %v5650_v5, %v5518_v46  ;;  %v5337_v56 = vadd.f32 %v5273_v23, %v5141_v50  ;;  %v6254_v57 = vmul.f32 %v13853_v33, %v14085_v17  ;;  %v4932_v3 = vadd.f32 %v4868_v19, %v4672_v14  ;;  %v14108_v5 = vld [vmem:[#allocation2 + $0x12a] sm:$0xff]  ;;  %v4616_v58 = vld [vmem:[#allocation2 + $0x1b8] sm:$0xff] }
 0x634   :  { %v5064_v15 = vmul.f32 %v14019_v53, %v16239_v22  ;;  %v6316_v10 = vadd.f32 %v6252_v39, %v6120_v40  ;;  %v5260_v29 = vmul.f32 %v14053_v48, %v16142_v34  ;;  %v5456_v44 = vmul.f32 %v14059_v31, %v16143_v63  ;;  %16324 = vst [vmem:[#allocation204_spill] sm:$0xff] %v14108_v5  ;;  %v5219_v39 = vld [vmem:[#allocation2 + $0x288] sm:$0xff]  ;;  %v4812_v50 = vld [vmem:[#allocation2 + $0x1b9] sm:$0xff] }
 0x635   :  { %v5911_v54 = vadd.f32 %v5847_v25, %v5714_v9  ;;  %v5533_v24 = vadd.f32 %v5469_v38, %v5337_v56  ;;  %v5652_v53 = vmul.f32 %v14061_v43, %v16144_v8  ;;  %v4699_v7 = vmul.f32 %v16237_v13, %v4631_v59  ;;  %v14123_v9 = vld [vmem:[#allocation2 + $0x2a0] sm:$0xff] }
 0x636   :  { %v5128_v1 = vadd.f32 %v5064_v15, %v4932_v3  ;;  %v6444_v25 = vsel %vm3108_vm8, %v6316_v10, 0.0  ;;  %v5849_v61 = vmul.f32 %v16151_v35, %v14100_v4  ;;  %v4895_v45 = vmul.f32 %v16238_v51, %v4827_v55  ;;  %v5008_v59 = vld [vmem:[#allocation2 + $0x1ba] sm:$0xff]  ;;  %v5204_v10 = vld [vmem:[#allocation2 + $0x1d0] sm:$0xff] }
 0x637   :  { %v6107_v26 = vadd.f32 %v6043_v21, %v5911_v54  ;;  %6445 = vadd.xlane.f32.xlu1 %v6444_v25  ;;  %v5729_v23 = vadd.f32 %v5665_v52, %v5533_v24  ;;  %v6045_v46 = vmul.f32 %v16314_v37, %v14106_v27  ;;  %v6241_v38 = vmul.f32 %v13853_v33, %v14108_v5  ;;  %v14127_v55 = vld [vmem:[#allocation2 + $0x2a1] sm:$0xff]  ;;  %v5220_v5 = vld [vmem:[#allocation2 + $0x290] sm:$0xff] }
 0x638   :  { %v5324_v41 = vadd.f32 %v5260_v29, %v5128_v1  ;;  %v4959_v21 = vadd.f32 %v4895_v45, %v4699_v7  ;;  %v5091_v19 = vmul.f32 %v16239_v22, %v5023_v30  ;;  %v5287_v40 = vmul.f32 %v16142_v34, %v5219_v39  ;;  %v14130_v29 = vld [vmem:[#allocation2 + $0x2a2] sm:$0xff]  ;;  %v5400_v7 = vld [vmem:[#allocation2 + $0x1d1] sm:$0xff] }
 0x639   :  { %v6303_v14 = vadd.f32 %v6239_v47, %v6107_v26  ;;  %v5926_v56 = vadd.f32 %v5862_v28, %v5729_v23  ;;  %v5483_v3 = vmul.f32 %v16143_v63, %v5415_v0  ;;  %v5679_v15 = vmul.f32 %v16144_v8, %v5611_v16  ;;  %v5596_v26 = vld [vmem:[#allocation2 + $0x1d2] sm:$0xff] }
 0x63a   :  { %v5520_v52 = vadd.f32 %v5456_v44, %v5324_v41  ;;  %v5155_v47 = vadd.f32 %v5091_v19, %v4959_v21  ;;  %v4684_v24 = vmul.f32 %v16237_v13, %v4616_v58  ;;  %v4880_v1 = vmul.f32 %v16238_v51, %v4812_v50  ;;  %v14140_v58 = vld [vmem:[#allocation2 + $0x1e8] sm:$0xff]  ;;  %v5416_v27 = vld [vmem:[#allocation2 + $0x291] sm:$0xff] }
 0x63b   :  { %v6405_v54 = vsel %vm3108_vm8, %v6303_v14, 0.0  ;;  %v6122_v28 = vadd.f32 %v6058_v11, %v5926_v56  ;;  %v5876_v30 = vmul.f32 %v16151_v35, %v14123_v9  ;;  %v5076_v25 = vmul.f32 %v16239_v22, %v5008_v59  ;;  %v14145_v19 = vld [vmem:[#allocation2 + $0x1e9] sm:$0xff]  ;;  %v5612_v4 = vld [vmem:[#allocation2 + $0x292] sm:$0xff] }
 0x63c   :  { %6406 = vadd.xlane.f32.xlu0 %v6405_v54  ;;  %v5716_v44 = vadd.f32 %v5652_v53, %v5520_v52  ;;  %v5351_v45 = vadd.f32 %v5287_v40, %v5155_v47  ;;  %v6072_v23 = vmul.f32 %v16314_v37, %v14127_v55  ;;  %v4944_v41 = vadd.f32 %v4880_v1, %v4684_v24  ;;  %v14147_v59 = vld [vmem:[#allocation2 + $0x1ea] sm:$0xff] }
 0x63d   :  { %v5272_v14 = vmul.f32 %v16142_v34, %v5204_v10  ;;  %v6318_v50 = vadd.f32 %v6254_v57, %v6122_v28  ;;  %v6268_v11 = vmul.f32 %v13853_v33, %v14130_v29  ;;  %v5468_v53 = vmul.f32 %v16143_v63, %v5400_v7 }
 0x63e   :  { %v5913_v21 = vadd.f32 %v5849_v61, %v5716_v44  ;;  %v5547_v40 = vadd.f32 %v5483_v3, %v5351_v45  ;;  %v5140_v56 = vadd.f32 %v5076_v25, %v4944_v41  ;;  %v5664_v52 = vmul.f32 %v16144_v8, %v5596_v26  ;;  %v14162_v41 = vld [vmem:[#allocation2 + $0x2b8] sm:$0xff] }
 0x63f   :  { %v4701_v54 = vmul.f32 %v5219_v39, %v16237_v13  ;;  %v6450_v47 = vsel %vm3108_vm8, %v6318_v50, 0.0  ;;  %v5861_v57 = vmul.f32 %v16151_v35, %v14140_v58  ;;  %v4897_v61 = vmul.f32 %v5415_v0, %v16238_v51  ;;  %v14164_v50 = vld [vmem:[#allocation2 + $0x2b9] sm:$0xff] }
 0x640   :  { %v6109_v24 = vadd.f32 %v6045_v46, %v5913_v21  ;;  %6451 = vadd.xlane.f32.xlu1 %v6450_v47  ;;  %v5743_v1 = vadd.f32 %v5679_v15, %v5547_v40  ;;  %v5336_v28 = vadd.f32 %v5272_v14, %v5140_v56  ;;  %v6057_v44 = vmul.f32 %v16314_v37, %v14145_v19  ;;  %v14170_v40 = vld [vmem:[#allocation2 + $0x2ba] sm:$0xff] }
 0x641   :  { %v6253_v3 = vmul.f32 %v13853_v33, %v14147_v59  ;;  %v4961_v45 = vadd.f32 %v4897_v61, %v4701_v54  ;;  %v5093_v39 = vmul.f32 %v5611_v16, %v16239_v22  ;;  %v5289_v46 = vmul.f32 %v14123_v9, %v16142_v34 }
 0x642   :  { %v6305_v25 = vadd.f32 %v6241_v38, %v6109_v24  ;;  %v5940_v0 = vadd.f32 %v5876_v30, %v5743_v1  ;;  %v5532_v15 = vadd.f32 %v5468_v53, %v5336_v28  ;;  %v5485_v14 = vmul.f32 %v14127_v55, %v16143_v63 }
 0x643   :  { %v5681_v21 = vmul.f32 %v14130_v29, %v16144_v8  ;;  %v5157_v16 = vadd.f32 %v5093_v39, %v4961_v45  ;;  %v4686_v56 = vmul.f32 %v5204_v10, %v16237_v13  ;;  %v4882_v54 = vmul.f32 %v5400_v7, %v16238_v51  ;;  %v14182_v45 = vld [vmem:[#allocation2 + $0x200] sm:$0xff] }
 0x644   :  { %v6411_v38 = vsel %vm3108_vm8, %v6305_v25, 0.0  ;;  %v6136_v47 = vadd.f32 %v6072_v23, %v5940_v0  ;;  %v5728_v24 = vadd.f32 %v5664_v52, %v5532_v15  ;;  %v5878_v30 = vmul.f32 %v16151_v35, %v14162_v41  ;;  %v14188_v39 = vld [vmem:[#allocation2 + $0x201] sm:$0xff] }
 0x645   :  { %6412 = vadd.xlane.f32.xlu0 %v6411_v38  ;;  %v6074_v53 = vmul.f32 %v16314_v37, %v14164_v50  ;;  %v5353_v61 = vadd.f32 %v5289_v46, %v5157_v16  ;;  %v6270_v1 = vmul.f32 %v13853_v33, %v14170_v40  ;;  %v4946_v28 = vadd.f32 %v4882_v54, %v4686_v56  ;;  %v14190_v0 = vld [vmem:[#allocation2 + $0x202] sm:$0xff] }
 0x646   :  { %v5078_v25 = vmul.f32 %v5596_v26, %v16239_v22  ;;  %v6332_v10 = vadd.f32 %v6268_v11, %v6136_v47  ;;  %v5925_v7 = vadd.f32 %v5861_v57, %v5728_v24  ;;  %v5274_v23 = vmul.f32 %v14140_v58, %v16142_v34 }
 0x647   :  { %v5470_v52 = vmul.f32 %v14145_v19, %v16143_v63  ;;  %v5549_v46 = vadd.f32 %v5485_v14, %v5353_v61  ;;  %v5666_v38 = vmul.f32 %v14147_v59, %v16144_v8  ;;  %v4687_v26 = vmul.f32 %v14032_v60, %v16237_v13  ;;  %v4632_v61 = vld [vmem:[#allocation2 + $0x278] sm:$0xff] }
 0x648   :  { %v5142_v15 = vadd.f32 %v5078_v25, %v4946_v28  ;;  %v6492_v11 = vsel %vm3108_vm8, %v6332_v10, 0.0  ;;  %v6121_v57 = vadd.f32 %v6057_v44, %v5925_v7  ;;  %v5863_v16 = vmul.f32 %v16151_v35, %v14182_v45  ;;  %v4828_v60 = vld [vmem:[#allocation2 + $0x279] sm:$0xff] }
 0x649   :  { %v4883_v56 = vmul.f32 %v14034_v62, %v16238_v51  ;;  %6493 = vadd.xlane.f32.xlu1 %v6492_v11  ;;  %v5745_v54 = vadd.f32 %v5681_v21, %v5549_v46  ;;  %v6059_v14 = vmul.f32 %v16314_v37, %v14188_v39  ;;  %v6255_v24 = vmul.f32 %v13853_v33, %v14190_v0  ;;  %v14209_v62 = vld [vmem:[#allocation2 + $0x210] sm:$0xff] }
 0x64a   :  { %v5338_v47 = vadd.f32 %v5274_v23, %v5142_v15  ;;  %v6317_v28 = vadd.f32 %v6253_v3, %v6121_v57  ;;  %v5079_v44 = vmul.f32 %v14038_v49, %v16239_v22  ;;  %v5275_v10 = vmul.f32 %v14077_v6, %v16142_v34  ;;  %v14211_v21 = vld [vmem:[#allocation2 + $0x211] sm:$0xff] }
 0x64b   :  { %v4947_v25 = vadd.f32 %v4883_v56, %v4687_v26  ;;  %v5942_v7 = vadd.f32 %v5878_v30, %v5745_v54  ;;  %v5471_v46 = vmul.f32 %v14079_v32, %v16143_v63  ;;  %v5667_v15 = vmul.f32 %v14085_v17, %v16144_v8  ;;  %v14217_v3 = vld [vmem:[#allocation2 + $0x212] sm:$0xff]  ;;  %v5024_v26 = vld [vmem:[#allocation2 + $0x27a] sm:$0xff] }
 0x64c   :  { %v5534_v23 = vadd.f32 %v5470_v52, %v5338_v47  ;;  %v6447_v49 = vsel %vm3108_vm8, %v6317_v28, 0.0  ;;  %v4700_v57 = vmul.f32 %v16237_v13, %v4632_v61  ;;  %v4896_v56 = vmul.f32 %v16238_v51, %v4828_v60  ;;  %v14229_v60 = vld [vmem:[#allocation2 + $0x2a8] sm:$0xff] }
 0x64d   :  { %v5143_v11 = vadd.f32 %v5079_v44, %v4947_v25  ;;  %6448 = vadd.xlane.f32.xlu0 %v6447_v49  ;;  %v6138_v30 = vadd.f32 %v6074_v53, %v5942_v7  ;;  %v5864_v54 = vmul.f32 %v16151_v35, %v14209_v62  ;;  %v6060_v47 = vmul.f32 %v16314_v37, %v14211_v21  ;;  %v14233_v7 = vld [vmem:[#allocation2 + $0x2a9] sm:$0xff] }
 0x64e   :  { %v5730_v52 = vadd.f32 %v5666_v38, %v5534_v23  ;;  %v6256_v28 = vmul.f32 %v13853_v33, %v14217_v3  ;;  %v4960_v25 = vadd.f32 %v4896_v56, %v4700_v57  ;;  %v5092_v61 = vmul.f32 %v16239_v22, %v5024_v26  ;;  %v14235_v23 = vld [vmem:[#allocation2 + $0x2aa] sm:$0xff] }
 0x64f   :  { %v5339_v43 = vadd.f32 %v5275_v10, %v5143_v11  ;;  %v6334_v44 = vadd.f32 %v6270_v1, %v6138_v30  ;;  %v5288_v53 = vmul.f32 %v16142_v34, %v5220_v5  ;;  %v5484_v38 = vmul.f32 %v16143_v63, %v5416_v27 }
 0x650   :  { %v5927_v49 = vadd.f32 %v5863_v16, %v5730_v52  ;;  %v5156_v10 = vadd.f32 %v5092_v61, %v4960_v25  ;;  %v5680_v11 = vmul.f32 %v16144_v8, %v5612_v4  ;;  %v4703_v57 = vmul.f32 %v14123_v9, %v16237_v13 }
 0x651   :  { %v5535_v31 = vadd.f32 %v5471_v46, %v5339_v43  ;;  %v6498_v26 = vsel %vm3108_vm8, %v6334_v44, 0.0  ;;  %v5877_v1 = vmul.f32 %v16151_v35, %v14229_v60  ;;  %v4899_v16 = vmul.f32 %v14127_v55, %v16238_v51  ;;  %v14253_v44 = vld [vmem:[#allocation2 + $0x2d0] sm:$0xff] }
 0x652   :  { %v6123_v56 = vadd.f32 %v6059_v14, %v5927_v49  ;;  %6499 = vadd.xlane.f32.xlu1 %v6498_v26  ;;  %v5352_v52 = vadd.f32 %v5288_v53, %v5156_v10  ;;  %v6073_v43 = vmul.f32 %v16314_v37, %v14233_v7  ;;  %v6269_v46 = vmul.f32 %v13853_v33, %v14235_v23  ;;  %v14255_v55 = vld [vmem:[#allocation2 + $0x2d1] sm:$0xff] }
 0x653   :  { %v5731_v30 = vadd.f32 %v5667_v15, %v5535_v31  ;;  %v4963_v9 = vadd.f32 %v4899_v16, %v4703_v57  ;;  %v5095_v14 = vmul.f32 %v14130_v29, %v16239_v22  ;;  %v5291_v61 = vmul.f32 %v14162_v41, %v16142_v34 }
 0x654   :  { %v6319_v25 = vadd.f32 %v6255_v24, %v6123_v56  ;;  %v5548_v15 = vadd.f32 %v5484_v38, %v5352_v52  ;;  %v5487_v49 = vmul.f32 %v14164_v50, %v16143_v63  ;;  %v5683_v53 = vmul.f32 %v14170_v40, %v16144_v8  ;;  %v14261_v24 = vld [vmem:[#allocation2 + $0x2d2] sm:$0xff] }
 0x655   :  { %v5928_v31 = vadd.f32 %v5864_v54, %v5731_v30  ;;  %v5159_v29 = vadd.f32 %v5095_v14, %v4963_v9  ;;  %v4702_v57 = vmul.f32 %v5220_v5, %v16237_v13  ;;  %v4898_v26 = vmul.f32 %v5416_v27, %v16238_v51  ;;  %v14273_v9 = vld [vmem:[#allocation2 + $0x2c0] sm:$0xff] }
 0x656   :  { %v6453_v10 = vsel %vm3108_vm8, %v6319_v25, 0.0  ;;  %v5744_v16 = vadd.f32 %v5680_v11, %v5548_v15  ;;  %v5880_v54 = vmul.f32 %v16151_v35, %v14253_v44  ;;  %v6076_v38 = vmul.f32 %v16314_v37, %v14255_v55  ;;  %v14279_v14 = vld [vmem:[#allocation2 + $0x2c1] sm:$0xff] }
 0x657   :  { %6454 = vadd.xlane.f32.xlu0 %v6453_v10  ;;  %v6124_v56 = vadd.f32 %v6060_v47, %v5928_v31  ;;  %v5355_v30 = vadd.f32 %v5291_v61, %v5159_v29  ;;  %v6272_v52 = vmul.f32 %v13853_v33, %v14261_v24  ;;  %v4962_v48 = vadd.f32 %v4898_v26, %v4702_v57  ;;  %v14281_v31 = vld [vmem:[#allocation2 + $0x2c2] sm:$0xff] }
 0x658   :  { %v5094_v25 = vmul.f32 %v5612_v4, %v16239_v22  ;;  %v5941_v27 = vadd.f32 %v5877_v1, %v5744_v16  ;;  %v5290_v47 = vmul.f32 %v14229_v60, %v16142_v34  ;;  %v5486_v11 = vmul.f32 %v14233_v7, %v16143_v63 }
 0x659   :  { %v6320_v5 = vadd.f32 %v6256_v28, %v6124_v56  ;;  %v5551_v61 = vadd.f32 %v5487_v49, %v5355_v30  ;;  %v5682_v10 = vmul.f32 %v14235_v23, %v16144_v8  ;;  %v4673_v4 = vmul.f32 %v13936_v42, %v16237_v13 }
 0x65a   :  { %v5158_v15 = vadd.f32 %v5094_v25, %v4962_v48  ;;  %v6137_v1 = vadd.f32 %v6073_v43, %v5941_v27  ;;  %v5879_v29 = vmul.f32 %v16151_v35, %v14273_v9  ;;  %v4869_v57 = vmul.f32 %v13938_v36, %v16238_v51  ;;  %v14300_v25 = vld [vmem:[#allocation2 + $0x138] sm:$0xff] }
 0x65b   :  { %v6456_v28 = vsel %vm3108_vm8, %v6320_v5, 0.0  ;;  %v5747_v26 = vadd.f32 %v5683_v53, %v5551_v61  ;;  %v6075_v48 = vmul.f32 %v16314_v37, %v14279_v14  ;;  %v6271_v49 = vmul.f32 %v13853_v33, %v14281_v31  ;;  %v14302_v36 = vld [vmem:[#allocation2 + $0x139] sm:$0xff] }
 0x65c   :  { %6457 = vadd.xlane.f32.xlu1 %v6456_v28  ;;  %v5354_v56 = vadd.f32 %v5290_v47, %v5158_v15  ;;  %v6333_v16 = vadd.f32 %v6269_v46, %v6137_v1  ;;  %v4933_v42 = vadd.f32 %v4869_v57, %v4673_v4  ;;  %v5065_v43 = vmul.f32 %v13944_v18, %v16239_v22  ;;  %v14308_v46 = vld [vmem:[#allocation2 + $0x13a] sm:$0xff] }
 0x65d   :  { %v5261_v30 = vmul.f32 %v13986_v20, %v16142_v34  ;;  %v5944_v53 = vadd.f32 %v5880_v54, %v5747_v26  ;;  %v5457_v27 = vmul.f32 %v13988_v12, %v16143_v63  ;;  %v5653_v47 = vmul.f32 %v13994_v2, %v16144_v8  ;;  %v14323_v57 = vld [vmem:[#allocation2 + $0x218] sm:$0xff] }
 0x65e   :  { %v5550_v5 = vadd.f32 %v5486_v11, %v5354_v56  ;;  %v6495_v61 = vsel %vm3108_vm8, %v6333_v16, 0.0  ;;  %v5129_v18 = vadd.f32 %v5065_v43, %v4933_v42  ;;  %v4688_v20 = vmul.f32 %v14140_v58, %v16237_v13  ;;  %v14329_v56 = vld [vmem:[#allocation2 + $0x219] sm:$0xff] }
 0x65f   :  { %v4884_v15 = vmul.f32 %v14145_v19, %v16238_v51  ;;  %6496 = vadd.xlane.f32.xlu0 %v6495_v61  ;;  %v6140_v54 = vadd.f32 %v6076_v38, %v5944_v53  ;;  %v5850_v12 = vmul.f32 %v16151_v35, %v14300_v25  ;;  %v6046_v2 = vmul.f32 %v16314_v37, %v14302_v36  ;;  %v14331_v16 = vld [vmem:[#allocation2 + $0x21a] sm:$0xff] }
 0x660   :  { %v5746_v11 = vadd.f32 %v5682_v10, %v5550_v5  ;;  %v5325_v4 = vadd.f32 %v5261_v30, %v5129_v18  ;;  %v6242_v28 = vmul.f32 %v13853_v33, %v14308_v46  ;;  %v5080_v58 = vmul.f32 %v14147_v59, %v16239_v22 }
 0x661   :  { %v4948_v1 = vadd.f32 %v4884_v15, %v4688_v20  ;;  %v6336_v19 = vadd.f32 %v6272_v52, %v6140_v54  ;;  %v5276_v38 = vmul.f32 %v14182_v45, %v16142_v34  ;;  %v5472_v10 = vmul.f32 %v14188_v39, %v16143_v63 }
 0x662   :  { %v5943_v26 = vadd.f32 %v5879_v29, %v5746_v11  ;;  %v5521_v42 = vadd.f32 %v5457_v27, %v5325_v4  ;;  %v5668_v30 = vmul.f32 %v14190_v0, %v16144_v8  ;;  %v4689_v59 = vmul.f32 %v14077_v6, %v16237_v13  ;;  %v14350_v11 = vld [vmem:[#allocation2 + $0x228] sm:$0xff] }
 0x663   :  { %v5144_v43 = vadd.f32 %v5080_v58, %v4948_v1  ;;  %v6504_v52 = vsel %vm3108_vm8, %v6336_v19, 0.0  ;;  %v5865_v53 = vmul.f32 %v16151_v35, %v14323_v57  ;;  %v4885_v5 = vmul.f32 %v14079_v32, %v16238_v51  ;;  %v14352_v32 = vld [vmem:[#allocation2 + $0x229] sm:$0xff] }
 0x664   :  { %v6139_v29 = vadd.f32 %v6075_v48, %v5943_v26  ;;  %6505 = vadd.xlane.f32.xlu1 %v6504_v52  ;;  %v5717_v61 = vadd.f32 %v5653_v47, %v5521_v42  ;;  %v6061_v27 = vmul.f32 %v16314_v37, %v14329_v56  ;;  %v6257_v20 = vmul.f32 %v13853_v33, %v14331_v16 }
 0x665   :  { %v5340_v18 = vadd.f32 %v5276_v38, %v5144_v43  ;;  %v4949_v6 = vadd.f32 %v4885_v5, %v4689_v59  ;;  %v5081_v48 = vmul.f32 %v14085_v17, %v16239_v22  ;;  %v5277_v54 = vmul.f32 %v14209_v62, %v16142_v34  ;;  %v14373_v5 = vld [vmem:[#allocation2 + $0x2d8] sm:$0xff] }
 0x666   :  { %v6335_v15 = vadd.f32 %v6271_v49, %v6139_v29  ;;  %v5914_v47 = vadd.f32 %v5850_v12, %v5717_v61  ;;  %v5473_v1 = vmul.f32 %v14211_v21, %v16143_v63  ;;  %v5669_v58 = vmul.f32 %v14217_v3, %v16144_v8  ;;  %v14358_v49 = vld [vmem:[#allocation2 + $0x22a] sm:$0xff] }
 0x667   :  { %v5536_v4 = vadd.f32 %v5472_v10, %v5340_v18  ;;  %v5145_v17 = vadd.f32 %v5081_v48, %v4949_v6  ;;  %v4704_v26 = vmul.f32 %v14229_v60, %v16237_v13  ;;  %v4900_v38 = vmul.f32 %v14233_v7, %v16238_v51  ;;  %v14379_v18 = vld [vmem:[#allocation2 + $0x2d9] sm:$0xff] }
 0x668   :  { %v6501_v19 = vsel %vm3108_vm8, %v6335_v15, 0.0  ;;  %v6110_v12 = vadd.f32 %v6046_v2, %v5914_v47  ;;  %v5866_v42 = vmul.f32 %v16151_v35, %v14350_v11  ;;  %v6062_v43 = vmul.f32 %v16314_v37, %v14352_v32  ;;  %v14381_v15 = vld [vmem:[#allocation2 + $0x2da] sm:$0xff] }
 0x669   :  { %6502 = vadd.xlane.f32.xlu0 %v6501_v19  ;;  %v5732_v10 = vadd.f32 %v5668_v30, %v5536_v4  ;;  %v5341_v59 = vadd.f32 %v5277_v54, %v5145_v17  ;;  %v6258_v52 = vmul.f32 %v13853_v33, %v14358_v49  ;;  %v4964_v29 = vadd.f32 %v4900_v38, %v4704_v26  ;;  %v14397_v17 = vld [vmem:[%s15351_s5 + $0x8] ss:$0 sm:$0xff] }
 0x66a   :  { %v5096_v60 = vmul.f32 %v14235_v23, %v16239_v22  ;;  %v6306_v7 = vadd.f32 %v6242_v28, %v6110_v12  ;;  %v5292_v2 = vmul.f32 %v14273_v9, %v16142_v34  ;;  %v5488_v30 = vmul.f32 %v14279_v14, %v16143_v63  ;;  %v14407_v12 = vld [vmem:[#allocation2 + $0x2e9] sm:$0xff] }
 0x66b   :  { %v5929_v61 = vadd.f32 %v5865_v53, %v5732_v10  ;;  %v5537_v6 = vadd.f32 %v5473_v1, %v5341_v59  ;;  %v5684_v48 = vmul.f32 %v14281_v31, %v16144_v8  ;;  %v4705_v23 = vmul.f32 %v14162_v41, %v16237_v13  ;;  %16326 = vst [vmem:[#allocation31_spill] sm:$0xff] %v14407_v12 }
 0x66c   :  { %v5160_v33 = vadd.f32 %v5096_v60, %v4964_v29  ;;  %v6414_v28 = vsel %vm3108_vm8, %v6306_v7, 0.0  ;;  %v5881_v54 = vmul.f32 %v16151_v35, %v14373_v5  ;;  %v4901_v47 = vmul.f32 %v14164_v50, %v16238_v51 }
 0x66d   :  { %v6125_v53 = vadd.f32 %v6061_v27, %v5929_v61  ;;  %6415 = vadd.xlane.f32.xlu1 %v6414_v28  ;;  %v5733_v4 = vadd.f32 %v5669_v58, %v5537_v6  ;;  %v6077_v1 = vmul.f32 %v16314_v37, %v14379_v18  ;;  %v6273_v41 = vmul.f32 %v14397_v17, %v14381_v15  ;;  %v14405_v58 = vld [vmem:[#allocation2 + $0x2e8] sm:$0xff]  ;;  %v16329_v6 = vld [vmem:[#allocation28_spill] sm:$0xff] }
 0x66e   :  { %v5356_v19 = vadd.f32 %v5292_v2, %v5160_v33  ;;  %v4965_v26 = vadd.f32 %v4901_v47, %v4705_v23  ;;  %v5097_v38 = vmul.f32 %v14170_v40, %v16239_v22  ;;  %v5293_v50 = vmul.f32 %v14253_v44, %v16142_v34  ;;  %16325 = vst [vmem:[#allocation253_spill] sm:$0xff] %v14405_v58  ;;  %v16328_v61 = vld [vmem:[#allocation205_spill] sm:$0xff] }
 0x66f   :  { %v6321_v27 = vadd.f32 %v6257_v20, %v6125_v53  ;;  %v5930_v10 = vadd.f32 %v5866_v42, %v5733_v4  ;;  %v5489_v29 = vmul.f32 %v14255_v55, %v16143_v63  ;;  %v5685_v60 = vmul.f32 %v14261_v24, %v16144_v8  ;;  %v14413_v20 = vld [vmem:[#allocation2 + $0x2ea] sm:$0xff]  ;;  %v4607_v53 = vld [vmem:[#allocation2 + $0x120] sm:$0xff] }
 0x670   :  { %v5552_v59 = vadd.f32 %v5488_v30, %v5356_v19  ;;  %16327 = vst [vmem:[#allocation89_spill] sm:$0xff] %v14413_v20  ;;  %v5161_v40 = vadd.f32 %v5097_v38, %v4965_v26  ;;  %v4674_v2 = vmul.f32 %v16328_v61, %v16237_v13  ;;  %v4870_v33 = vmul.f32 %v16329_v6, %v16238_v51  ;;  %v14428_v38 = vld [vmem:[#allocation2 + $0x140] sm:$0xff]  ;;  %v16332_v61 = vld [vmem:[#allocation145_spill] sm:$0xff] }
 0x671   :  { %v6459_v7 = vsel %vm3108_vm8, %v6321_v27, 0.0  ;;  %v6126_v42 = vadd.f32 %v6062_v43, %v5930_v10  ;;  %v5882_v23 = vmul.f32 %v16151_v35, %v14405_v58  ;;  %v6078_v28 = vmul.f32 %v16314_v37, %v14407_v12  ;;  %v16330_v27 = vld [vmem:[#allocation254_spill] sm:$0xff]  ;;  %v14434_v12 = vld [vmem:[#allocation2 + $0x141] sm:$0xff] }
 0x672   :  { %6460 = vadd.xlane.f32.xlu0 %v6459_v7  ;;  %v5748_v30 = vadd.f32 %v5684_v48, %v5552_v59  ;;  %v5357_v47 = vadd.f32 %v5293_v50, %v5161_v40  ;;  %v6274_v4 = vmul.f32 %v14397_v17, %v14413_v20  ;;  %v4934_v19 = vadd.f32 %v4870_v33, %v4674_v2  ;;  %v4803_v7 = vld [vmem:[#allocation2 + $0x121] sm:$0xff]  ;;  %v16331_v10 = vld [vmem:[#allocation86_spill] sm:$0xff] }
 0x673   :  { %v5066_v26 = vmul.f32 %v16330_v27, %v16239_v22  ;;  %v6322_v43 = vadd.f32 %v6258_v52, %v6126_v42  ;;  %v5262_v59 = vmul.f32 %v16331_v10, %v16142_v34  ;;  %v5458_v6 = vmul.f32 %v16332_v61, %v16143_v63  ;;  %v14436_v50 = vld [vmem:[#allocation2 + $0x142] sm:$0xff] }
 0x674   :  { %v5945_v48 = vadd.f32 %v5881_v54, %v5748_v30  ;;  %v5553_v40 = vadd.f32 %v5489_v29, %v5357_v47  ;;  %v16333_v33 = vld [vmem:[#allocation204_spill] sm:$0xff]  ;;  %v4675_v20 = vmul.f32 %v16237_v13, %v4607_v53  ;;  %v5851_v42 = vmul.f32 %v16151_v35, %v14428_v38 }
 0x675   :  { %v5130_v2 = vadd.f32 %v5066_v26, %v4934_v19  ;;  %v5654_v27 = vmul.f32 %v16333_v33, %v16144_v8  ;;  %v4999_v58 = vld [vmem:[#allocation2 + $0x122] sm:$0xff]  ;;  %v6462_v52 = vsel %vm3108_vm8, %v6322_v43, 0.0  ;;  %v4871_v30 = vmul.f32 %v16238_v51, %v4803_v7  ;;  %v14452_v43 = vld [vmem:[#allocation2 + $0x150] sm:$0xff] }
 0x676   :  { %v6141_v54 = vadd.f32 %v6077_v1, %v5945_v48  ;;  %6463 = vadd.xlane.f32.xlu1 %v6462_v52  ;;  %v5749_v10 = vadd.f32 %v5685_v60, %v5553_v40  ;;  %v6047_v29 = vmul.f32 %v16314_v37, %v14434_v12  ;;  %v6243_v47 = vmul.f32 %v14397_v17, %v14436_v50  ;;  %v14454_v48 = vld [vmem:[#allocation2 + $0x151] sm:$0xff] }
 0x677   :  { %v5326_v61 = vadd.f32 %v5262_v59, %v5130_v2  ;;  %v4935_v53 = vadd.f32 %v4871_v30, %v4675_v20  ;;  %v5067_v26 = vmul.f32 %v16239_v22, %v4999_v58  ;;  %v5263_v1 = vmul.f32 %v14300_v25, %v16142_v34  ;;  %v14460_v2 = vld [vmem:[#allocation2 + $0x152] sm:$0xff] }
 0x678   :  { %v6337_v19 = vadd.f32 %v6273_v41, %v6141_v54  ;;  %v5946_v7 = vadd.f32 %v5882_v23, %v5749_v10  ;;  %v5459_v59 = vmul.f32 %v14302_v36, %v16143_v63  ;;  %v5655_v40 = vmul.f32 %v14308_v46, %v16144_v8 }
 0x679   :  { %v5522_v60 = vadd.f32 %v5458_v6, %v5326_v61  ;;  %v5131_v58 = vadd.f32 %v5067_v26, %v4935_v53  ;;  %v4690_v20 = vmul.f32 %v14182_v45, %v16237_v13  ;;  %v4886_v33 = vmul.f32 %v14188_v39, %v16238_v51  ;;  %v14481_v26 = vld [vmem:[#allocation2 + $0x231] sm:$0xff] }
 0x67a   :  { %v6507_v41 = vsel %vm3108_vm8, %v6337_v19, 0.0  ;;  %v6142_v23 = vadd.f32 %v6078_v28, %v5946_v7  ;;  %v5852_v52 = vmul.f32 %v16151_v35, %v14452_v43  ;;  %v6048_v54 = vmul.f32 %v16314_v37, %v14454_v48  ;;  %v14475_v19 = vld [vmem:[#allocation2 + $0x230] sm:$0xff] }
 0x67b   :  { %6508 = vadd.xlane.f32.xlu0 %v6507_v41  ;;  %v5718_v6 = vadd.f32 %v5654_v27, %v5522_v60  ;;  %v5327_v30 = vadd.f32 %v5263_v1, %v5131_v58  ;;  %v6244_v10 = vmul.f32 %v14397_v17, %v14460_v2  ;;  %v4950_v61 = vadd.f32 %v4886_v33, %v4690_v20  ;;  %v14483_v1 = vld [vmem:[#allocation2 + $0x232] sm:$0xff] }
 0x67c   :  { %v5082_v45 = vmul.f32 %v14190_v0, %v16239_v22  ;;  %v6338_v39 = vadd.f32 %v6274_v4, %v6142_v23  ;;  %v5278_v28 = vmul.f32 %v14323_v57, %v16142_v34  ;;  %v5474_v27 = vmul.f32 %v14329_v56, %v16143_v63 }
 0x67d   :  { %v5915_v53 = vadd.f32 %v5851_v42, %v5718_v6  ;;  %v5523_v7 = vadd.f32 %v5459_v59, %v5327_v30  ;;  %v5670_v41 = vmul.f32 %v14331_v16, %v16144_v8  ;;  %v4691_v0 = vmul.f32 %v14209_v62, %v16237_v13 }
 0x67e   :  { %v5146_v60 = vadd.f32 %v5082_v45, %v4950_v61  ;;  %v6510_v4 = vsel %vm3108_vm8, %v6338_v39, 0.0  ;;  %v5867_v58 = vmul.f32 %v16151_v35, %v14475_v19  ;;  %v4887_v20 = vmul.f32 %v14211_v21, %v16238_v51  ;;  %v14502_v45 = vld [vmem:[#allocation2 + $0x240] sm:$0xff] }
 0x67f   :  { %v6111_v42 = vadd.f32 %v6047_v29, %v5915_v53  ;;  %6511 = vadd.xlane.f32.xlu1 %v6510_v4  ;;  %v5719_v33 = vadd.f32 %v5655_v40, %v5523_v7  ;;  %v6063_v59 = vmul.f32 %v16314_v37, %v14481_v26  ;;  %v6259_v6 = vmul.f32 %v14397_v17, %v14483_v1  ;;  %v14504_v21 = vld [vmem:[#allocation2 + $0x241] sm:$0xff] }
 0x680   :  { %v5342_v23 = vadd.f32 %v5278_v28, %v5146_v60  ;;  %v4951_v62 = vadd.f32 %v4887_v20, %v4691_v0  ;;  %v5083_v29 = vmul.f32 %v14217_v3, %v16239_v22  ;;  %v5279_v61 = vmul.f32 %v14350_v11, %v16142_v34 }
 0x681   :  { %v6307_v30 = vadd.f32 %v6243_v47, %v6111_v42  ;;  %v5916_v40 = vadd.f32 %v5852_v52, %v5719_v33  ;;  %v5475_v53 = vmul.f32 %v14352_v32, %v16143_v63  ;;  %v5671_v28 = vmul.f32 %v14358_v49, %v16144_v8  ;;  %v14510_v47 = vld [vmem:[#allocation2 + $0x242] sm:$0xff] }
 0x682   :  { %v5538_v39 = vadd.f32 %v5474_v27, %v5342_v23  ;;  %v5147_v3 = vadd.f32 %v5083_v29, %v4951_v62  ;;  %v4706_v60 = vmul.f32 %v14273_v9, %v16237_v13  ;;  %v4902_v0 = vmul.f32 %v14279_v14, %v16238_v51  ;;  %v14531_v29 = vld [vmem:[#allocation2 + $0x2f1] sm:$0xff] }
 0x683   :  { %v6417_v7 = vsel %vm3108_vm8, %v6307_v30, 0.0  ;;  %v6112_v52 = vadd.f32 %v6048_v54, %v5916_v40  ;;  %v5868_v4 = vmul.f32 %v16151_v35, %v14502_v45  ;;  %v6064_v42 = vmul.f32 %v16314_v37, %v14504_v21  ;;  %v14525_v30 = vld [vmem:[#allocation2 + $0x2f0] sm:$0xff]  ;;  %16335 = vst [vmem:[#allocation209_spill] sm:$0xff] %v14531_v29 }
 0x684   :  { %6418 = vadd.xlane.f32.xlu0 %v6417_v7  ;;  %v5734_v27 = vadd.f32 %v5670_v41, %v5538_v39  ;;  %v5343_v20 = vadd.f32 %v5279_v61, %v5147_v3  ;;  %v6260_v33 = vmul.f32 %v14397_v17, %v14510_v47  ;;  %v4966_v23 = vadd.f32 %v4902_v0, %v4706_v60  ;;  %v14533_v61 = vld [vmem:[#allocation2 + $0x2f2] sm:$0xff] }
 0x685   :  { %v5098_v9 = vmul.f32 %v14281_v31, %v16239_v22  ;;  %16334 = vst [vmem:[#allocation148_spill] sm:$0xff] %v14525_v30  ;;  %v6308_v14 = vadd.f32 %v6244_v10, %v6112_v52  ;;  %v5294_v54 = vmul.f32 %v14373_v5, %v16142_v34  ;;  %v5490_v41 = vmul.f32 %v14379_v18, %v16143_v63 }
 0x686   :  { %v5931_v62 = vadd.f32 %v5867_v58, %v5734_v27  ;;  %16336 = vst [vmem:[#allocation30_spill] sm:$0xff] %v14533_v61  ;;  %v5539_v40 = vadd.f32 %v5475_v53, %v5343_v20  ;;  %v5686_v7 = vmul.f32 %v14381_v15, %v16144_v8  ;;  %v4707_v31 = vmul.f32 %v14253_v44, %v16237_v13  ;;  %v4608_v20 = vld [vmem:[#allocation2 + $0x128] sm:$0xff] }
 0x687   :  { %v5162_v39 = vadd.f32 %v5098_v9, %v4966_v23  ;;  %v6420_v10 = vsel %vm3108_vm8, %v6308_v14, 0.0  ;;  %v5883_v3 = vmul.f32 %v16151_v35, %v14525_v30  ;;  %v4903_v60 = vmul.f32 %v14255_v55, %v16238_v51  ;;  %v4804_v44 = vld [vmem:[#allocation2 + $0x129] sm:$0xff]  ;;  %v14552_v55 = vld [vmem:[#allocation2 + $0x300] sm:$0xff] }
 0x688   :  { %v6127_v58 = vadd.f32 %v6063_v59, %v5931_v62  ;;  %6421 = vadd.xlane.f32.xlu1 %v6420_v10  ;;  %v5735_v0 = vadd.f32 %v5671_v28, %v5539_v40  ;;  %v6079_v53 = vmul.f32 %v16314_v37, %v14531_v29  ;;  %v6275_v27 = vmul.f32 %v14397_v17, %v14533_v61  ;;  %v16337_v14 = vld [vmem:[#allocation253_spill] sm:$0xff] }
 0x689   :  { %v5358_v52 = vadd.f32 %v5294_v54, %v5162_v39  ;;  %v4967_v9 = vadd.f32 %v4903_v60, %v4707_v31  ;;  %v5099_v59 = vmul.f32 %v14261_v24, %v16239_v22  ;;  %v5295_v62 = vmul.f32 %v16337_v14, %v16142_v34  ;;  %v14554_v28 = vld [vmem:[#allocation2 + $0x301] sm:$0xff]  ;;  %v16338_v39 = vld [vmem:[#allocation31_spill] sm:$0xff]  ;;  %v5000_v31 = vld [vmem:[#allocation2 + $0x12a] sm:$0xff] }
 0x68a   :  { %v6323_v23 = vadd.f32 %v6259_v6, %v6127_v58  ;;  %v5932_v54 = vadd.f32 %v5868_v4, %v5735_v0  ;;  %v5491_v10 = vmul.f32 %v16338_v39, %v16143_v63  ;;  %v16339_v61 = vld [vmem:[#allocation89_spill] sm:$0xff]  ;;  %v4676_v60 = vmul.f32 %v16237_v13, %v4608_v20 }
 0x68b   :  { %v5554_v40 = vadd.f32 %v5490_v41, %v5358_v52  ;;  %v5687_v29 = vmul.f32 %v16339_v61, %v16144_v8  ;;  %v14560_v6 = vld [vmem:[#allocation2 + $0x302] sm:$0xff]  ;;  %v5163_v58 = vadd.f32 %v5099_v59, %v4967_v9  ;;  %v4872_v14 = vmul.f32 %v16238_v51, %v4804_v44  ;;  %v14572_v9 = vld [vmem:[#allocation2 + $0x158] sm:$0xff] }
 0x68c   :  { %16340 = vst [vmem:[#allocation88_spill] sm:$0xff] %v14560_v6  ;;  %v6465_v24 = vsel %vm3108_vm8, %v6323_v23, 0.0  ;;  %v6128_v30 = vadd.f32 %v6064_v42, %v5932_v54  ;;  %v5884_v41 = vmul.f32 %v16151_v35, %v14552_v55  ;;  %v6080_v0 = vmul.f32 %v16314_v37, %v14554_v28  ;;  %v14578_v59 = vld [vmem:[#allocation2 + $0x159] sm:$0xff] }
 0x68d   :  { %6466 = vadd.xlane.f32.xlu0 %v6465_v24  ;;  %v5750_v4 = vadd.f32 %v5686_v7, %v5554_v40  ;;  %v5359_v52 = vadd.f32 %v5295_v62, %v5163_v58  ;;  %v6276_v61 = vmul.f32 %v14397_v17, %v14560_v6  ;;  %v4936_v39 = vadd.f32 %v4872_v14, %v4676_v60  ;;  %v14580_v54 = vld [vmem:[#allocation2 + $0x15a] sm:$0xff] }
 0x68e   :  { %v5068_v23 = vmul.f32 %v16239_v22, %v5000_v31  ;;  %v6324_v20 = vadd.f32 %v6260_v33, %v6128_v30  ;;  %v5264_v42 = vmul.f32 %v14428_v38, %v16142_v34  ;;  %v5460_v7 = vmul.f32 %v14434_v12, %v16143_v63 }
 0x68f   :  { %v5947_v44 = vadd.f32 %v5883_v3, %v5750_v4  ;;  %v5555_v62 = vadd.f32 %v5491_v10, %v5359_v52  ;;  %v5656_v14 = vmul.f32 %v14436_v50, %v16144_v8  ;;  %v4677_v31 = vmul.f32 %v14300_v25, %v16237_v13 }
 0x690   :  { %v5132_v40 = vadd.f32 %v5068_v23, %v4936_v39  ;;  %v6468_v33 = vsel %vm3108_vm8, %v6324_v20, 0.0  ;;  %v5853_v3 = vmul.f32 %v16151_v35, %v14572_v9  ;;  %v4873_v24 = vmul.f32 %v14302_v36, %v16238_v51  ;;  %v14599_v23 = vld [vmem:[#allocation2 + $0x168] sm:$0xff] }
 0x691   :  { %v6143_v30 = vadd.f32 %v6079_v53, %v5947_v44  ;;  %6469 = vadd.xlane.f32.xlu1 %v6468_v33  ;;  %v5751_v58 = vadd.f32 %v5687_v29, %v5555_v62  ;;  %v6049_v39 = vmul.f32 %v16314_v37, %v14578_v59  ;;  %v6245_v10 = vmul.f32 %v14397_v17, %v14580_v54  ;;  %v14601_v36 = vld [vmem:[#allocation2 + $0x169] sm:$0xff] }
 0x692   :  { %v5328_v60 = vadd.f32 %v5264_v42, %v5132_v40  ;;  %v4937_v25 = vadd.f32 %v4873_v24, %v4677_v31  ;;  %v5069_v53 = vmul.f32 %v14308_v46, %v16239_v22  ;;  %v5265_v52 = vmul.f32 %v14452_v43, %v16142_v34 }
 0x693   :  { %v6339_v4 = vadd.f32 %v6275_v27, %v6143_v30  ;;  %v5948_v29 = vadd.f32 %v5884_v41, %v5751_v58  ;;  %v5461_v44 = vmul.f32 %v14454_v48, %v16143_v63  ;;  %v5657_v42 = vmul.f32 %v14460_v2, %v16144_v8  ;;  %v14607_v27 = vld [vmem:[#allocation2 + $0x16a] sm:$0xff] }
 0x694   :  { %v5524_v20 = vadd.f32 %v5460_v7, %v5328_v60  ;;  %v5133_v46 = vadd.f32 %v5069_v53, %v4937_v25  ;;  %v4692_v40 = vmul.f32 %v14323_v57, %v16237_v13  ;;  %v4888_v31 = vmul.f32 %v14329_v56, %v16238_v51  ;;  %v14628_v53 = vld [vmem:[#allocation2 + $0x249] sm:$0xff] }
 0x695   :  { %v6513_v62 = vsel %vm3108_vm8, %v6339_v4, 0.0  ;;  %v6144_v41 = vadd.f32 %v6080_v0, %v5948_v29  ;;  %v5854_v33 = vmul.f32 %v16151_v35, %v14599_v23  ;;  %v6050_v30 = vmul.f32 %v16314_v37, %v14601_v36  ;;  %v14622_v4 = vld [vmem:[#allocation2 + $0x248] sm:$0xff] }
 0x696   :  { %6514 = vadd.xlane.f32.xlu0 %v6513_v62  ;;  %v5720_v7 = vadd.f32 %v5656_v14, %v5524_v20  ;;  %v5329_v24 = vadd.f32 %v5265_v52, %v5133_v46  ;;  %v6246_v58 = vmul.f32 %v14397_v17, %v14607_v27  ;;  %v4952_v60 = vadd.f32 %v4888_v31, %v4692_v40  ;;  %v14630_v52 = vld [vmem:[#allocation2 + $0x24a] sm:$0xff] }
 0x697   :  { %v5084_v57 = vmul.f32 %v14331_v16, %v16239_v22  ;;  %v6340_v56 = vadd.f32 %v6276_v61, %v6144_v41  ;;  %v5280_v0 = vmul.f32 %v14475_v19, %v16142_v34  ;;  %v5476_v14 = vmul.f32 %v14481_v26, %v16143_v63 }
 0x698   :  { %v5917_v25 = vadd.f32 %v5853_v3, %v5720_v7  ;;  %v5525_v29 = vadd.f32 %v5461_v44, %v5329_v24  ;;  %v5672_v62 = vmul.f32 %v14483_v1, %v16144_v8  ;;  %v4693_v16 = vmul.f32 %v14350_v11, %v16237_v13 }
 0x699   :  { %v5148_v20 = vadd.f32 %v5084_v57, %v4952_v60  ;;  %v6516_v61 = vsel %vm3108_vm8, %v6340_v56, 0.0  ;;  %v5869_v46 = vmul.f32 %v16151_v35, %v14622_v4  ;;  %v4889_v40 = vmul.f32 %v14352_v32, %v16238_v51  ;;  %v14649_v57 = vld [vmem:[#allocation2 + $0x258] sm:$0xff] }
 0x69a   :  { %v6113_v3 = vadd.f32 %v6049_v39, %v5917_v25  ;;  %6517 = vadd.xlane.f32.xlu1 %v6516_v61  ;;  %v5721_v31 = vadd.f32 %v5657_v42, %v5525_v29  ;;  %v6065_v44 = vmul.f32 %v16314_v37, %v14628_v53  ;;  %v6261_v7 = vmul.f32 %v14397_v17, %v14630_v52  ;;  %v14651_v32 = vld [vmem:[#allocation2 + $0x259] sm:$0xff] }
 0x69b   :  { %v5344_v41 = vadd.f32 %v5280_v0, %v5148_v20  ;;  %v4953_v11 = vadd.f32 %v4889_v40, %v4693_v16  ;;  %v5085_v39 = vmul.f32 %v14358_v49, %v16239_v22  ;;  %v5281_v60 = vmul.f32 %v14502_v45, %v16142_v34  ;;  %16341 = vst [vmem:[#allocation147_spill] sm:$0xff] %v14649_v57 }
 0x69c   :  { %v6309_v24 = vadd.f32 %v6245_v10, %v6113_v3  ;;  %16342 = vst [vmem:[#allocation208_spill] sm:$0xff] %v14651_v32  ;;  %v5918_v42 = vadd.f32 %v5854_v33, %v5721_v31  ;;  %v5477_v25 = vmul.f32 %v14504_v21, %v16143_v63  ;;  %v5673_v0 = vmul.f32 %v14510_v47, %v16144_v8  ;;  %v14657_v10 = vld [vmem:[#allocation2 + $0x25a] sm:$0xff] }
 0x69d   :  { %v5540_v56 = vadd.f32 %v5476_v14, %v5344_v41  ;;  %16343 = vst [vmem:[#allocation255_spill] sm:$0xff] %v14657_v10  ;;  %v5149_v49 = vadd.f32 %v5085_v39, %v4953_v11  ;;  %v4708_v20 = vmul.f32 %v14373_v5, %v16237_v13  ;;  %v4904_v16 = vmul.f32 %v14379_v18, %v16238_v51  ;;  %v16346_v39 = vld [vmem:[#allocation209_spill] sm:$0xff] }
 0x69e   :  { %v6423_v29 = vsel %vm3108_vm8, %v6309_v24, 0.0  ;;  %v6114_v33 = vadd.f32 %v6050_v30, %v5918_v42  ;;  %v5870_v61 = vmul.f32 %v16151_v35, %v14649_v57  ;;  %v6066_v3 = vmul.f32 %v16314_v37, %v14651_v32  ;;  %v14672_v24 = vld [vmem:[#allocation2 + $0x308] sm:$0xff]  ;;  %v16345_v30 = vld [vmem:[#allocation148_spill] sm:$0xff] }
 0x69f   :  { %6424 = vadd.xlane.f32.xlu0 %v6423_v29  ;;  %v5736_v14 = vadd.f32 %v5672_v62, %v5540_v56  ;;  %v5345_v40 = vadd.f32 %v5281_v60, %v5149_v49  ;;  %v6262_v31 = vmul.f32 %v14397_v17, %v14657_v10  ;;  %v4968_v41 = vadd.f32 %v4904_v16, %v4708_v20  ;;  %v14678_v56 = vld [vmem:[#allocation2 + $0x309] sm:$0xff] }
 0x6a0   :  { %v5100_v5 = vmul.f32 %v14381_v15, %v16239_v22  ;;  %16344 = vst [vmem:[#allocation33_spill] sm:$0xff] %v14672_v24  ;;  %v6310_v18 = vadd.f32 %v6246_v58, %v6114_v33  ;;  %v5296_v62 = vmul.f32 %v16345_v30, %v16142_v34  ;;  %v5492_v42 = vmul.f32 %v16346_v39, %v16143_v63  ;;  %v14680_v60 = vld [vmem:[#allocation2 + $0x30a] sm:$0xff]  ;;  %v14686_v58 = vpop.xlane.xlu0 %6349  ;;  %v16351_v39 = vld [vmem:[#allocation31_spill] sm:$0xff] }
 0x6a1   :  { %v5933_v11 = vadd.f32 %v5869_v46, %v5736_v14  ;;  %16347 = vst [vmem:[#allocation91_spill] sm:$0xff] %v14678_v56  ;;  %v5541_v29 = vadd.f32 %v5477_v25, %v5345_v40  ;;  %v16348_v20 = vld [vmem:[#allocation30_spill] sm:$0xff]  ;;  %v16349_v15 = vld [vmem:[#allocation253_spill] sm:$0xff]  ;;  %16350 = vst [vmem:[#allocation150_spill] sm:$0xff] %v14686_v58  ;;  %v5885_v14 = vmul.f32 %v16151_v35, %v14672_v24 }
 0x6a2   :  { %v5164_v49 = vadd.f32 %v5100_v5, %v4968_v41  ;;  %v5688_v16 = vmul.f32 %v16348_v20, %v16144_v8  ;;  %v4709_v10 = vmul.f32 %v16349_v15, %v16237_v13  ;;  %v6426_v46 = vsel %vm3108_vm8, %v6310_v18, 0.0  ;;  %v16352_v18 = vld [vmem:[#allocation89_spill] sm:$0xff]  ;;  %v14701_v24 = vld [vmem:[#allocation2 + $0x318] sm:$0xff] }
 0x6a3   :  { %v6129_v33 = vadd.f32 %v6065_v44, %v5933_v11  ;;  %v4905_v30 = vmul.f32 %v16351_v39, %v16238_v51  ;;  %6427 = vadd.xlane.f32.xlu1 %v6426_v46  ;;  %v5737_v25 = vadd.f32 %v5673_v0, %v5541_v29  ;;  %v6081_v41 = vmul.f32 %v16314_v37, %v14678_v56  ;;  %v14703_v39 = vld [vmem:[#allocation2 + $0x319] sm:$0xff] }
 0x6a4   :  { %v5360_v40 = vadd.f32 %v5296_v62, %v5164_v49  ;;  %v6277_v5 = vmul.f32 %v14397_v17, %v14680_v60  ;;  %v5101_v44 = vmul.f32 %v16352_v18, %v16239_v22  ;;  %v5297_v11 = vmul.f32 %v14552_v55, %v16142_v34  ;;  %v14720_v18 = vpop.xlane.xlu0 %6355 }
 0x6a5   :  { %v6325_v15 = vadd.f32 %v6261_v7, %v6129_v33  ;;  %v4969_v58 = vadd.f32 %v4905_v30, %v4709_v10  ;;  %v5934_v0 = vadd.f32 %v5870_v61, %v5737_v25  ;;  %v5493_v29 = vmul.f32 %v14554_v28, %v16143_v63  ;;  %v14709_v7 = vld [vmem:[#allocation2 + $0x31a] sm:$0xff]  ;;  %16354 = vst [vmem:[#allocation32_spill] sm:$0xff] %v14720_v18 }
 0x6a6   :  { %v5556_v62 = vadd.f32 %v5492_v42, %v5360_v40  ;;  %v5689_v49 = vmul.f32 %v14560_v6, %v16144_v8  ;;  %16353 = vst [vmem:[#allocation213_spill] sm:$0xff] %v14709_v7  ;;  %v4678_v46 = vmul.f32 %v14428_v38, %v16237_v13  ;;  %v4874_v33 = vmul.f32 %v14434_v12, %v16238_v51  ;;  %v14726_v12 = vld [vmem:[#allocation2 + $0x170] sm:$0xff] }
 0x6a7   :  { %v6471_v10 = vsel %vm3108_vm8, %v6325_v15, 0.0  ;;  %v5165_v30 = vadd.f32 %v5101_v44, %v4969_v58  ;;  %v6130_v61 = vadd.f32 %v6066_v3, %v5934_v0  ;;  %v5886_v25 = vmul.f32 %v16151_v35, %v14701_v24 }
 0x6a8   :  { %6472 = vadd.xlane.f32.xlu0 %v6471_v10  ;;  %v5752_v42 = vadd.f32 %v5688_v16, %v5556_v62  ;;  %v6082_v40 = vmul.f32 %v16314_v37, %v14703_v39  ;;  %v6278_v58 = vmul.f32 %v14397_v17, %v14709_v7  ;;  %v4938_v15 = vadd.f32 %v4874_v33, %v4678_v46  ;;  %v14732_v62 = vld [vmem:[#allocation2 + $0x171] sm:$0xff]  ;;  %v14736_v10 = vpop.xlane.xlu1 %6352 }
 0x6a9   :  { %v5361_v6 = vadd.f32 %v5297_v11, %v5165_v30  ;;  %v5070_v38 = vmul.f32 %v14436_v50, %v16239_v22  ;;  %v6326_v3 = vadd.f32 %v6262_v31, %v6130_v61  ;;  %v5266_v44 = vmul.f32 %v14572_v9, %v16142_v34  ;;  %v14734_v11 = vld [vmem:[#allocation2 + $0x172] sm:$0xff]  ;;  %16355 = vst [vmem:[#allocation90_spill] sm:$0xff] %v14736_v10 }
 0x6aa   :  { %v5949_v16 = vadd.f32 %v5885_v14, %v5752_v42  ;;  %v5462_v0 = vmul.f32 %v14578_v59, %v16143_v63  ;;  %v5658_v50 = vmul.f32 %v14580_v54, %v16144_v8  ;;  %v4679_v31 = vmul.f32 %v14452_v43, %v16237_v13 }
 0x6ab   :  { %v5557_v30 = vadd.f32 %v5493_v29, %v5361_v6  ;;  %v5134_v46 = vadd.f32 %v5070_v38, %v4938_v15  ;;  %v6474_v14 = vsel %vm3108_vm8, %v6326_v3, 0.0  ;;  %v5855_v61 = vmul.f32 %v16151_v35, %v14726_v12  ;;  %v14755_v3 = vld [vmem:[#allocation2 + $0x180] sm:$0xff] }
 0x6ac   :  { %v6145_v33 = vadd.f32 %v6081_v41, %v5949_v16  ;;  %v4875_v42 = vmul.f32 %v14454_v48, %v16238_v51  ;;  %6475 = vadd.xlane.f32.xlu1 %v6474_v14  ;;  %v6051_v6 = vmul.f32 %v16314_v37, %v14732_v62  ;;  %v6247_v29 = vmul.f32 %v14397_v17, %v14734_v11  ;;  %v14757_v48 = vld [vmem:[#allocation2 + $0x181] sm:$0xff] }
 0x6ad   :  { %v5753_v18 = vadd.f32 %v5689_v49, %v5557_v30  ;;  %v5330_v10 = vadd.f32 %v5266_v44, %v5134_v46  ;;  %v5071_v41 = vmul.f32 %v14460_v2, %v16239_v22  ;;  %v5267_v38 = vmul.f32 %v14599_v23, %v16142_v34  ;;  %v14759_v49 = vpop.xlane.xlu0 %6358  ;;  %v14765_v46 = vld [vmem:[#allocation2 + $0x182] sm:$0xff] }
 0x6ae   :  { %v6341_v15 = vadd.f32 %v6277_v5, %v6145_v33  ;;  %v4939_v43 = vadd.f32 %v4875_v42, %v4679_v31  ;;  %16356 = vst [vmem:[#allocation149_spill] sm:$0xff] %v14759_v49  ;;  %v5463_v30 = vmul.f32 %v14601_v36, %v16143_v63  ;;  %v5659_v5 = vmul.f32 %v14607_v27, %v16144_v8  ;;  %v14772_v42 = vpop.xlane.xlu1 %6361 }
 0x6af   :  { %v5950_v16 = vadd.f32 %v5886_v25, %v5753_v18  ;;  %v5526_v44 = vadd.f32 %v5462_v0, %v5330_v10  ;;  %v4694_v14 = vmul.f32 %v14475_v19, %v16237_v13  ;;  %v4890_v33 = vmul.f32 %v14481_v26, %v16238_v51  ;;  %16357 = vst [vmem:[#allocation212_spill] sm:$0xff] %v14772_v42  ;;  %v14782_v26 = vld [vmem:[#allocation2 + $0x260] sm:$0xff]  ;;  %v16362_v42 = vld [vmem:[#allocation209_spill] sm:$0xff] }
 0x6b0   :  { %v6519_v2 = vsel %vm3108_vm8, %v6341_v15, 0.0  ;;  %v5135_v31 = vadd.f32 %v5071_v41, %v4939_v43  ;;  %v5856_v0 = vmul.f32 %v16151_v35, %v14755_v3  ;;  %v6052_v10 = vmul.f32 %v16314_v37, %v14757_v48 }
 0x6b1   :  { %6520 = vadd.xlane.f32.xlu0 %v6519_v2  ;;  %v6146_v25 = vadd.f32 %v6082_v40, %v5950_v16  ;;  %v5722_v18 = vadd.f32 %v5658_v50, %v5526_v44  ;;  %v6248_v15 = vmul.f32 %v14397_v17, %v14765_v46  ;;  %v4954_v43 = vadd.f32 %v4890_v33, %v4694_v14  ;;  %v14788_v16 = vld [vmem:[#allocation2 + $0x261] sm:$0xff] }
 0x6b2   :  { %v5331_v49 = vadd.f32 %v5267_v38, %v5135_v31  ;;  %v5086_v19 = vmul.f32 %v14483_v1, %v16239_v22  ;;  %v5282_v40 = vmul.f32 %v14622_v4, %v16142_v34  ;;  %v5478_v50 = vmul.f32 %v14628_v53, %v16143_v63  ;;  %v14790_v38 = vld [vmem:[#allocation2 + $0x262] sm:$0xff] }
 0x6b3   :  { %v6342_v41 = vadd.f32 %v6278_v58, %v6146_v25  ;;  %v5919_v2 = vadd.f32 %v5855_v61, %v5722_v18  ;;  %v5674_v14 = vmul.f32 %v14630_v52, %v16144_v8  ;;  %v4695_v1 = vmul.f32 %v14502_v45, %v16237_v13  ;;  %v14796_v58 = vpop.xlane.xlu0 %6364 }
 0x6b4   :  { %v5527_v44 = vadd.f32 %v5463_v30, %v5331_v49  ;;  %v5150_v31 = vadd.f32 %v5086_v19, %v4954_v43  ;;  %16358 = vst [vmem:[#allocation256_spill] sm:$0xff] %v14796_v58  ;;  %v5871_v25 = vmul.f32 %v16151_v35, %v14782_v26  ;;  %v4891_v18 = vmul.f32 %v14504_v21, %v16238_v51  ;;  %v14807_v19 = vpop.xlane.xlu1 %6367  ;;  %v14813_v21 = vld [vmem:[#allocation2 + $0x270] sm:$0xff] }
 0x6b5   :  { %v6522_v61 = vsel %vm3108_vm8, %v6342_v41, 0.0  ;;  %v6115_v33 = vadd.f32 %v6051_v6, %v5919_v2  ;;  %v6067_v43 = vmul.f32 %v16314_v37, %v14788_v16  ;;  %v6263_v45 = vmul.f32 %v14397_v17, %v14790_v38  ;;  %16359 = vst [vmem:[#allocation35_spill] sm:$0xff] %v14807_v19 }
 0x6b6   :  { %6523 = vadd.xlane.f32.xlu1 %v6522_v61  ;;  %v5723_v49 = vadd.f32 %v5659_v5, %v5527_v44  ;;  %v5346_v30 = vadd.f32 %v5282_v40, %v5150_v31  ;;  %v4955_v41 = vadd.f32 %v4891_v18, %v4695_v1  ;;  %v5087_v6 = vmul.f32 %v14510_v47, %v16239_v22  ;;  %v14815_v5 = vld [vmem:[#allocation2 + $0x271] sm:$0xff] }
 0x6b7   :  { %v6311_v58 = vadd.f32 %v6247_v29, %v6115_v33  ;;  %v5283_v2 = vmul.f32 %v14649_v57, %v16142_v34  ;;  %v5479_v31 = vmul.f32 %v14651_v32, %v16143_v63  ;;  %v16360_v61 = vld [vmem:[#allocation255_spill] sm:$0xff]  ;;  %v16361_v33 = vld [vmem:[#allocation148_spill] sm:$0xff]  ;;  %v4906_v57 = vmul.f32 %v16362_v42, %v16238_v51 }
 0x6b8   :  { %v5920_v40 = vadd.f32 %v5856_v0, %v5723_v49  ;;  %v5542_v44 = vadd.f32 %v5478_v50, %v5346_v30  ;;  %v5675_v19 = vmul.f32 %v16360_v61, %v16144_v8  ;;  %v14821_v29 = vld [vmem:[#allocation2 + $0x272] sm:$0xff]  ;;  %v5151_v47 = vadd.f32 %v5087_v6, %v4955_v41  ;;  %v14832_v61 = vpop.xlane.xlu0 %6370  ;;  %v14838_v42 = vld [vmem:[#allocation2 + $0x320] sm:$0xff] }
 0x6b9   :  { %v6429_v1 = vsel %vm3108_vm8, %v6311_v58, 0.0  ;;  %v4710_v18 = vmul.f32 %v16361_v33, %v16237_v13  ;;  %v5872_v49 = vmul.f32 %v16151_v35, %v14813_v21  ;;  %v6068_v30 = vmul.f32 %v16314_v37, %v14815_v5  ;;  %16363 = vst [vmem:[#allocation93_spill] sm:$0xff] %v14832_v61  ;;  %v14844_v33 = vld [vmem:[#allocation2 + $0x321] sm:$0xff] }
 0x6ba   :  { %6430 = vadd.xlane.f32.xlu0 %v6429_v1  ;;  %v6116_v0 = vadd.f32 %v6052_v10, %v5920_v40  ;;  %v5738_v50 = vadd.f32 %v5674_v14, %v5542_v44  ;;  %v5347_v32 = vadd.f32 %v5283_v2, %v5151_v47  ;;  %v6264_v58 = vmul.f32 %v14397_v17, %v14821_v29  ;;  %v16364_v40 = vld [vmem:[#allocation33_spill] sm:$0xff]  ;;  %v14848_v47 = vpop.xlane.xlu1 %6373 }
 0x6bb   :  { %v4970_v41 = vadd.f32 %v4906_v57, %v4710_v18  ;;  %v5102_v6 = vmul.f32 %v16348_v20, %v16239_v22  ;;  %v5298_v44 = vmul.f32 %v16364_v40, %v16142_v34  ;;  %v5494_v1 = vmul.f32 %v14678_v56, %v16143_v63  ;;  %v14846_v2 = vld [vmem:[#allocation2 + $0x322] sm:$0xff]  ;;  %16365 = vst [vmem:[#allocation152_spill] sm:$0xff] %v14848_v47 }
 0x6bc   :  { %v6312_v10 = vadd.f32 %v6248_v15, %v6116_v0  ;;  %v5935_v14 = vadd.f32 %v5871_v25, %v5738_v50  ;;  %v5543_v57 = vadd.f32 %v5479_v31, %v5347_v32  ;;  %v5690_v20 = vmul.f32 %v14680_v60, %v16144_v8 }
 0x6bd   :  { %v5166_v18 = vadd.f32 %v5102_v6, %v4970_v41  ;;  %v4711_v15 = vmul.f32 %v14552_v55, %v16237_v13  ;;  %v5887_v50 = vmul.f32 %v16151_v35, %v14838_v42  ;;  %v4907_v61 = vmul.f32 %v14554_v28, %v16238_v51  ;;  %v16366_v6 = vld [vmem:[#allocation88_spill] sm:$0xff]  ;;  %v14869_v28 = vld [vmem:[#allocation2 + $0x331] sm:$0xff] }
 0x6be   :  { %v6432_v25 = vsel %vm3108_vm8, %v6312_v10, 0.0  ;;  %v6131_v0 = vadd.f32 %v6067_v43, %v5935_v14  ;;  %v5739_v56 = vadd.f32 %v5675_v19, %v5543_v57  ;;  %v6083_v32 = vmul.f32 %v16314_v37, %v14844_v33  ;;  %v14867_v14 = vld [vmem:[#allocation2 + $0x330] sm:$0xff]  ;;  %v14871_v19 = vpop.xlane.xlu0 %6376 }
 0x6bf   :  { %6433 = vadd.xlane.f32.xlu1 %v6432_v25  ;;  %v5362_v47 = vadd.f32 %v5298_v44, %v5166_v18  ;;  %v6279_v31 = vmul.f32 %v14397_v17, %v14846_v2  ;;  %v4971_v55 = vadd.f32 %v4907_v61, %v4711_v15  ;;  %v5103_v43 = vmul.f32 %v16366_v6, %v16239_v22  ;;  %v14877_v61 = vld [vmem:[#allocation2 + $0x332] sm:$0xff] }
 0x6c0   :  { %v6327_v41 = vadd.f32 %v6263_v45, %v6131_v0  ;;  %v5299_v10 = vmul.f32 %v14701_v24, %v16142_v34  ;;  %16367 = vst [vmem:[#allocation217_spill] sm:$0xff] %v14871_v19  ;;  %v5936_v44 = vadd.f32 %v5872_v49, %v5739_v56  ;;  %v5495_v18 = vmul.f32 %v14703_v39, %v16143_v63  ;;  %v14884_v19 = vpop.xlane.xlu1 %6379 }
 0x6c1   :  { %v5558_v57 = vadd.f32 %v5494_v1, %v5362_v47  ;;  %v5691_v45 = vmul.f32 %v14709_v7, %v16144_v8  ;;  %v5167_v25 = vadd.f32 %v5103_v43, %v4971_v55  ;;  %v4680_v0 = vmul.f32 %v14572_v9, %v16237_v13  ;;  %16368 = vst [vmem:[#allocation34_spill] sm:$0xff] %v14884_v19  ;;  %v6182_v19 = vld [vmem:[#allocation2 + $0x19a] sm:$0xff] }
 0x6c2   :  { %v6477_v15 = vsel %vm3108_vm8, %v6327_v41, 0.0  ;;  %v4876_v6 = vmul.f32 %v14578_v59, %v16238_v51  ;;  %v6132_v56 = vadd.f32 %v6068_v30, %v5936_v44  ;;  %v5888_v1 = vmul.f32 %v16151_v35, %v14867_v14  ;;  %v14894_v59 = vld [vmem:[#allocation2 + $0x188] sm:$0xff] }
 0x6c3   :  { %6478 = vadd.xlane.f32.xlu0 %v6477_v15  ;;  %v5754_v49 = vadd.f32 %v5690_v20, %v5558_v57  ;;  %v6084_v47 = vmul.f32 %v16314_v37, %v14869_v28  ;;  %v5363_v7 = vadd.f32 %v5299_v10, %v5167_v25  ;;  %v6280_v41 = vmul.f32 %v14397_v17, %v14877_v61  ;;  %v14900_v44 = vld [vmem:[#allocation2 + $0x189] sm:$0xff] }
 0x6c4   :  { %v4940_v55 = vadd.f32 %v4876_v6, %v4680_v0  ;;  %v5072_v9 = vmul.f32 %v14580_v54, %v16239_v22  ;;  %v6328_v43 = vadd.f32 %v6264_v58, %v6132_v56  ;;  %v5268_v30 = vmul.f32 %v14726_v12, %v16142_v34  ;;  %v14902_v10 = vld [vmem:[#allocation2 + $0x18a] sm:$0xff]  ;;  %v14908_v58 = vpop.xlane.xlu0 %6382 }
 0x6c5   :  { %v5951_v15 = vadd.f32 %v5887_v50, %v5754_v49  ;;  %v5464_v20 = vmul.f32 %v14732_v62, %v16143_v63  ;;  %v5559_v57 = vadd.f32 %v5495_v18, %v5363_v7  ;;  %v5660_v0 = vmul.f32 %v14734_v11, %v16144_v8  ;;  %16369 = vst [vmem:[#allocation258_spill] sm:$0xff] %v14908_v58 }
 0x6c6   :  { %v5136_v25 = vadd.f32 %v5072_v9, %v4940_v55  ;;  %v4681_v54 = vmul.f32 %v14599_v23, %v16237_v13  ;;  %v6480_v50 = vsel %vm3108_vm8, %v6328_v43, 0.0  ;;  %v5857_v56 = vmul.f32 %v16151_v35, %v14894_v59  ;;  %v14919_v9 = vpop.xlane.xlu1 %6385 }
 0x6c7   :  { %v6147_v6 = vadd.f32 %v6083_v32, %v5951_v15  ;;  %v4877_v49 = vmul.f32 %v14601_v36, %v16238_v51  ;;  %6481 = vadd.xlane.f32.xlu1 %v6480_v50  ;;  %v5755_v7 = vadd.f32 %v5691_v45, %v5559_v57  ;;  %v6053_v55 = vmul.f32 %v16314_v37, %v14900_v44  ;;  %v5790_v36 = vld [vmem:[#allocation2 + $0x198] sm:$0xff] }
 0x6c8   :  { %v5332_v18 = vadd.f32 %v5268_v30, %v5136_v25  ;;  %v6249_v23 = vmul.f32 %v14397_v17, %v14902_v10  ;;  %v5073_v32 = vmul.f32 %v14607_v27, %v16239_v22  ;;  %v5269_v15 = vmul.f32 %v14755_v3, %v16142_v34  ;;  %v5986_v50 = vld [vmem:[#allocation2 + $0x199] sm:$0xff] }
 0x6c9   :  { %v6343_v58 = vadd.f32 %v6279_v31, %v6147_v6  ;;  %v4941_v43 = vadd.f32 %v4877_v49, %v4681_v54  ;;  %v5952_v45 = vadd.f32 %v5888_v1, %v5755_v7  ;;  %v5465_v57 = vmul.f32 %v14757_v48, %v16143_v63  ;;  %v14936_v49 = vpop.xlane.xlu0 %6388 }
 0x6ca   :  { %v5528_v30 = vadd.f32 %v5464_v20, %v5332_v18  ;;  %v5661_v25 = vmul.f32 %v14765_v46, %v16144_v8  ;;  %v4696_v27 = vmul.f32 %v14622_v4, %v16237_v13  ;;  %v4892_v3 = vmul.f32 %v14628_v53, %v16238_v51  ;;  %v14941_v4 = vld [vmem:[#allocation2 + $0x278] sm:$0xff] }
 0x6cb   :  { %v6525_v31 = vsel %vm3108_vm8, %v6343_v58, 0.0  ;;  %v5137_v54 = vadd.f32 %v5073_v32, %v4941_v43  ;;  %v6148_v6 = vadd.f32 %v6084_v47, %v5952_v45  ;;  %v5858_v20 = vmul.f32 %v16151_v35, %v5790_v36  ;;  %v14947_v32 = vld [vmem:[#allocation2 + $0x279] sm:$0xff] }
 0x6cc   :  { %6526 = vadd.xlane.f32.xlu0 %v6525_v31  ;;  %v5724_v1 = vadd.f32 %v5660_v0, %v5528_v30  ;;  %v6054_v48 = vmul.f32 %v16314_v37, %v5986_v50  ;;  %v6250_v7 = vmul.f32 %v14397_v17, %v6182_v19  ;;  %v4956_v58 = vadd.f32 %v4892_v3, %v4696_v27  ;;  %v14949_v36 = vld [vmem:[#allocation2 + $0x27a] sm:$0xff] }
 0x6cd   :  { %v5333_v46 = vadd.f32 %v5269_v15, %v5137_v54  ;;  %v5088_v18 = vmul.f32 %v14630_v52, %v16239_v22  ;;  %v6344_v43 = vadd.f32 %v6280_v41, %v6148_v6  ;;  %v5284_v47 = vmul.f32 %v14782_v26, %v16142_v34  ;;  %v14951_v15 = vpop.xlane.xlu1 %6391  ;;  %v16370_v41 = vld [vmem:[#allocation147_spill] sm:$0xff]  ;;  %v16371_v54 = vld [vmem:[#allocation208_spill] sm:$0xff] }
 0x6ce   :  { %v5921_v53 = vadd.f32 %v5857_v56, %v5724_v1  ;;  %v5480_v0 = vmul.f32 %v14788_v16, %v16143_v63  ;;  %v5676_v52 = vmul.f32 %v14790_v38, %v16144_v8  ;;  %v4697_v56 = vmul.f32 %v16370_v41, %v16237_v13  ;;  %v6002_v41 = vld [vmem:[#allocation2 + $0x289] sm:$0xff] }
 0x6cf   :  { %v5529_v19 = vadd.f32 %v5465_v57, %v5333_v46  ;;  %v5152_v50 = vadd.f32 %v5088_v18, %v4956_v58  ;;  %v6528_v45 = vsel %vm3108_vm8, %v6344_v43, 0.0  ;;  %v5873_v31 = vmul.f32 %v16151_v35, %v14941_v4  ;;  %v16372_v18 = vld [vmem:[#allocation255_spill] sm:$0xff] }
 0x6d0   :  { %v6117_v30 = vadd.f32 %v6053_v55, %v5921_v53  ;;  %v4893_v27 = vmul.f32 %v16371_v54, %v16238_v51  ;;  %6529 = vadd.xlane.f32.xlu1 %v6528_v45  ;;  %v6069_v57 = vmul.f32 %v16314_v37, %v14947_v32  ;;  %v6265_v1 = vmul.f32 %v14397_v17, %v14949_v36  ;;  %v5806_v53 = vld [vmem:[#allocation2 + $0x288] sm:$0xff]  ;;  %v14970_v54 = vpop.xlane.xlu0 %6394 }
 0x6d1   :  { %v5725_v3 = vadd.f32 %v5661_v25, %v5529_v19  ;;  %v5348_v6 = vadd.f32 %v5284_v47, %v5152_v50  ;;  %v5089_v55 = vmul.f32 %v16372_v18, %v16239_v22  ;;  %v5285_v43 = vmul.f32 %v14813_v21, %v16142_v34  ;;  %v16373_v21 = vld [vmem:[#allocation91_spill] sm:$0xff] }
 0x6d2   :  { %v6313_v46 = vadd.f32 %v6249_v23, %v6117_v30  ;;  %v4957_v58 = vadd.f32 %v4893_v27, %v4697_v56  ;;  %v5481_v19 = vmul.f32 %v14815_v5, %v16143_v63  ;;  %v5677_v17 = vmul.f32 %v14821_v29, %v16144_v8  ;;  %v6198_v23 = vld [vmem:[#allocation2 + $0x28a] sm:$0xff]  ;;  %v14981_v27 = vpop.xlane.xlu1 %6397  ;;  %v14993_v18 = vld [vmem:[#allocation2 + $0x338] sm:$0xff] }
 0x6d3   :  { %v5922_v25 = vadd.f32 %v5858_v20, %v5725_v3  ;;  %v5544_v47 = vadd.f32 %v5480_v0, %v5348_v6  ;;  %v4712_v45 = vmul.f32 %v16364_v40, %v16237_v13  ;;  %v4908_v30 = vmul.f32 %v16373_v21, %v16238_v51  ;;  %v14988_v6 = vld [vmem:[%s15351_s5 + $0x8] ss:$0 sm:$0xff] }
 0x6d4   :  { %v6435_v50 = vsel %vm3108_vm8, %v6313_v46, 0.0  ;;  %v5153_v56 = vadd.f32 %v5089_v55, %v4957_v58  ;;  %v5874_v5 = vmul.f32 %v16151_v35, %v5806_v53  ;;  %v6070_v3 = vmul.f32 %v16314_v37, %v6002_v41  ;;  %v14999_v53 = vld [vmem:[#allocation2 + $0x339] sm:$0xff] }
 0x6d5   :  { %6436 = vadd.xlane.f32.xlu0 %v6435_v50  ;;  %v6118_v20 = vadd.f32 %v6054_v48, %v5922_v25  ;;  %v5740_v0 = vadd.f32 %v5676_v52, %v5544_v47  ;;  %v6266_v40 = vmul.f32 %v14988_v6, %v6198_v23  ;;  %v4972_v46 = vadd.f32 %v4908_v30, %v4712_v45  ;;  %v15001_v41 = vld [vmem:[#allocation2 + $0x33a] sm:$0xff] }
 0x6d6   :  { %v5349_v29 = vadd.f32 %v5285_v43, %v5153_v56  ;;  %v5104_v58 = vmul.f32 %v14680_v60, %v16239_v22  ;;  %v5300_v55 = vmul.f32 %v14838_v42, %v16142_v34  ;;  %v5496_v43 = vmul.f32 %v14844_v33, %v16143_v63 }
 0x6d7   :  { %v6314_v48 = vadd.f32 %v6250_v7, %v6118_v20  ;;  %v5937_v52 = vadd.f32 %v5873_v31, %v5740_v0  ;;  %v5692_v23 = vmul.f32 %v14846_v2, %v16144_v8  ;;  %v4713_v60 = vmul.f32 %v14701_v24, %v16237_v13  ;;  %v15007_v7 = vpop.xlane.xlu0 %6400  ;;  %v15018_v20 = vpop.xlane.xlu1 %6403 }
 0x6d8   :  { %v5545_v25 = vadd.f32 %v5481_v19, %v5349_v29  ;;  %v5168_v47 = vadd.f32 %v5104_v58, %v4972_v46  ;;  %v5889_v56 = vmul.f32 %v16151_v35, %v14993_v18  ;;  %v4909_v45 = vmul.f32 %v14703_v39, %v16238_v51  ;;  %v5822_v39 = vld [vmem:[#allocation2 + $0x348] sm:$0xff] }
 0x6d9   :  { %v6438_v31 = vsel %vm3108_vm8, %v6314_v48, 0.0  ;;  %v6133_v50 = vadd.f32 %v6069_v57, %v5937_v52  ;;  %v6085_v30 = vmul.f32 %v16314_v37, %v14999_v53  ;;  %v6281_v24 = vmul.f32 %v14988_v6, %v15001_v41  ;;  %v16374_v57 = vld [vmem:[#allocation213_spill] sm:$0xff] }
 0x6da   :  { %6439 = vadd.xlane.f32.xlu1 %v6438_v31  ;;  %v5741_v19 = vadd.f32 %v5677_v17, %v5545_v25  ;;  %v5364_v21 = vadd.f32 %v5300_v55, %v5168_v47  ;;  %v4973_v29 = vadd.f32 %v4909_v45, %v4713_v60  ;;  %v5105_v46 = vmul.f32 %v16374_v57, %v16239_v22  ;;  %v6018_v48 = vld [vmem:[#allocation2 + $0x349] sm:$0xff] }
 0x6db   :  { %v6329_v0 = vadd.f32 %v6265_v1, %v6133_v50  ;;  %v5301_v58 = vmul.f32 %v14867_v14, %v16142_v34  ;;  %v5497_v55 = vmul.f32 %v14869_v28, %v16143_v63  ;;  %v5693_v25 = vmul.f32 %v14877_v61, %v16144_v8  ;;  %v6214_v47 = vld [vmem:[#allocation2 + $0x34a] sm:$0xff]  ;;  %v15035_v45 = vpop.xlane.xlu0 %6406 }
 0x6dc   :  { %v5938_v17 = vadd.f32 %v5874_v5, %v5741_v19  ;;  %v5560_v52 = vadd.f32 %v5496_v43, %v5364_v21  ;;  %v5169_v60 = vadd.f32 %v5105_v46, %v4973_v29  ;;  %v4682_v31 = vmul.f32 %v14726_v12, %v16237_v13  ;;  %v5791_v12 = vld [vmem:[#allocation2 + $0x1a0] sm:$0xff] }
 0x6dd   :  { %v6483_v1 = vsel %vm3108_vm8, %v6329_v0, 0.0  ;;  %v4878_v14 = vmul.f32 %v14732_v62, %v16238_v51  ;;  %v5890_v43 = vmul.f32 %v16151_v35, %v5822_v39  ;;  %v6086_v28 = vmul.f32 %v16314_v37, %v6018_v48  ;;  %v6183_v46 = vld [vmem:[#allocation2 + $0x1a2] sm:$0xff]  ;;  %v15044_v39 = vpop.xlane.xlu1 %6409 }
 0x6de   :  { %6484 = vadd.xlane.f32.xlu0 %v6483_v1  ;;  %v6134_v50 = vadd.f32 %v6070_v3, %v5938_v17  ;;  %v5756_v5 = vadd.f32 %v5692_v23, %v5560_v52  ;;  %v5365_v61 = vadd.f32 %v5301_v58, %v5169_v60  ;;  %v6282_v19 = vmul.f32 %v14988_v6, %v6214_v47  ;;  %v5987_v23 = vld [vmem:[#allocation2 + $0x1a1] sm:$0xff] }
 0x6df   :  { %v4942_v21 = vadd.f32 %v4878_v14, %v4682_v31  ;;  %v5074_v0 = vmul.f32 %v14734_v11, %v16239_v22  ;;  %v5270_v62 = vmul.f32 %v14894_v59, %v16142_v34  ;;  %v5466_v3 = vmul.f32 %v14900_v44, %v16143_v63  ;;  %v5807_v31 = vld [vmem:[#allocation2 + $0x290] sm:$0xff] }
 0x6e0   :  { %v6330_v29 = vadd.f32 %v6266_v40, %v6134_v50  ;;  %v5953_v57 = vadd.f32 %v5889_v56, %v5756_v5  ;;  %v5561_v58 = vadd.f32 %v5497_v55, %v5365_v61  ;;  %v5662_v17 = vmul.f32 %v14902_v10, %v16144_v8  ;;  %v6003_v14 = vld [vmem:[#allocation2 + $0x291] sm:$0xff]  ;;  %v15060_v50 = vpop.xlane.xlu0 %6412 }
 0x6e1   :  { %v5138_v48 = vadd.f32 %v5074_v0, %v4942_v21  ;;  %v4698_v11 = vmul.f32 %v14782_v26, %v16237_v13  ;;  %v5859_v59 = vmul.f32 %v16151_v35, %v5791_v12  ;;  %v4894_v44 = vmul.f32 %v14788_v16, %v16238_v51  ;;  %v15071_v12 = vpop.xlane.xlu1 %6445 }
 0x6e2   :  { %v6486_v40 = vsel %vm3108_vm8, %v6330_v29, 0.0  ;;  %v6149_v56 = vadd.f32 %v6085_v30, %v5953_v57  ;;  %v5757_v52 = vadd.f32 %v5693_v25, %v5561_v58  ;;  %v6055_v55 = vmul.f32 %v16314_v37, %v5987_v23 }
 0x6e3   :  { %6487 = vadd.xlane.f32.xlu1 %v6486_v40  ;;  %v5334_v47 = vadd.f32 %v5270_v62, %v5138_v48  ;;  %v6251_v1 = vmul.f32 %v14988_v6, %v6183_v46  ;;  %v4958_v10 = vadd.f32 %v4894_v44, %v4698_v11  ;;  %v5090_v26 = vmul.f32 %v14790_v38, %v16239_v22 }
 0x6e4   :  { %v6345_v60 = vadd.f32 %v6281_v24, %v6149_v56  ;;  %v5286_v30 = vmul.f32 %v14941_v4, %v16142_v34  ;;  %v5954_v16 = vadd.f32 %v5890_v43, %v5757_v52  ;;  %v5482_v25 = vmul.f32 %v14947_v32, %v16143_v63  ;;  %v6199_v24 = vld [vmem:[#allocation2 + $0x292] sm:$0xff] }
 0x6e5   :  { %v5530_v5 = vadd.f32 %v5466_v3, %v5334_v47  ;;  %v5678_v61 = vmul.f32 %v14949_v36, %v16144_v8  ;;  %v5154_v0 = vadd.f32 %v5090_v26, %v4958_v10  ;;  %v4714_v38 = vmul.f32 %v14838_v42, %v16237_v13  ;;  %v5823_v13 = vld [vmem:[#allocation2 + $0x350] sm:$0xff]  ;;  %v15098_v52 = vpop.xlane.xlu1 %6451 }
 0x6e6   :  { %v6531_v21 = vsel %vm3108_vm8, %v6345_v60, 0.0  ;;  %v4910_v4 = vmul.f32 %v14844_v33, %v16238_v51  ;;  %v6150_v43 = vadd.f32 %v6086_v28, %v5954_v16  ;;  %v5875_v32 = vmul.f32 %v16151_v35, %v5807_v31  ;;  %v6215_v56 = vld [vmem:[#allocation2 + $0x352] sm:$0xff]  ;;  %v16380_v16 = vld [vmem:[#allocation32_spill] sm:$0xff] }
 0x6e7   :  { %6532 = vadd.xlane.f32.xlu0 %v6531_v21  ;;  %v5726_v29 = vadd.f32 %v5662_v17, %v5530_v5  ;;  %v6071_v57 = vmul.f32 %v16314_v37, %v6003_v14  ;;  %v5350_v36 = vadd.f32 %v5286_v30, %v5154_v0  ;;  %v6267_v62 = vmul.f32 %v14988_v6, %v6199_v24  ;;  %v16381_v24 = vld [vmem:[#allocation35_spill] sm:$0xff] }
 0x6e8   :  { %v4974_v3 = vadd.f32 %v4910_v4, %v4714_v38  ;;  %v5106_v23 = vmul.f32 %v14846_v2, %v16239_v22  ;;  %v6346_v42 = vadd.f32 %v6282_v19, %v6150_v43  ;;  %v5302_v51 = vmul.f32 %v14993_v18, %v16142_v34  ;;  %v15089_v22 = vpop.xlane.xlu0 %6448  ;;  %v6019_v18 = vld [vmem:[#allocation2 + $0x351] sm:$0xff] }
 0x6e9   :  { %v5923_v46 = vadd.f32 %v5859_v59, %v5726_v29  ;;  %v5498_v33 = vmul.f32 %v14999_v53, %v16143_v63  ;;  %v5546_v28 = vadd.f32 %v5482_v25, %v5350_v36  ;;  %v5694_v48 = vmul.f32 %v15001_v41, %v16144_v8  ;;  %v16376_v8 = vld [vmem:[#allocation90_spill] sm:$0xff]  ;;  %v16383_v36 = vld [vmem:[#allocation152_spill] sm:$0xff] }
 0x6ea   :  { %v5170_v58 = vadd.f32 %v5106_v23, %v4974_v3  ;;  %v15087_v17 = vstv %s15354_s6  ;;  %v6534_v2 = vsel %vm3108_vm8, %v6346_v42, 0.0  ;;  %v5891_v34 = vmul.f32 %v16151_v35, %v5823_v13  ;;  %v16377_v59 = vld [vmem:[#allocation150_spill] sm:$0xff]  ;;  %v16379_v35 = vld [vmem:[#allocation212_spill] sm:$0xff] }
 0x6eb   :  { %v6119_v19 = vadd.f32 %v6055_v55, %v5923_v46  ;;  %v16375_v11 = vlaneseq  ;;  %6535 = vadd.xlane.f32.xlu1 %v6534_v2  ;;  %v5742_v53 = vadd.f32 %v5678_v61, %v5546_v28  ;;  %v6543_v41 = vadd.f32 %v15087_v17, %v16376_v8  ;;  %v16378_v55 = vld [vmem:[#allocation8_spill] sm:$0xff] }
 0x6ec   :  { %v5366_v40 = vadd.f32 %v5302_v51, %v5170_v58  ;;  %v6542_v44 = vadd.f32 %v15087_v17, %v16377_v59  ;;  %v6546_v26 = vadd.f32 %v15087_v17, %v16379_v35  ;;  %v6087_v14 = vmul.f32 %v16314_v37, %v6019_v18  ;;  %v15116_v37 = vpop.xlane.xlu0 %6454  ;;  %v16384_v42 = vld [vmem:[#allocation256_spill] sm:$0xff]  ;;  %v15127_v51 = vpop.xlane.xlu1 %6493  ;;  %v16385_v58 = vld [vmem:[#allocation34_spill] sm:$0xff] }
 0x6ed   :  { %v6671_v63 = vand.u32 127, %v16375_v11  ;;  %v6315_v47 = vadd.f32 %v6251_v1, %v6119_v19  ;;  %v5939_v30 = vadd.f32 %v5875_v32, %v5742_v53  ;;  %v6544_v5 = vadd.f32 %v15087_v17, %v16380_v16  ;;  %v16382_v32 = vld [vmem:[#allocation149_spill] sm:$0xff] }
 0x6ee   :  { %v5562_v31 = vadd.f32 %v5498_v33, %v5366_v40  ;;  %v6283_v61 = vmul.f32 %v14988_v6, %v6215_v56  ;;  %v6548_v21 = vadd.f32 %v15087_v17, %v16381_v24  ;;  %v6545_v6 = vadd.f32 %v15087_v17, %v16382_v32 }
 0x6ef   :  { %v6676_v60 = vadd.s32 4294967288, %v6671_v63  ;;  %v15101_v10 = vsub.s32 %v6671_v63, %v16378_v55  ;;  %v6441_v25 = vsel %vm3108_vm8, %v6315_v47, 0.0  ;;  %v6135_v0 = vadd.f32 %v6071_v57, %v5939_v30  ;;  %v16386_v63 = vld [vmem:[#allocation93_spill] sm:$0xff]  ;;  %v16388_v30 = vld [vmem:[#allocation258_spill] sm:$0xff] }
 0x6f0   :  { %6442 = vadd.xlane.f32.xlu0 %v6441_v25  ;;  %v5758_v38 = vadd.f32 %v5694_v48, %v5562_v31  ;;  %v6550_v3 = vadd.f32 %v15087_v17, %v16383_v36  ;;  %v6547_v46 = vadd.f32 %v15087_v17, %v16384_v42  ;;  %v6552_v48 = vadd.f32 %v15087_v17, %v16385_v58 }
 0x6f1   :  { %v15111_v1 = vsub.s32 %v6676_v60, %v16378_v55  ;;  %v6675_v4 = vrot.slane %v6542_v44, %v15101_v10  ;;  %v6695_v29 = vrot.slane %v6546_v26, %v15101_v10  ;;  %v6331_v23 = vadd.f32 %v6267_v62, %v6135_v0  ;;  %v16387_v60 = vld [vmem:[#allocation217_spill] sm:$0xff] }
 0x6f2   :  { %v5955_v13 = vadd.f32 %v5891_v34, %v5758_v38  ;;  %v6686_v57 = vrot.slane %v6544_v5, %v15101_v10  ;;  %v6704_v33 = vrot.slane %v6548_v21, %v15101_v10  ;;  %v6713_v11 = vrot.slane %v6550_v3, %v15101_v10 }
 0x6f3   :  { %v6680_v43 = vrot.slane %v6543_v41, %v15111_v1  ;;  %v6690_v28 = vrot.slane %v6545_v6, %v15111_v1  ;;  %v6489_v2 = vsel %vm3108_vm8, %v6331_v23, 0.0  ;;  %v6699_v62 = vrot.slane %v6547_v46, %v15111_v1  ;;  %v6497_v41 = vpop.xlane.xlu0 %6496 }
 0x6f4   :  { %v6151_v19 = vadd.f32 %v6087_v14, %v5955_v13  ;;  %6490 = vadd.xlane.f32.xlu0 %v6489_v2  ;;  %v6549_v53 = vadd.f32 %v15087_v17, %v16386_v63  ;;  %v6554_v8 = vadd.f32 %v15087_v17, %v14919_v9  ;;  %v6722_v44 = vrot.slane %v6552_v48, %v15101_v10  ;;  %v6500_v9 = vpop.xlane.xlu1 %6499 }
 0x6f5   :  { %v6682_v34 = vsel %vm6681_vm12, %v6680_v43, %v6675_v4  ;;  %v6691_v18 = vsel %vm6681_vm12, %v6690_v28, %v6686_v57  ;;  %v6700_v56 = vsel %vm6681_vm12, %v6699_v62, %v6695_v29  ;;  %v6551_v55 = vadd.f32 %v15087_v17, %v16387_v60 }
 0x6f6   :  { %v6347_v40 = vadd.f32 %v6283_v61, %v6151_v19  ;;  %v6963_v59 = vsel %vm6962_vm13, %v6691_v18, %v6682_v34  ;;  %v6708_v47 = vrot.slane %v6549_v53, %v15111_v1  ;;  %v6556_v26 = vadd.f32 %v15087_v17, %v14951_v15 }
 0x6f7   :  { %v6553_v31 = vadd.f32 %v15087_v17, %v16388_v30  ;;  %v6965_v14 = vsel %vm6964_vm14, %v6700_v56, %v6963_v59  ;;  %v6717_v5 = vrot.slane %v6551_v55, %v15111_v1  ;;  %v6558_v25 = vadd.f32 %v15087_v17, %v14981_v27  ;;  %v6503_v32 = vpop.xlane.xlu0 %6502 }
 0x6f8   :  { %v6537_v35 = vsel %vm3108_vm8, %v6347_v40, 0.0  ;;  %v6709_v16 = vsel %vm6681_vm12, %v6708_v47, %v6704_v33  ;;  %v6731_v61 = vrot.slane %v6554_v8, %v15101_v10  ;;  %v6555_v15 = vadd.f32 %v15087_v17, %v14936_v49 }
 0x6f9   :  { %6538 = vadd.xlane.f32.xlu0 %v6537_v35  ;;  %v6726_v24 = vrot.slane %v6553_v31, %v15111_v1  ;;  %v6967_v21 = vsel %vm6966_vm15, %v6709_v16, %v6965_v14  ;;  %v6718_v0 = vsel %vm6681_vm12, %v6717_v5, %v6713_v11  ;;  %v6560_v38 = vadd.f32 %v15087_v17, %v15018_v20 }
 0x6fa   :  { %v6740_v4 = vrot.slane %v6556_v26, %v15101_v10  ;;  %v6735_v43 = vrot.slane %v6555_v15, %v15111_v1  ;;  %v6557_v29 = vadd.f32 %v15087_v17, %v14970_v54  ;;  %v6749_v49 = vrot.slane %v6558_v25, %v15101_v10  ;;  %v6458_v54 = vpop.xlane.xlu1 %6457 }
 0x6fb   :  { %v6727_v27 = vsel %vm6681_vm12, %v6726_v24, %v6722_v44  ;;  %v6562_v6 = vadd.f32 %v15087_v17, %v15044_v39  ;;  %v6559_v36 = vadd.f32 %v15087_v17, %v15007_v7  ;;  %v6969_v20 = vsel %vm6968_vm0, %v6718_v0, %v6967_v21 }
 0x6fc   :  { %v6736_v3 = vsel %vm6681_vm12, %v6735_v43, %v6731_v61  ;;  %v6744_v23 = vrot.slane %v6557_v29, %v15111_v1  ;;  %v6561_v13 = vadd.f32 %v15087_v17, %v15035_v45  ;;  %v6971_v57 = vsel %vm6970_vm1, %v6727_v27, %v6969_v20 }
 0x6fd   :  { %v6758_v42 = vrot.slane %v6560_v38, %v15101_v10  ;;  %v6753_v46 = vrot.slane %v6559_v36, %v15111_v1  ;;  %v6574_v39 = vadd.f32 %v15087_v17, %v15071_v12  ;;  %v6973_v7 = vsel %vm6972_vm2, %v6736_v3, %v6971_v57 }
 0x6fe   :  { %v6745_v33 = vsel %vm6681_vm12, %v6744_v23, %v6740_v4  ;;  %v6762_v28 = vrot.slane %v6561_v13, %v15111_v1  ;;  %v6563_v58 = vadd.f32 %v15087_v17, %v15060_v50  ;;  %v6767_v48 = vrot.slane %v6562_v6, %v15101_v10 }
 0x6ff   :  { %v6975_v45 = vsel %vm6974_vm3, %v6745_v33, %v6973_v7  ;;  %v6754_v2 = vsel %vm6681_vm12, %v6753_v46, %v6749_v49  ;;  %v6576_v19 = vadd.f32 %v15087_v17, %v15098_v52  ;;  %v6590_v50 = vadd.f32 %v15087_v17, %v15127_v51  ;;  %v6461_v18 = vpop.xlane.xlu0 %6460  ;;  %v6506_v51 = vpop.xlane.xlu1 %6505 }
 0x700   :  { %7001 = vst.msk [vmem:[%s15355_s7] sm:$0xff] %vm2848_vm4, %v6975_v45  ;;  %v6763_v12 = vsel %vm6681_vm12, %v6762_v28, %v6758_v42  ;;  %v6771_v62 = vrot.slane %v6563_v58, %v15111_v1  ;;  %v6575_v34 = vadd.f32 %v15087_v17, %v15089_v22  ;;  %v6821_v11 = vrot.slane %v6574_v39, %v15101_v10 }
 0x701   :  { %v6976_v52 = vsel %vm6962_vm13, %v6763_v12, %v6754_v2  ;;  %v6577_v63 = vadd.f32 %v15087_v17, %v15116_v37  ;;  %v6592_v56 = vadd.f32 %v15087_v17, %v6500_v9  ;;  %v6591_v8 = vadd.f32 %v15087_v17, %v6497_v41 }
 0x702   :  { %v6772_v53 = vsel %vm6681_vm12, %v6771_v62, %v6767_v48  ;;  %v6825_v40 = vrot.slane %v6575_v34, %v15111_v1  ;;  %v6830_v59 = vrot.slane %v6576_v19, %v15101_v10  ;;  %v6578_v47 = vadd.f32 %v15087_v17, %v6458_v54 }
 0x703   :  { %v6977_v22 = vsel %vm6964_vm14, %v6772_v53, %v6976_v52  ;;  %v6834_v44 = vrot.slane %v6577_v63, %v15111_v1  ;;  %v6893_v60 = vrot.slane %v6590_v50, %v15101_v10  ;;  %v6897_v55 = vrot.slane %v6591_v8, %v15111_v1  ;;  %v6416_v43 = vpop.xlane.xlu1 %6415 }
 0x704   :  { %v6826_v37 = vsel %vm6681_vm12, %v6825_v40, %v6821_v11  ;;  %v6593_v35 = vadd.f32 %v15087_v17, %v6503_v32  ;;  %v6594_v41 = vadd.f32 %v15087_v17, %v6506_v51  ;;  %v6579_v30 = vadd.f32 %v15087_v17, %v6461_v18 }
 0x705   :  { %v6835_v26 = vsel %vm6681_vm12, %v6834_v44, %v6830_v59  ;;  %v6902_v31 = vrot.slane %v6592_v56, %v15101_v10  ;;  %v6898_v14 = vsel %vm6681_vm12, %v6897_v55, %v6893_v60  ;;  %v6839_v25 = vrot.slane %v6578_v47, %v15101_v10 }
 0x706   :  { %v6983_v9 = vsel %vm6962_vm13, %v6835_v26, %v6826_v37  ;;  %v6906_v16 = vrot.slane %v6593_v35, %v15111_v1  ;;  %v6843_v61 = vrot.slane %v6579_v30, %v15111_v1  ;;  %v6911_v21 = vrot.slane %v6594_v41, %v15101_v10 }
 0x707   :  { %v6564_v49 = vadd.f32 %v15087_v17, %v6416_v43  ;;  %v6464_v23 = vpop.xlane.xlu1 %6463 }
 0x708   :  { %v6509_v5 = vpop.xlane.xlu0 %6508  ;;  %v6907_v15 = vsel %vm6681_vm12, %v6906_v16, %v6902_v31  ;;  %v6844_v38 = vsel %vm6681_vm12, %v6843_v61, %v6839_v25  ;;  %v6580_v57 = vadd.f32 %v15087_v17, %v6464_v23 }
 0x709   :  { %v6595_v24 = vadd.f32 %v15087_v17, %v6509_v5  ;;  %v6990_v0 = vsel %vm6962_vm13, %v6907_v15, %v6898_v14  ;;  %v6984_v27 = vsel %vm6964_vm14, %v6844_v38, %v6983_v9  ;;  %v6776_v20 = vrot.slane %v6564_v49, %v15101_v10 }
 0x70a   :  { %v6848_v39 = vrot.slane %v6580_v57, %v15101_v10 }
 0x70b   :  { %v6915_v4 = vrot.slane %v6595_v24, %v15111_v1 }
 0x70c   :  { %v6512_v33 = vpop.xlane.xlu1 %6511 }
 0x70d   :  { %v6916_v29 = vsel %vm6681_vm12, %v6915_v4, %v6911_v21  ;;  %v6596_v45 = vadd.f32 %v15087_v17, %v6512_v33 }
 0x70e   :  { %v6991_v32 = vsel %vm6964_vm14, %v6916_v29, %v6990_v0 }
 0x70f   :  { %v6920_v19 = vrot.slane %v6596_v45, %v15101_v10 }
 0x711   :  { %v6419_v6 = vpop.xlane.xlu0 %6418 }
 0x712   :  { %v6565_v36 = vadd.f32 %v15087_v17, %v6419_v6 }
 0x714   :  { %v6780_v3 = vrot.slane %v6565_v36, %v15111_v1 }
 0x715   :  { %v6422_v34 = vpop.xlane.xlu1 %6421 }
 0x716   :  { %v6781_v13 = vsel %vm6681_vm12, %v6780_v3, %v6776_v20  ;;  %v6566_v26 = vadd.f32 %v15087_v17, %v6422_v34 }
 0x717   :  { %v6978_v54 = vsel %vm6966_vm15, %v6781_v13, %v6977_v22 }
 0x718   :  { %v6785_v5 = vrot.slane %v6566_v26, %v15101_v10 }
 0x71a   :  { %v6467_v42 = vpop.xlane.xlu0 %6466 }
 0x71b   :  { %v6581_v46 = vadd.f32 %v15087_v17, %v6467_v42 }
 0x71d   :  { %v6852_v7 = vrot.slane %v6581_v46, %v15111_v1 }
 0x71e   :  { %v6470_v18 = vpop.xlane.xlu1 %6469 }
 0x71f   :  { %v6853_v28 = vsel %vm6681_vm12, %v6852_v7, %v6848_v39  ;;  %v6582_v25 = vadd.f32 %v15087_v17, %v6470_v18 }
 0x720   :  { %v15252_v58 = vsel %vm6966_vm15, %v6853_v28, %v6984_v27 }
 0x721   :  { %v6857_v43 = vrot.slane %v6582_v25, %v15101_v10 }
 0x723   :  { %v6515_v48 = vpop.xlane.xlu0 %6514 }
 0x724   :  { %v6597_v2 = vadd.f32 %v15087_v17, %v6515_v48 }
 0x726   :  { %v6924_v12 = vrot.slane %v6597_v2, %v15111_v1 }
 0x727   :  { %v6518_v52 = vpop.xlane.xlu1 %6517 }
 0x728   :  { %v6925_v62 = vsel %vm6681_vm12, %v6924_v12, %v6920_v19  ;;  %v6598_v36 = vadd.f32 %v15087_v17, %v6518_v52 }
 0x729   :  { %v15260_v50 = vsel %vm6966_vm15, %v6925_v62, %v6991_v32 }
 0x72c   :  { %v6425_v11 = vpop.xlane.xlu0 %6424 }
 0x72d   :  { %v6567_v35 = vadd.f32 %v15087_v17, %v6425_v11 }
 0x72f   :  { %v6789_v41 = vrot.slane %v6567_v35, %v15111_v1 }
 0x730   :  { %v6428_v53 = vpop.xlane.xlu1 %6427 }
 0x731   :  { %v6568_v61 = vadd.f32 %v15087_v17, %v6428_v53  ;;  %v6790_v15 = vsel %vm6681_vm12, %v6789_v41, %v6785_v5 }
 0x732   :  { %v6979_v20 = vsel %vm6968_vm0, %v6790_v15, %v6978_v54 }
 0x733   :  { %v6794_v29 = vrot.slane %v6568_v61, %v15101_v10 }
 0x735   :  { %v6473_v63 = vpop.xlane.xlu0 %6472 }
 0x736   :  { %v6583_v30 = vadd.f32 %v15087_v17, %v6473_v63 }
 0x738   :  { %v6861_v21 = vrot.slane %v6583_v30, %v15111_v1 }
 0x739   :  { %v6476_v56 = vpop.xlane.xlu1 %6475 }
 0x73a   :  { %v6584_v38 = vadd.f32 %v15087_v17, %v6476_v56  ;;  %v6862_v57 = vsel %vm6681_vm12, %v6861_v21, %v6857_v43 }
 0x73c   :  { %v6866_v7 = vrot.slane %v6584_v38, %v15101_v10 }
 0x73e   :  { %v6521_v40 = vpop.xlane.xlu0 %6520 }
 0x73f   :  { %v6599_v3 = vadd.f32 %v15087_v17, %v6521_v40 }
 0x741   :  { %v6933_v12 = vrot.slane %v6599_v3, %v15111_v1 }
 0x743   :  { %v6524_v51 = vpop.xlane.xlu1 %6523 }
 0x744   :  { %v6600_v62 = vadd.f32 %v15087_v17, %v6524_v51 }
 0x747   :  { %v6431_v8 = vpop.xlane.xlu0 %6430 }
 0x748   :  { %v6569_v31 = vadd.f32 %v15087_v17, %v6431_v8 }
 0x74a   :  { %v6798_v0 = vrot.slane %v6569_v31, %v15111_v1 }
 0x74c   :  { %v6434_v22 = vpop.xlane.xlu1 %6433  ;;  %v6799_v42 = vsel %vm6681_vm12, %v6798_v0, %v6794_v29 }
 0x74d   :  { %v6570_v24 = vadd.f32 %v15087_v17, %v6434_v22  ;;  %v6980_v34 = vsel %vm6970_vm1, %v6799_v42, %v6979_v20 }
 0x74f   :  { %v6803_v23 = vrot.slane %v6570_v24, %v15101_v10 }
 0x750   :  { %v6479_v59 = vpop.xlane.xlu0 %6478 }
 0x751   :  { %v6585_v4 = vadd.f32 %v15087_v17, %v6479_v59 }
 0x753   :  { %v6870_v33 = vrot.slane %v6585_v4, %v15111_v1 }
 0x754   :  { %v6482_v47 = vpop.xlane.xlu1 %6481 }
 0x755   :  { %v6586_v46 = vadd.f32 %v15087_v17, %v6482_v47  ;;  %v6871_v8 = vsel %vm6681_vm12, %v6870_v33, %v6866_v7  ;;  %v6986_v47 = vsel %vm6968_vm0, %v6862_v57, %v15252_v58 }
 0x756   :  { %v6987_v58 = vsel %vm6970_vm1, %v6871_v8, %v6986_v47 }
 0x757   :  { %v6875_v11 = vrot.slane %v6586_v46, %v15101_v10 }
 0x759   :  { %v6527_v44 = vpop.xlane.xlu0 %6526 }
 0x75a   :  { %v6601_v28 = vadd.f32 %v15087_v17, %v6527_v44  ;;  %v6929_v44 = vrot.slane %v6598_v36, %v15101_v10 }
 0x75c   :  { %v6942_v59 = vrot.slane %v6601_v28, %v15111_v1  ;;  %v6934_v30 = vsel %vm6681_vm12, %v6933_v12, %v6929_v44 }
 0x75d   :  { %v6530_v37 = vpop.xlane.xlu1 %6529  ;;  %v6993_v15 = vsel %vm6968_vm0, %v6934_v30, %v15260_v50 }
 0x75e   :  { %v6602_v52 = vadd.f32 %v15087_v17, %v6530_v37 }
 0x760   :  { %v6947_v31 = vrot.slane %v6602_v52, %v15101_v10 }
 0x762   :  { %v6437_v60 = vpop.xlane.xlu0 %6436 }
 0x763   :  { %v6571_v14 = vadd.f32 %v15087_v17, %v6437_v60 }
 0x765   :  { %v6807_v27 = vrot.slane %v6571_v14, %v15111_v1 }
 0x767   :  { %v6440_v9 = vpop.xlane.xlu1 %6439  ;;  %v6808_v54 = vsel %vm6681_vm12, %v6807_v27, %v6803_v23 }
 0x768   :  { %v6572_v32 = vadd.f32 %v15087_v17, %v6440_v9  ;;  %v6981_v63 = vsel %vm6972_vm2, %v6808_v54, %v6980_v34 }
 0x76a   :  { %v6812_v45 = vrot.slane %v6572_v32, %v15101_v10 }
 0x76b   :  { %v6485_v55 = vpop.xlane.xlu0 %6484 }
 0x76c   :  { %v6587_v49 = vadd.f32 %v15087_v17, %v6485_v55  ;;  %v6938_v55 = vrot.slane %v6600_v62, %v15101_v10 }
 0x76e   :  { %v6879_v48 = vrot.slane %v6587_v49, %v15111_v1  ;;  %v6943_v14 = vsel %vm6681_vm12, %v6942_v59, %v6938_v55 }
 0x76f   :  { %v6994_v38 = vsel %vm6970_vm1, %v6943_v14, %v6993_v15 }
 0x770   :  { %v6488_v6 = vpop.xlane.xlu1 %6487  ;;  %v6880_v60 = vsel %vm6681_vm12, %v6879_v48, %v6875_v11 }
 0x771   :  { %v6588_v18 = vadd.f32 %v15087_v17, %v6488_v6 }
 0x773   :  { %v6884_v35 = vrot.slane %v6588_v18, %v15101_v10 }
 0x774   :  { %v6533_v16 = vpop.xlane.xlu0 %6532 }
 0x775   :  { %v6603_v2 = vadd.f32 %v15087_v17, %v6533_v16  ;;  %v6988_v16 = vsel %vm6972_vm2, %v6880_v60, %v6987_v58 }
 0x777   :  { %v6951_v37 = vrot.slane %v6603_v2, %v15111_v1 }
 0x778   :  { %v6536_v53 = vpop.xlane.xlu1 %6535 }
 0x779   :  { %v6604_v26 = vadd.f32 %v15087_v17, %v6536_v53  ;;  %v6952_v61 = vsel %vm6681_vm12, %v6951_v37, %v6947_v31 }
 0x77b   :  { %v6956_v21 = vrot.slane %v6604_v26, %v15101_v10 }
 0x77d   :  { %v6443_v13 = vpop.xlane.xlu0 %6442 }
 0x77e   :  { %v6573_v39 = vadd.f32 %v15087_v17, %v6443_v13 }
 0x780   :  { %v6816_v19 = vrot.slane %v6573_v39, %v15111_v1 }
 0x781   :  { %v6491_v56 = vpop.xlane.xlu0 %6490 }
 0x782   :  { %v6817_v40 = vsel %vm6681_vm12, %v6816_v19, %v6812_v45  ;;  %v6589_v22 = vadd.f32 %v15087_v17, %v6491_v56 }
 0x783   :  { %v6982_v51 = vsel %vm6974_vm3, %v6817_v40, %v6981_v63 }
 0x784   :  { %7002 = vst.msk [vmem:[%s15355_s7 + $0x8] sm:$0xff] %vm2848_vm4, %v6982_v51  ;;  %v6888_v41 = vrot.slane %v6589_v22, %v15111_v1 }
 0x786   :  { %v6539_v9 = vpop.xlane.xlu0 %6538  ;;  %v6889_v5 = vsel %vm6681_vm12, %v6888_v41, %v6884_v35 }
 0x787   :  { %v6605_v25 = vadd.f32 %v15087_v17, %v6539_v9  ;;  %v6989_v24 = vsel %vm6974_vm3, %v6889_v5, %v6988_v16  ;;  %v6995_v17 = vsel %vm6972_vm2, %v6952_v61, %v6994_v38 }
 0x788   :  { %7003 = vst.msk [vmem:[%s15355_s7 + $0x10] sm:$0xff] %vm2848_vm4, %v6989_v24 }
 0x789   :  { %v6960_v0 = vrot.slane %v6605_v25, %v15111_v1 }
 0x78b   :  { %v6961_v4 = vsel %vm6681_vm12, %v6960_v0, %v6956_v21 }
 0x78c   :  { %v6996_v27 = vsel %vm6974_vm3, %v6961_v4, %v6995_v17 }
 0x78d   :  { %7004 = vst.msk [vmem:[%s15355_s7 + $0x18] sm:$0xff] %vm2848_vm4, %v6996_v27 }

</bundles_post_ra>
